<compile_context>
chip_gen: v7x
topology: tpu7x:2x2x1
jax: 0.10.0
libtpu: 0.0.40
codegen_flags: <defaults>
</compile_context>

<pallas_src>
import jax
import jax.numpy as jnp
from jax.experimental import pallas as pl
from jax.experimental.pallas import tpu as pltpu

_BN_EPS = 1e-5
_SLOPE = 0.2
_DIMS = [74, 128, 256, 512, 1024, 28 * 28]

# Packed parameter layout (all offsets multiples of 128 lanes):
#   b1[128] | g2[256] | be2[256] | g3[512] | be3[512] | g4[1024] | be4[1024] | b5[784]
_OFF_B1, _OFF_G2, _OFF_BE2 = 0, 128, 384
_OFF_G3, _OFF_BE3 = 640, 1152
_OFF_G4, _OFF_BE4 = 1664, 2688
_OFF_B5, _PACKED_LEN = 3712, 4496


def _leaky_relu(x, slope=_SLOPE):
    return jnp.where(x > 0, x, slope * x)


def _bn_leaky(h, gamma, beta, eps=_BN_EPS, slope=_SLOPE):
    # Training-mode BatchNorm1d (biased variance over the batch), one-pass
    # stats, folded into a single scale/shift and fused with LeakyReLU.
    inv_n = 1.0 / h.shape[0]
    mean = jnp.sum(h, axis=0, keepdims=True) * inv_n
    ex2 = jnp.sum(h * h, axis=0, keepdims=True) * inv_n
    var = jnp.maximum(ex2 - mean * mean, 0.0)
    scale = gamma * jax.lax.rsqrt(var + eps)
    shift = beta - mean * scale
    y = h * scale + shift
    return jnp.where(y > 0, y, slope * y)


def generator_kernel(
    x_ref,      # (B, 74)        f32  VMEM
    p_ref,      # (1, 4496)      f32  VMEM (packed biases / BN params)
    w1_ref,     # (74, 128)      bf16 VMEM
    w2_ref,     # (128, 256)     bf16 VMEM
    w3_ref,     # (256, 512)     bf16 VMEM
    w4_hbm,     # (512, 1024)    bf16 HBM (pl.ANY)
    w5_hbm,     # (1024, 784)    bf16 HBM (pl.ANY)
    out_ref,    # (B, 784)       f32  VMEM
    w4_vmem,    # scratch (512, 1024)  bf16
    w5_vmem,    # scratch (1024, 784)  bf16
    dma_sems,   # scratch DMA semaphores (2,)
):
    bf16 = jnp.bfloat16

    # Kick off the two large weight DMAs immediately so they overlap with the
    # layer-1..3 compute below.
    w4_cp = pltpu.make_async_copy(w4_hbm, w4_vmem, dma_sems.at[0])
    w5_cp = pltpu.make_async_copy(w5_hbm, w5_vmem, dma_sems.at[1])
    w4_cp.start()
    w5_cp.start()

    # Static, lane-aligned views into the packed parameter vector.
    b1 = p_ref[:, _OFF_B1:_OFF_G2]
    g2 = p_ref[:, _OFF_G2:_OFF_BE2]
    be2 = p_ref[:, _OFF_BE2:_OFF_G3]
    g3 = p_ref[:, _OFF_G3:_OFF_BE3]
    be3 = p_ref[:, _OFF_BE3:_OFF_G4]
    g4 = p_ref[:, _OFF_G4:_OFF_BE4]
    be4 = p_ref[:, _OFF_BE4:_OFF_B5]
    b5 = p_ref[:, _OFF_B5:_PACKED_LEN]

    # Layer 1: Linear(74 -> 128) + bias + LeakyReLU
    h = jnp.dot(x_ref[...].astype(bf16), w1_ref[...],
                preferred_element_type=jnp.float32) + b1
    h = _leaky_relu(h)

    # Layer 2: Linear(128 -> 256) [bias folded away by BN] + BN + LeakyReLU
    h = jnp.dot(h.astype(bf16), w2_ref[...], preferred_element_type=jnp.float32)
    h = _bn_leaky(h, g2, be2)

    # Layer 3: Linear(256 -> 512) + BN + LeakyReLU
    h = jnp.dot(h.astype(bf16), w3_ref[...], preferred_element_type=jnp.float32)
    h = _bn_leaky(h, g3, be3)

    # Layer 4: Linear(512 -> 1024) + BN + LeakyReLU (wait only for w4 here)
    w4_cp.wait()
    h = jnp.dot(h.astype(bf16), w4_vmem[...], preferred_element_type=jnp.float32)
    h = _bn_leaky(h, g4, be4)

    # Layer 5: Linear(1024 -> 784) + bias + Tanh
    w5_cp.wait()
    h = jnp.dot(h.astype(bf16), w5_vmem[...],
                preferred_element_type=jnp.float32) + b5
    out_ref[...] = jnp.tanh(h)


def init_params(key):
    """Init mimicking PyTorch Linear defaults (uniform +-1/sqrt(fan_in)), BN
    gamma=1 / beta=0. Weights stored (in_features, out_features) in bf16.
    Biases of the three BN-followed linears are omitted (training-mode
    BatchNorm is shift-invariant). All 1-D params are packed into one f32
    vector."""
    kw1, kb1, kw2, kw3, kw4, kw5, kb5 = jax.random.split(key, 7)

    def lin_w(k, fi, fo):
        bound = 1.0 / (fi ** 0.5)
        return jax.random.uniform(k, (fi, fo), jnp.float32, -bound, bound
                                  ).astype(jnp.bfloat16)

    def lin_b(k, fi, fo):
        bound = 1.0 / (fi ** 0.5)
        return jax.random.uniform(k, (1, fo), jnp.float32, -bound, bound)

    w1, b1 = lin_w(kw1, 74, 128), lin_b(kb1, 74, 128)
    w2 = lin_w(kw2, 128, 256)
    w3 = lin_w(kw3, 256, 512)
    w4 = lin_w(kw4, 512, 1024)
    w5, b5 = lin_w(kw5, 1024, 784), lin_b(kb5, 1024, 784)

    g2, be2 = jnp.ones((1, 256), jnp.float32), jnp.zeros((1, 256), jnp.float32)
    g3, be3 = jnp.ones((1, 512), jnp.float32), jnp.zeros((1, 512), jnp.float32)
    g4, be4 = jnp.ones((1, 1024), jnp.float32), jnp.zeros((1, 1024), jnp.float32)

    packed = jnp.concatenate([b1, g2, be2, g3, be3, g4, be4, b5], axis=1)
    assert packed.shape == (1, _PACKED_LEN)
    return packed, w1, w2, w3, w4, w5


@jax.jit
def generator_forward(x, packed, w1, w2, w3, w4, w5):
    B = x.shape[0]

    # Roofline hints for the XLA scheduler.
    weight_elems = sum(_DIMS[i] * _DIMS[i + 1] for i in range(len(_DIMS) - 1))
    flops = 2 * B * weight_elems
    bytes_accessed = (
        weight_elems * 2            # bf16 weights
        + _PACKED_LEN * 4           # packed biases / BN params (f32)
        + B * 74 * 4                # input
        + B * 784 * 4               # output
    )
    transcendentals = B * 784 + (256 + 512 + 1024)   # tanh + per-feature rsqrt

    flat = pl.pallas_call(
        generator_kernel,
        out_shape=jax.ShapeDtypeStruct((B, 28 * 28), jnp.float32),
        in_specs=[
            pl.BlockSpec(memory_space=pltpu.MemorySpace.VMEM),  # x
            pl.BlockSpec(memory_space=pltpu.MemorySpace.VMEM),  # packed params
            pl.BlockSpec(memory_space=pltpu.MemorySpace.VMEM),  # w1
            pl.BlockSpec(memory_space=pltpu.MemorySpace.VMEM),  # w2
            pl.BlockSpec(memory_space=pltpu.MemorySpace.VMEM),  # w3
            pl.BlockSpec(memory_space=pl.ANY),                  # w4 (manual DMA)
            pl.BlockSpec(memory_space=pl.ANY),                  # w5 (manual DMA)
        ],
        out_specs=pl.BlockSpec(memory_space=pltpu.MemorySpace.VMEM),
        scratch_shapes=[
            pltpu.VMEM((512, 1024), jnp.bfloat16),
            pltpu.VMEM((1024, 28 * 28), jnp.bfloat16),
            pltpu.SemaphoreType.DMA((2,)),
        ],
        compiler_params=pltpu.CompilerParams(
            vmem_limit_bytes=32 * 1024 * 1024,
        ),
        cost_estimate=pl.CostEstimate(
            flops=flops,
            transcendentals=transcendentals,
            bytes_accessed=bytes_accessed,
        ),
    )(x, packed, w1, w2, w3, w4, w5)
    # PyTorch: .view(-1, 1, 28, 28)  (NCHW)
    return flat.reshape(B, 1, 28, 28)


if __name__ == "__main__":
    key = jax.random.PRNGKey(0)
    k_x, k_p = jax.random.split(key)

    # z_dim=62, cate=10, con=2 -> input feature dim 74; small batch of 8.
    B = 8
    x = jax.random.normal(k_x, (B, 74), dtype=jnp.float32)

    packed, w1, w2, w3, w4, w5 = init_params(k_p)

    out = generator_forward(x, packed, w1, w2, w3, w4, w5)
    jax.block_until_ready(out)

    assert out.shape == (B, 1, 28, 28), out.shape
    assert out.dtype == jnp.float32
    assert bool(jnp.all(jnp.isfinite(out)))
    assert bool(jnp.all(jnp.abs(out) <= 1.0))  # tanh range
    print("KERNEL_OK")
</pallas_src>

<mosaic_0001>
module attributes {stable_mosaic.version = 11 : i64} {
  func.func @generator_kernel(%arg0: memref<8x74xf32, #tpu.memory_space<vmem>>, %arg1: memref<1x4496xf32, #tpu.memory_space<vmem>>, %arg2: memref<74x128xbf16, #tpu.memory_space<vmem>>, %arg3: memref<128x256xbf16, #tpu.memory_space<vmem>>, %arg4: memref<256x512xbf16, #tpu.memory_space<vmem>>, %arg5: memref<512x1024xbf16, #tpu.memory_space<any>>, %arg6: memref<1024x784xbf16, #tpu.memory_space<any>>, %arg7: memref<8x784xf32, #tpu.memory_space<vmem>>, %arg8: memref<512x1024xbf16, #tpu.memory_space<vmem>>, %arg9: memref<1024x784xbf16, #tpu.memory_space<vmem>>, %arg10: memref<2x!tpu.dma_semaphore, #tpu.memory_space<semaphore_mem>>) attributes {dimension_semantics = [], scalar_prefetch = 0 : i64, scratch_operands = 3 : i64, tpu.core_type = #tpu.core_type<tc>} {
    %c0_i32 = arith.constant 0 : i32
    %0 = tpu.memref_slice %arg10[%c0_i32] : memref<2x!tpu.dma_semaphore, #tpu.memory_space<semaphore_mem>> -> memref<1x!tpu.dma_semaphore, #tpu.memory_space<semaphore_mem>>
    %1 = tpu.memref_squeeze %0 : memref<1x!tpu.dma_semaphore, #tpu.memory_space<semaphore_mem>> -> memref<!tpu.dma_semaphore, #tpu.memory_space<semaphore_mem>>
    tpu.enqueue_dma source(%arg5 : memref<512x1024xbf16, #tpu.memory_space<any>>) target(%arg8 : memref<512x1024xbf16, #tpu.memory_space<vmem>>) target_semaphore(%1 : memref<!tpu.dma_semaphore, #tpu.memory_space<semaphore_mem>>)
    %c1_i32 = arith.constant 1 : i32
    %2 = tpu.memref_slice %arg10[%c1_i32] : memref<2x!tpu.dma_semaphore, #tpu.memory_space<semaphore_mem>> -> memref<1x!tpu.dma_semaphore, #tpu.memory_space<semaphore_mem>>
    %3 = tpu.memref_squeeze %2 : memref<1x!tpu.dma_semaphore, #tpu.memory_space<semaphore_mem>> -> memref<!tpu.dma_semaphore, #tpu.memory_space<semaphore_mem>>
    tpu.enqueue_dma source(%arg6 : memref<1024x784xbf16, #tpu.memory_space<any>>) target(%arg9 : memref<1024x784xbf16, #tpu.memory_space<vmem>>) target_semaphore(%3 : memref<!tpu.dma_semaphore, #tpu.memory_space<semaphore_mem>>)
    %c0 = arith.constant 0 : index
    %c0_0 = arith.constant 0 : index
    %4 = vector.load %arg1[%c0, %c0_0] : memref<1x4496xf32, #tpu.memory_space<vmem>>, vector<1x128xf32>
    %c0_1 = arith.constant 0 : index
    %c128 = arith.constant 128 : index
    %5 = vector.load %arg1[%c0_1, %c128] : memref<1x4496xf32, #tpu.memory_space<vmem>>, vector<1x256xf32>
    %c0_2 = arith.constant 0 : index
    %c384 = arith.constant 384 : index
    %6 = vector.load %arg1[%c0_2, %c384] : memref<1x4496xf32, #tpu.memory_space<vmem>>, vector<1x256xf32>
    %c0_3 = arith.constant 0 : index
    %c640 = arith.constant 640 : index
    %7 = vector.load %arg1[%c0_3, %c640] : memref<1x4496xf32, #tpu.memory_space<vmem>>, vector<1x512xf32>
    %c0_4 = arith.constant 0 : index
    %c1152 = arith.constant 1152 : index
    %8 = vector.load %arg1[%c0_4, %c1152] : memref<1x4496xf32, #tpu.memory_space<vmem>>, vector<1x512xf32>
    %c0_5 = arith.constant 0 : index
    %c1664 = arith.constant 1664 : index
    %9 = vector.load %arg1[%c0_5, %c1664] : memref<1x4496xf32, #tpu.memory_space<vmem>>, vector<1x1024xf32>
    %c0_6 = arith.constant 0 : index
    %c2688 = arith.constant 2688 : index
    %10 = vector.load %arg1[%c0_6, %c2688] : memref<1x4496xf32, #tpu.memory_space<vmem>>, vector<1x1024xf32>
    %c0_7 = arith.constant 0 : index
    %c3712 = arith.constant 3712 : index
    %11 = vector.load %arg1[%c0_7, %c3712] : memref<1x4496xf32, #tpu.memory_space<vmem>>, vector<1x784xf32>
    %c0_8 = arith.constant 0 : index
    %c0_9 = arith.constant 0 : index
    %12 = vector.load %arg0[%c0_8, %c0_9] : memref<8x74xf32, #tpu.memory_space<vmem>>, vector<8x74xf32>
    %13 = arith.truncf %12 : vector<8x74xf32> to vector<8x74xbf16>
    %c0_10 = arith.constant 0 : index
    %c0_11 = arith.constant 0 : index
    %14 = vector.load %arg2[%c0_10, %c0_11] : memref<74x128xbf16, #tpu.memory_space<vmem>>, vector<74x128xbf16>
    %cst = arith.constant dense<0.000000e+00> : vector<8x128xf32>
    %15 = tpu.matmul %13, %14, %cst {dimension_numbers = #tpu.dot_dimension_numbers<[1], [0], [0], [1], [0, 0, 1, 1], [], []>} : vector<8x74xbf16>, vector<74x128xbf16>, vector<8x128xf32> -> vector<8x128xf32>
    %16 = vector.broadcast %4 : vector<1x128xf32> to vector<8x128xf32>
    %17 = arith.addf %15, %16 : vector<8x128xf32>
    %cst_12 = arith.constant 0.000000e+00 : f32
    %18 = vector.broadcast %cst_12 : f32 to vector<8x128xf32>
    %19 = arith.cmpf ogt, %17, %18 : vector<8x128xf32>
    %cst_13 = arith.constant 2.000000e-01 : f32
    %20 = vector.broadcast %cst_13 : f32 to vector<8x128xf32>
    %21 = arith.mulf %20, %17 : vector<8x128xf32>
    %22 = arith.select %19, %17, %21 : vector<8x128xi1>, vector<8x128xf32>
    %23 = arith.truncf %22 : vector<8x128xf32> to vector<8x128xbf16>
    %c0_14 = arith.constant 0 : index
    %c0_15 = arith.constant 0 : index
    %24 = vector.load %arg3[%c0_14, %c0_15] : memref<128x256xbf16, #tpu.memory_space<vmem>>, vector<128x256xbf16>
    %cst_16 = arith.constant dense<0.000000e+00> : vector<8x256xf32>
    %25 = tpu.matmul %23, %24, %cst_16 {dimension_numbers = #tpu.dot_dimension_numbers<[1], [0], [0], [1], [0, 0, 1, 1], [], []>} : vector<8x128xbf16>, vector<128x256xbf16>, vector<8x256xf32> -> vector<8x256xf32>
    %cst_17 = arith.constant dense<0.000000e+00> : vector<256xf32>
    %26 = vector.multi_reduction <add>, %25, %cst_17 [0] : vector<8x256xf32> to vector<256xf32>
    %27 = vector.shape_cast %26 : vector<256xf32> to vector<1x256xf32>
    %cst_18 = arith.constant 1.250000e-01 : f32
    %28 = vector.broadcast %cst_18 : f32 to vector<1x256xf32>
    %29 = arith.mulf %27, %28 : vector<1x256xf32>
    %30 = arith.mulf %25, %25 : vector<8x256xf32>
    %cst_19 = arith.constant dense<0.000000e+00> : vector<256xf32>
    %31 = vector.multi_reduction <add>, %30, %cst_19 [0] : vector<8x256xf32> to vector<256xf32>
    %32 = vector.shape_cast %31 : vector<256xf32> to vector<1x256xf32>
    %cst_20 = arith.constant 1.250000e-01 : f32
    %33 = vector.broadcast %cst_20 : f32 to vector<1x256xf32>
    %34 = arith.mulf %32, %33 : vector<1x256xf32>
    %35 = arith.mulf %29, %29 : vector<1x256xf32>
    %36 = arith.subf %34, %35 : vector<1x256xf32>
    %cst_21 = arith.constant 0.000000e+00 : f32
    %37 = vector.broadcast %cst_21 : f32 to vector<1x256xf32>
    %38 = arith.maximumf %36, %37 : vector<1x256xf32>
    %cst_22 = arith.constant 9.99999974E-6 : f32
    %39 = vector.broadcast %cst_22 : f32 to vector<1x256xf32>
    %40 = arith.addf %38, %39 : vector<1x256xf32>
    %41 = math.rsqrt %40 : vector<1x256xf32>
    %42 = arith.mulf %5, %41 : vector<1x256xf32>
    %43 = arith.mulf %29, %42 : vector<1x256xf32>
    %44 = arith.subf %6, %43 : vector<1x256xf32>
    %45 = vector.broadcast %42 : vector<1x256xf32> to vector<8x256xf32>
    %46 = arith.mulf %25, %45 : vector<8x256xf32>
    %47 = vector.broadcast %44 : vector<1x256xf32> to vector<8x256xf32>
    %48 = arith.addf %46, %47 : vector<8x256xf32>
    %cst_23 = arith.constant 0.000000e+00 : f32
    %49 = vector.broadcast %cst_23 : f32 to vector<8x256xf32>
    %50 = arith.cmpf ogt, %48, %49 : vector<8x256xf32>
    %cst_24 = arith.constant 2.000000e-01 : f32
    %51 = vector.broadcast %cst_24 : f32 to vector<8x256xf32>
    %52 = arith.mulf %51, %48 : vector<8x256xf32>
    %53 = arith.select %50, %48, %52 : vector<8x256xi1>, vector<8x256xf32>
    %54 = arith.truncf %53 : vector<8x256xf32> to vector<8x256xbf16>
    %c0_25 = arith.constant 0 : index
    %c0_26 = arith.constant 0 : index
    %55 = vector.load %arg4[%c0_25, %c0_26] : memref<256x512xbf16, #tpu.memory_space<vmem>>, vector<256x512xbf16>
    %cst_27 = arith.constant dense<0.000000e+00> : vector<8x512xf32>
    %56 = tpu.matmul %54, %55, %cst_27 {dimension_numbers = #tpu.dot_dimension_numbers<[1], [0], [0], [1], [0, 0, 1, 1], [], []>} : vector<8x256xbf16>, vector<256x512xbf16>, vector<8x512xf32> -> vector<8x512xf32>
    %cst_28 = arith.constant dense<0.000000e+00> : vector<512xf32>
    %57 = vector.multi_reduction <add>, %56, %cst_28 [0] : vector<8x512xf32> to vector<512xf32>
    %58 = vector.shape_cast %57 : vector<512xf32> to vector<1x512xf32>
    %cst_29 = arith.constant 1.250000e-01 : f32
    %59 = vector.broadcast %cst_29 : f32 to vector<1x512xf32>
    %60 = arith.mulf %58, %59 : vector<1x512xf32>
    %61 = arith.mulf %56, %56 : vector<8x512xf32>
    %cst_30 = arith.constant dense<0.000000e+00> : vector<512xf32>
    %62 = vector.multi_reduction <add>, %61, %cst_30 [0] : vector<8x512xf32> to vector<512xf32>
    %63 = vector.shape_cast %62 : vector<512xf32> to vector<1x512xf32>
    %cst_31 = arith.constant 1.250000e-01 : f32
    %64 = vector.broadcast %cst_31 : f32 to vector<1x512xf32>
    %65 = arith.mulf %63, %64 : vector<1x512xf32>
    %66 = arith.mulf %60, %60 : vector<1x512xf32>
    %67 = arith.subf %65, %66 : vector<1x512xf32>
    %cst_32 = arith.constant 0.000000e+00 : f32
    %68 = vector.broadcast %cst_32 : f32 to vector<1x512xf32>
    %69 = arith.maximumf %67, %68 : vector<1x512xf32>
    %cst_33 = arith.constant 9.99999974E-6 : f32
    %70 = vector.broadcast %cst_33 : f32 to vector<1x512xf32>
    %71 = arith.addf %69, %70 : vector<1x512xf32>
    %72 = math.rsqrt %71 : vector<1x512xf32>
    %73 = arith.mulf %7, %72 : vector<1x512xf32>
    %74 = arith.mulf %60, %73 : vector<1x512xf32>
    %75 = arith.subf %8, %74 : vector<1x512xf32>
    %76 = vector.broadcast %73 : vector<1x512xf32> to vector<8x512xf32>
    %77 = arith.mulf %56, %76 : vector<8x512xf32>
    %78 = vector.broadcast %75 : vector<1x512xf32> to vector<8x512xf32>
    %79 = arith.addf %77, %78 : vector<8x512xf32>
    %cst_34 = arith.constant 0.000000e+00 : f32
    %80 = vector.broadcast %cst_34 : f32 to vector<8x512xf32>
    %81 = arith.cmpf ogt, %79, %80 : vector<8x512xf32>
    %cst_35 = arith.constant 2.000000e-01 : f32
    %82 = vector.broadcast %cst_35 : f32 to vector<8x512xf32>
    %83 = arith.mulf %82, %79 : vector<8x512xf32>
    %84 = arith.select %81, %79, %83 : vector<8x512xi1>, vector<8x512xf32>
    %c0_i32_36 = arith.constant 0 : i32
    %85 = tpu.memref_slice %arg10[%c0_i32_36] : memref<2x!tpu.dma_semaphore, #tpu.memory_space<semaphore_mem>> -> memref<1x!tpu.dma_semaphore, #tpu.memory_space<semaphore_mem>>
    %86 = tpu.memref_squeeze %85 : memref<1x!tpu.dma_semaphore, #tpu.memory_space<semaphore_mem>> -> memref<!tpu.dma_semaphore, #tpu.memory_space<semaphore_mem>>
    tpu.wait_dma2 semaphore(%86 : memref<!tpu.dma_semaphore, #tpu.memory_space<semaphore_mem>>) src(%arg5 : memref<512x1024xbf16, #tpu.memory_space<any>>) dst(%arg8 : memref<512x1024xbf16, #tpu.memory_space<vmem>>)
    %87 = arith.truncf %84 : vector<8x512xf32> to vector<8x512xbf16>
    %c0_37 = arith.constant 0 : index
    %c0_38 = arith.constant 0 : index
    %88 = vector.load %arg8[%c0_37, %c0_38] : memref<512x1024xbf16, #tpu.memory_space<vmem>>, vector<512x1024xbf16>
    %cst_39 = arith.constant dense<0.000000e+00> : vector<8x1024xf32>
    %89 = tpu.matmul %87, %88, %cst_39 {dimension_numbers = #tpu.dot_dimension_numbers<[1], [0], [0], [1], [0, 0, 1, 1], [], []>} : vector<8x512xbf16>, vector<512x1024xbf16>, vector<8x1024xf32> -> vector<8x1024xf32>
    %cst_40 = arith.constant dense<0.000000e+00> : vector<1024xf32>
    %90 = vector.multi_reduction <add>, %89, %cst_40 [0] : vector<8x1024xf32> to vector<1024xf32>
    %91 = vector.shape_cast %90 : vector<1024xf32> to vector<1x1024xf32>
    %cst_41 = arith.constant 1.250000e-01 : f32
    %92 = vector.broadcast %cst_41 : f32 to vector<1x1024xf32>
    %93 = arith.mulf %91, %92 : vector<1x1024xf32>
    %94 = arith.mulf %89, %89 : vector<8x1024xf32>
    %cst_42 = arith.constant dense<0.000000e+00> : vector<1024xf32>
    %95 = vector.multi_reduction <add>, %94, %cst_42 [0] : vector<8x1024xf32> to vector<1024xf32>
    %96 = vector.shape_cast %95 : vector<1024xf32> to vector<1x1024xf32>
    %cst_43 = arith.constant 1.250000e-01 : f32
    %97 = vector.broadcast %cst_43 : f32 to vector<1x1024xf32>
    %98 = arith.mulf %96, %97 : vector<1x1024xf32>
    %99 = arith.mulf %93, %93 : vector<1x1024xf32>
    %100 = arith.subf %98, %99 : vector<1x1024xf32>
    %cst_44 = arith.constant 0.000000e+00 : f32
    %101 = vector.broadcast %cst_44 : f32 to vector<1x1024xf32>
    %102 = arith.maximumf %100, %101 : vector<1x1024xf32>
    %cst_45 = arith.constant 9.99999974E-6 : f32
    %103 = vector.broadcast %cst_45 : f32 to vector<1x1024xf32>
    %104 = arith.addf %102, %103 : vector<1x1024xf32>
    %105 = math.rsqrt %104 : vector<1x1024xf32>
    %106 = arith.mulf %9, %105 : vector<1x1024xf32>
    %107 = arith.mulf %93, %106 : vector<1x1024xf32>
    %108 = arith.subf %10, %107 : vector<1x1024xf32>
    %109 = vector.broadcast %106 : vector<1x1024xf32> to vector<8x1024xf32>
    %110 = arith.mulf %89, %109 : vector<8x1024xf32>
    %111 = vector.broadcast %108 : vector<1x1024xf32> to vector<8x1024xf32>
    %112 = arith.addf %110, %111 : vector<8x1024xf32>
    %cst_46 = arith.constant 0.000000e+00 : f32
    %113 = vector.broadcast %cst_46 : f32 to vector<8x1024xf32>
    %114 = arith.cmpf ogt, %112, %113 : vector<8x1024xf32>
    %cst_47 = arith.constant 2.000000e-01 : f32
    %115 = vector.broadcast %cst_47 : f32 to vector<8x1024xf32>
    %116 = arith.mulf %115, %112 : vector<8x1024xf32>
    %117 = arith.select %114, %112, %116 : vector<8x1024xi1>, vector<8x1024xf32>
    %c1_i32_48 = arith.constant 1 : i32
    %118 = tpu.memref_slice %arg10[%c1_i32_48] : memref<2x!tpu.dma_semaphore, #tpu.memory_space<semaphore_mem>> -> memref<1x!tpu.dma_semaphore, #tpu.memory_space<semaphore_mem>>
    %119 = tpu.memref_squeeze %118 : memref<1x!tpu.dma_semaphore, #tpu.memory_space<semaphore_mem>> -> memref<!tpu.dma_semaphore, #tpu.memory_space<semaphore_mem>>
    tpu.wait_dma2 semaphore(%119 : memref<!tpu.dma_semaphore, #tpu.memory_space<semaphore_mem>>) src(%arg6 : memref<1024x784xbf16, #tpu.memory_space<any>>) dst(%arg9 : memref<1024x784xbf16, #tpu.memory_space<vmem>>)
    %120 = arith.truncf %117 : vector<8x1024xf32> to vector<8x1024xbf16>
    %c0_49 = arith.constant 0 : index
    %c0_50 = arith.constant 0 : index
    %121 = vector.load %arg9[%c0_49, %c0_50] : memref<1024x784xbf16, #tpu.memory_space<vmem>>, vector<1024x784xbf16>
    %cst_51 = arith.constant dense<0.000000e+00> : vector<8x784xf32>
    %122 = tpu.matmul %120, %121, %cst_51 {dimension_numbers = #tpu.dot_dimension_numbers<[1], [0], [0], [1], [0, 0, 1, 1], [], []>} : vector<8x1024xbf16>, vector<1024x784xbf16>, vector<8x784xf32> -> vector<8x784xf32>
    %123 = vector.broadcast %11 : vector<1x784xf32> to vector<8x784xf32>
    %124 = arith.addf %122, %123 : vector<8x784xf32>
    %125 = math.tanh %124 : vector<8x784xf32>
    %c0_52 = arith.constant 0 : index
    %c0_53 = arith.constant 0 : index
    %126 = vector.load %arg7[%c0_52, %c0_53] : memref<8x784xf32, #tpu.memory_space<vmem>>, vector<8x784xf32>
    tpu.vector_store %arg7[%c0_52, %c0_53], %125 {strides = array<i32>} : memref<8x784xf32, #tpu.memory_space<vmem>>, vector<8x784xf32>,
    return
  }
}

</mosaic_0001>

<bundles_post_ra>
// kernel: generator_forward.1
= control target key start
LH: loop header
LB: loop body
LE: loop exit
PB: predicated region body
PF: predicated region fallthrough
CT: control target
= control target key end

     0   :  { %s19830_s0 = inlined_call_operand.vmem [shape: f32[8,74], index: 0, kind: input, shape index: {}]   ;;  %s19831_s1 = inlined_call_operand.vmem [shape: f32[1,4496], index: 1, kind: input, shape index: {}]   ;;  %s19832_s2 = inlined_call_operand.vmem [shape: bf16[74,128], index: 2, kind: input, shape index: {}]   ;;  %s19833_s3 = inlined_call_operand.vmem [shape: bf16[128,256], index: 3, kind: input, shape index: {}]   ;;  %s19834_s4 = inlined_call_operand.vmem [shape: bf16[256,512], index: 4, kind: input, shape index: {}]   ;;  %s19835_s5 = inlined_call_operand.vmem [shape: bf16[512,1024], index: 5, kind: input, shape index: {}]   ;;  %s19836_s6 = inlined_call_operand.vmem [shape: bf16[1024,784], index: 6, kind: input, shape index: {}]   ;;  %s19837_s7 = inlined_call_operand.vmem [shape: f32[8,784], index: 7, kind: output, shape index: {}]  }
   0x1   :  { %v40_v0 = vld [vmem:[%s19835_s5] sm:$0xf]  ;;  %v44_v2 = vld [vmem:[%s19835_s5 + $0x4] sm:$0xf]  ;;  %v48_v4 = vld [vmem:[%s19835_s5 + $0x8] sm:$0xf] }
   0x2   :  { %v42_v1 = vld [vmem:[%s19835_s5 + $0x20] sm:$0xf]  ;;  %41 = vst [vmem:[#allocation2] sm:$0xf] %v40_v0  ;;  %45 = vst [vmem:[#allocation2 + $0x8] sm:$0xf] %v44_v2 }
   0x3   :  { %43 = vst [vmem:[#allocation2 + $0x4] sm:$0xf] %v42_v1  ;;  %v46_v3 = vld [vmem:[%s19835_s5 + $0x24] sm:$0xf]  ;;  %v50_v5 = vld [vmem:[%s19835_s5 + $0x28] sm:$0xf] }
   0x4   :  { %47 = vst [vmem:[#allocation2 + $0xc] sm:$0xf] %v46_v3  ;;  %49 = vst [vmem:[#allocation2 + $0x10] sm:$0xf] %v48_v4  ;;  %v52_v6 = vld [vmem:[%s19835_s5 + $0xc] sm:$0xf] }
   0x5   :  { %51 = vst [vmem:[#allocation2 + $0x14] sm:$0xf] %v50_v5  ;;  %v54_v7 = vld [vmem:[%s19835_s5 + $0x2c] sm:$0xf]  ;;  %v56_v8 = vld [vmem:[%s19835_s5 + $0x10] sm:$0xf] }
   0x6   :  { %53 = vst [vmem:[#allocation2 + $0x18] sm:$0xf] %v52_v6  ;;  %55 = vst [vmem:[#allocation2 + $0x1c] sm:$0xf] %v54_v7  ;;  %v58_v9 = vld [vmem:[%s19835_s5 + $0x30] sm:$0xf] }
   0x7   :  { %57 = vst [vmem:[#allocation2 + $0x20] sm:$0xf] %v56_v8  ;;  %v60_v10 = vld [vmem:[%s19835_s5 + $0x14] sm:$0xf]  ;;  %59 = vst [vmem:[#allocation2 + $0x24] sm:$0xf] %v58_v9 }
   0x8   :  { %v62_v11 = vld [vmem:[%s19835_s5 + $0x34] sm:$0xf]  ;;  %61 = vst [vmem:[#allocation2 + $0x28] sm:$0xf] %v60_v10  ;;  %v64_v12 = vld [vmem:[%s19835_s5 + $0x18] sm:$0xf] }
   0x9   :  { %63 = vst [vmem:[#allocation2 + $0x2c] sm:$0xf] %v62_v11  ;;  %v66_v13 = vld [vmem:[%s19835_s5 + $0x38] sm:$0xf]  ;;  %v68_v14 = vld [vmem:[%s19835_s5 + $0x1c] sm:$0xf] }
   0xa   :  { %65 = vst [vmem:[#allocation2 + $0x30] sm:$0xf] %v64_v12  ;;  %67 = vst [vmem:[#allocation2 + $0x34] sm:$0xf] %v66_v13  ;;  %v70_v15 = vld [vmem:[%s19835_s5 + $0x3c] sm:$0xff]  }
   0xb   :  { %69 = vst [vmem:[#allocation2 + $0x38] sm:$0xf] %v68_v14  ;;  %v74_v16 = vld [vmem:[%s19835_s5 + $0x60] sm:$0xf]  ;;  %v76_v17 = vld [vmem:[%s19835_s5 + $0x44] sm:$0xf] }
   0xc   :  { %71 = vst [vmem:[#allocation2 + $0x3c] sm:$0xff] %v70_v15   ;;  %75 = vst [vmem:[#allocation2 + $0x44] sm:$0xf] %v74_v16  ;;  %v78_v18 = vld [vmem:[%s19835_s5 + $0x64] sm:$0xf]  ;;  %v102_v30 = vld [vmem:[%s19835_s5 + $0x7c] sm:$0xff]  }
   0xd   :  { %77 = vst [vmem:[#allocation2 + $0x48] sm:$0xf] %v76_v17  ;;  %v80_v19 = vld [vmem:[%s19835_s5 + $0x48] sm:$0xf]  ;;  %79 = vst [vmem:[#allocation2 + $0x4c] sm:$0xf] %v78_v18 }
   0xe   :  { %v82_v20 = vld [vmem:[%s19835_s5 + $0x68] sm:$0xf]  ;;  %81 = vst [vmem:[#allocation2 + $0x50] sm:$0xf] %v80_v19  ;;  %v84_v21 = vld [vmem:[%s19835_s5 + $0x4c] sm:$0xf] }
   0xf   :  { %83 = vst [vmem:[#allocation2 + $0x54] sm:$0xf] %v82_v20  ;;  %v86_v22 = vld [vmem:[%s19835_s5 + $0x6c] sm:$0xf]  ;;  %v88_v23 = vld [vmem:[%s19835_s5 + $0x50] sm:$0xf] }
  0x10   :  { %85 = vst [vmem:[#allocation2 + $0x58] sm:$0xf] %v84_v21  ;;  %87 = vst [vmem:[#allocation2 + $0x5c] sm:$0xf] %v86_v22  ;;  %v90_v24 = vld [vmem:[%s19835_s5 + $0x70] sm:$0xf] }
  0x11   :  { %89 = vst [vmem:[#allocation2 + $0x60] sm:$0xf] %v88_v23  ;;  %v92_v25 = vld [vmem:[%s19835_s5 + $0x54] sm:$0xf]  ;;  %91 = vst [vmem:[#allocation2 + $0x64] sm:$0xf] %v90_v24 }
  0x12   :  { %v94_v26 = vld [vmem:[%s19835_s5 + $0x74] sm:$0xf]  ;;  %93 = vst [vmem:[#allocation2 + $0x68] sm:$0xf] %v92_v25  ;;  %v96_v27 = vld [vmem:[%s19835_s5 + $0x58] sm:$0xf] }
  0x13   :  { %95 = vst [vmem:[#allocation2 + $0x6c] sm:$0xf] %v94_v26  ;;  %v98_v28 = vld [vmem:[%s19835_s5 + $0x78] sm:$0xf]  ;;  %v100_v29 = vld [vmem:[%s19835_s5 + $0x5c] sm:$0xf] }
  0x14   :  { %97 = vst [vmem:[#allocation2 + $0x70] sm:$0xf] %v96_v27  ;;  %99 = vst [vmem:[#allocation2 + $0x74] sm:$0xf] %v98_v28  ;;  %v106_v31 = vld [vmem:[%s19835_s5 + $0xa0] sm:$0xf] }
  0x15   :  { %101 = vst [vmem:[#allocation2 + $0x78] sm:$0xf] %v100_v29  ;;  %v108_v32 = vld [vmem:[%s19835_s5 + $0x84] sm:$0xf]  ;;  %103 = vst [vmem:[#allocation2 + $0x7c] sm:$0xff] %v102_v30   ;;  %v134_v45 = vld [vmem:[%s19835_s5 + $0xbc] sm:$0xff]  }
  0x16   :  { %107 = vst [vmem:[#allocation2 + $0x84] sm:$0xf] %v106_v31  ;;  %109 = vst [vmem:[#allocation2 + $0x88] sm:$0xf] %v108_v32  ;;  %v110_v33 = vld [vmem:[%s19835_s5 + $0xa4] sm:$0xf] }
  0x17   :  { %v112_v34 = vld [vmem:[%s19835_s5 + $0x88] sm:$0xf]  ;;  %111 = vst [vmem:[#allocation2 + $0x8c] sm:$0xf] %v110_v33  ;;  %v116_v36 = vld [vmem:[%s19835_s5 + $0x8c] sm:$0xf] }
  0x18   :  { %v114_v35 = vld [vmem:[%s19835_s5 + $0xa8] sm:$0xf]  ;;  %113 = vst [vmem:[#allocation2 + $0x90] sm:$0xf] %v112_v34  ;;  %v118_v37 = vld [vmem:[%s19835_s5 + $0xac] sm:$0xf] }
  0x19   :  { %115 = vst [vmem:[#allocation2 + $0x94] sm:$0xf] %v114_v35  ;;  %v120_v38 = vld [vmem:[%s19835_s5 + $0x90] sm:$0xf]  ;;  %117 = vst [vmem:[#allocation2 + $0x98] sm:$0xf] %v116_v36 }
  0x1a   :  { %119 = vst [vmem:[#allocation2 + $0x9c] sm:$0xf] %v118_v37  ;;  %121 = vst [vmem:[#allocation2 + $0xa0] sm:$0xf] %v120_v38  ;;  %v122_v39 = vld [vmem:[%s19835_s5 + $0xb0] sm:$0xf] }
  0x1b   :  { %v124_v40 = vld [vmem:[%s19835_s5 + $0x94] sm:$0xf]  ;;  %123 = vst [vmem:[#allocation2 + $0xa4] sm:$0xf] %v122_v39  ;;  %v128_v42 = vld [vmem:[%s19835_s5 + $0x98] sm:$0xf] }
  0x1c   :  { %v126_v41 = vld [vmem:[%s19835_s5 + $0xb4] sm:$0xf]  ;;  %125 = vst [vmem:[#allocation2 + $0xa8] sm:$0xf] %v124_v40  ;;  %v130_v43 = vld [vmem:[%s19835_s5 + $0xb8] sm:$0xf] }
  0x1d   :  { %127 = vst [vmem:[#allocation2 + $0xac] sm:$0xf] %v126_v41  ;;  %v132_v44 = vld [vmem:[%s19835_s5 + $0x9c] sm:$0xf]  ;;  %129 = vst [vmem:[#allocation2 + $0xb0] sm:$0xf] %v128_v42 }
  0x1e   :  { %131 = vst [vmem:[#allocation2 + $0xb4] sm:$0xf] %v130_v43  ;;  %133 = vst [vmem:[#allocation2 + $0xb8] sm:$0xf] %v132_v44  ;;  %v138_v46 = vld [vmem:[%s19835_s5 + $0xe0] sm:$0xf] }
  0x1f   :  { %v140_v47 = vld [vmem:[%s19835_s5 + $0xc4] sm:$0xf]  ;;  %135 = vst [vmem:[#allocation2 + $0xbc] sm:$0xff] %v134_v45   ;;  %139 = vst [vmem:[#allocation2 + $0xc4] sm:$0xf] %v138_v46  ;;  %v166_v60 = vld [vmem:[%s19835_s5 + $0xfc] sm:$0xff]  }
  0x20   :  { %141 = vst [vmem:[#allocation2 + $0xc8] sm:$0xf] %v140_v47  ;;  %v142_v48 = vld [vmem:[%s19835_s5 + $0xe4] sm:$0xf]  ;;  %v144_v49 = vld [vmem:[%s19835_s5 + $0xc8] sm:$0xf] }
  0x21   :  { %v146_v50 = vld [vmem:[%s19835_s5 + $0xe8] sm:$0xf]  ;;  %143 = vst [vmem:[#allocation2 + $0xcc] sm:$0xf] %v142_v48  ;;  %145 = vst [vmem:[#allocation2 + $0xd0] sm:$0xf] %v144_v49 }
  0x22   :  { %147 = vst [vmem:[#allocation2 + $0xd4] sm:$0xf] %v146_v50  ;;  %v148_v51 = vld [vmem:[%s19835_s5 + $0xcc] sm:$0xf]  ;;  %v152_v53 = vld [vmem:[%s19835_s5 + $0xd0] sm:$0xf] }
  0x23   :  { %v150_v52 = vld [vmem:[%s19835_s5 + $0xec] sm:$0xf]  ;;  %149 = vst [vmem:[#allocation2 + $0xd8] sm:$0xf] %v148_v51  ;;  %153 = vst [vmem:[#allocation2 + $0xe0] sm:$0xf] %v152_v53 }
  0x24   :  { %151 = vst [vmem:[#allocation2 + $0xdc] sm:$0xf] %v150_v52  ;;  %v154_v54 = vld [vmem:[%s19835_s5 + $0xf0] sm:$0xf]  ;;  %v156_v55 = vld [vmem:[%s19835_s5 + $0xd4] sm:$0xf] }
  0x25   :  { %v158_v56 = vld [vmem:[%s19835_s5 + $0xf4] sm:$0xf]  ;;  %155 = vst [vmem:[#allocation2 + $0xe4] sm:$0xf] %v154_v54  ;;  %157 = vst [vmem:[#allocation2 + $0xe8] sm:$0xf] %v156_v55 }
  0x26   :  { %159 = vst [vmem:[#allocation2 + $0xec] sm:$0xf] %v158_v56  ;;  %v160_v57 = vld [vmem:[%s19835_s5 + $0xd8] sm:$0xf]  ;;  %v164_v59 = vld [vmem:[%s19835_s5 + $0xdc] sm:$0xf] }
  0x27   :  { %v162_v58 = vld [vmem:[%s19835_s5 + $0xf8] sm:$0xf]  ;;  %161 = vst [vmem:[#allocation2 + $0xf0] sm:$0xf] %v160_v57  ;;  %165 = vst [vmem:[#allocation2 + $0xf8] sm:$0xf] %v164_v59 }
  0x28   :  { %163 = vst [vmem:[#allocation2 + $0xf4] sm:$0xf] %v162_v58  ;;  %v170_v61 = vld [vmem:[%s19835_s5 + $0x120] sm:$0xf]  ;;  %v172_v62 = vld [vmem:[%s19835_s5 + $0x104] sm:$0xf] }
  0x29   :  { %167 = vst [vmem:[#allocation2 + $0xfc] sm:$0xff] %v166_v60   ;;  %171 = vst [vmem:[#allocation2 + $0x104] sm:$0xf] %v170_v61  ;;  %v174_v63 = vld [vmem:[%s19835_s5 + $0x124] sm:$0xf]  ;;  %v198_v11 = vld [vmem:[%s19835_s5 + $0x13c] sm:$0xff]  }
  0x2a   :  { %173 = vst [vmem:[#allocation2 + $0x108] sm:$0xf] %v172_v62  ;;  %v176_v0 = vld [vmem:[%s19835_s5 + $0x108] sm:$0xf]  ;;  %175 = vst [vmem:[#allocation2 + $0x10c] sm:$0xf] %v174_v63 }
  0x2b   :  { %v178_v1 = vld [vmem:[%s19835_s5 + $0x128] sm:$0xf]  ;;  %177 = vst [vmem:[#allocation2 + $0x110] sm:$0xf] %v176_v0  ;;  %v180_v2 = vld [vmem:[%s19835_s5 + $0x10c] sm:$0xf] }
  0x2c   :  { %179 = vst [vmem:[#allocation2 + $0x114] sm:$0xf] %v178_v1  ;;  %v182_v3 = vld [vmem:[%s19835_s5 + $0x12c] sm:$0xf]  ;;  %v184_v4 = vld [vmem:[%s19835_s5 + $0x110] sm:$0xf] }
  0x2d   :  { %181 = vst [vmem:[#allocation2 + $0x118] sm:$0xf] %v180_v2  ;;  %183 = vst [vmem:[#allocation2 + $0x11c] sm:$0xf] %v182_v3  ;;  %v186_v5 = vld [vmem:[%s19835_s5 + $0x130] sm:$0xf] }
  0x2e   :  { %185 = vst [vmem:[#allocation2 + $0x120] sm:$0xf] %v184_v4  ;;  %v188_v6 = vld [vmem:[%s19835_s5 + $0x114] sm:$0xf]  ;;  %187 = vst [vmem:[#allocation2 + $0x124] sm:$0xf] %v186_v5 }
  0x2f   :  { %v190_v7 = vld [vmem:[%s19835_s5 + $0x134] sm:$0xf]  ;;  %189 = vst [vmem:[#allocation2 + $0x128] sm:$0xf] %v188_v6  ;;  %v192_v8 = vld [vmem:[%s19835_s5 + $0x118] sm:$0xf] }
  0x30   :  { %191 = vst [vmem:[#allocation2 + $0x12c] sm:$0xf] %v190_v7  ;;  %v194_v9 = vld [vmem:[%s19835_s5 + $0x138] sm:$0xf]  ;;  %v196_v10 = vld [vmem:[%s19835_s5 + $0x11c] sm:$0xf] }
  0x31   :  { %193 = vst [vmem:[#allocation2 + $0x130] sm:$0xf] %v192_v8  ;;  %195 = vst [vmem:[#allocation2 + $0x134] sm:$0xf] %v194_v9  ;;  %v202_v12 = vld [vmem:[%s19835_s5 + $0x160] sm:$0xf] }
  0x32   :  { %197 = vst [vmem:[#allocation2 + $0x138] sm:$0xf] %v196_v10  ;;  %v204_v13 = vld [vmem:[%s19835_s5 + $0x144] sm:$0xf]  ;;  %199 = vst [vmem:[#allocation2 + $0x13c] sm:$0xff] %v198_v11   ;;  %v230_v26 = vld [vmem:[%s19835_s5 + $0x17c] sm:$0xff]  }
  0x33   :  { %203 = vst [vmem:[#allocation2 + $0x144] sm:$0xf] %v202_v12  ;;  %205 = vst [vmem:[#allocation2 + $0x148] sm:$0xf] %v204_v13  ;;  %v206_v14 = vld [vmem:[%s19835_s5 + $0x164] sm:$0xf] }
  0x34   :  { %v208_v15 = vld [vmem:[%s19835_s5 + $0x148] sm:$0xf]  ;;  %207 = vst [vmem:[#allocation2 + $0x14c] sm:$0xf] %v206_v14  ;;  %v212_v17 = vld [vmem:[%s19835_s5 + $0x14c] sm:$0xf] }
  0x35   :  { %v210_v16 = vld [vmem:[%s19835_s5 + $0x168] sm:$0xf]  ;;  %209 = vst [vmem:[#allocation2 + $0x150] sm:$0xf] %v208_v15  ;;  %v214_v18 = vld [vmem:[%s19835_s5 + $0x16c] sm:$0xf] }
  0x36   :  { %211 = vst [vmem:[#allocation2 + $0x154] sm:$0xf] %v210_v16  ;;  %v216_v19 = vld [vmem:[%s19835_s5 + $0x150] sm:$0xf]  ;;  %213 = vst [vmem:[#allocation2 + $0x158] sm:$0xf] %v212_v17 }
  0x37   :  { %215 = vst [vmem:[#allocation2 + $0x15c] sm:$0xf] %v214_v18  ;;  %217 = vst [vmem:[#allocation2 + $0x160] sm:$0xf] %v216_v19  ;;  %v218_v20 = vld [vmem:[%s19835_s5 + $0x170] sm:$0xf] }
  0x38   :  { %v220_v21 = vld [vmem:[%s19835_s5 + $0x154] sm:$0xf]  ;;  %219 = vst [vmem:[#allocation2 + $0x164] sm:$0xf] %v218_v20  ;;  %v224_v23 = vld [vmem:[%s19835_s5 + $0x158] sm:$0xf] }
  0x39   :  { %v222_v22 = vld [vmem:[%s19835_s5 + $0x174] sm:$0xf]  ;;  %221 = vst [vmem:[#allocation2 + $0x168] sm:$0xf] %v220_v21  ;;  %v226_v24 = vld [vmem:[%s19835_s5 + $0x178] sm:$0xf] }
  0x3a   :  { %223 = vst [vmem:[#allocation2 + $0x16c] sm:$0xf] %v222_v22  ;;  %v228_v25 = vld [vmem:[%s19835_s5 + $0x15c] sm:$0xf]  ;;  %225 = vst [vmem:[#allocation2 + $0x170] sm:$0xf] %v224_v23 }
  0x3b   :  { %227 = vst [vmem:[#allocation2 + $0x174] sm:$0xf] %v226_v24  ;;  %229 = vst [vmem:[#allocation2 + $0x178] sm:$0xf] %v228_v25  ;;  %v234_v27 = vld [vmem:[%s19835_s5 + $0x1a0] sm:$0xf] }
  0x3c   :  { %v236_v28 = vld [vmem:[%s19835_s5 + $0x184] sm:$0xf]  ;;  %231 = vst [vmem:[#allocation2 + $0x17c] sm:$0xff] %v230_v26   ;;  %235 = vst [vmem:[#allocation2 + $0x184] sm:$0xf] %v234_v27  ;;  %v262_v41 = vld [vmem:[%s19835_s5 + $0x1bc] sm:$0xff]  }
  0x3d   :  { %237 = vst [vmem:[#allocation2 + $0x188] sm:$0xf] %v236_v28  ;;  %v238_v29 = vld [vmem:[%s19835_s5 + $0x1a4] sm:$0xf]  ;;  %v240_v30 = vld [vmem:[%s19835_s5 + $0x188] sm:$0xf] }
  0x3e   :  { %v242_v31 = vld [vmem:[%s19835_s5 + $0x1a8] sm:$0xf]  ;;  %239 = vst [vmem:[#allocation2 + $0x18c] sm:$0xf] %v238_v29  ;;  %241 = vst [vmem:[#allocation2 + $0x190] sm:$0xf] %v240_v30 }
  0x3f   :  { %243 = vst [vmem:[#allocation2 + $0x194] sm:$0xf] %v242_v31  ;;  %v244_v32 = vld [vmem:[%s19835_s5 + $0x18c] sm:$0xf]  ;;  %v248_v34 = vld [vmem:[%s19835_s5 + $0x190] sm:$0xf] }
  0x40   :  { %v246_v33 = vld [vmem:[%s19835_s5 + $0x1ac] sm:$0xf]  ;;  %245 = vst [vmem:[#allocation2 + $0x198] sm:$0xf] %v244_v32  ;;  %249 = vst [vmem:[#allocation2 + $0x1a0] sm:$0xf] %v248_v34 }
  0x41   :  { %247 = vst [vmem:[#allocation2 + $0x19c] sm:$0xf] %v246_v33  ;;  %v250_v35 = vld [vmem:[%s19835_s5 + $0x1b0] sm:$0xf]  ;;  %v252_v36 = vld [vmem:[%s19835_s5 + $0x194] sm:$0xf] }
  0x42   :  { %v254_v37 = vld [vmem:[%s19835_s5 + $0x1b4] sm:$0xf]  ;;  %251 = vst [vmem:[#allocation2 + $0x1a4] sm:$0xf] %v250_v35  ;;  %253 = vst [vmem:[#allocation2 + $0x1a8] sm:$0xf] %v252_v36 }
  0x43   :  { %255 = vst [vmem:[#allocation2 + $0x1ac] sm:$0xf] %v254_v37  ;;  %v256_v38 = vld [vmem:[%s19835_s5 + $0x198] sm:$0xf]  ;;  %v260_v40 = vld [vmem:[%s19835_s5 + $0x19c] sm:$0xf] }
  0x44   :  { %v258_v39 = vld [vmem:[%s19835_s5 + $0x1b8] sm:$0xf]  ;;  %257 = vst [vmem:[#allocation2 + $0x1b0] sm:$0xf] %v256_v38  ;;  %261 = vst [vmem:[#allocation2 + $0x1b8] sm:$0xf] %v260_v40 }
  0x45   :  { %259 = vst [vmem:[#allocation2 + $0x1b4] sm:$0xf] %v258_v39  ;;  %v266_v42 = vld [vmem:[%s19835_s5 + $0x1e0] sm:$0xf]  ;;  %v268_v43 = vld [vmem:[%s19835_s5 + $0x1c4] sm:$0xf] }
  0x46   :  { %263 = vst [vmem:[#allocation2 + $0x1bc] sm:$0xff] %v262_v41   ;;  %267 = vst [vmem:[#allocation2 + $0x1c4] sm:$0xf] %v266_v42  ;;  %v270_v44 = vld [vmem:[%s19835_s5 + $0x1e4] sm:$0xf]  ;;  %v294_v56 = vld [vmem:[%s19835_s5 + $0x1fc] sm:$0xff]  }
  0x47   :  { %269 = vst [vmem:[#allocation2 + $0x1c8] sm:$0xf] %v268_v43  ;;  %v272_v45 = vld [vmem:[%s19835_s5 + $0x1c8] sm:$0xf]  ;;  %271 = vst [vmem:[#allocation2 + $0x1cc] sm:$0xf] %v270_v44 }
  0x48   :  { %v274_v46 = vld [vmem:[%s19835_s5 + $0x1e8] sm:$0xf]  ;;  %273 = vst [vmem:[#allocation2 + $0x1d0] sm:$0xf] %v272_v45  ;;  %v276_v47 = vld [vmem:[%s19835_s5 + $0x1cc] sm:$0xf] }
  0x49   :  { %275 = vst [vmem:[#allocation2 + $0x1d4] sm:$0xf] %v274_v46  ;;  %v278_v48 = vld [vmem:[%s19835_s5 + $0x1ec] sm:$0xf]  ;;  %v280_v49 = vld [vmem:[%s19835_s5 + $0x1d0] sm:$0xf] }
  0x4a   :  { %277 = vst [vmem:[#allocation2 + $0x1d8] sm:$0xf] %v276_v47  ;;  %279 = vst [vmem:[#allocation2 + $0x1dc] sm:$0xf] %v278_v48  ;;  %v282_v50 = vld [vmem:[%s19835_s5 + $0x1f0] sm:$0xf] }
  0x4b   :  { %281 = vst [vmem:[#allocation2 + $0x1e0] sm:$0xf] %v280_v49  ;;  %v284_v51 = vld [vmem:[%s19835_s5 + $0x1d4] sm:$0xf]  ;;  %283 = vst [vmem:[#allocation2 + $0x1e4] sm:$0xf] %v282_v50 }
  0x4c   :  { %v286_v52 = vld [vmem:[%s19835_s5 + $0x1f4] sm:$0xf]  ;;  %285 = vst [vmem:[#allocation2 + $0x1e8] sm:$0xf] %v284_v51  ;;  %v288_v53 = vld [vmem:[%s19835_s5 + $0x1d8] sm:$0xf] }
  0x4d   :  { %287 = vst [vmem:[#allocation2 + $0x1ec] sm:$0xf] %v286_v52  ;;  %v290_v54 = vld [vmem:[%s19835_s5 + $0x1f8] sm:$0xf]  ;;  %v292_v55 = vld [vmem:[%s19835_s5 + $0x1dc] sm:$0xf] }
  0x4e   :  { %289 = vst [vmem:[#allocation2 + $0x1f0] sm:$0xf] %v288_v53  ;;  %291 = vst [vmem:[#allocation2 + $0x1f4] sm:$0xf] %v290_v54  ;;  %v298_v57 = vld [vmem:[%s19835_s5 + $0x220] sm:$0xf] }
  0x4f   :  { %293 = vst [vmem:[#allocation2 + $0x1f8] sm:$0xf] %v292_v55  ;;  %v300_v58 = vld [vmem:[%s19835_s5 + $0x204] sm:$0xf]  ;;  %295 = vst [vmem:[#allocation2 + $0x1fc] sm:$0xff] %v294_v56   ;;  %v326_v7 = vld [vmem:[%s19835_s5 + $0x23c] sm:$0xff]  }
  0x50   :  { %299 = vst [vmem:[#allocation2 + $0x204] sm:$0xf] %v298_v57  ;;  %301 = vst [vmem:[#allocation2 + $0x208] sm:$0xf] %v300_v58  ;;  %v302_v59 = vld [vmem:[%s19835_s5 + $0x224] sm:$0xf] }
  0x51   :  { %v304_v60 = vld [vmem:[%s19835_s5 + $0x208] sm:$0xf]  ;;  %303 = vst [vmem:[#allocation2 + $0x20c] sm:$0xf] %v302_v59  ;;  %v308_v62 = vld [vmem:[%s19835_s5 + $0x20c] sm:$0xf] }
  0x52   :  { %v306_v61 = vld [vmem:[%s19835_s5 + $0x228] sm:$0xf]  ;;  %305 = vst [vmem:[#allocation2 + $0x210] sm:$0xf] %v304_v60  ;;  %v310_v63 = vld [vmem:[%s19835_s5 + $0x22c] sm:$0xf] }
  0x53   :  { %307 = vst [vmem:[#allocation2 + $0x214] sm:$0xf] %v306_v61  ;;  %v312_v0 = vld [vmem:[%s19835_s5 + $0x210] sm:$0xf]  ;;  %309 = vst [vmem:[#allocation2 + $0x218] sm:$0xf] %v308_v62 }
  0x54   :  { %311 = vst [vmem:[#allocation2 + $0x21c] sm:$0xf] %v310_v63  ;;  %313 = vst [vmem:[#allocation2 + $0x220] sm:$0xf] %v312_v0  ;;  %v314_v1 = vld [vmem:[%s19835_s5 + $0x230] sm:$0xf] }
  0x55   :  { %v316_v2 = vld [vmem:[%s19835_s5 + $0x214] sm:$0xf]  ;;  %315 = vst [vmem:[#allocation2 + $0x224] sm:$0xf] %v314_v1  ;;  %v320_v4 = vld [vmem:[%s19835_s5 + $0x218] sm:$0xf] }
  0x56   :  { %v318_v3 = vld [vmem:[%s19835_s5 + $0x234] sm:$0xf]  ;;  %317 = vst [vmem:[#allocation2 + $0x228] sm:$0xf] %v316_v2  ;;  %v322_v5 = vld [vmem:[%s19835_s5 + $0x238] sm:$0xf] }
  0x57   :  { %319 = vst [vmem:[#allocation2 + $0x22c] sm:$0xf] %v318_v3  ;;  %v324_v6 = vld [vmem:[%s19835_s5 + $0x21c] sm:$0xf]  ;;  %321 = vst [vmem:[#allocation2 + $0x230] sm:$0xf] %v320_v4 }
  0x58   :  { %323 = vst [vmem:[#allocation2 + $0x234] sm:$0xf] %v322_v5  ;;  %325 = vst [vmem:[#allocation2 + $0x238] sm:$0xf] %v324_v6  ;;  %v330_v8 = vld [vmem:[%s19835_s5 + $0x260] sm:$0xf] }
  0x59   :  { %v332_v9 = vld [vmem:[%s19835_s5 + $0x244] sm:$0xf]  ;;  %327 = vst [vmem:[#allocation2 + $0x23c] sm:$0xff] %v326_v7   ;;  %331 = vst [vmem:[#allocation2 + $0x244] sm:$0xf] %v330_v8  ;;  %v358_v22 = vld [vmem:[%s19835_s5 + $0x27c] sm:$0xff]  }
  0x5a   :  { %333 = vst [vmem:[#allocation2 + $0x248] sm:$0xf] %v332_v9  ;;  %v334_v10 = vld [vmem:[%s19835_s5 + $0x264] sm:$0xf]  ;;  %v336_v11 = vld [vmem:[%s19835_s5 + $0x248] sm:$0xf] }
  0x5b   :  { %v338_v12 = vld [vmem:[%s19835_s5 + $0x268] sm:$0xf]  ;;  %335 = vst [vmem:[#allocation2 + $0x24c] sm:$0xf] %v334_v10  ;;  %337 = vst [vmem:[#allocation2 + $0x250] sm:$0xf] %v336_v11 }
  0x5c   :  { %339 = vst [vmem:[#allocation2 + $0x254] sm:$0xf] %v338_v12  ;;  %v340_v13 = vld [vmem:[%s19835_s5 + $0x24c] sm:$0xf]  ;;  %v344_v15 = vld [vmem:[%s19835_s5 + $0x250] sm:$0xf] }
  0x5d   :  { %v342_v14 = vld [vmem:[%s19835_s5 + $0x26c] sm:$0xf]  ;;  %341 = vst [vmem:[#allocation2 + $0x258] sm:$0xf] %v340_v13  ;;  %345 = vst [vmem:[#allocation2 + $0x260] sm:$0xf] %v344_v15 }
  0x5e   :  { %343 = vst [vmem:[#allocation2 + $0x25c] sm:$0xf] %v342_v14  ;;  %v346_v16 = vld [vmem:[%s19835_s5 + $0x270] sm:$0xf]  ;;  %v348_v17 = vld [vmem:[%s19835_s5 + $0x254] sm:$0xf] }
  0x5f   :  { %v350_v18 = vld [vmem:[%s19835_s5 + $0x274] sm:$0xf]  ;;  %347 = vst [vmem:[#allocation2 + $0x264] sm:$0xf] %v346_v16  ;;  %349 = vst [vmem:[#allocation2 + $0x268] sm:$0xf] %v348_v17 }
  0x60   :  { %351 = vst [vmem:[#allocation2 + $0x26c] sm:$0xf] %v350_v18  ;;  %v352_v19 = vld [vmem:[%s19835_s5 + $0x258] sm:$0xf]  ;;  %v356_v21 = vld [vmem:[%s19835_s5 + $0x25c] sm:$0xf] }
  0x61   :  { %v354_v20 = vld [vmem:[%s19835_s5 + $0x278] sm:$0xf]  ;;  %353 = vst [vmem:[#allocation2 + $0x270] sm:$0xf] %v352_v19  ;;  %357 = vst [vmem:[#allocation2 + $0x278] sm:$0xf] %v356_v21 }
  0x62   :  { %355 = vst [vmem:[#allocation2 + $0x274] sm:$0xf] %v354_v20  ;;  %v362_v23 = vld [vmem:[%s19835_s5 + $0x2a0] sm:$0xf]  ;;  %v364_v24 = vld [vmem:[%s19835_s5 + $0x284] sm:$0xf] }
  0x63   :  { %359 = vst [vmem:[#allocation2 + $0x27c] sm:$0xff] %v358_v22   ;;  %363 = vst [vmem:[#allocation2 + $0x284] sm:$0xf] %v362_v23  ;;  %v366_v25 = vld [vmem:[%s19835_s5 + $0x2a4] sm:$0xf]  ;;  %v390_v37 = vld [vmem:[%s19835_s5 + $0x2bc] sm:$0xff]  }
  0x64   :  { %365 = vst [vmem:[#allocation2 + $0x288] sm:$0xf] %v364_v24  ;;  %v368_v26 = vld [vmem:[%s19835_s5 + $0x288] sm:$0xf]  ;;  %367 = vst [vmem:[#allocation2 + $0x28c] sm:$0xf] %v366_v25 }
  0x65   :  { %v370_v27 = vld [vmem:[%s19835_s5 + $0x2a8] sm:$0xf]  ;;  %369 = vst [vmem:[#allocation2 + $0x290] sm:$0xf] %v368_v26  ;;  %v372_v28 = vld [vmem:[%s19835_s5 + $0x28c] sm:$0xf] }
  0x66   :  { %371 = vst [vmem:[#allocation2 + $0x294] sm:$0xf] %v370_v27  ;;  %v374_v29 = vld [vmem:[%s19835_s5 + $0x2ac] sm:$0xf]  ;;  %v376_v30 = vld [vmem:[%s19835_s5 + $0x290] sm:$0xf] }
  0x67   :  { %373 = vst [vmem:[#allocation2 + $0x298] sm:$0xf] %v372_v28  ;;  %375 = vst [vmem:[#allocation2 + $0x29c] sm:$0xf] %v374_v29  ;;  %v378_v31 = vld [vmem:[%s19835_s5 + $0x2b0] sm:$0xf] }
  0x68   :  { %377 = vst [vmem:[#allocation2 + $0x2a0] sm:$0xf] %v376_v30  ;;  %v380_v32 = vld [vmem:[%s19835_s5 + $0x294] sm:$0xf]  ;;  %379 = vst [vmem:[#allocation2 + $0x2a4] sm:$0xf] %v378_v31 }
  0x69   :  { %v382_v33 = vld [vmem:[%s19835_s5 + $0x2b4] sm:$0xf]  ;;  %381 = vst [vmem:[#allocation2 + $0x2a8] sm:$0xf] %v380_v32  ;;  %v384_v34 = vld [vmem:[%s19835_s5 + $0x298] sm:$0xf] }
  0x6a   :  { %383 = vst [vmem:[#allocation2 + $0x2ac] sm:$0xf] %v382_v33  ;;  %v386_v35 = vld [vmem:[%s19835_s5 + $0x2b8] sm:$0xf]  ;;  %v388_v36 = vld [vmem:[%s19835_s5 + $0x29c] sm:$0xf] }
  0x6b   :  { %385 = vst [vmem:[#allocation2 + $0x2b0] sm:$0xf] %v384_v34  ;;  %387 = vst [vmem:[#allocation2 + $0x2b4] sm:$0xf] %v386_v35  ;;  %v394_v38 = vld [vmem:[%s19835_s5 + $0x2e0] sm:$0xf] }
  0x6c   :  { %389 = vst [vmem:[#allocation2 + $0x2b8] sm:$0xf] %v388_v36  ;;  %v396_v39 = vld [vmem:[%s19835_s5 + $0x2c4] sm:$0xf]  ;;  %391 = vst [vmem:[#allocation2 + $0x2bc] sm:$0xff] %v390_v37   ;;  %v422_v52 = vld [vmem:[%s19835_s5 + $0x2fc] sm:$0xff]  }
  0x6d   :  { %395 = vst [vmem:[#allocation2 + $0x2c4] sm:$0xf] %v394_v38  ;;  %397 = vst [vmem:[#allocation2 + $0x2c8] sm:$0xf] %v396_v39  ;;  %v398_v40 = vld [vmem:[%s19835_s5 + $0x2e4] sm:$0xf] }
  0x6e   :  { %v400_v41 = vld [vmem:[%s19835_s5 + $0x2c8] sm:$0xf]  ;;  %399 = vst [vmem:[#allocation2 + $0x2cc] sm:$0xf] %v398_v40  ;;  %v404_v43 = vld [vmem:[%s19835_s5 + $0x2cc] sm:$0xf] }
  0x6f   :  { %v402_v42 = vld [vmem:[%s19835_s5 + $0x2e8] sm:$0xf]  ;;  %401 = vst [vmem:[#allocation2 + $0x2d0] sm:$0xf] %v400_v41  ;;  %v406_v44 = vld [vmem:[%s19835_s5 + $0x2ec] sm:$0xf] }
  0x70   :  { %403 = vst [vmem:[#allocation2 + $0x2d4] sm:$0xf] %v402_v42  ;;  %v408_v45 = vld [vmem:[%s19835_s5 + $0x2d0] sm:$0xf]  ;;  %405 = vst [vmem:[#allocation2 + $0x2d8] sm:$0xf] %v404_v43 }
  0x71   :  { %407 = vst [vmem:[#allocation2 + $0x2dc] sm:$0xf] %v406_v44  ;;  %409 = vst [vmem:[#allocation2 + $0x2e0] sm:$0xf] %v408_v45  ;;  %v410_v46 = vld [vmem:[%s19835_s5 + $0x2f0] sm:$0xf] }
  0x72   :  { %v412_v47 = vld [vmem:[%s19835_s5 + $0x2d4] sm:$0xf]  ;;  %411 = vst [vmem:[#allocation2 + $0x2e4] sm:$0xf] %v410_v46  ;;  %v416_v49 = vld [vmem:[%s19835_s5 + $0x2d8] sm:$0xf] }
  0x73   :  { %v414_v48 = vld [vmem:[%s19835_s5 + $0x2f4] sm:$0xf]  ;;  %413 = vst [vmem:[#allocation2 + $0x2e8] sm:$0xf] %v412_v47  ;;  %v418_v50 = vld [vmem:[%s19835_s5 + $0x2f8] sm:$0xf] }
  0x74   :  { %415 = vst [vmem:[#allocation2 + $0x2ec] sm:$0xf] %v414_v48  ;;  %v420_v51 = vld [vmem:[%s19835_s5 + $0x2dc] sm:$0xf]  ;;  %417 = vst [vmem:[#allocation2 + $0x2f0] sm:$0xf] %v416_v49 }
  0x75   :  { %419 = vst [vmem:[#allocation2 + $0x2f4] sm:$0xf] %v418_v50  ;;  %421 = vst [vmem:[#allocation2 + $0x2f8] sm:$0xf] %v420_v51  ;;  %v426_v53 = vld [vmem:[%s19835_s5 + $0x320] sm:$0xf] }
  0x76   :  { %v428_v54 = vld [vmem:[%s19835_s5 + $0x304] sm:$0xf]  ;;  %423 = vst [vmem:[#allocation2 + $0x2fc] sm:$0xff] %v422_v52   ;;  %427 = vst [vmem:[#allocation2 + $0x304] sm:$0xf] %v426_v53  ;;  %v454_v3 = vld [vmem:[%s19835_s5 + $0x33c] sm:$0xff]  }
  0x77   :  { %429 = vst [vmem:[#allocation2 + $0x308] sm:$0xf] %v428_v54  ;;  %v430_v55 = vld [vmem:[%s19835_s5 + $0x324] sm:$0xf]  ;;  %v432_v56 = vld [vmem:[%s19835_s5 + $0x308] sm:$0xf] }
  0x78   :  { %v434_v57 = vld [vmem:[%s19835_s5 + $0x328] sm:$0xf]  ;;  %431 = vst [vmem:[#allocation2 + $0x30c] sm:$0xf] %v430_v55  ;;  %433 = vst [vmem:[#allocation2 + $0x310] sm:$0xf] %v432_v56 }
  0x79   :  { %435 = vst [vmem:[#allocation2 + $0x314] sm:$0xf] %v434_v57  ;;  %v436_v58 = vld [vmem:[%s19835_s5 + $0x30c] sm:$0xf]  ;;  %v440_v60 = vld [vmem:[%s19835_s5 + $0x310] sm:$0xf] }
  0x7a   :  { %v438_v59 = vld [vmem:[%s19835_s5 + $0x32c] sm:$0xf]  ;;  %437 = vst [vmem:[#allocation2 + $0x318] sm:$0xf] %v436_v58  ;;  %441 = vst [vmem:[#allocation2 + $0x320] sm:$0xf] %v440_v60 }
  0x7b   :  { %439 = vst [vmem:[#allocation2 + $0x31c] sm:$0xf] %v438_v59  ;;  %v442_v61 = vld [vmem:[%s19835_s5 + $0x330] sm:$0xf]  ;;  %v444_v62 = vld [vmem:[%s19835_s5 + $0x314] sm:$0xf] }
  0x7c   :  { %v446_v63 = vld [vmem:[%s19835_s5 + $0x334] sm:$0xf]  ;;  %443 = vst [vmem:[#allocation2 + $0x324] sm:$0xf] %v442_v61  ;;  %445 = vst [vmem:[#allocation2 + $0x328] sm:$0xf] %v444_v62 }
  0x7d   :  { %447 = vst [vmem:[#allocation2 + $0x32c] sm:$0xf] %v446_v63  ;;  %v448_v0 = vld [vmem:[%s19835_s5 + $0x318] sm:$0xf]  ;;  %v452_v2 = vld [vmem:[%s19835_s5 + $0x31c] sm:$0xf] }
  0x7e   :  { %v450_v1 = vld [vmem:[%s19835_s5 + $0x338] sm:$0xf]  ;;  %449 = vst [vmem:[#allocation2 + $0x330] sm:$0xf] %v448_v0  ;;  %453 = vst [vmem:[#allocation2 + $0x338] sm:$0xf] %v452_v2 }
  0x7f   :  { %451 = vst [vmem:[#allocation2 + $0x334] sm:$0xf] %v450_v1  ;;  %v458_v4 = vld [vmem:[%s19835_s5 + $0x360] sm:$0xf]  ;;  %v460_v5 = vld [vmem:[%s19835_s5 + $0x344] sm:$0xf] }
  0x80   :  { %455 = vst [vmem:[#allocation2 + $0x33c] sm:$0xff] %v454_v3   ;;  %459 = vst [vmem:[#allocation2 + $0x344] sm:$0xf] %v458_v4  ;;  %v462_v6 = vld [vmem:[%s19835_s5 + $0x364] sm:$0xf]  ;;  %v486_v18 = vld [vmem:[%s19835_s5 + $0x37c] sm:$0xff]  }
  0x81   :  { %461 = vst [vmem:[#allocation2 + $0x348] sm:$0xf] %v460_v5  ;;  %v464_v7 = vld [vmem:[%s19835_s5 + $0x348] sm:$0xf]  ;;  %463 = vst [vmem:[#allocation2 + $0x34c] sm:$0xf] %v462_v6 }
  0x82   :  { %v466_v8 = vld [vmem:[%s19835_s5 + $0x368] sm:$0xf]  ;;  %465 = vst [vmem:[#allocation2 + $0x350] sm:$0xf] %v464_v7  ;;  %v468_v9 = vld [vmem:[%s19835_s5 + $0x34c] sm:$0xf] }
  0x83   :  { %467 = vst [vmem:[#allocation2 + $0x354] sm:$0xf] %v466_v8  ;;  %v470_v10 = vld [vmem:[%s19835_s5 + $0x36c] sm:$0xf]  ;;  %v472_v11 = vld [vmem:[%s19835_s5 + $0x350] sm:$0xf] }
  0x84   :  { %469 = vst [vmem:[#allocation2 + $0x358] sm:$0xf] %v468_v9  ;;  %471 = vst [vmem:[#allocation2 + $0x35c] sm:$0xf] %v470_v10  ;;  %v474_v12 = vld [vmem:[%s19835_s5 + $0x370] sm:$0xf] }
  0x85   :  { %473 = vst [vmem:[#allocation2 + $0x360] sm:$0xf] %v472_v11  ;;  %v476_v13 = vld [vmem:[%s19835_s5 + $0x354] sm:$0xf]  ;;  %475 = vst [vmem:[#allocation2 + $0x364] sm:$0xf] %v474_v12 }
  0x86   :  { %v478_v14 = vld [vmem:[%s19835_s5 + $0x374] sm:$0xf]  ;;  %477 = vst [vmem:[#allocation2 + $0x368] sm:$0xf] %v476_v13  ;;  %v480_v15 = vld [vmem:[%s19835_s5 + $0x358] sm:$0xf] }
  0x87   :  { %479 = vst [vmem:[#allocation2 + $0x36c] sm:$0xf] %v478_v14  ;;  %v482_v16 = vld [vmem:[%s19835_s5 + $0x378] sm:$0xf]  ;;  %v484_v17 = vld [vmem:[%s19835_s5 + $0x35c] sm:$0xf] }
  0x88   :  { %481 = vst [vmem:[#allocation2 + $0x370] sm:$0xf] %v480_v15  ;;  %483 = vst [vmem:[#allocation2 + $0x374] sm:$0xf] %v482_v16  ;;  %v490_v19 = vld [vmem:[%s19835_s5 + $0x3a0] sm:$0xf] }
  0x89   :  { %485 = vst [vmem:[#allocation2 + $0x378] sm:$0xf] %v484_v17  ;;  %v492_v20 = vld [vmem:[%s19835_s5 + $0x384] sm:$0xf]  ;;  %487 = vst [vmem:[#allocation2 + $0x37c] sm:$0xff] %v486_v18   ;;  %v518_v33 = vld [vmem:[%s19835_s5 + $0x3bc] sm:$0xff]  }
  0x8a   :  { %491 = vst [vmem:[#allocation2 + $0x384] sm:$0xf] %v490_v19  ;;  %493 = vst [vmem:[#allocation2 + $0x388] sm:$0xf] %v492_v20  ;;  %v494_v21 = vld [vmem:[%s19835_s5 + $0x3a4] sm:$0xf] }
  0x8b   :  { %v496_v22 = vld [vmem:[%s19835_s5 + $0x388] sm:$0xf]  ;;  %495 = vst [vmem:[#allocation2 + $0x38c] sm:$0xf] %v494_v21  ;;  %v500_v24 = vld [vmem:[%s19835_s5 + $0x38c] sm:$0xf] }
  0x8c   :  { %v498_v23 = vld [vmem:[%s19835_s5 + $0x3a8] sm:$0xf]  ;;  %497 = vst [vmem:[#allocation2 + $0x390] sm:$0xf] %v496_v22  ;;  %v502_v25 = vld [vmem:[%s19835_s5 + $0x3ac] sm:$0xf] }
  0x8d   :  { %499 = vst [vmem:[#allocation2 + $0x394] sm:$0xf] %v498_v23  ;;  %v504_v26 = vld [vmem:[%s19835_s5 + $0x390] sm:$0xf]  ;;  %501 = vst [vmem:[#allocation2 + $0x398] sm:$0xf] %v500_v24 }
  0x8e   :  { %503 = vst [vmem:[#allocation2 + $0x39c] sm:$0xf] %v502_v25  ;;  %505 = vst [vmem:[#allocation2 + $0x3a0] sm:$0xf] %v504_v26  ;;  %v506_v27 = vld [vmem:[%s19835_s5 + $0x3b0] sm:$0xf] }
  0x8f   :  { %v508_v28 = vld [vmem:[%s19835_s5 + $0x394] sm:$0xf]  ;;  %507 = vst [vmem:[#allocation2 + $0x3a4] sm:$0xf] %v506_v27  ;;  %v512_v30 = vld [vmem:[%s19835_s5 + $0x398] sm:$0xf] }
  0x90   :  { %v510_v29 = vld [vmem:[%s19835_s5 + $0x3b4] sm:$0xf]  ;;  %509 = vst [vmem:[#allocation2 + $0x3a8] sm:$0xf] %v508_v28  ;;  %v514_v31 = vld [vmem:[%s19835_s5 + $0x3b8] sm:$0xf] }
  0x91   :  { %511 = vst [vmem:[#allocation2 + $0x3ac] sm:$0xf] %v510_v29  ;;  %v516_v32 = vld [vmem:[%s19835_s5 + $0x39c] sm:$0xf]  ;;  %513 = vst [vmem:[#allocation2 + $0x3b0] sm:$0xf] %v512_v30 }
  0x92   :  { %515 = vst [vmem:[#allocation2 + $0x3b4] sm:$0xf] %v514_v31  ;;  %517 = vst [vmem:[#allocation2 + $0x3b8] sm:$0xf] %v516_v32  ;;  %v522_v34 = vld [vmem:[%s19835_s5 + $0x3e0] sm:$0xf] }
  0x93   :  { %v524_v35 = vld [vmem:[%s19835_s5 + $0x3c4] sm:$0xf]  ;;  %519 = vst [vmem:[#allocation2 + $0x3bc] sm:$0xff] %v518_v33   ;;  %523 = vst [vmem:[#allocation2 + $0x3c4] sm:$0xf] %v522_v34  ;;  %v550_v48 = vld [vmem:[%s19835_s5 + $0x3fc] sm:$0xff]  }
  0x94   :  { %525 = vst [vmem:[#allocation2 + $0x3c8] sm:$0xf] %v524_v35  ;;  %v526_v36 = vld [vmem:[%s19835_s5 + $0x3e4] sm:$0xf]  ;;  %v528_v37 = vld [vmem:[%s19835_s5 + $0x3c8] sm:$0xf] }
  0x95   :  { %v530_v38 = vld [vmem:[%s19835_s5 + $0x3e8] sm:$0xf]  ;;  %527 = vst [vmem:[#allocation2 + $0x3cc] sm:$0xf] %v526_v36  ;;  %529 = vst [vmem:[#allocation2 + $0x3d0] sm:$0xf] %v528_v37 }
  0x96   :  { %531 = vst [vmem:[#allocation2 + $0x3d4] sm:$0xf] %v530_v38  ;;  %v532_v39 = vld [vmem:[%s19835_s5 + $0x3cc] sm:$0xf]  ;;  %v536_v41 = vld [vmem:[%s19835_s5 + $0x3d0] sm:$0xf] }
  0x97   :  { %v534_v40 = vld [vmem:[%s19835_s5 + $0x3ec] sm:$0xf]  ;;  %533 = vst [vmem:[#allocation2 + $0x3d8] sm:$0xf] %v532_v39  ;;  %537 = vst [vmem:[#allocation2 + $0x3e0] sm:$0xf] %v536_v41 }
  0x98   :  { %535 = vst [vmem:[#allocation2 + $0x3dc] sm:$0xf] %v534_v40  ;;  %v538_v42 = vld [vmem:[%s19835_s5 + $0x3f0] sm:$0xf]  ;;  %v540_v43 = vld [vmem:[%s19835_s5 + $0x3d4] sm:$0xf] }
  0x99   :  { %v542_v44 = vld [vmem:[%s19835_s5 + $0x3f4] sm:$0xf]  ;;  %539 = vst [vmem:[#allocation2 + $0x3e4] sm:$0xf] %v538_v42  ;;  %541 = vst [vmem:[#allocation2 + $0x3e8] sm:$0xf] %v540_v43 }
  0x9a   :  { %543 = vst [vmem:[#allocation2 + $0x3ec] sm:$0xf] %v542_v44  ;;  %v544_v45 = vld [vmem:[%s19835_s5 + $0x3d8] sm:$0xf]  ;;  %v548_v47 = vld [vmem:[%s19835_s5 + $0x3dc] sm:$0xf] }
  0x9b   :  { %v546_v46 = vld [vmem:[%s19835_s5 + $0x3f8] sm:$0xf]  ;;  %545 = vst [vmem:[#allocation2 + $0x3f0] sm:$0xf] %v544_v45  ;;  %549 = vst [vmem:[#allocation2 + $0x3f8] sm:$0xf] %v548_v47 }
  0x9c   :  { %547 = vst [vmem:[#allocation2 + $0x3f4] sm:$0xf] %v546_v46  ;;  %v554_v49 = vld [vmem:[%s19835_s5 + $0x420] sm:$0xf]  ;;  %v556_v50 = vld [vmem:[%s19835_s5 + $0x404] sm:$0xf] }
  0x9d   :  { %551 = vst [vmem:[#allocation2 + $0x3fc] sm:$0xff] %v550_v48   ;;  %555 = vst [vmem:[#allocation2 + $0x404] sm:$0xf] %v554_v49  ;;  %v558_v51 = vld [vmem:[%s19835_s5 + $0x424] sm:$0xf]  ;;  %v582_v63 = vld [vmem:[%s19835_s5 + $0x43c] sm:$0xff]  }
  0x9e   :  { %557 = vst [vmem:[#allocation2 + $0x408] sm:$0xf] %v556_v50  ;;  %v560_v52 = vld [vmem:[%s19835_s5 + $0x408] sm:$0xf]  ;;  %559 = vst [vmem:[#allocation2 + $0x40c] sm:$0xf] %v558_v51 }
  0x9f   :  { %v562_v53 = vld [vmem:[%s19835_s5 + $0x428] sm:$0xf]  ;;  %561 = vst [vmem:[#allocation2 + $0x410] sm:$0xf] %v560_v52  ;;  %v564_v54 = vld [vmem:[%s19835_s5 + $0x40c] sm:$0xf] }
  0xa0   :  { %563 = vst [vmem:[#allocation2 + $0x414] sm:$0xf] %v562_v53  ;;  %v566_v55 = vld [vmem:[%s19835_s5 + $0x42c] sm:$0xf]  ;;  %v568_v56 = vld [vmem:[%s19835_s5 + $0x410] sm:$0xf] }
  0xa1   :  { %565 = vst [vmem:[#allocation2 + $0x418] sm:$0xf] %v564_v54  ;;  %567 = vst [vmem:[#allocation2 + $0x41c] sm:$0xf] %v566_v55  ;;  %v570_v57 = vld [vmem:[%s19835_s5 + $0x430] sm:$0xf] }
  0xa2   :  { %569 = vst [vmem:[#allocation2 + $0x420] sm:$0xf] %v568_v56  ;;  %v572_v58 = vld [vmem:[%s19835_s5 + $0x414] sm:$0xf]  ;;  %571 = vst [vmem:[#allocation2 + $0x424] sm:$0xf] %v570_v57 }
  0xa3   :  { %v574_v59 = vld [vmem:[%s19835_s5 + $0x434] sm:$0xf]  ;;  %573 = vst [vmem:[#allocation2 + $0x428] sm:$0xf] %v572_v58  ;;  %v576_v60 = vld [vmem:[%s19835_s5 + $0x418] sm:$0xf] }
  0xa4   :  { %575 = vst [vmem:[#allocation2 + $0x42c] sm:$0xf] %v574_v59  ;;  %v578_v61 = vld [vmem:[%s19835_s5 + $0x438] sm:$0xf]  ;;  %v580_v62 = vld [vmem:[%s19835_s5 + $0x41c] sm:$0xf] }
  0xa5   :  { %577 = vst [vmem:[#allocation2 + $0x430] sm:$0xf] %v576_v60  ;;  %579 = vst [vmem:[#allocation2 + $0x434] sm:$0xf] %v578_v61  ;;  %v586_v0 = vld [vmem:[%s19835_s5 + $0x460] sm:$0xf] }
  0xa6   :  { %581 = vst [vmem:[#allocation2 + $0x438] sm:$0xf] %v580_v62  ;;  %v588_v1 = vld [vmem:[%s19835_s5 + $0x444] sm:$0xf]  ;;  %583 = vst [vmem:[#allocation2 + $0x43c] sm:$0xff] %v582_v63   ;;  %v614_v14 = vld [vmem:[%s19835_s5 + $0x47c] sm:$0xff]  }
  0xa7   :  { %587 = vst [vmem:[#allocation2 + $0x444] sm:$0xf] %v586_v0  ;;  %589 = vst [vmem:[#allocation2 + $0x448] sm:$0xf] %v588_v1  ;;  %v590_v2 = vld [vmem:[%s19835_s5 + $0x464] sm:$0xf] }
  0xa8   :  { %v592_v3 = vld [vmem:[%s19835_s5 + $0x448] sm:$0xf]  ;;  %591 = vst [vmem:[#allocation2 + $0x44c] sm:$0xf] %v590_v2  ;;  %v596_v5 = vld [vmem:[%s19835_s5 + $0x44c] sm:$0xf] }
  0xa9   :  { %v594_v4 = vld [vmem:[%s19835_s5 + $0x468] sm:$0xf]  ;;  %593 = vst [vmem:[#allocation2 + $0x450] sm:$0xf] %v592_v3  ;;  %v598_v6 = vld [vmem:[%s19835_s5 + $0x46c] sm:$0xf] }
  0xaa   :  { %595 = vst [vmem:[#allocation2 + $0x454] sm:$0xf] %v594_v4  ;;  %v600_v7 = vld [vmem:[%s19835_s5 + $0x450] sm:$0xf]  ;;  %597 = vst [vmem:[#allocation2 + $0x458] sm:$0xf] %v596_v5 }
  0xab   :  { %599 = vst [vmem:[#allocation2 + $0x45c] sm:$0xf] %v598_v6  ;;  %601 = vst [vmem:[#allocation2 + $0x460] sm:$0xf] %v600_v7  ;;  %v602_v8 = vld [vmem:[%s19835_s5 + $0x470] sm:$0xf] }
  0xac   :  { %v604_v9 = vld [vmem:[%s19835_s5 + $0x454] sm:$0xf]  ;;  %603 = vst [vmem:[#allocation2 + $0x464] sm:$0xf] %v602_v8  ;;  %v608_v11 = vld [vmem:[%s19835_s5 + $0x458] sm:$0xf] }
  0xad   :  { %v606_v10 = vld [vmem:[%s19835_s5 + $0x474] sm:$0xf]  ;;  %605 = vst [vmem:[#allocation2 + $0x468] sm:$0xf] %v604_v9  ;;  %v610_v12 = vld [vmem:[%s19835_s5 + $0x478] sm:$0xf] }
  0xae   :  { %607 = vst [vmem:[#allocation2 + $0x46c] sm:$0xf] %v606_v10  ;;  %v612_v13 = vld [vmem:[%s19835_s5 + $0x45c] sm:$0xf]  ;;  %609 = vst [vmem:[#allocation2 + $0x470] sm:$0xf] %v608_v11 }
  0xaf   :  { %611 = vst [vmem:[#allocation2 + $0x474] sm:$0xf] %v610_v12  ;;  %613 = vst [vmem:[#allocation2 + $0x478] sm:$0xf] %v612_v13  ;;  %v618_v15 = vld [vmem:[%s19835_s5 + $0x4a0] sm:$0xf] }
  0xb0   :  { %v620_v16 = vld [vmem:[%s19835_s5 + $0x484] sm:$0xf]  ;;  %615 = vst [vmem:[#allocation2 + $0x47c] sm:$0xff] %v614_v14   ;;  %619 = vst [vmem:[#allocation2 + $0x484] sm:$0xf] %v618_v15  ;;  %v646_v29 = vld [vmem:[%s19835_s5 + $0x4bc] sm:$0xff]  }
  0xb1   :  { %621 = vst [vmem:[#allocation2 + $0x488] sm:$0xf] %v620_v16  ;;  %v622_v17 = vld [vmem:[%s19835_s5 + $0x4a4] sm:$0xf]  ;;  %v624_v18 = vld [vmem:[%s19835_s5 + $0x488] sm:$0xf] }
  0xb2   :  { %v626_v19 = vld [vmem:[%s19835_s5 + $0x4a8] sm:$0xf]  ;;  %623 = vst [vmem:[#allocation2 + $0x48c] sm:$0xf] %v622_v17  ;;  %625 = vst [vmem:[#allocation2 + $0x490] sm:$0xf] %v624_v18 }
  0xb3   :  { %627 = vst [vmem:[#allocation2 + $0x494] sm:$0xf] %v626_v19  ;;  %v628_v20 = vld [vmem:[%s19835_s5 + $0x48c] sm:$0xf]  ;;  %v632_v22 = vld [vmem:[%s19835_s5 + $0x490] sm:$0xf] }
  0xb4   :  { %v630_v21 = vld [vmem:[%s19835_s5 + $0x4ac] sm:$0xf]  ;;  %629 = vst [vmem:[#allocation2 + $0x498] sm:$0xf] %v628_v20  ;;  %633 = vst [vmem:[#allocation2 + $0x4a0] sm:$0xf] %v632_v22 }
  0xb5   :  { %631 = vst [vmem:[#allocation2 + $0x49c] sm:$0xf] %v630_v21  ;;  %v634_v23 = vld [vmem:[%s19835_s5 + $0x4b0] sm:$0xf]  ;;  %v636_v24 = vld [vmem:[%s19835_s5 + $0x494] sm:$0xf] }
  0xb6   :  { %v638_v25 = vld [vmem:[%s19835_s5 + $0x4b4] sm:$0xf]  ;;  %635 = vst [vmem:[#allocation2 + $0x4a4] sm:$0xf] %v634_v23  ;;  %637 = vst [vmem:[#allocation2 + $0x4a8] sm:$0xf] %v636_v24 }
  0xb7   :  { %639 = vst [vmem:[#allocation2 + $0x4ac] sm:$0xf] %v638_v25  ;;  %v640_v26 = vld [vmem:[%s19835_s5 + $0x498] sm:$0xf]  ;;  %v644_v28 = vld [vmem:[%s19835_s5 + $0x49c] sm:$0xf] }
  0xb8   :  { %v642_v27 = vld [vmem:[%s19835_s5 + $0x4b8] sm:$0xf]  ;;  %641 = vst [vmem:[#allocation2 + $0x4b0] sm:$0xf] %v640_v26  ;;  %645 = vst [vmem:[#allocation2 + $0x4b8] sm:$0xf] %v644_v28 }
  0xb9   :  { %643 = vst [vmem:[#allocation2 + $0x4b4] sm:$0xf] %v642_v27  ;;  %v650_v30 = vld [vmem:[%s19835_s5 + $0x4e0] sm:$0xf]  ;;  %v652_v31 = vld [vmem:[%s19835_s5 + $0x4c4] sm:$0xf] }
  0xba   :  { %647 = vst [vmem:[#allocation2 + $0x4bc] sm:$0xff] %v646_v29   ;;  %651 = vst [vmem:[#allocation2 + $0x4c4] sm:$0xf] %v650_v30  ;;  %v654_v32 = vld [vmem:[%s19835_s5 + $0x4e4] sm:$0xf]  ;;  %v678_v44 = vld [vmem:[%s19835_s5 + $0x4fc] sm:$0xff]  }
  0xbb   :  { %653 = vst [vmem:[#allocation2 + $0x4c8] sm:$0xf] %v652_v31  ;;  %v656_v33 = vld [vmem:[%s19835_s5 + $0x4c8] sm:$0xf]  ;;  %655 = vst [vmem:[#allocation2 + $0x4cc] sm:$0xf] %v654_v32 }
  0xbc   :  { %v658_v34 = vld [vmem:[%s19835_s5 + $0x4e8] sm:$0xf]  ;;  %657 = vst [vmem:[#allocation2 + $0x4d0] sm:$0xf] %v656_v33  ;;  %v660_v35 = vld [vmem:[%s19835_s5 + $0x4cc] sm:$0xf] }
  0xbd   :  { %659 = vst [vmem:[#allocation2 + $0x4d4] sm:$0xf] %v658_v34  ;;  %v662_v36 = vld [vmem:[%s19835_s5 + $0x4ec] sm:$0xf]  ;;  %v664_v37 = vld [vmem:[%s19835_s5 + $0x4d0] sm:$0xf] }
  0xbe   :  { %661 = vst [vmem:[#allocation2 + $0x4d8] sm:$0xf] %v660_v35  ;;  %663 = vst [vmem:[#allocation2 + $0x4dc] sm:$0xf] %v662_v36  ;;  %v666_v38 = vld [vmem:[%s19835_s5 + $0x4f0] sm:$0xf] }
  0xbf   :  { %665 = vst [vmem:[#allocation2 + $0x4e0] sm:$0xf] %v664_v37  ;;  %v668_v39 = vld [vmem:[%s19835_s5 + $0x4d4] sm:$0xf]  ;;  %667 = vst [vmem:[#allocation2 + $0x4e4] sm:$0xf] %v666_v38 }
  0xc0   :  { %v670_v40 = vld [vmem:[%s19835_s5 + $0x4f4] sm:$0xf]  ;;  %669 = vst [vmem:[#allocation2 + $0x4e8] sm:$0xf] %v668_v39  ;;  %v672_v41 = vld [vmem:[%s19835_s5 + $0x4d8] sm:$0xf] }
  0xc1   :  { %671 = vst [vmem:[#allocation2 + $0x4ec] sm:$0xf] %v670_v40  ;;  %v674_v42 = vld [vmem:[%s19835_s5 + $0x4f8] sm:$0xf]  ;;  %v676_v43 = vld [vmem:[%s19835_s5 + $0x4dc] sm:$0xf] }
  0xc2   :  { %673 = vst [vmem:[#allocation2 + $0x4f0] sm:$0xf] %v672_v41  ;;  %675 = vst [vmem:[#allocation2 + $0x4f4] sm:$0xf] %v674_v42  ;;  %v682_v45 = vld [vmem:[%s19835_s5 + $0x520] sm:$0xf] }
  0xc3   :  { %677 = vst [vmem:[#allocation2 + $0x4f8] sm:$0xf] %v676_v43  ;;  %v684_v46 = vld [vmem:[%s19835_s5 + $0x504] sm:$0xf]  ;;  %679 = vst [vmem:[#allocation2 + $0x4fc] sm:$0xff] %v678_v44   ;;  %v710_v59 = vld [vmem:[%s19835_s5 + $0x53c] sm:$0xff]  }
  0xc4   :  { %683 = vst [vmem:[#allocation2 + $0x504] sm:$0xf] %v682_v45  ;;  %685 = vst [vmem:[#allocation2 + $0x508] sm:$0xf] %v684_v46  ;;  %v686_v47 = vld [vmem:[%s19835_s5 + $0x524] sm:$0xf] }
  0xc5   :  { %v688_v48 = vld [vmem:[%s19835_s5 + $0x508] sm:$0xf]  ;;  %687 = vst [vmem:[#allocation2 + $0x50c] sm:$0xf] %v686_v47  ;;  %v692_v50 = vld [vmem:[%s19835_s5 + $0x50c] sm:$0xf] }
  0xc6   :  { %v690_v49 = vld [vmem:[%s19835_s5 + $0x528] sm:$0xf]  ;;  %689 = vst [vmem:[#allocation2 + $0x510] sm:$0xf] %v688_v48  ;;  %v694_v51 = vld [vmem:[%s19835_s5 + $0x52c] sm:$0xf] }
  0xc7   :  { %691 = vst [vmem:[#allocation2 + $0x514] sm:$0xf] %v690_v49  ;;  %v696_v52 = vld [vmem:[%s19835_s5 + $0x510] sm:$0xf]  ;;  %693 = vst [vmem:[#allocation2 + $0x518] sm:$0xf] %v692_v50 }
  0xc8   :  { %695 = vst [vmem:[#allocation2 + $0x51c] sm:$0xf] %v694_v51  ;;  %697 = vst [vmem:[#allocation2 + $0x520] sm:$0xf] %v696_v52  ;;  %v698_v53 = vld [vmem:[%s19835_s5 + $0x530] sm:$0xf] }
  0xc9   :  { %v700_v54 = vld [vmem:[%s19835_s5 + $0x514] sm:$0xf]  ;;  %699 = vst [vmem:[#allocation2 + $0x524] sm:$0xf] %v698_v53  ;;  %v704_v56 = vld [vmem:[%s19835_s5 + $0x518] sm:$0xf] }
  0xca   :  { %v702_v55 = vld [vmem:[%s19835_s5 + $0x534] sm:$0xf]  ;;  %701 = vst [vmem:[#allocation2 + $0x528] sm:$0xf] %v700_v54  ;;  %v706_v57 = vld [vmem:[%s19835_s5 + $0x538] sm:$0xf] }
  0xcb   :  { %703 = vst [vmem:[#allocation2 + $0x52c] sm:$0xf] %v702_v55  ;;  %v708_v58 = vld [vmem:[%s19835_s5 + $0x51c] sm:$0xf]  ;;  %705 = vst [vmem:[#allocation2 + $0x530] sm:$0xf] %v704_v56 }
  0xcc   :  { %707 = vst [vmem:[#allocation2 + $0x534] sm:$0xf] %v706_v57  ;;  %709 = vst [vmem:[#allocation2 + $0x538] sm:$0xf] %v708_v58  ;;  %v714_v60 = vld [vmem:[%s19835_s5 + $0x560] sm:$0xf] }
  0xcd   :  { %v716_v61 = vld [vmem:[%s19835_s5 + $0x544] sm:$0xf]  ;;  %711 = vst [vmem:[#allocation2 + $0x53c] sm:$0xff] %v710_v59   ;;  %715 = vst [vmem:[#allocation2 + $0x544] sm:$0xf] %v714_v60  ;;  %v742_v10 = vld [vmem:[%s19835_s5 + $0x57c] sm:$0xff]  }
  0xce   :  { %717 = vst [vmem:[#allocation2 + $0x548] sm:$0xf] %v716_v61  ;;  %v718_v62 = vld [vmem:[%s19835_s5 + $0x564] sm:$0xf]  ;;  %v720_v63 = vld [vmem:[%s19835_s5 + $0x548] sm:$0xf] }
  0xcf   :  { %v722_v0 = vld [vmem:[%s19835_s5 + $0x568] sm:$0xf]  ;;  %719 = vst [vmem:[#allocation2 + $0x54c] sm:$0xf] %v718_v62  ;;  %721 = vst [vmem:[#allocation2 + $0x550] sm:$0xf] %v720_v63 }
  0xd0   :  { %723 = vst [vmem:[#allocation2 + $0x554] sm:$0xf] %v722_v0  ;;  %v724_v1 = vld [vmem:[%s19835_s5 + $0x54c] sm:$0xf]  ;;  %v728_v3 = vld [vmem:[%s19835_s5 + $0x550] sm:$0xf] }
  0xd1   :  { %v726_v2 = vld [vmem:[%s19835_s5 + $0x56c] sm:$0xf]  ;;  %725 = vst [vmem:[#allocation2 + $0x558] sm:$0xf] %v724_v1  ;;  %729 = vst [vmem:[#allocation2 + $0x560] sm:$0xf] %v728_v3 }
  0xd2   :  { %727 = vst [vmem:[#allocation2 + $0x55c] sm:$0xf] %v726_v2  ;;  %v730_v4 = vld [vmem:[%s19835_s5 + $0x570] sm:$0xf]  ;;  %v732_v5 = vld [vmem:[%s19835_s5 + $0x554] sm:$0xf] }
  0xd3   :  { %v734_v6 = vld [vmem:[%s19835_s5 + $0x574] sm:$0xf]  ;;  %731 = vst [vmem:[#allocation2 + $0x564] sm:$0xf] %v730_v4  ;;  %733 = vst [vmem:[#allocation2 + $0x568] sm:$0xf] %v732_v5 }
  0xd4   :  { %735 = vst [vmem:[#allocation2 + $0x56c] sm:$0xf] %v734_v6  ;;  %v736_v7 = vld [vmem:[%s19835_s5 + $0x558] sm:$0xf]  ;;  %v740_v9 = vld [vmem:[%s19835_s5 + $0x55c] sm:$0xf] }
  0xd5   :  { %v738_v8 = vld [vmem:[%s19835_s5 + $0x578] sm:$0xf]  ;;  %737 = vst [vmem:[#allocation2 + $0x570] sm:$0xf] %v736_v7  ;;  %741 = vst [vmem:[#allocation2 + $0x578] sm:$0xf] %v740_v9 }
  0xd6   :  { %739 = vst [vmem:[#allocation2 + $0x574] sm:$0xf] %v738_v8  ;;  %v746_v11 = vld [vmem:[%s19835_s5 + $0x5a0] sm:$0xf]  ;;  %v748_v12 = vld [vmem:[%s19835_s5 + $0x584] sm:$0xf] }
  0xd7   :  { %743 = vst [vmem:[#allocation2 + $0x57c] sm:$0xff] %v742_v10   ;;  %747 = vst [vmem:[#allocation2 + $0x584] sm:$0xf] %v746_v11  ;;  %v750_v13 = vld [vmem:[%s19835_s5 + $0x5a4] sm:$0xf]  ;;  %v774_v25 = vld [vmem:[%s19835_s5 + $0x5bc] sm:$0xff]  }
  0xd8   :  { %749 = vst [vmem:[#allocation2 + $0x588] sm:$0xf] %v748_v12  ;;  %v752_v14 = vld [vmem:[%s19835_s5 + $0x588] sm:$0xf]  ;;  %751 = vst [vmem:[#allocation2 + $0x58c] sm:$0xf] %v750_v13 }
  0xd9   :  { %v754_v15 = vld [vmem:[%s19835_s5 + $0x5a8] sm:$0xf]  ;;  %753 = vst [vmem:[#allocation2 + $0x590] sm:$0xf] %v752_v14  ;;  %v756_v16 = vld [vmem:[%s19835_s5 + $0x58c] sm:$0xf] }
  0xda   :  { %755 = vst [vmem:[#allocation2 + $0x594] sm:$0xf] %v754_v15  ;;  %v758_v17 = vld [vmem:[%s19835_s5 + $0x5ac] sm:$0xf]  ;;  %v760_v18 = vld [vmem:[%s19835_s5 + $0x590] sm:$0xf] }
  0xdb   :  { %757 = vst [vmem:[#allocation2 + $0x598] sm:$0xf] %v756_v16  ;;  %759 = vst [vmem:[#allocation2 + $0x59c] sm:$0xf] %v758_v17  ;;  %v762_v19 = vld [vmem:[%s19835_s5 + $0x5b0] sm:$0xf] }
  0xdc   :  { %761 = vst [vmem:[#allocation2 + $0x5a0] sm:$0xf] %v760_v18  ;;  %v764_v20 = vld [vmem:[%s19835_s5 + $0x594] sm:$0xf]  ;;  %763 = vst [vmem:[#allocation2 + $0x5a4] sm:$0xf] %v762_v19 }
  0xdd   :  { %v766_v21 = vld [vmem:[%s19835_s5 + $0x5b4] sm:$0xf]  ;;  %765 = vst [vmem:[#allocation2 + $0x5a8] sm:$0xf] %v764_v20  ;;  %v768_v22 = vld [vmem:[%s19835_s5 + $0x598] sm:$0xf] }
  0xde   :  { %767 = vst [vmem:[#allocation2 + $0x5ac] sm:$0xf] %v766_v21  ;;  %v770_v23 = vld [vmem:[%s19835_s5 + $0x5b8] sm:$0xf]  ;;  %v772_v24 = vld [vmem:[%s19835_s5 + $0x59c] sm:$0xf] }
  0xdf   :  { %769 = vst [vmem:[#allocation2 + $0x5b0] sm:$0xf] %v768_v22  ;;  %771 = vst [vmem:[#allocation2 + $0x5b4] sm:$0xf] %v770_v23  ;;  %v778_v26 = vld [vmem:[%s19835_s5 + $0x5e0] sm:$0xf] }
  0xe0   :  { %773 = vst [vmem:[#allocation2 + $0x5b8] sm:$0xf] %v772_v24  ;;  %v780_v27 = vld [vmem:[%s19835_s5 + $0x5c4] sm:$0xf]  ;;  %775 = vst [vmem:[#allocation2 + $0x5bc] sm:$0xff] %v774_v25   ;;  %v806_v40 = vld [vmem:[%s19835_s5 + $0x5fc] sm:$0xff]  }
  0xe1   :  { %779 = vst [vmem:[#allocation2 + $0x5c4] sm:$0xf] %v778_v26  ;;  %781 = vst [vmem:[#allocation2 + $0x5c8] sm:$0xf] %v780_v27  ;;  %v782_v28 = vld [vmem:[%s19835_s5 + $0x5e4] sm:$0xf] }
  0xe2   :  { %v784_v29 = vld [vmem:[%s19835_s5 + $0x5c8] sm:$0xf]  ;;  %783 = vst [vmem:[#allocation2 + $0x5cc] sm:$0xf] %v782_v28  ;;  %v788_v31 = vld [vmem:[%s19835_s5 + $0x5cc] sm:$0xf] }
  0xe3   :  { %v786_v30 = vld [vmem:[%s19835_s5 + $0x5e8] sm:$0xf]  ;;  %785 = vst [vmem:[#allocation2 + $0x5d0] sm:$0xf] %v784_v29  ;;  %v790_v32 = vld [vmem:[%s19835_s5 + $0x5ec] sm:$0xf] }
  0xe4   :  { %787 = vst [vmem:[#allocation2 + $0x5d4] sm:$0xf] %v786_v30  ;;  %v792_v33 = vld [vmem:[%s19835_s5 + $0x5d0] sm:$0xf]  ;;  %789 = vst [vmem:[#allocation2 + $0x5d8] sm:$0xf] %v788_v31 }
  0xe5   :  { %791 = vst [vmem:[#allocation2 + $0x5dc] sm:$0xf] %v790_v32  ;;  %793 = vst [vmem:[#allocation2 + $0x5e0] sm:$0xf] %v792_v33  ;;  %v794_v34 = vld [vmem:[%s19835_s5 + $0x5f0] sm:$0xf] }
  0xe6   :  { %v796_v35 = vld [vmem:[%s19835_s5 + $0x5d4] sm:$0xf]  ;;  %795 = vst [vmem:[#allocation2 + $0x5e4] sm:$0xf] %v794_v34  ;;  %v800_v37 = vld [vmem:[%s19835_s5 + $0x5d8] sm:$0xf] }
  0xe7   :  { %v798_v36 = vld [vmem:[%s19835_s5 + $0x5f4] sm:$0xf]  ;;  %797 = vst [vmem:[#allocation2 + $0x5e8] sm:$0xf] %v796_v35  ;;  %v802_v38 = vld [vmem:[%s19835_s5 + $0x5f8] sm:$0xf] }
  0xe8   :  { %799 = vst [vmem:[#allocation2 + $0x5ec] sm:$0xf] %v798_v36  ;;  %v804_v39 = vld [vmem:[%s19835_s5 + $0x5dc] sm:$0xf]  ;;  %801 = vst [vmem:[#allocation2 + $0x5f0] sm:$0xf] %v800_v37 }
  0xe9   :  { %803 = vst [vmem:[#allocation2 + $0x5f4] sm:$0xf] %v802_v38  ;;  %805 = vst [vmem:[#allocation2 + $0x5f8] sm:$0xf] %v804_v39  ;;  %v810_v41 = vld [vmem:[%s19835_s5 + $0x620] sm:$0xf] }
  0xea   :  { %v812_v42 = vld [vmem:[%s19835_s5 + $0x604] sm:$0xf]  ;;  %807 = vst [vmem:[#allocation2 + $0x5fc] sm:$0xff] %v806_v40   ;;  %811 = vst [vmem:[#allocation2 + $0x604] sm:$0xf] %v810_v41  ;;  %v838_v55 = vld [vmem:[%s19835_s5 + $0x63c] sm:$0xff]  }
  0xeb   :  { %813 = vst [vmem:[#allocation2 + $0x608] sm:$0xf] %v812_v42  ;;  %v814_v43 = vld [vmem:[%s19835_s5 + $0x624] sm:$0xf]  ;;  %v816_v44 = vld [vmem:[%s19835_s5 + $0x608] sm:$0xf] }
  0xec   :  { %v818_v45 = vld [vmem:[%s19835_s5 + $0x628] sm:$0xf]  ;;  %815 = vst [vmem:[#allocation2 + $0x60c] sm:$0xf] %v814_v43  ;;  %817 = vst [vmem:[#allocation2 + $0x610] sm:$0xf] %v816_v44 }
  0xed   :  { %819 = vst [vmem:[#allocation2 + $0x614] sm:$0xf] %v818_v45  ;;  %v820_v46 = vld [vmem:[%s19835_s5 + $0x60c] sm:$0xf]  ;;  %v824_v48 = vld [vmem:[%s19835_s5 + $0x610] sm:$0xf] }
  0xee   :  { %v822_v47 = vld [vmem:[%s19835_s5 + $0x62c] sm:$0xf]  ;;  %821 = vst [vmem:[#allocation2 + $0x618] sm:$0xf] %v820_v46  ;;  %825 = vst [vmem:[#allocation2 + $0x620] sm:$0xf] %v824_v48 }
  0xef   :  { %823 = vst [vmem:[#allocation2 + $0x61c] sm:$0xf] %v822_v47  ;;  %v826_v49 = vld [vmem:[%s19835_s5 + $0x630] sm:$0xf]  ;;  %v828_v50 = vld [vmem:[%s19835_s5 + $0x614] sm:$0xf] }
  0xf0   :  { %v830_v51 = vld [vmem:[%s19835_s5 + $0x634] sm:$0xf]  ;;  %827 = vst [vmem:[#allocation2 + $0x624] sm:$0xf] %v826_v49  ;;  %829 = vst [vmem:[#allocation2 + $0x628] sm:$0xf] %v828_v50 }
  0xf1   :  { %831 = vst [vmem:[#allocation2 + $0x62c] sm:$0xf] %v830_v51  ;;  %v832_v52 = vld [vmem:[%s19835_s5 + $0x618] sm:$0xf]  ;;  %v836_v54 = vld [vmem:[%s19835_s5 + $0x61c] sm:$0xf] }
  0xf2   :  { %v834_v53 = vld [vmem:[%s19835_s5 + $0x638] sm:$0xf]  ;;  %833 = vst [vmem:[#allocation2 + $0x630] sm:$0xf] %v832_v52  ;;  %837 = vst [vmem:[#allocation2 + $0x638] sm:$0xf] %v836_v54 }
  0xf3   :  { %835 = vst [vmem:[#allocation2 + $0x634] sm:$0xf] %v834_v53  ;;  %v842_v56 = vld [vmem:[%s19835_s5 + $0x660] sm:$0xf]  ;;  %v844_v57 = vld [vmem:[%s19835_s5 + $0x644] sm:$0xf] }
  0xf4   :  { %839 = vst [vmem:[#allocation2 + $0x63c] sm:$0xff] %v838_v55   ;;  %843 = vst [vmem:[#allocation2 + $0x644] sm:$0xf] %v842_v56  ;;  %v846_v58 = vld [vmem:[%s19835_s5 + $0x664] sm:$0xf]  ;;  %v870_v6 = vld [vmem:[%s19835_s5 + $0x67c] sm:$0xff]  }
  0xf5   :  { %845 = vst [vmem:[#allocation2 + $0x648] sm:$0xf] %v844_v57  ;;  %v848_v59 = vld [vmem:[%s19835_s5 + $0x648] sm:$0xf]  ;;  %847 = vst [vmem:[#allocation2 + $0x64c] sm:$0xf] %v846_v58 }
  0xf6   :  { %v850_v60 = vld [vmem:[%s19835_s5 + $0x668] sm:$0xf]  ;;  %849 = vst [vmem:[#allocation2 + $0x650] sm:$0xf] %v848_v59  ;;  %v852_v61 = vld [vmem:[%s19835_s5 + $0x64c] sm:$0xf] }
  0xf7   :  { %851 = vst [vmem:[#allocation2 + $0x654] sm:$0xf] %v850_v60  ;;  %v854_v62 = vld [vmem:[%s19835_s5 + $0x66c] sm:$0xf]  ;;  %v856_v63 = vld [vmem:[%s19835_s5 + $0x650] sm:$0xf] }
  0xf8   :  { %853 = vst [vmem:[#allocation2 + $0x658] sm:$0xf] %v852_v61  ;;  %855 = vst [vmem:[#allocation2 + $0x65c] sm:$0xf] %v854_v62  ;;  %v858_v0 = vld [vmem:[%s19835_s5 + $0x670] sm:$0xf] }
  0xf9   :  { %857 = vst [vmem:[#allocation2 + $0x660] sm:$0xf] %v856_v63  ;;  %v860_v1 = vld [vmem:[%s19835_s5 + $0x654] sm:$0xf]  ;;  %859 = vst [vmem:[#allocation2 + $0x664] sm:$0xf] %v858_v0 }
  0xfa   :  { %v862_v2 = vld [vmem:[%s19835_s5 + $0x674] sm:$0xf]  ;;  %861 = vst [vmem:[#allocation2 + $0x668] sm:$0xf] %v860_v1  ;;  %v864_v3 = vld [vmem:[%s19835_s5 + $0x658] sm:$0xf] }
  0xfb   :  { %863 = vst [vmem:[#allocation2 + $0x66c] sm:$0xf] %v862_v2  ;;  %v866_v4 = vld [vmem:[%s19835_s5 + $0x678] sm:$0xf]  ;;  %v868_v5 = vld [vmem:[%s19835_s5 + $0x65c] sm:$0xf] }
  0xfc   :  { %865 = vst [vmem:[#allocation2 + $0x670] sm:$0xf] %v864_v3  ;;  %867 = vst [vmem:[#allocation2 + $0x674] sm:$0xf] %v866_v4  ;;  %v874_v7 = vld [vmem:[%s19835_s5 + $0x6a0] sm:$0xf] }
  0xfd   :  { %869 = vst [vmem:[#allocation2 + $0x678] sm:$0xf] %v868_v5  ;;  %v876_v8 = vld [vmem:[%s19835_s5 + $0x684] sm:$0xf]  ;;  %871 = vst [vmem:[#allocation2 + $0x67c] sm:$0xff] %v870_v6   ;;  %v902_v21 = vld [vmem:[%s19835_s5 + $0x6bc] sm:$0xff]  }
  0xfe   :  { %875 = vst [vmem:[#allocation2 + $0x684] sm:$0xf] %v874_v7  ;;  %877 = vst [vmem:[#allocation2 + $0x688] sm:$0xf] %v876_v8  ;;  %v878_v9 = vld [vmem:[%s19835_s5 + $0x6a4] sm:$0xf] }
  0xff   :  { %v880_v10 = vld [vmem:[%s19835_s5 + $0x688] sm:$0xf]  ;;  %879 = vst [vmem:[#allocation2 + $0x68c] sm:$0xf] %v878_v9  ;;  %v884_v12 = vld [vmem:[%s19835_s5 + $0x68c] sm:$0xf] }
 0x100   :  { %v882_v11 = vld [vmem:[%s19835_s5 + $0x6a8] sm:$0xf]  ;;  %881 = vst [vmem:[#allocation2 + $0x690] sm:$0xf] %v880_v10  ;;  %v886_v13 = vld [vmem:[%s19835_s5 + $0x6ac] sm:$0xf] }
 0x101   :  { %883 = vst [vmem:[#allocation2 + $0x694] sm:$0xf] %v882_v11  ;;  %v888_v14 = vld [vmem:[%s19835_s5 + $0x690] sm:$0xf]  ;;  %885 = vst [vmem:[#allocation2 + $0x698] sm:$0xf] %v884_v12 }
 0x102   :  { %887 = vst [vmem:[#allocation2 + $0x69c] sm:$0xf] %v886_v13  ;;  %889 = vst [vmem:[#allocation2 + $0x6a0] sm:$0xf] %v888_v14  ;;  %v890_v15 = vld [vmem:[%s19835_s5 + $0x6b0] sm:$0xf] }
 0x103   :  { %v892_v16 = vld [vmem:[%s19835_s5 + $0x694] sm:$0xf]  ;;  %891 = vst [vmem:[#allocation2 + $0x6a4] sm:$0xf] %v890_v15  ;;  %v896_v18 = vld [vmem:[%s19835_s5 + $0x698] sm:$0xf] }
 0x104   :  { %v894_v17 = vld [vmem:[%s19835_s5 + $0x6b4] sm:$0xf]  ;;  %893 = vst [vmem:[#allocation2 + $0x6a8] sm:$0xf] %v892_v16  ;;  %v898_v19 = vld [vmem:[%s19835_s5 + $0x6b8] sm:$0xf] }
 0x105   :  { %895 = vst [vmem:[#allocation2 + $0x6ac] sm:$0xf] %v894_v17  ;;  %v900_v20 = vld [vmem:[%s19835_s5 + $0x69c] sm:$0xf]  ;;  %897 = vst [vmem:[#allocation2 + $0x6b0] sm:$0xf] %v896_v18 }
 0x106   :  { %899 = vst [vmem:[#allocation2 + $0x6b4] sm:$0xf] %v898_v19  ;;  %901 = vst [vmem:[#allocation2 + $0x6b8] sm:$0xf] %v900_v20  ;;  %v906_v22 = vld [vmem:[%s19835_s5 + $0x6e0] sm:$0xf] }
 0x107   :  { %v908_v23 = vld [vmem:[%s19835_s5 + $0x6c4] sm:$0xf]  ;;  %903 = vst [vmem:[#allocation2 + $0x6bc] sm:$0xff] %v902_v21   ;;  %907 = vst [vmem:[#allocation2 + $0x6c4] sm:$0xf] %v906_v22  ;;  %v934_v36 = vld [vmem:[%s19835_s5 + $0x6fc] sm:$0xff]  }
 0x108   :  { %909 = vst [vmem:[#allocation2 + $0x6c8] sm:$0xf] %v908_v23  ;;  %v910_v24 = vld [vmem:[%s19835_s5 + $0x6e4] sm:$0xf]  ;;  %v912_v25 = vld [vmem:[%s19835_s5 + $0x6c8] sm:$0xf] }
 0x109   :  { %v914_v26 = vld [vmem:[%s19835_s5 + $0x6e8] sm:$0xf]  ;;  %911 = vst [vmem:[#allocation2 + $0x6cc] sm:$0xf] %v910_v24  ;;  %913 = vst [vmem:[#allocation2 + $0x6d0] sm:$0xf] %v912_v25 }
 0x10a   :  { %915 = vst [vmem:[#allocation2 + $0x6d4] sm:$0xf] %v914_v26  ;;  %v916_v27 = vld [vmem:[%s19835_s5 + $0x6cc] sm:$0xf]  ;;  %v920_v29 = vld [vmem:[%s19835_s5 + $0x6d0] sm:$0xf] }
 0x10b   :  { %v918_v28 = vld [vmem:[%s19835_s5 + $0x6ec] sm:$0xf]  ;;  %917 = vst [vmem:[#allocation2 + $0x6d8] sm:$0xf] %v916_v27  ;;  %921 = vst [vmem:[#allocation2 + $0x6e0] sm:$0xf] %v920_v29 }
 0x10c   :  { %919 = vst [vmem:[#allocation2 + $0x6dc] sm:$0xf] %v918_v28  ;;  %v922_v30 = vld [vmem:[%s19835_s5 + $0x6f0] sm:$0xf]  ;;  %v924_v31 = vld [vmem:[%s19835_s5 + $0x6d4] sm:$0xf] }
 0x10d   :  { %v926_v32 = vld [vmem:[%s19835_s5 + $0x6f4] sm:$0xf]  ;;  %923 = vst [vmem:[#allocation2 + $0x6e4] sm:$0xf] %v922_v30  ;;  %925 = vst [vmem:[#allocation2 + $0x6e8] sm:$0xf] %v924_v31 }
 0x10e   :  { %927 = vst [vmem:[#allocation2 + $0x6ec] sm:$0xf] %v926_v32  ;;  %v928_v33 = vld [vmem:[%s19835_s5 + $0x6d8] sm:$0xf]  ;;  %v932_v35 = vld [vmem:[%s19835_s5 + $0x6dc] sm:$0xf] }
 0x10f   :  { %v930_v34 = vld [vmem:[%s19835_s5 + $0x6f8] sm:$0xf]  ;;  %929 = vst [vmem:[#allocation2 + $0x6f0] sm:$0xf] %v928_v33  ;;  %933 = vst [vmem:[#allocation2 + $0x6f8] sm:$0xf] %v932_v35 }
 0x110   :  { %931 = vst [vmem:[#allocation2 + $0x6f4] sm:$0xf] %v930_v34  ;;  %v938_v37 = vld [vmem:[%s19835_s5 + $0x720] sm:$0xf]  ;;  %v940_v38 = vld [vmem:[%s19835_s5 + $0x704] sm:$0xf] }
 0x111   :  { %935 = vst [vmem:[#allocation2 + $0x6fc] sm:$0xff] %v934_v36   ;;  %939 = vst [vmem:[#allocation2 + $0x704] sm:$0xf] %v938_v37  ;;  %v942_v39 = vld [vmem:[%s19835_s5 + $0x724] sm:$0xf]  ;;  %v966_v51 = vld [vmem:[%s19835_s5 + $0x73c] sm:$0xff]  }
 0x112   :  { %941 = vst [vmem:[#allocation2 + $0x708] sm:$0xf] %v940_v38  ;;  %v944_v40 = vld [vmem:[%s19835_s5 + $0x708] sm:$0xf]  ;;  %943 = vst [vmem:[#allocation2 + $0x70c] sm:$0xf] %v942_v39 }
 0x113   :  { %v946_v41 = vld [vmem:[%s19835_s5 + $0x728] sm:$0xf]  ;;  %945 = vst [vmem:[#allocation2 + $0x710] sm:$0xf] %v944_v40  ;;  %v948_v42 = vld [vmem:[%s19835_s5 + $0x70c] sm:$0xf] }
 0x114   :  { %947 = vst [vmem:[#allocation2 + $0x714] sm:$0xf] %v946_v41  ;;  %v950_v43 = vld [vmem:[%s19835_s5 + $0x72c] sm:$0xf]  ;;  %v952_v44 = vld [vmem:[%s19835_s5 + $0x710] sm:$0xf] }
 0x115   :  { %949 = vst [vmem:[#allocation2 + $0x718] sm:$0xf] %v948_v42  ;;  %951 = vst [vmem:[#allocation2 + $0x71c] sm:$0xf] %v950_v43  ;;  %v954_v45 = vld [vmem:[%s19835_s5 + $0x730] sm:$0xf] }
 0x116   :  { %953 = vst [vmem:[#allocation2 + $0x720] sm:$0xf] %v952_v44  ;;  %v956_v46 = vld [vmem:[%s19835_s5 + $0x714] sm:$0xf]  ;;  %955 = vst [vmem:[#allocation2 + $0x724] sm:$0xf] %v954_v45 }
 0x117   :  { %v958_v47 = vld [vmem:[%s19835_s5 + $0x734] sm:$0xf]  ;;  %957 = vst [vmem:[#allocation2 + $0x728] sm:$0xf] %v956_v46  ;;  %v960_v48 = vld [vmem:[%s19835_s5 + $0x718] sm:$0xf] }
 0x118   :  { %959 = vst [vmem:[#allocation2 + $0x72c] sm:$0xf] %v958_v47  ;;  %v962_v49 = vld [vmem:[%s19835_s5 + $0x738] sm:$0xf]  ;;  %v964_v50 = vld [vmem:[%s19835_s5 + $0x71c] sm:$0xf] }
 0x119   :  { %961 = vst [vmem:[#allocation2 + $0x730] sm:$0xf] %v960_v48  ;;  %963 = vst [vmem:[#allocation2 + $0x734] sm:$0xf] %v962_v49  ;;  %v970_v52 = vld [vmem:[%s19835_s5 + $0x760] sm:$0xf] }
 0x11a   :  { %965 = vst [vmem:[#allocation2 + $0x738] sm:$0xf] %v964_v50  ;;  %v972_v53 = vld [vmem:[%s19835_s5 + $0x744] sm:$0xf]  ;;  %967 = vst [vmem:[#allocation2 + $0x73c] sm:$0xff] %v966_v51   ;;  %v998_v2 = vld [vmem:[%s19835_s5 + $0x77c] sm:$0xff]  }
 0x11b   :  { %971 = vst [vmem:[#allocation2 + $0x744] sm:$0xf] %v970_v52  ;;  %973 = vst [vmem:[#allocation2 + $0x748] sm:$0xf] %v972_v53  ;;  %v974_v54 = vld [vmem:[%s19835_s5 + $0x764] sm:$0xf] }
 0x11c   :  { %v976_v55 = vld [vmem:[%s19835_s5 + $0x748] sm:$0xf]  ;;  %975 = vst [vmem:[#allocation2 + $0x74c] sm:$0xf] %v974_v54  ;;  %v980_v57 = vld [vmem:[%s19835_s5 + $0x74c] sm:$0xf] }
 0x11d   :  { %v978_v56 = vld [vmem:[%s19835_s5 + $0x768] sm:$0xf]  ;;  %977 = vst [vmem:[#allocation2 + $0x750] sm:$0xf] %v976_v55  ;;  %v982_v58 = vld [vmem:[%s19835_s5 + $0x76c] sm:$0xf] }
 0x11e   :  { %979 = vst [vmem:[#allocation2 + $0x754] sm:$0xf] %v978_v56  ;;  %v984_v59 = vld [vmem:[%s19835_s5 + $0x750] sm:$0xf]  ;;  %981 = vst [vmem:[#allocation2 + $0x758] sm:$0xf] %v980_v57 }
 0x11f   :  { %983 = vst [vmem:[#allocation2 + $0x75c] sm:$0xf] %v982_v58  ;;  %985 = vst [vmem:[#allocation2 + $0x760] sm:$0xf] %v984_v59  ;;  %v986_v60 = vld [vmem:[%s19835_s5 + $0x770] sm:$0xf] }
 0x120   :  { %v988_v61 = vld [vmem:[%s19835_s5 + $0x754] sm:$0xf]  ;;  %987 = vst [vmem:[#allocation2 + $0x764] sm:$0xf] %v986_v60  ;;  %v992_v63 = vld [vmem:[%s19835_s5 + $0x758] sm:$0xf] }
 0x121   :  { %v990_v62 = vld [vmem:[%s19835_s5 + $0x774] sm:$0xf]  ;;  %989 = vst [vmem:[#allocation2 + $0x768] sm:$0xf] %v988_v61  ;;  %v994_v0 = vld [vmem:[%s19835_s5 + $0x778] sm:$0xf] }
 0x122   :  { %991 = vst [vmem:[#allocation2 + $0x76c] sm:$0xf] %v990_v62  ;;  %v996_v1 = vld [vmem:[%s19835_s5 + $0x75c] sm:$0xf]  ;;  %993 = vst [vmem:[#allocation2 + $0x770] sm:$0xf] %v992_v63 }
 0x123   :  { %995 = vst [vmem:[#allocation2 + $0x774] sm:$0xf] %v994_v0  ;;  %997 = vst [vmem:[#allocation2 + $0x778] sm:$0xf] %v996_v1  ;;  %v1002_v3 = vld [vmem:[%s19835_s5 + $0x7a0] sm:$0xf] }
 0x124   :  { %v1004_v4 = vld [vmem:[%s19835_s5 + $0x784] sm:$0xf]  ;;  %999 = vst [vmem:[#allocation2 + $0x77c] sm:$0xff] %v998_v2   ;;  %1003 = vst [vmem:[#allocation2 + $0x784] sm:$0xf] %v1002_v3  ;;  %v1030_v17 = vld [vmem:[%s19835_s5 + $0x7bc] sm:$0xff]  }
 0x125   :  { %1005 = vst [vmem:[#allocation2 + $0x788] sm:$0xf] %v1004_v4  ;;  %v1006_v5 = vld [vmem:[%s19835_s5 + $0x7a4] sm:$0xf]  ;;  %v1008_v6 = vld [vmem:[%s19835_s5 + $0x788] sm:$0xf] }
 0x126   :  { %v1010_v7 = vld [vmem:[%s19835_s5 + $0x7a8] sm:$0xf]  ;;  %1007 = vst [vmem:[#allocation2 + $0x78c] sm:$0xf] %v1006_v5  ;;  %1009 = vst [vmem:[#allocation2 + $0x790] sm:$0xf] %v1008_v6 }
 0x127   :  { %1011 = vst [vmem:[#allocation2 + $0x794] sm:$0xf] %v1010_v7  ;;  %v1012_v8 = vld [vmem:[%s19835_s5 + $0x78c] sm:$0xf]  ;;  %v1016_v10 = vld [vmem:[%s19835_s5 + $0x790] sm:$0xf] }
 0x128   :  { %v1014_v9 = vld [vmem:[%s19835_s5 + $0x7ac] sm:$0xf]  ;;  %1013 = vst [vmem:[#allocation2 + $0x798] sm:$0xf] %v1012_v8  ;;  %1017 = vst [vmem:[#allocation2 + $0x7a0] sm:$0xf] %v1016_v10 }
 0x129   :  { %1015 = vst [vmem:[#allocation2 + $0x79c] sm:$0xf] %v1014_v9  ;;  %v1018_v11 = vld [vmem:[%s19835_s5 + $0x7b0] sm:$0xf]  ;;  %v1020_v12 = vld [vmem:[%s19835_s5 + $0x794] sm:$0xf] }
 0x12a   :  { %v1022_v13 = vld [vmem:[%s19835_s5 + $0x7b4] sm:$0xf]  ;;  %1019 = vst [vmem:[#allocation2 + $0x7a4] sm:$0xf] %v1018_v11  ;;  %1021 = vst [vmem:[#allocation2 + $0x7a8] sm:$0xf] %v1020_v12 }
 0x12b   :  { %1023 = vst [vmem:[#allocation2 + $0x7ac] sm:$0xf] %v1022_v13  ;;  %v1024_v14 = vld [vmem:[%s19835_s5 + $0x798] sm:$0xf]  ;;  %v1028_v16 = vld [vmem:[%s19835_s5 + $0x79c] sm:$0xf] }
 0x12c   :  { %v1026_v15 = vld [vmem:[%s19835_s5 + $0x7b8] sm:$0xf]  ;;  %1025 = vst [vmem:[#allocation2 + $0x7b0] sm:$0xf] %v1024_v14  ;;  %1029 = vst [vmem:[#allocation2 + $0x7b8] sm:$0xf] %v1028_v16 }
 0x12d   :  { %1027 = vst [vmem:[#allocation2 + $0x7b4] sm:$0xf] %v1026_v15  ;;  %v1034_v18 = vld [vmem:[%s19835_s5 + $0x7e0] sm:$0xf]  ;;  %v1036_v19 = vld [vmem:[%s19835_s5 + $0x7c4] sm:$0xf] }
 0x12e   :  { %1031 = vst [vmem:[#allocation2 + $0x7bc] sm:$0xff] %v1030_v17   ;;  %1035 = vst [vmem:[#allocation2 + $0x7c4] sm:$0xf] %v1034_v18  ;;  %v1038_v20 = vld [vmem:[%s19835_s5 + $0x7e4] sm:$0xf] }
 0x12f   :  { %1037 = vst [vmem:[#allocation2 + $0x7c8] sm:$0xf] %v1036_v19  ;;  %v1040_v21 = vld [vmem:[%s19835_s5 + $0x7c8] sm:$0xf]  ;;  %1039 = vst [vmem:[#allocation2 + $0x7cc] sm:$0xf] %v1038_v20 }
 0x130   :  { %v1042_v22 = vld [vmem:[%s19835_s5 + $0x7e8] sm:$0xf]  ;;  %1041 = vst [vmem:[#allocation2 + $0x7d0] sm:$0xf] %v1040_v21  ;;  %v1044_v23 = vld [vmem:[%s19835_s5 + $0x7cc] sm:$0xf] }
 0x131   :  { %1043 = vst [vmem:[#allocation2 + $0x7d4] sm:$0xf] %v1042_v22  ;;  %v1046_v24 = vld [vmem:[%s19835_s5 + $0x7ec] sm:$0xf]  ;;  %v1048_v25 = vld [vmem:[%s19835_s5 + $0x7d0] sm:$0xf] }
 0x132   :  { %1045 = vst [vmem:[#allocation2 + $0x7d8] sm:$0xf] %v1044_v23  ;;  %1047 = vst [vmem:[#allocation2 + $0x7dc] sm:$0xf] %v1046_v24  ;;  %v1050_v26 = vld [vmem:[%s19835_s5 + $0x7f0] sm:$0xf] }
 0x133   :  { %1049 = vst [vmem:[#allocation2 + $0x7e0] sm:$0xf] %v1048_v25  ;;  %v1052_v27 = vld [vmem:[%s19835_s5 + $0x7d4] sm:$0xf]  ;;  %1051 = vst [vmem:[#allocation2 + $0x7e4] sm:$0xf] %v1050_v26 }
 0x134   :  { %v1054_v28 = vld [vmem:[%s19835_s5 + $0x7f4] sm:$0xf]  ;;  %1053 = vst [vmem:[#allocation2 + $0x7e8] sm:$0xf] %v1052_v27  ;;  %v1056_v29 = vld [vmem:[%s19835_s5 + $0x7d8] sm:$0xf] }
 0x135   :  { %1055 = vst [vmem:[#allocation2 + $0x7ec] sm:$0xf] %v1054_v28  ;;  %v1058_v30 = vld [vmem:[%s19835_s5 + $0x7f8] sm:$0xf]  ;;  %v1060_v31 = vld [vmem:[%s19835_s5 + $0x7dc] sm:$0xf] }
 0x136   :  { %1057 = vst [vmem:[#allocation2 + $0x7f0] sm:$0xf] %v1056_v29  ;;  %1059 = vst [vmem:[#allocation2 + $0x7f4] sm:$0xf] %v1058_v30  ;;  %v1062_v32 = vld [vmem:[%s19835_s5 + $0x7fc] sm:$0xf] }
 0x137   :  { %1061 = vst [vmem:[#allocation2 + $0x7f8] sm:$0xf] %v1060_v31  ;;  %1063 = vst [vmem:[#allocation2 + $0x7fc] sm:$0xf] %v1062_v32 }
 0x138   :  { %4199 = vsyncadd [#allocation4], 32768  ;;  %v4218_v33 = vld [vmem:[%s19836_s6] sm:$0xf]  ;;  %v4220_v34 = vld [vmem:[%s19836_s6 + $0x1c] sm:$0xf] }
 0x139   :  { %4219 = vst [vmem:[#allocation3] sm:$0xf] %v4218_v33  ;;  %4221 = vst [vmem:[#allocation3 + $0x4] sm:$0xf] %v4220_v34  ;;  %v4222_v35 = vld [vmem:[%s19836_s6 + $0x4] sm:$0xf] }
 0x13a   :  { %v4224_v36 = vld [vmem:[%s19836_s6 + $0x20] sm:$0xf]  ;;  %v4226_v37 = vld [vmem:[%s19836_s6 + $0x8] sm:$0xf]  ;;  %4223 = vst [vmem:[#allocation3 + $0x8] sm:$0xf] %v4222_v35 }
 0x13b   :  { %4225 = vst [vmem:[#allocation3 + $0xc] sm:$0xf] %v4224_v36  ;;  %4227 = vst [vmem:[#allocation3 + $0x10] sm:$0xf] %v4226_v37  ;;  %v4228_v38 = vld [vmem:[%s19836_s6 + $0x24] sm:$0xf] }
 0x13c   :  { %v4230_v39 = vld [vmem:[%s19836_s6 + $0xc] sm:$0xf]  ;;  %v4232_v40 = vld [vmem:[%s19836_s6 + $0x28] sm:$0xf]  ;;  %4229 = vst [vmem:[#allocation3 + $0x14] sm:$0xf] %v4228_v38 }
 0x13d   :  { %4231 = vst [vmem:[#allocation3 + $0x18] sm:$0xf] %v4230_v39  ;;  %4233 = vst [vmem:[#allocation3 + $0x1c] sm:$0xf] %v4232_v40  ;;  %v4234_v41 = vld [vmem:[%s19836_s6 + $0x10] sm:$0xf] }
 0x13e   :  { %v4236_v42 = vld [vmem:[%s19836_s6 + $0x2c] sm:$0xf]  ;;  %v4238_v43 = vld [vmem:[%s19836_s6 + $0x14] sm:$0xf]  ;;  %4235 = vst [vmem:[#allocation3 + $0x20] sm:$0xf] %v4234_v41 }
 0x13f   :  { %4237 = vst [vmem:[#allocation3 + $0x24] sm:$0xf] %v4236_v42  ;;  %4239 = vst [vmem:[#allocation3 + $0x28] sm:$0xf] %v4238_v43  ;;  %v4240_v44 = vld [vmem:[%s19836_s6 + $0x30] sm:$0xf] }
 0x140   :  { %v4242_v45 = vld [vmem:[%s19836_s6 + $0x18] sm:$0xf]  ;;  %4241 = vst [vmem:[#allocation3 + $0x2c] sm:$0xf] %v4240_v44  ;;  %v4248_v47 = vld [vmem:[%s19836_s6 + $0x54] sm:$0xf] }
 0x141   :  { %v4244_v46 = vld [vmem:[%s19836_s6 + $0x34] sm:$0xff]   ;;  %4243 = vst [vmem:[#allocation3 + $0x30] sm:$0xf] %v4242_v45  ;;  %v4250_v48 = vld [vmem:[%s19836_s6 + $0x3c] sm:$0xf]  ;;  %v4272_v59 = vld [vmem:[%s19836_s6 + $0x6c] sm:$0xff]  }
 0x142   :  { %4245 = vst [vmem:[#allocation3 + $0x34] sm:$0xff] %v4244_v46   ;;  %v4252_v49 = vld [vmem:[%s19836_s6 + $0x58] sm:$0xf]  ;;  %4249 = vst [vmem:[#allocation3 + $0x3c] sm:$0xf] %v4248_v47  ;;  %v4300_v8 = vld [vmem:[%s19836_s6 + $0xa4] sm:$0xff]  }
 0x143   :  { %4251 = vst [vmem:[#allocation3 + $0x40] sm:$0xf] %v4250_v48  ;;  %4253 = vst [vmem:[#allocation3 + $0x44] sm:$0xf] %v4252_v49  ;;  %v4254_v50 = vld [vmem:[%s19836_s6 + $0x40] sm:$0xf] }
 0x144   :  { %v4256_v51 = vld [vmem:[%s19836_s6 + $0x5c] sm:$0xf]  ;;  %v4258_v52 = vld [vmem:[%s19836_s6 + $0x44] sm:$0xf]  ;;  %4255 = vst [vmem:[#allocation3 + $0x48] sm:$0xf] %v4254_v50 }
 0x145   :  { %4257 = vst [vmem:[#allocation3 + $0x4c] sm:$0xf] %v4256_v51  ;;  %4259 = vst [vmem:[#allocation3 + $0x50] sm:$0xf] %v4258_v52  ;;  %v4260_v53 = vld [vmem:[%s19836_s6 + $0x60] sm:$0xf] }
 0x146   :  { %v4262_v54 = vld [vmem:[%s19836_s6 + $0x48] sm:$0xf]  ;;  %v4264_v55 = vld [vmem:[%s19836_s6 + $0x64] sm:$0xf]  ;;  %4261 = vst [vmem:[#allocation3 + $0x54] sm:$0xf] %v4260_v53 }
 0x147   :  { %4263 = vst [vmem:[#allocation3 + $0x58] sm:$0xf] %v4262_v54  ;;  %4265 = vst [vmem:[#allocation3 + $0x5c] sm:$0xf] %v4264_v55  ;;  %v4266_v56 = vld [vmem:[%s19836_s6 + $0x4c] sm:$0xf] }
 0x148   :  { %v4268_v57 = vld [vmem:[%s19836_s6 + $0x68] sm:$0xf]  ;;  %v4270_v58 = vld [vmem:[%s19836_s6 + $0x50] sm:$0xf]  ;;  %4267 = vst [vmem:[#allocation3 + $0x60] sm:$0xf] %v4266_v56 }
 0x149   :  { %4269 = vst [vmem:[#allocation3 + $0x64] sm:$0xf] %v4268_v57  ;;  %4271 = vst [vmem:[#allocation3 + $0x68] sm:$0xf] %v4270_v58  ;;  %v4276_v60 = vld [vmem:[%s19836_s6 + $0x8c] sm:$0xf] }
 0x14a   :  { %v4278_v61 = vld [vmem:[%s19836_s6 + $0x74] sm:$0xf]  ;;  %4273 = vst [vmem:[#allocation3 + $0x6c] sm:$0xff] %v4272_v59   ;;  %4277 = vst [vmem:[#allocation3 + $0x74] sm:$0xf] %v4276_v60  ;;  %v4328_v21 = vld [vmem:[%s19836_s6 + $0xdc] sm:$0xff]  }
 0x14b   :  { %4279 = vst [vmem:[#allocation3 + $0x78] sm:$0xf] %v4278_v61  ;;  %v4280_v62 = vld [vmem:[%s19836_s6 + $0x90] sm:$0xf]  ;;  %v4282_v63 = vld [vmem:[%s19836_s6 + $0x78] sm:$0xf] }
 0x14c   :  { %v4284_v0 = vld [vmem:[%s19836_s6 + $0x94] sm:$0xf]  ;;  %4281 = vst [vmem:[#allocation3 + $0x7c] sm:$0xf] %v4280_v62  ;;  %4283 = vst [vmem:[#allocation3 + $0x80] sm:$0xf] %v4282_v63 }
 0x14d   :  { %4285 = vst [vmem:[#allocation3 + $0x84] sm:$0xf] %v4284_v0  ;;  %v4286_v1 = vld [vmem:[%s19836_s6 + $0x7c] sm:$0xf]  ;;  %v4288_v2 = vld [vmem:[%s19836_s6 + $0x98] sm:$0xf] }
 0x14e   :  { %v4290_v3 = vld [vmem:[%s19836_s6 + $0x80] sm:$0xf]  ;;  %4287 = vst [vmem:[#allocation3 + $0x88] sm:$0xf] %v4286_v1  ;;  %4289 = vst [vmem:[#allocation3 + $0x8c] sm:$0xf] %v4288_v2 }
 0x14f   :  { %4291 = vst [vmem:[#allocation3 + $0x90] sm:$0xf] %v4290_v3  ;;  %v4292_v4 = vld [vmem:[%s19836_s6 + $0x9c] sm:$0xf]  ;;  %v4294_v5 = vld [vmem:[%s19836_s6 + $0x84] sm:$0xf] }
 0x150   :  { %v4296_v6 = vld [vmem:[%s19836_s6 + $0xa0] sm:$0xf]  ;;  %4293 = vst [vmem:[#allocation3 + $0x94] sm:$0xf] %v4292_v4  ;;  %4295 = vst [vmem:[#allocation3 + $0x98] sm:$0xf] %v4294_v5 }
 0x151   :  { %4297 = vst [vmem:[#allocation3 + $0x9c] sm:$0xf] %v4296_v6  ;;  %v4298_v7 = vld [vmem:[%s19836_s6 + $0x88] sm:$0xf]  ;;  %v4304_v9 = vld [vmem:[%s19836_s6 + $0xc4] sm:$0xf] }
 0x152   :  { %4299 = vst [vmem:[#allocation3 + $0xa0] sm:$0xf] %v4298_v7  ;;  %4301 = vst [vmem:[#allocation3 + $0xa4] sm:$0xff] %v4300_v8   ;;  %v4306_v10 = vld [vmem:[%s19836_s6 + $0xac] sm:$0xf]  ;;  %v4356_v34 = vld [vmem:[%s19836_s6 + $0x114] sm:$0xff]  }
 0x153   :  { %4305 = vst [vmem:[#allocation3 + $0xac] sm:$0xf] %v4304_v9  ;;  %v4308_v11 = vld [vmem:[%s19836_s6 + $0xc8] sm:$0xf]  ;;  %v4310_v12 = vld [vmem:[%s19836_s6 + $0xb0] sm:$0xf] }
 0x154   :  { %4307 = vst [vmem:[#allocation3 + $0xb0] sm:$0xf] %v4306_v10  ;;  %4309 = vst [vmem:[#allocation3 + $0xb4] sm:$0xf] %v4308_v11  ;;  %v4312_v13 = vld [vmem:[%s19836_s6 + $0xcc] sm:$0xf] }
 0x155   :  { %4311 = vst [vmem:[#allocation3 + $0xb8] sm:$0xf] %v4310_v12  ;;  %v4314_v14 = vld [vmem:[%s19836_s6 + $0xb4] sm:$0xf]  ;;  %v4316_v15 = vld [vmem:[%s19836_s6 + $0xd0] sm:$0xf] }
 0x156   :  { %4313 = vst [vmem:[#allocation3 + $0xbc] sm:$0xf] %v4312_v13  ;;  %4315 = vst [vmem:[#allocation3 + $0xc0] sm:$0xf] %v4314_v14  ;;  %v4318_v16 = vld [vmem:[%s19836_s6 + $0xb8] sm:$0xf] }
 0x157   :  { %4317 = vst [vmem:[#allocation3 + $0xc4] sm:$0xf] %v4316_v15  ;;  %v4320_v17 = vld [vmem:[%s19836_s6 + $0xd4] sm:$0xf]  ;;  %v4322_v18 = vld [vmem:[%s19836_s6 + $0xbc] sm:$0xf] }
 0x158   :  { %4319 = vst [vmem:[#allocation3 + $0xc8] sm:$0xf] %v4318_v16  ;;  %4321 = vst [vmem:[#allocation3 + $0xcc] sm:$0xf] %v4320_v17  ;;  %v4324_v19 = vld [vmem:[%s19836_s6 + $0xd8] sm:$0xf] }
 0x159   :  { %4323 = vst [vmem:[#allocation3 + $0xd0] sm:$0xf] %v4322_v18  ;;  %v4326_v20 = vld [vmem:[%s19836_s6 + $0xc0] sm:$0xf]  ;;  %4325 = vst [vmem:[#allocation3 + $0xd4] sm:$0xf] %v4324_v19 }
 0x15a   :  { %4327 = vst [vmem:[#allocation3 + $0xd8] sm:$0xf] %v4326_v20  ;;  %4329 = vst [vmem:[#allocation3 + $0xdc] sm:$0xff] %v4328_v21   ;;  %v4332_v22 = vld [vmem:[%s19836_s6 + $0xfc] sm:$0xf]  ;;  %v4384_v47 = vld [vmem:[%s19836_s6 + $0x14c] sm:$0xff]  }
 0x15b   :  { %v4334_v23 = vld [vmem:[%s19836_s6 + $0xe4] sm:$0xf]  ;;  %v4336_v24 = vld [vmem:[%s19836_s6 + $0x100] sm:$0xf]  ;;  %4333 = vst [vmem:[#allocation3 + $0xe4] sm:$0xf] %v4332_v22 }
 0x15c   :  { %4335 = vst [vmem:[#allocation3 + $0xe8] sm:$0xf] %v4334_v23  ;;  %4337 = vst [vmem:[#allocation3 + $0xec] sm:$0xf] %v4336_v24  ;;  %v4338_v25 = vld [vmem:[%s19836_s6 + $0xe8] sm:$0xf] }
 0x15d   :  { %v4340_v26 = vld [vmem:[%s19836_s6 + $0x104] sm:$0xf]  ;;  %v4342_v27 = vld [vmem:[%s19836_s6 + $0xec] sm:$0xf]  ;;  %4339 = vst [vmem:[#allocation3 + $0xf0] sm:$0xf] %v4338_v25 }
 0x15e   :  { %4341 = vst [vmem:[#allocation3 + $0xf4] sm:$0xf] %v4340_v26  ;;  %4343 = vst [vmem:[#allocation3 + $0xf8] sm:$0xf] %v4342_v27  ;;  %v4344_v28 = vld [vmem:[%s19836_s6 + $0x108] sm:$0xf] }
 0x15f   :  { %v4346_v29 = vld [vmem:[%s19836_s6 + $0xf0] sm:$0xf]  ;;  %v4348_v30 = vld [vmem:[%s19836_s6 + $0x10c] sm:$0xf]  ;;  %4345 = vst [vmem:[#allocation3 + $0xfc] sm:$0xf] %v4344_v28 }
 0x160   :  { %4347 = vst [vmem:[#allocation3 + $0x100] sm:$0xf] %v4346_v29  ;;  %4349 = vst [vmem:[#allocation3 + $0x104] sm:$0xf] %v4348_v30  ;;  %v4350_v31 = vld [vmem:[%s19836_s6 + $0xf4] sm:$0xf] }
 0x161   :  { %v4352_v32 = vld [vmem:[%s19836_s6 + $0x110] sm:$0xf]  ;;  %v4354_v33 = vld [vmem:[%s19836_s6 + $0xf8] sm:$0xf]  ;;  %4351 = vst [vmem:[#allocation3 + $0x108] sm:$0xf] %v4350_v31 }
 0x162   :  { %4353 = vst [vmem:[#allocation3 + $0x10c] sm:$0xf] %v4352_v32  ;;  %4355 = vst [vmem:[#allocation3 + $0x110] sm:$0xf] %v4354_v33  ;;  %v4360_v35 = vld [vmem:[%s19836_s6 + $0x134] sm:$0xf] }
 0x163   :  { %v4362_v36 = vld [vmem:[%s19836_s6 + $0x11c] sm:$0xf]  ;;  %4357 = vst [vmem:[#allocation3 + $0x114] sm:$0xff] %v4356_v34   ;;  %4361 = vst [vmem:[#allocation3 + $0x11c] sm:$0xf] %v4360_v35  ;;  %v4412_v60 = vld [vmem:[%s19836_s6 + $0x184] sm:$0xff]  }
 0x164   :  { %4363 = vst [vmem:[#allocation3 + $0x120] sm:$0xf] %v4362_v36  ;;  %v4364_v37 = vld [vmem:[%s19836_s6 + $0x138] sm:$0xf]  ;;  %v4366_v38 = vld [vmem:[%s19836_s6 + $0x120] sm:$0xf] }
 0x165   :  { %v4368_v39 = vld [vmem:[%s19836_s6 + $0x13c] sm:$0xf]  ;;  %4365 = vst [vmem:[#allocation3 + $0x124] sm:$0xf] %v4364_v37  ;;  %4367 = vst [vmem:[#allocation3 + $0x128] sm:$0xf] %v4366_v38 }
 0x166   :  { %4369 = vst [vmem:[#allocation3 + $0x12c] sm:$0xf] %v4368_v39  ;;  %v4370_v40 = vld [vmem:[%s19836_s6 + $0x124] sm:$0xf]  ;;  %v4372_v41 = vld [vmem:[%s19836_s6 + $0x140] sm:$0xf] }
 0x167   :  { %v4374_v42 = vld [vmem:[%s19836_s6 + $0x128] sm:$0xf]  ;;  %4371 = vst [vmem:[#allocation3 + $0x130] sm:$0xf] %v4370_v40  ;;  %4373 = vst [vmem:[#allocation3 + $0x134] sm:$0xf] %v4372_v41 }
 0x168   :  { %4375 = vst [vmem:[#allocation3 + $0x138] sm:$0xf] %v4374_v42  ;;  %v4376_v43 = vld [vmem:[%s19836_s6 + $0x144] sm:$0xf]  ;;  %v4378_v44 = vld [vmem:[%s19836_s6 + $0x12c] sm:$0xf] }
 0x169   :  { %v4380_v45 = vld [vmem:[%s19836_s6 + $0x148] sm:$0xf]  ;;  %4377 = vst [vmem:[#allocation3 + $0x13c] sm:$0xf] %v4376_v43  ;;  %4379 = vst [vmem:[#allocation3 + $0x140] sm:$0xf] %v4378_v44 }
 0x16a   :  { %4381 = vst [vmem:[#allocation3 + $0x144] sm:$0xf] %v4380_v45  ;;  %v4382_v46 = vld [vmem:[%s19836_s6 + $0x130] sm:$0xf]  ;;  %v4388_v48 = vld [vmem:[%s19836_s6 + $0x16c] sm:$0xf] }
 0x16b   :  { %4383 = vst [vmem:[#allocation3 + $0x148] sm:$0xf] %v4382_v46  ;;  %4385 = vst [vmem:[#allocation3 + $0x14c] sm:$0xff] %v4384_v47   ;;  %v4390_v49 = vld [vmem:[%s19836_s6 + $0x154] sm:$0xf]  ;;  %v4440_v9 = vld [vmem:[%s19836_s6 + $0x1bc] sm:$0xff]  }
 0x16c   :  { %4389 = vst [vmem:[#allocation3 + $0x154] sm:$0xf] %v4388_v48  ;;  %v4392_v50 = vld [vmem:[%s19836_s6 + $0x170] sm:$0xf]  ;;  %v4394_v51 = vld [vmem:[%s19836_s6 + $0x158] sm:$0xf] }
 0x16d   :  { %4391 = vst [vmem:[#allocation3 + $0x158] sm:$0xf] %v4390_v49  ;;  %4393 = vst [vmem:[#allocation3 + $0x15c] sm:$0xf] %v4392_v50  ;;  %v4396_v52 = vld [vmem:[%s19836_s6 + $0x174] sm:$0xf] }
 0x16e   :  { %4395 = vst [vmem:[#allocation3 + $0x160] sm:$0xf] %v4394_v51  ;;  %v4398_v53 = vld [vmem:[%s19836_s6 + $0x15c] sm:$0xf]  ;;  %v4400_v54 = vld [vmem:[%s19836_s6 + $0x178] sm:$0xf] }
 0x16f   :  { %4397 = vst [vmem:[#allocation3 + $0x164] sm:$0xf] %v4396_v52  ;;  %4399 = vst [vmem:[#allocation3 + $0x168] sm:$0xf] %v4398_v53  ;;  %v4402_v55 = vld [vmem:[%s19836_s6 + $0x160] sm:$0xf] }
 0x170   :  { %4401 = vst [vmem:[#allocation3 + $0x16c] sm:$0xf] %v4400_v54  ;;  %v4404_v56 = vld [vmem:[%s19836_s6 + $0x17c] sm:$0xf]  ;;  %v4406_v57 = vld [vmem:[%s19836_s6 + $0x164] sm:$0xf] }
 0x171   :  { %4403 = vst [vmem:[#allocation3 + $0x170] sm:$0xf] %v4402_v55  ;;  %4405 = vst [vmem:[#allocation3 + $0x174] sm:$0xf] %v4404_v56  ;;  %v4408_v58 = vld [vmem:[%s19836_s6 + $0x180] sm:$0xf] }
 0x172   :  { %4407 = vst [vmem:[#allocation3 + $0x178] sm:$0xf] %v4406_v57  ;;  %v4410_v59 = vld [vmem:[%s19836_s6 + $0x168] sm:$0xf]  ;;  %4409 = vst [vmem:[#allocation3 + $0x17c] sm:$0xf] %v4408_v58 }
 0x173   :  { %4411 = vst [vmem:[#allocation3 + $0x180] sm:$0xf] %v4410_v59  ;;  %4413 = vst [vmem:[#allocation3 + $0x184] sm:$0xff] %v4412_v60   ;;  %v4416_v61 = vld [vmem:[%s19836_s6 + $0x1a4] sm:$0xf]  ;;  %v4468_v22 = vld [vmem:[%s19836_s6 + $0x1f4] sm:$0xff]  }
 0x174   :  { %v4418_v62 = vld [vmem:[%s19836_s6 + $0x18c] sm:$0xf]  ;;  %v4420_v63 = vld [vmem:[%s19836_s6 + $0x1a8] sm:$0xf]  ;;  %4417 = vst [vmem:[#allocation3 + $0x18c] sm:$0xf] %v4416_v61 }
 0x175   :  { %4419 = vst [vmem:[#allocation3 + $0x190] sm:$0xf] %v4418_v62  ;;  %4421 = vst [vmem:[#allocation3 + $0x194] sm:$0xf] %v4420_v63  ;;  %v4422_v0 = vld [vmem:[%s19836_s6 + $0x190] sm:$0xf] }
 0x176   :  { %v4424_v1 = vld [vmem:[%s19836_s6 + $0x1ac] sm:$0xf]  ;;  %v4426_v2 = vld [vmem:[%s19836_s6 + $0x194] sm:$0xf]  ;;  %4423 = vst [vmem:[#allocation3 + $0x198] sm:$0xf] %v4422_v0 }
 0x177   :  { %4425 = vst [vmem:[#allocation3 + $0x19c] sm:$0xf] %v4424_v1  ;;  %4427 = vst [vmem:[#allocation3 + $0x1a0] sm:$0xf] %v4426_v2  ;;  %v4428_v3 = vld [vmem:[%s19836_s6 + $0x1b0] sm:$0xf] }
 0x178   :  { %v4430_v4 = vld [vmem:[%s19836_s6 + $0x198] sm:$0xf]  ;;  %v4432_v5 = vld [vmem:[%s19836_s6 + $0x1b4] sm:$0xf]  ;;  %4429 = vst [vmem:[#allocation3 + $0x1a4] sm:$0xf] %v4428_v3 }
 0x179   :  { %4431 = vst [vmem:[#allocation3 + $0x1a8] sm:$0xf] %v4430_v4  ;;  %4433 = vst [vmem:[#allocation3 + $0x1ac] sm:$0xf] %v4432_v5  ;;  %v4434_v6 = vld [vmem:[%s19836_s6 + $0x19c] sm:$0xf] }
 0x17a   :  { %v4436_v7 = vld [vmem:[%s19836_s6 + $0x1b8] sm:$0xf]  ;;  %v4438_v8 = vld [vmem:[%s19836_s6 + $0x1a0] sm:$0xf]  ;;  %4435 = vst [vmem:[#allocation3 + $0x1b0] sm:$0xf] %v4434_v6 }
 0x17b   :  { %4437 = vst [vmem:[#allocation3 + $0x1b4] sm:$0xf] %v4436_v7  ;;  %4439 = vst [vmem:[#allocation3 + $0x1b8] sm:$0xf] %v4438_v8  ;;  %v4444_v10 = vld [vmem:[%s19836_s6 + $0x1dc] sm:$0xf] }
 0x17c   :  { %v4446_v11 = vld [vmem:[%s19836_s6 + $0x1c4] sm:$0xf]  ;;  %4441 = vst [vmem:[#allocation3 + $0x1bc] sm:$0xff] %v4440_v9   ;;  %4445 = vst [vmem:[#allocation3 + $0x1c4] sm:$0xf] %v4444_v10  ;;  %v4496_v35 = vld [vmem:[%s19836_s6 + $0x22c] sm:$0xff]  }
 0x17d   :  { %4447 = vst [vmem:[#allocation3 + $0x1c8] sm:$0xf] %v4446_v11  ;;  %v4448_v12 = vld [vmem:[%s19836_s6 + $0x1e0] sm:$0xf]  ;;  %v4450_v13 = vld [vmem:[%s19836_s6 + $0x1c8] sm:$0xf] }
 0x17e   :  { %v4452_v14 = vld [vmem:[%s19836_s6 + $0x1e4] sm:$0xf]  ;;  %4449 = vst [vmem:[#allocation3 + $0x1cc] sm:$0xf] %v4448_v12  ;;  %4451 = vst [vmem:[#allocation3 + $0x1d0] sm:$0xf] %v4450_v13 }
 0x17f   :  { %4453 = vst [vmem:[#allocation3 + $0x1d4] sm:$0xf] %v4452_v14  ;;  %v4454_v15 = vld [vmem:[%s19836_s6 + $0x1cc] sm:$0xf]  ;;  %v4456_v16 = vld [vmem:[%s19836_s6 + $0x1e8] sm:$0xf] }
 0x180   :  { %v4458_v17 = vld [vmem:[%s19836_s6 + $0x1d0] sm:$0xf]  ;;  %4455 = vst [vmem:[#allocation3 + $0x1d8] sm:$0xf] %v4454_v15  ;;  %4457 = vst [vmem:[#allocation3 + $0x1dc] sm:$0xf] %v4456_v16 }
 0x181   :  { %4459 = vst [vmem:[#allocation3 + $0x1e0] sm:$0xf] %v4458_v17  ;;  %v4460_v18 = vld [vmem:[%s19836_s6 + $0x1ec] sm:$0xf]  ;;  %v4462_v19 = vld [vmem:[%s19836_s6 + $0x1d4] sm:$0xf] }
 0x182   :  { %v4464_v20 = vld [vmem:[%s19836_s6 + $0x1f0] sm:$0xf]  ;;  %4461 = vst [vmem:[#allocation3 + $0x1e4] sm:$0xf] %v4460_v18  ;;  %4463 = vst [vmem:[#allocation3 + $0x1e8] sm:$0xf] %v4462_v19 }
 0x183   :  { %4465 = vst [vmem:[#allocation3 + $0x1ec] sm:$0xf] %v4464_v20  ;;  %v4466_v21 = vld [vmem:[%s19836_s6 + $0x1d8] sm:$0xf]  ;;  %v4472_v23 = vld [vmem:[%s19836_s6 + $0x214] sm:$0xf] }
 0x184   :  { %4467 = vst [vmem:[#allocation3 + $0x1f0] sm:$0xf] %v4466_v21  ;;  %4469 = vst [vmem:[#allocation3 + $0x1f4] sm:$0xff] %v4468_v22   ;;  %v4474_v24 = vld [vmem:[%s19836_s6 + $0x1fc] sm:$0xf]  ;;  %v4524_v48 = vld [vmem:[%s19836_s6 + $0x264] sm:$0xff]  }
 0x185   :  { %4473 = vst [vmem:[#allocation3 + $0x1fc] sm:$0xf] %v4472_v23  ;;  %v4476_v25 = vld [vmem:[%s19836_s6 + $0x218] sm:$0xf]  ;;  %v4478_v26 = vld [vmem:[%s19836_s6 + $0x200] sm:$0xf] }
 0x186   :  { %4475 = vst [vmem:[#allocation3 + $0x200] sm:$0xf] %v4474_v24  ;;  %4477 = vst [vmem:[#allocation3 + $0x204] sm:$0xf] %v4476_v25  ;;  %v4480_v27 = vld [vmem:[%s19836_s6 + $0x21c] sm:$0xf] }
 0x187   :  { %4479 = vst [vmem:[#allocation3 + $0x208] sm:$0xf] %v4478_v26  ;;  %v4482_v28 = vld [vmem:[%s19836_s6 + $0x204] sm:$0xf]  ;;  %v4484_v29 = vld [vmem:[%s19836_s6 + $0x220] sm:$0xf] }
 0x188   :  { %4481 = vst [vmem:[#allocation3 + $0x20c] sm:$0xf] %v4480_v27  ;;  %4483 = vst [vmem:[#allocation3 + $0x210] sm:$0xf] %v4482_v28  ;;  %v4486_v30 = vld [vmem:[%s19836_s6 + $0x208] sm:$0xf] }
 0x189   :  { %4485 = vst [vmem:[#allocation3 + $0x214] sm:$0xf] %v4484_v29  ;;  %v4488_v31 = vld [vmem:[%s19836_s6 + $0x224] sm:$0xf]  ;;  %v4490_v32 = vld [vmem:[%s19836_s6 + $0x20c] sm:$0xf] }
 0x18a   :  { %4487 = vst [vmem:[#allocation3 + $0x218] sm:$0xf] %v4486_v30  ;;  %4489 = vst [vmem:[#allocation3 + $0x21c] sm:$0xf] %v4488_v31  ;;  %v4492_v33 = vld [vmem:[%s19836_s6 + $0x228] sm:$0xf] }
 0x18b   :  { %4491 = vst [vmem:[#allocation3 + $0x220] sm:$0xf] %v4490_v32  ;;  %v4494_v34 = vld [vmem:[%s19836_s6 + $0x210] sm:$0xf]  ;;  %4493 = vst [vmem:[#allocation3 + $0x224] sm:$0xf] %v4492_v33 }
 0x18c   :  { %4495 = vst [vmem:[#allocation3 + $0x228] sm:$0xf] %v4494_v34  ;;  %4497 = vst [vmem:[#allocation3 + $0x22c] sm:$0xff] %v4496_v35   ;;  %v4500_v36 = vld [vmem:[%s19836_s6 + $0x24c] sm:$0xf]  ;;  %v4552_v61 = vld [vmem:[%s19836_s6 + $0x29c] sm:$0xff]  }
 0x18d   :  { %v4502_v37 = vld [vmem:[%s19836_s6 + $0x234] sm:$0xf]  ;;  %v4504_v38 = vld [vmem:[%s19836_s6 + $0x250] sm:$0xf]  ;;  %4501 = vst [vmem:[#allocation3 + $0x234] sm:$0xf] %v4500_v36 }
 0x18e   :  { %4503 = vst [vmem:[#allocation3 + $0x238] sm:$0xf] %v4502_v37  ;;  %4505 = vst [vmem:[#allocation3 + $0x23c] sm:$0xf] %v4504_v38  ;;  %v4506_v39 = vld [vmem:[%s19836_s6 + $0x238] sm:$0xf] }
 0x18f   :  { %v4508_v40 = vld [vmem:[%s19836_s6 + $0x254] sm:$0xf]  ;;  %v4510_v41 = vld [vmem:[%s19836_s6 + $0x23c] sm:$0xf]  ;;  %4507 = vst [vmem:[#allocation3 + $0x240] sm:$0xf] %v4506_v39 }
 0x190   :  { %4509 = vst [vmem:[#allocation3 + $0x244] sm:$0xf] %v4508_v40  ;;  %4511 = vst [vmem:[#allocation3 + $0x248] sm:$0xf] %v4510_v41  ;;  %v4512_v42 = vld [vmem:[%s19836_s6 + $0x258] sm:$0xf] }
 0x191   :  { %v4514_v43 = vld [vmem:[%s19836_s6 + $0x240] sm:$0xf]  ;;  %v4516_v44 = vld [vmem:[%s19836_s6 + $0x25c] sm:$0xf]  ;;  %4513 = vst [vmem:[#allocation3 + $0x24c] sm:$0xf] %v4512_v42 }
 0x192   :  { %4515 = vst [vmem:[#allocation3 + $0x250] sm:$0xf] %v4514_v43  ;;  %4517 = vst [vmem:[#allocation3 + $0x254] sm:$0xf] %v4516_v44  ;;  %v4518_v45 = vld [vmem:[%s19836_s6 + $0x244] sm:$0xf] }
 0x193   :  { %v4520_v46 = vld [vmem:[%s19836_s6 + $0x260] sm:$0xf]  ;;  %v4522_v47 = vld [vmem:[%s19836_s6 + $0x248] sm:$0xf]  ;;  %4519 = vst [vmem:[#allocation3 + $0x258] sm:$0xf] %v4518_v45 }
 0x194   :  { %4521 = vst [vmem:[#allocation3 + $0x25c] sm:$0xf] %v4520_v46  ;;  %4523 = vst [vmem:[#allocation3 + $0x260] sm:$0xf] %v4522_v47  ;;  %v4528_v49 = vld [vmem:[%s19836_s6 + $0x284] sm:$0xf] }
 0x195   :  { %v4530_v50 = vld [vmem:[%s19836_s6 + $0x26c] sm:$0xf]  ;;  %4525 = vst [vmem:[#allocation3 + $0x264] sm:$0xff] %v4524_v48   ;;  %4529 = vst [vmem:[#allocation3 + $0x26c] sm:$0xf] %v4528_v49  ;;  %v4580_v10 = vld [vmem:[%s19836_s6 + $0x2d4] sm:$0xff]  }
 0x196   :  { %4531 = vst [vmem:[#allocation3 + $0x270] sm:$0xf] %v4530_v50  ;;  %v4532_v51 = vld [vmem:[%s19836_s6 + $0x288] sm:$0xf]  ;;  %v4534_v52 = vld [vmem:[%s19836_s6 + $0x270] sm:$0xf] }
 0x197   :  { %v4536_v53 = vld [vmem:[%s19836_s6 + $0x28c] sm:$0xf]  ;;  %4533 = vst [vmem:[#allocation3 + $0x274] sm:$0xf] %v4532_v51  ;;  %4535 = vst [vmem:[#allocation3 + $0x278] sm:$0xf] %v4534_v52 }
 0x198   :  { %4537 = vst [vmem:[#allocation3 + $0x27c] sm:$0xf] %v4536_v53  ;;  %v4538_v54 = vld [vmem:[%s19836_s6 + $0x274] sm:$0xf]  ;;  %v4540_v55 = vld [vmem:[%s19836_s6 + $0x290] sm:$0xf] }
 0x199   :  { %v4542_v56 = vld [vmem:[%s19836_s6 + $0x278] sm:$0xf]  ;;  %4539 = vst [vmem:[#allocation3 + $0x280] sm:$0xf] %v4538_v54  ;;  %4541 = vst [vmem:[#allocation3 + $0x284] sm:$0xf] %v4540_v55 }
 0x19a   :  { %4543 = vst [vmem:[#allocation3 + $0x288] sm:$0xf] %v4542_v56  ;;  %v4544_v57 = vld [vmem:[%s19836_s6 + $0x294] sm:$0xf]  ;;  %v4546_v58 = vld [vmem:[%s19836_s6 + $0x27c] sm:$0xf] }
 0x19b   :  { %v4548_v59 = vld [vmem:[%s19836_s6 + $0x298] sm:$0xf]  ;;  %4545 = vst [vmem:[#allocation3 + $0x28c] sm:$0xf] %v4544_v57  ;;  %4547 = vst [vmem:[#allocation3 + $0x290] sm:$0xf] %v4546_v58 }
 0x19c   :  { %4549 = vst [vmem:[#allocation3 + $0x294] sm:$0xf] %v4548_v59  ;;  %v4550_v60 = vld [vmem:[%s19836_s6 + $0x280] sm:$0xf]  ;;  %v4556_v62 = vld [vmem:[%s19836_s6 + $0x2bc] sm:$0xf] }
 0x19d   :  { %4551 = vst [vmem:[#allocation3 + $0x298] sm:$0xf] %v4550_v60  ;;  %4553 = vst [vmem:[#allocation3 + $0x29c] sm:$0xff] %v4552_v61   ;;  %v4558_v63 = vld [vmem:[%s19836_s6 + $0x2a4] sm:$0xf]  ;;  %v4608_v23 = vld [vmem:[%s19836_s6 + $0x30c] sm:$0xff]  }
 0x19e   :  { %4557 = vst [vmem:[#allocation3 + $0x2a4] sm:$0xf] %v4556_v62  ;;  %v4560_v0 = vld [vmem:[%s19836_s6 + $0x2c0] sm:$0xf]  ;;  %v4562_v1 = vld [vmem:[%s19836_s6 + $0x2a8] sm:$0xf] }
 0x19f   :  { %4559 = vst [vmem:[#allocation3 + $0x2a8] sm:$0xf] %v4558_v63  ;;  %4561 = vst [vmem:[#allocation3 + $0x2ac] sm:$0xf] %v4560_v0  ;;  %v4564_v2 = vld [vmem:[%s19836_s6 + $0x2c4] sm:$0xf] }
 0x1a0   :  { %4563 = vst [vmem:[#allocation3 + $0x2b0] sm:$0xf] %v4562_v1  ;;  %v4566_v3 = vld [vmem:[%s19836_s6 + $0x2ac] sm:$0xf]  ;;  %v4568_v4 = vld [vmem:[%s19836_s6 + $0x2c8] sm:$0xf] }
 0x1a1   :  { %4565 = vst [vmem:[#allocation3 + $0x2b4] sm:$0xf] %v4564_v2  ;;  %4567 = vst [vmem:[#allocation3 + $0x2b8] sm:$0xf] %v4566_v3  ;;  %v4570_v5 = vld [vmem:[%s19836_s6 + $0x2b0] sm:$0xf] }
 0x1a2   :  { %4569 = vst [vmem:[#allocation3 + $0x2bc] sm:$0xf] %v4568_v4  ;;  %v4572_v6 = vld [vmem:[%s19836_s6 + $0x2cc] sm:$0xf]  ;;  %v4574_v7 = vld [vmem:[%s19836_s6 + $0x2b4] sm:$0xf] }
 0x1a3   :  { %4571 = vst [vmem:[#allocation3 + $0x2c0] sm:$0xf] %v4570_v5  ;;  %4573 = vst [vmem:[#allocation3 + $0x2c4] sm:$0xf] %v4572_v6  ;;  %v4576_v8 = vld [vmem:[%s19836_s6 + $0x2d0] sm:$0xf] }
 0x1a4   :  { %4575 = vst [vmem:[#allocation3 + $0x2c8] sm:$0xf] %v4574_v7  ;;  %v4578_v9 = vld [vmem:[%s19836_s6 + $0x2b8] sm:$0xf]  ;;  %4577 = vst [vmem:[#allocation3 + $0x2cc] sm:$0xf] %v4576_v8 }
 0x1a5   :  { %4579 = vst [vmem:[#allocation3 + $0x2d0] sm:$0xf] %v4578_v9  ;;  %4581 = vst [vmem:[#allocation3 + $0x2d4] sm:$0xff] %v4580_v10   ;;  %v4584_v11 = vld [vmem:[%s19836_s6 + $0x2f4] sm:$0xf]  ;;  %v4636_v36 = vld [vmem:[%s19836_s6 + $0x344] sm:$0xff]  }
 0x1a6   :  { %v4586_v12 = vld [vmem:[%s19836_s6 + $0x2dc] sm:$0xf]  ;;  %v4588_v13 = vld [vmem:[%s19836_s6 + $0x2f8] sm:$0xf]  ;;  %4585 = vst [vmem:[#allocation3 + $0x2dc] sm:$0xf] %v4584_v11 }
 0x1a7   :  { %4587 = vst [vmem:[#allocation3 + $0x2e0] sm:$0xf] %v4586_v12  ;;  %4589 = vst [vmem:[#allocation3 + $0x2e4] sm:$0xf] %v4588_v13  ;;  %v4590_v14 = vld [vmem:[%s19836_s6 + $0x2e0] sm:$0xf] }
 0x1a8   :  { %v4592_v15 = vld [vmem:[%s19836_s6 + $0x2fc] sm:$0xf]  ;;  %v4594_v16 = vld [vmem:[%s19836_s6 + $0x2e4] sm:$0xf]  ;;  %4591 = vst [vmem:[#allocation3 + $0x2e8] sm:$0xf] %v4590_v14 }
 0x1a9   :  { %4593 = vst [vmem:[#allocation3 + $0x2ec] sm:$0xf] %v4592_v15  ;;  %4595 = vst [vmem:[#allocation3 + $0x2f0] sm:$0xf] %v4594_v16  ;;  %v4596_v17 = vld [vmem:[%s19836_s6 + $0x300] sm:$0xf] }
 0x1aa   :  { %v4598_v18 = vld [vmem:[%s19836_s6 + $0x2e8] sm:$0xf]  ;;  %v4600_v19 = vld [vmem:[%s19836_s6 + $0x304] sm:$0xf]  ;;  %4597 = vst [vmem:[#allocation3 + $0x2f4] sm:$0xf] %v4596_v17 }
 0x1ab   :  { %4599 = vst [vmem:[#allocation3 + $0x2f8] sm:$0xf] %v4598_v18  ;;  %4601 = vst [vmem:[#allocation3 + $0x2fc] sm:$0xf] %v4600_v19  ;;  %v4602_v20 = vld [vmem:[%s19836_s6 + $0x2ec] sm:$0xf] }
 0x1ac   :  { %v4604_v21 = vld [vmem:[%s19836_s6 + $0x308] sm:$0xf]  ;;  %v4606_v22 = vld [vmem:[%s19836_s6 + $0x2f0] sm:$0xf]  ;;  %4603 = vst [vmem:[#allocation3 + $0x300] sm:$0xf] %v4602_v20 }
 0x1ad   :  { %4605 = vst [vmem:[#allocation3 + $0x304] sm:$0xf] %v4604_v21  ;;  %4607 = vst [vmem:[#allocation3 + $0x308] sm:$0xf] %v4606_v22  ;;  %v4612_v24 = vld [vmem:[%s19836_s6 + $0x32c] sm:$0xf] }
 0x1ae   :  { %v4614_v25 = vld [vmem:[%s19836_s6 + $0x314] sm:$0xf]  ;;  %4609 = vst [vmem:[#allocation3 + $0x30c] sm:$0xff] %v4608_v23   ;;  %4613 = vst [vmem:[#allocation3 + $0x314] sm:$0xf] %v4612_v24  ;;  %v4664_v49 = vld [vmem:[%s19836_s6 + $0x37c] sm:$0xff]  }
 0x1af   :  { %4615 = vst [vmem:[#allocation3 + $0x318] sm:$0xf] %v4614_v25  ;;  %v4616_v26 = vld [vmem:[%s19836_s6 + $0x330] sm:$0xf]  ;;  %v4618_v27 = vld [vmem:[%s19836_s6 + $0x318] sm:$0xf] }
 0x1b0   :  { %v4620_v28 = vld [vmem:[%s19836_s6 + $0x334] sm:$0xf]  ;;  %4617 = vst [vmem:[#allocation3 + $0x31c] sm:$0xf] %v4616_v26  ;;  %4619 = vst [vmem:[#allocation3 + $0x320] sm:$0xf] %v4618_v27 }
 0x1b1   :  { %4621 = vst [vmem:[#allocation3 + $0x324] sm:$0xf] %v4620_v28  ;;  %v4622_v29 = vld [vmem:[%s19836_s6 + $0x31c] sm:$0xf]  ;;  %v4624_v30 = vld [vmem:[%s19836_s6 + $0x338] sm:$0xf] }
 0x1b2   :  { %v4626_v31 = vld [vmem:[%s19836_s6 + $0x320] sm:$0xf]  ;;  %4623 = vst [vmem:[#allocation3 + $0x328] sm:$0xf] %v4622_v29  ;;  %4625 = vst [vmem:[#allocation3 + $0x32c] sm:$0xf] %v4624_v30 }
 0x1b3   :  { %4627 = vst [vmem:[#allocation3 + $0x330] sm:$0xf] %v4626_v31  ;;  %v4628_v32 = vld [vmem:[%s19836_s6 + $0x33c] sm:$0xf]  ;;  %v4630_v33 = vld [vmem:[%s19836_s6 + $0x324] sm:$0xf] }
 0x1b4   :  { %v4632_v34 = vld [vmem:[%s19836_s6 + $0x340] sm:$0xf]  ;;  %4629 = vst [vmem:[#allocation3 + $0x334] sm:$0xf] %v4628_v32  ;;  %4631 = vst [vmem:[#allocation3 + $0x338] sm:$0xf] %v4630_v33 }
 0x1b5   :  { %4633 = vst [vmem:[#allocation3 + $0x33c] sm:$0xf] %v4632_v34  ;;  %v4634_v35 = vld [vmem:[%s19836_s6 + $0x328] sm:$0xf]  ;;  %v4640_v37 = vld [vmem:[%s19836_s6 + $0x364] sm:$0xf] }
 0x1b6   :  { %4635 = vst [vmem:[#allocation3 + $0x340] sm:$0xf] %v4634_v35  ;;  %4637 = vst [vmem:[#allocation3 + $0x344] sm:$0xff] %v4636_v36   ;;  %v4642_v38 = vld [vmem:[%s19836_s6 + $0x34c] sm:$0xf]  ;;  %v4692_v62 = vld [vmem:[%s19836_s6 + $0x3b4] sm:$0xff]  }
 0x1b7   :  { %4641 = vst [vmem:[#allocation3 + $0x34c] sm:$0xf] %v4640_v37  ;;  %v4644_v39 = vld [vmem:[%s19836_s6 + $0x368] sm:$0xf]  ;;  %v4646_v40 = vld [vmem:[%s19836_s6 + $0x350] sm:$0xf] }
 0x1b8   :  { %4643 = vst [vmem:[#allocation3 + $0x350] sm:$0xf] %v4642_v38  ;;  %4645 = vst [vmem:[#allocation3 + $0x354] sm:$0xf] %v4644_v39  ;;  %v4648_v41 = vld [vmem:[%s19836_s6 + $0x36c] sm:$0xf] }
 0x1b9   :  { %4647 = vst [vmem:[#allocation3 + $0x358] sm:$0xf] %v4646_v40  ;;  %v4650_v42 = vld [vmem:[%s19836_s6 + $0x354] sm:$0xf]  ;;  %v4652_v43 = vld [vmem:[%s19836_s6 + $0x370] sm:$0xf] }
 0x1ba   :  { %4649 = vst [vmem:[#allocation3 + $0x35c] sm:$0xf] %v4648_v41  ;;  %4651 = vst [vmem:[#allocation3 + $0x360] sm:$0xf] %v4650_v42  ;;  %v4654_v44 = vld [vmem:[%s19836_s6 + $0x358] sm:$0xf] }
 0x1bb   :  { %4653 = vst [vmem:[#allocation3 + $0x364] sm:$0xf] %v4652_v43  ;;  %v4656_v45 = vld [vmem:[%s19836_s6 + $0x374] sm:$0xf]  ;;  %v4658_v46 = vld [vmem:[%s19836_s6 + $0x35c] sm:$0xf] }
 0x1bc   :  { %4655 = vst [vmem:[#allocation3 + $0x368] sm:$0xf] %v4654_v44  ;;  %4657 = vst [vmem:[#allocation3 + $0x36c] sm:$0xf] %v4656_v45  ;;  %v4660_v47 = vld [vmem:[%s19836_s6 + $0x378] sm:$0xf] }
 0x1bd   :  { %4659 = vst [vmem:[#allocation3 + $0x370] sm:$0xf] %v4658_v46  ;;  %v4662_v48 = vld [vmem:[%s19836_s6 + $0x360] sm:$0xf]  ;;  %4661 = vst [vmem:[#allocation3 + $0x374] sm:$0xf] %v4660_v47 }
 0x1be   :  { %4663 = vst [vmem:[#allocation3 + $0x378] sm:$0xf] %v4662_v48  ;;  %4665 = vst [vmem:[#allocation3 + $0x37c] sm:$0xff] %v4664_v49   ;;  %v4668_v50 = vld [vmem:[%s19836_s6 + $0x39c] sm:$0xf]  ;;  %v4720_v11 = vld [vmem:[%s19836_s6 + $0x3ec] sm:$0xff]  }
 0x1bf   :  { %v4670_v51 = vld [vmem:[%s19836_s6 + $0x384] sm:$0xf]  ;;  %v4672_v52 = vld [vmem:[%s19836_s6 + $0x3a0] sm:$0xf]  ;;  %4669 = vst [vmem:[#allocation3 + $0x384] sm:$0xf] %v4668_v50 }
 0x1c0   :  { %4671 = vst [vmem:[#allocation3 + $0x388] sm:$0xf] %v4670_v51  ;;  %4673 = vst [vmem:[#allocation3 + $0x38c] sm:$0xf] %v4672_v52  ;;  %v4674_v53 = vld [vmem:[%s19836_s6 + $0x388] sm:$0xf] }
 0x1c1   :  { %v4676_v54 = vld [vmem:[%s19836_s6 + $0x3a4] sm:$0xf]  ;;  %v4678_v55 = vld [vmem:[%s19836_s6 + $0x38c] sm:$0xf]  ;;  %4675 = vst [vmem:[#allocation3 + $0x390] sm:$0xf] %v4674_v53 }
 0x1c2   :  { %4677 = vst [vmem:[#allocation3 + $0x394] sm:$0xf] %v4676_v54  ;;  %4679 = vst [vmem:[#allocation3 + $0x398] sm:$0xf] %v4678_v55  ;;  %v4680_v56 = vld [vmem:[%s19836_s6 + $0x3a8] sm:$0xf] }
 0x1c3   :  { %v4682_v57 = vld [vmem:[%s19836_s6 + $0x390] sm:$0xf]  ;;  %v4684_v58 = vld [vmem:[%s19836_s6 + $0x3ac] sm:$0xf]  ;;  %4681 = vst [vmem:[#allocation3 + $0x39c] sm:$0xf] %v4680_v56 }
 0x1c4   :  { %4683 = vst [vmem:[#allocation3 + $0x3a0] sm:$0xf] %v4682_v57  ;;  %4685 = vst [vmem:[#allocation3 + $0x3a4] sm:$0xf] %v4684_v58  ;;  %v4686_v59 = vld [vmem:[%s19836_s6 + $0x394] sm:$0xf] }
 0x1c5   :  { %v4688_v60 = vld [vmem:[%s19836_s6 + $0x3b0] sm:$0xf]  ;;  %v4690_v61 = vld [vmem:[%s19836_s6 + $0x398] sm:$0xf]  ;;  %4687 = vst [vmem:[#allocation3 + $0x3a8] sm:$0xf] %v4686_v59 }
 0x1c6   :  { %4689 = vst [vmem:[#allocation3 + $0x3ac] sm:$0xf] %v4688_v60  ;;  %4691 = vst [vmem:[#allocation3 + $0x3b0] sm:$0xf] %v4690_v61  ;;  %v4696_v63 = vld [vmem:[%s19836_s6 + $0x3d4] sm:$0xf] }
 0x1c7   :  { %v4698_v0 = vld [vmem:[%s19836_s6 + $0x3bc] sm:$0xf]  ;;  %4693 = vst [vmem:[#allocation3 + $0x3b4] sm:$0xff] %v4692_v62   ;;  %4697 = vst [vmem:[#allocation3 + $0x3bc] sm:$0xf] %v4696_v63  ;;  %v4748_v24 = vld [vmem:[%s19836_s6 + $0x424] sm:$0xff]  }
 0x1c8   :  { %4699 = vst [vmem:[#allocation3 + $0x3c0] sm:$0xf] %v4698_v0  ;;  %v4700_v1 = vld [vmem:[%s19836_s6 + $0x3d8] sm:$0xf]  ;;  %v4702_v2 = vld [vmem:[%s19836_s6 + $0x3c0] sm:$0xf] }
 0x1c9   :  { %v4704_v3 = vld [vmem:[%s19836_s6 + $0x3dc] sm:$0xf]  ;;  %4701 = vst [vmem:[#allocation3 + $0x3c4] sm:$0xf] %v4700_v1  ;;  %4703 = vst [vmem:[#allocation3 + $0x3c8] sm:$0xf] %v4702_v2 }
 0x1ca   :  { %4705 = vst [vmem:[#allocation3 + $0x3cc] sm:$0xf] %v4704_v3  ;;  %v4706_v4 = vld [vmem:[%s19836_s6 + $0x3c4] sm:$0xf]  ;;  %v4708_v5 = vld [vmem:[%s19836_s6 + $0x3e0] sm:$0xf] }
 0x1cb   :  { %v4710_v6 = vld [vmem:[%s19836_s6 + $0x3c8] sm:$0xf]  ;;  %4707 = vst [vmem:[#allocation3 + $0x3d0] sm:$0xf] %v4706_v4  ;;  %4709 = vst [vmem:[#allocation3 + $0x3d4] sm:$0xf] %v4708_v5 }
 0x1cc   :  { %4711 = vst [vmem:[#allocation3 + $0x3d8] sm:$0xf] %v4710_v6  ;;  %v4712_v7 = vld [vmem:[%s19836_s6 + $0x3e4] sm:$0xf]  ;;  %v4714_v8 = vld [vmem:[%s19836_s6 + $0x3cc] sm:$0xf] }
 0x1cd   :  { %v4716_v9 = vld [vmem:[%s19836_s6 + $0x3e8] sm:$0xf]  ;;  %4713 = vst [vmem:[#allocation3 + $0x3dc] sm:$0xf] %v4712_v7  ;;  %4715 = vst [vmem:[#allocation3 + $0x3e0] sm:$0xf] %v4714_v8 }
 0x1ce   :  { %4717 = vst [vmem:[#allocation3 + $0x3e4] sm:$0xf] %v4716_v9  ;;  %v4718_v10 = vld [vmem:[%s19836_s6 + $0x3d0] sm:$0xf]  ;;  %v4724_v12 = vld [vmem:[%s19836_s6 + $0x40c] sm:$0xf] }
 0x1cf   :  { %4719 = vst [vmem:[#allocation3 + $0x3e8] sm:$0xf] %v4718_v10  ;;  %4721 = vst [vmem:[#allocation3 + $0x3ec] sm:$0xff] %v4720_v11   ;;  %v4726_v13 = vld [vmem:[%s19836_s6 + $0x3f4] sm:$0xf]  ;;  %v4776_v37 = vld [vmem:[%s19836_s6 + $0x45c] sm:$0xff]  }
 0x1d0   :  { %4725 = vst [vmem:[#allocation3 + $0x3f4] sm:$0xf] %v4724_v12  ;;  %v4728_v14 = vld [vmem:[%s19836_s6 + $0x410] sm:$0xf]  ;;  %v4730_v15 = vld [vmem:[%s19836_s6 + $0x3f8] sm:$0xf] }
 0x1d1   :  { %4727 = vst [vmem:[#allocation3 + $0x3f8] sm:$0xf] %v4726_v13  ;;  %4729 = vst [vmem:[#allocation3 + $0x3fc] sm:$0xf] %v4728_v14  ;;  %v4732_v16 = vld [vmem:[%s19836_s6 + $0x414] sm:$0xf] }
 0x1d2   :  { %4731 = vst [vmem:[#allocation3 + $0x400] sm:$0xf] %v4730_v15  ;;  %v4734_v17 = vld [vmem:[%s19836_s6 + $0x3fc] sm:$0xf]  ;;  %v4736_v18 = vld [vmem:[%s19836_s6 + $0x418] sm:$0xf] }
 0x1d3   :  { %4733 = vst [vmem:[#allocation3 + $0x404] sm:$0xf] %v4732_v16  ;;  %4735 = vst [vmem:[#allocation3 + $0x408] sm:$0xf] %v4734_v17  ;;  %v4738_v19 = vld [vmem:[%s19836_s6 + $0x400] sm:$0xf] }
 0x1d4   :  { %4737 = vst [vmem:[#allocation3 + $0x40c] sm:$0xf] %v4736_v18  ;;  %v4740_v20 = vld [vmem:[%s19836_s6 + $0x41c] sm:$0xf]  ;;  %v4742_v21 = vld [vmem:[%s19836_s6 + $0x404] sm:$0xf] }
 0x1d5   :  { %4739 = vst [vmem:[#allocation3 + $0x410] sm:$0xf] %v4738_v19  ;;  %4741 = vst [vmem:[#allocation3 + $0x414] sm:$0xf] %v4740_v20  ;;  %v4744_v22 = vld [vmem:[%s19836_s6 + $0x420] sm:$0xf] }
 0x1d6   :  { %4743 = vst [vmem:[#allocation3 + $0x418] sm:$0xf] %v4742_v21  ;;  %v4746_v23 = vld [vmem:[%s19836_s6 + $0x408] sm:$0xf]  ;;  %4745 = vst [vmem:[#allocation3 + $0x41c] sm:$0xf] %v4744_v22 }
 0x1d7   :  { %4747 = vst [vmem:[#allocation3 + $0x420] sm:$0xf] %v4746_v23  ;;  %4749 = vst [vmem:[#allocation3 + $0x424] sm:$0xff] %v4748_v24   ;;  %v4752_v25 = vld [vmem:[%s19836_s6 + $0x444] sm:$0xf]  ;;  %v4804_v50 = vld [vmem:[%s19836_s6 + $0x494] sm:$0xff]  }
 0x1d8   :  { %v4754_v26 = vld [vmem:[%s19836_s6 + $0x42c] sm:$0xf]  ;;  %v4756_v27 = vld [vmem:[%s19836_s6 + $0x448] sm:$0xf]  ;;  %4753 = vst [vmem:[#allocation3 + $0x42c] sm:$0xf] %v4752_v25 }
 0x1d9   :  { %4755 = vst [vmem:[#allocation3 + $0x430] sm:$0xf] %v4754_v26  ;;  %4757 = vst [vmem:[#allocation3 + $0x434] sm:$0xf] %v4756_v27  ;;  %v4758_v28 = vld [vmem:[%s19836_s6 + $0x430] sm:$0xf] }
 0x1da   :  { %v4760_v29 = vld [vmem:[%s19836_s6 + $0x44c] sm:$0xf]  ;;  %v4762_v30 = vld [vmem:[%s19836_s6 + $0x434] sm:$0xf]  ;;  %4759 = vst [vmem:[#allocation3 + $0x438] sm:$0xf] %v4758_v28 }
 0x1db   :  { %4761 = vst [vmem:[#allocation3 + $0x43c] sm:$0xf] %v4760_v29  ;;  %4763 = vst [vmem:[#allocation3 + $0x440] sm:$0xf] %v4762_v30  ;;  %v4764_v31 = vld [vmem:[%s19836_s6 + $0x450] sm:$0xf] }
 0x1dc   :  { %v4766_v32 = vld [vmem:[%s19836_s6 + $0x438] sm:$0xf]  ;;  %v4768_v33 = vld [vmem:[%s19836_s6 + $0x454] sm:$0xf]  ;;  %4765 = vst [vmem:[#allocation3 + $0x444] sm:$0xf] %v4764_v31 }
 0x1dd   :  { %4767 = vst [vmem:[#allocation3 + $0x448] sm:$0xf] %v4766_v32  ;;  %4769 = vst [vmem:[#allocation3 + $0x44c] sm:$0xf] %v4768_v33  ;;  %v4770_v34 = vld [vmem:[%s19836_s6 + $0x43c] sm:$0xf] }
 0x1de   :  { %v4772_v35 = vld [vmem:[%s19836_s6 + $0x458] sm:$0xf]  ;;  %v4774_v36 = vld [vmem:[%s19836_s6 + $0x440] sm:$0xf]  ;;  %4771 = vst [vmem:[#allocation3 + $0x450] sm:$0xf] %v4770_v34 }
 0x1df   :  { %4773 = vst [vmem:[#allocation3 + $0x454] sm:$0xf] %v4772_v35  ;;  %4775 = vst [vmem:[#allocation3 + $0x458] sm:$0xf] %v4774_v36  ;;  %v4780_v38 = vld [vmem:[%s19836_s6 + $0x47c] sm:$0xf] }
 0x1e0   :  { %v4782_v39 = vld [vmem:[%s19836_s6 + $0x464] sm:$0xf]  ;;  %4777 = vst [vmem:[#allocation3 + $0x45c] sm:$0xff] %v4776_v37   ;;  %4781 = vst [vmem:[#allocation3 + $0x464] sm:$0xf] %v4780_v38  ;;  %v4832_v63 = vld [vmem:[%s19836_s6 + $0x4cc] sm:$0xff]  }
 0x1e1   :  { %4783 = vst [vmem:[#allocation3 + $0x468] sm:$0xf] %v4782_v39  ;;  %v4784_v40 = vld [vmem:[%s19836_s6 + $0x480] sm:$0xf]  ;;  %v4786_v41 = vld [vmem:[%s19836_s6 + $0x468] sm:$0xf] }
 0x1e2   :  { %v4788_v42 = vld [vmem:[%s19836_s6 + $0x484] sm:$0xf]  ;;  %4785 = vst [vmem:[#allocation3 + $0x46c] sm:$0xf] %v4784_v40  ;;  %4787 = vst [vmem:[#allocation3 + $0x470] sm:$0xf] %v4786_v41 }
 0x1e3   :  { %4789 = vst [vmem:[#allocation3 + $0x474] sm:$0xf] %v4788_v42  ;;  %v4790_v43 = vld [vmem:[%s19836_s6 + $0x46c] sm:$0xf]  ;;  %v4792_v44 = vld [vmem:[%s19836_s6 + $0x488] sm:$0xf] }
 0x1e4   :  { %v4794_v45 = vld [vmem:[%s19836_s6 + $0x470] sm:$0xf]  ;;  %4791 = vst [vmem:[#allocation3 + $0x478] sm:$0xf] %v4790_v43  ;;  %4793 = vst [vmem:[#allocation3 + $0x47c] sm:$0xf] %v4792_v44 }
 0x1e5   :  { %4795 = vst [vmem:[#allocation3 + $0x480] sm:$0xf] %v4794_v45  ;;  %v4796_v46 = vld [vmem:[%s19836_s6 + $0x48c] sm:$0xf]  ;;  %v4798_v47 = vld [vmem:[%s19836_s6 + $0x474] sm:$0xf] }
 0x1e6   :  { %v4800_v48 = vld [vmem:[%s19836_s6 + $0x490] sm:$0xf]  ;;  %4797 = vst [vmem:[#allocation3 + $0x484] sm:$0xf] %v4796_v46  ;;  %4799 = vst [vmem:[#allocation3 + $0x488] sm:$0xf] %v4798_v47 }
 0x1e7   :  { %4801 = vst [vmem:[#allocation3 + $0x48c] sm:$0xf] %v4800_v48  ;;  %v4802_v49 = vld [vmem:[%s19836_s6 + $0x478] sm:$0xf]  ;;  %v4808_v51 = vld [vmem:[%s19836_s6 + $0x4b4] sm:$0xf] }
 0x1e8   :  { %4803 = vst [vmem:[#allocation3 + $0x490] sm:$0xf] %v4802_v49  ;;  %4805 = vst [vmem:[#allocation3 + $0x494] sm:$0xff] %v4804_v50   ;;  %v4810_v52 = vld [vmem:[%s19836_s6 + $0x49c] sm:$0xf]  ;;  %v4860_v12 = vld [vmem:[%s19836_s6 + $0x504] sm:$0xff]  }
 0x1e9   :  { %4809 = vst [vmem:[#allocation3 + $0x49c] sm:$0xf] %v4808_v51  ;;  %v4812_v53 = vld [vmem:[%s19836_s6 + $0x4b8] sm:$0xf]  ;;  %v4814_v54 = vld [vmem:[%s19836_s6 + $0x4a0] sm:$0xf] }
 0x1ea   :  { %4811 = vst [vmem:[#allocation3 + $0x4a0] sm:$0xf] %v4810_v52  ;;  %4813 = vst [vmem:[#allocation3 + $0x4a4] sm:$0xf] %v4812_v53  ;;  %v4816_v55 = vld [vmem:[%s19836_s6 + $0x4bc] sm:$0xf] }
 0x1eb   :  { %4815 = vst [vmem:[#allocation3 + $0x4a8] sm:$0xf] %v4814_v54  ;;  %v4818_v56 = vld [vmem:[%s19836_s6 + $0x4a4] sm:$0xf]  ;;  %v4820_v57 = vld [vmem:[%s19836_s6 + $0x4c0] sm:$0xf] }
 0x1ec   :  { %4817 = vst [vmem:[#allocation3 + $0x4ac] sm:$0xf] %v4816_v55  ;;  %4819 = vst [vmem:[#allocation3 + $0x4b0] sm:$0xf] %v4818_v56  ;;  %v4822_v58 = vld [vmem:[%s19836_s6 + $0x4a8] sm:$0xf] }
 0x1ed   :  { %4821 = vst [vmem:[#allocation3 + $0x4b4] sm:$0xf] %v4820_v57  ;;  %v4824_v59 = vld [vmem:[%s19836_s6 + $0x4c4] sm:$0xf]  ;;  %v4826_v60 = vld [vmem:[%s19836_s6 + $0x4ac] sm:$0xf] }
 0x1ee   :  { %4823 = vst [vmem:[#allocation3 + $0x4b8] sm:$0xf] %v4822_v58  ;;  %4825 = vst [vmem:[#allocation3 + $0x4bc] sm:$0xf] %v4824_v59  ;;  %v4828_v61 = vld [vmem:[%s19836_s6 + $0x4c8] sm:$0xf] }
 0x1ef   :  { %4827 = vst [vmem:[#allocation3 + $0x4c0] sm:$0xf] %v4826_v60  ;;  %v4830_v62 = vld [vmem:[%s19836_s6 + $0x4b0] sm:$0xf]  ;;  %4829 = vst [vmem:[#allocation3 + $0x4c4] sm:$0xf] %v4828_v61 }
 0x1f0   :  { %4831 = vst [vmem:[#allocation3 + $0x4c8] sm:$0xf] %v4830_v62  ;;  %4833 = vst [vmem:[#allocation3 + $0x4cc] sm:$0xff] %v4832_v63   ;;  %v4836_v0 = vld [vmem:[%s19836_s6 + $0x4ec] sm:$0xf]  ;;  %v4888_v25 = vld [vmem:[%s19836_s6 + $0x53c] sm:$0xff]  }
 0x1f1   :  { %v4838_v1 = vld [vmem:[%s19836_s6 + $0x4d4] sm:$0xf]  ;;  %v4840_v2 = vld [vmem:[%s19836_s6 + $0x4f0] sm:$0xf]  ;;  %4837 = vst [vmem:[#allocation3 + $0x4d4] sm:$0xf] %v4836_v0 }
 0x1f2   :  { %4839 = vst [vmem:[#allocation3 + $0x4d8] sm:$0xf] %v4838_v1  ;;  %4841 = vst [vmem:[#allocation3 + $0x4dc] sm:$0xf] %v4840_v2  ;;  %v4842_v3 = vld [vmem:[%s19836_s6 + $0x4d8] sm:$0xf] }
 0x1f3   :  { %v4844_v4 = vld [vmem:[%s19836_s6 + $0x4f4] sm:$0xf]  ;;  %v4846_v5 = vld [vmem:[%s19836_s6 + $0x4dc] sm:$0xf]  ;;  %4843 = vst [vmem:[#allocation3 + $0x4e0] sm:$0xf] %v4842_v3 }
 0x1f4   :  { %4845 = vst [vmem:[#allocation3 + $0x4e4] sm:$0xf] %v4844_v4  ;;  %4847 = vst [vmem:[#allocation3 + $0x4e8] sm:$0xf] %v4846_v5  ;;  %v4848_v6 = vld [vmem:[%s19836_s6 + $0x4f8] sm:$0xf] }
 0x1f5   :  { %v4850_v7 = vld [vmem:[%s19836_s6 + $0x4e0] sm:$0xf]  ;;  %v4852_v8 = vld [vmem:[%s19836_s6 + $0x4fc] sm:$0xf]  ;;  %4849 = vst [vmem:[#allocation3 + $0x4ec] sm:$0xf] %v4848_v6 }
 0x1f6   :  { %4851 = vst [vmem:[#allocation3 + $0x4f0] sm:$0xf] %v4850_v7  ;;  %4853 = vst [vmem:[#allocation3 + $0x4f4] sm:$0xf] %v4852_v8  ;;  %v4854_v9 = vld [vmem:[%s19836_s6 + $0x4e4] sm:$0xf] }
 0x1f7   :  { %v4856_v10 = vld [vmem:[%s19836_s6 + $0x500] sm:$0xf]  ;;  %v4858_v11 = vld [vmem:[%s19836_s6 + $0x4e8] sm:$0xf]  ;;  %4855 = vst [vmem:[#allocation3 + $0x4f8] sm:$0xf] %v4854_v9 }
 0x1f8   :  { %4857 = vst [vmem:[#allocation3 + $0x4fc] sm:$0xf] %v4856_v10  ;;  %4859 = vst [vmem:[#allocation3 + $0x500] sm:$0xf] %v4858_v11  ;;  %v4864_v13 = vld [vmem:[%s19836_s6 + $0x524] sm:$0xf] }
 0x1f9   :  { %v4866_v14 = vld [vmem:[%s19836_s6 + $0x50c] sm:$0xf]  ;;  %4861 = vst [vmem:[#allocation3 + $0x504] sm:$0xff] %v4860_v12   ;;  %4865 = vst [vmem:[#allocation3 + $0x50c] sm:$0xf] %v4864_v13  ;;  %v4916_v38 = vld [vmem:[%s19836_s6 + $0x574] sm:$0xff]  }
 0x1fa   :  { %4867 = vst [vmem:[#allocation3 + $0x510] sm:$0xf] %v4866_v14  ;;  %v4868_v15 = vld [vmem:[%s19836_s6 + $0x528] sm:$0xf]  ;;  %v4870_v16 = vld [vmem:[%s19836_s6 + $0x510] sm:$0xf] }
 0x1fb   :  { %v4872_v17 = vld [vmem:[%s19836_s6 + $0x52c] sm:$0xf]  ;;  %4869 = vst [vmem:[#allocation3 + $0x514] sm:$0xf] %v4868_v15  ;;  %4871 = vst [vmem:[#allocation3 + $0x518] sm:$0xf] %v4870_v16 }
 0x1fc   :  { %4873 = vst [vmem:[#allocation3 + $0x51c] sm:$0xf] %v4872_v17  ;;  %v4874_v18 = vld [vmem:[%s19836_s6 + $0x514] sm:$0xf]  ;;  %v4876_v19 = vld [vmem:[%s19836_s6 + $0x530] sm:$0xf] }
 0x1fd   :  { %v4878_v20 = vld [vmem:[%s19836_s6 + $0x518] sm:$0xf]  ;;  %4875 = vst [vmem:[#allocation3 + $0x520] sm:$0xf] %v4874_v18  ;;  %4877 = vst [vmem:[#allocation3 + $0x524] sm:$0xf] %v4876_v19 }
 0x1fe   :  { %4879 = vst [vmem:[#allocation3 + $0x528] sm:$0xf] %v4878_v20  ;;  %v4880_v21 = vld [vmem:[%s19836_s6 + $0x534] sm:$0xf]  ;;  %v4882_v22 = vld [vmem:[%s19836_s6 + $0x51c] sm:$0xf] }
 0x1ff   :  { %v4884_v23 = vld [vmem:[%s19836_s6 + $0x538] sm:$0xf]  ;;  %4881 = vst [vmem:[#allocation3 + $0x52c] sm:$0xf] %v4880_v21  ;;  %4883 = vst [vmem:[#allocation3 + $0x530] sm:$0xf] %v4882_v22 }
 0x200   :  { %4885 = vst [vmem:[#allocation3 + $0x534] sm:$0xf] %v4884_v23  ;;  %v4886_v24 = vld [vmem:[%s19836_s6 + $0x520] sm:$0xf]  ;;  %v4892_v26 = vld [vmem:[%s19836_s6 + $0x55c] sm:$0xf] }
 0x201   :  { %4887 = vst [vmem:[#allocation3 + $0x538] sm:$0xf] %v4886_v24  ;;  %4889 = vst [vmem:[#allocation3 + $0x53c] sm:$0xff] %v4888_v25   ;;  %v4894_v27 = vld [vmem:[%s19836_s6 + $0x544] sm:$0xf]  ;;  %v4944_v51 = vld [vmem:[%s19836_s6 + $0x5ac] sm:$0xff]  }
 0x202   :  { %4893 = vst [vmem:[#allocation3 + $0x544] sm:$0xf] %v4892_v26  ;;  %v4896_v28 = vld [vmem:[%s19836_s6 + $0x560] sm:$0xf]  ;;  %v4898_v29 = vld [vmem:[%s19836_s6 + $0x548] sm:$0xf] }
 0x203   :  { %4895 = vst [vmem:[#allocation3 + $0x548] sm:$0xf] %v4894_v27  ;;  %4897 = vst [vmem:[#allocation3 + $0x54c] sm:$0xf] %v4896_v28  ;;  %v4900_v30 = vld [vmem:[%s19836_s6 + $0x564] sm:$0xf] }
 0x204   :  { %4899 = vst [vmem:[#allocation3 + $0x550] sm:$0xf] %v4898_v29  ;;  %v4902_v31 = vld [vmem:[%s19836_s6 + $0x54c] sm:$0xf]  ;;  %v4904_v32 = vld [vmem:[%s19836_s6 + $0x568] sm:$0xf] }
 0x205   :  { %4901 = vst [vmem:[#allocation3 + $0x554] sm:$0xf] %v4900_v30  ;;  %4903 = vst [vmem:[#allocation3 + $0x558] sm:$0xf] %v4902_v31  ;;  %v4906_v33 = vld [vmem:[%s19836_s6 + $0x550] sm:$0xf] }
 0x206   :  { %4905 = vst [vmem:[#allocation3 + $0x55c] sm:$0xf] %v4904_v32  ;;  %v4908_v34 = vld [vmem:[%s19836_s6 + $0x56c] sm:$0xf]  ;;  %v4910_v35 = vld [vmem:[%s19836_s6 + $0x554] sm:$0xf] }
 0x207   :  { %4907 = vst [vmem:[#allocation3 + $0x560] sm:$0xf] %v4906_v33  ;;  %4909 = vst [vmem:[#allocation3 + $0x564] sm:$0xf] %v4908_v34  ;;  %v4912_v36 = vld [vmem:[%s19836_s6 + $0x570] sm:$0xf] }
 0x208   :  { %4911 = vst [vmem:[#allocation3 + $0x568] sm:$0xf] %v4910_v35  ;;  %v4914_v37 = vld [vmem:[%s19836_s6 + $0x558] sm:$0xf]  ;;  %4913 = vst [vmem:[#allocation3 + $0x56c] sm:$0xf] %v4912_v36 }
 0x209   :  { %4915 = vst [vmem:[#allocation3 + $0x570] sm:$0xf] %v4914_v37  ;;  %4917 = vst [vmem:[#allocation3 + $0x574] sm:$0xff] %v4916_v38   ;;  %v4920_v39 = vld [vmem:[%s19836_s6 + $0x594] sm:$0xf]  ;;  %v4972_v0 = vld [vmem:[%s19836_s6 + $0x5e4] sm:$0xff]  }
 0x20a   :  { %v4922_v40 = vld [vmem:[%s19836_s6 + $0x57c] sm:$0xf]  ;;  %v4924_v41 = vld [vmem:[%s19836_s6 + $0x598] sm:$0xf]  ;;  %4921 = vst [vmem:[#allocation3 + $0x57c] sm:$0xf] %v4920_v39 }
 0x20b   :  { %4923 = vst [vmem:[#allocation3 + $0x580] sm:$0xf] %v4922_v40  ;;  %4925 = vst [vmem:[#allocation3 + $0x584] sm:$0xf] %v4924_v41  ;;  %v4926_v42 = vld [vmem:[%s19836_s6 + $0x580] sm:$0xf] }
 0x20c   :  { %v4928_v43 = vld [vmem:[%s19836_s6 + $0x59c] sm:$0xf]  ;;  %v4930_v44 = vld [vmem:[%s19836_s6 + $0x584] sm:$0xf]  ;;  %4927 = vst [vmem:[#allocation3 + $0x588] sm:$0xf] %v4926_v42 }
 0x20d   :  { %4929 = vst [vmem:[#allocation3 + $0x58c] sm:$0xf] %v4928_v43  ;;  %4931 = vst [vmem:[#allocation3 + $0x590] sm:$0xf] %v4930_v44  ;;  %v4932_v45 = vld [vmem:[%s19836_s6 + $0x5a0] sm:$0xf] }
 0x20e   :  { %v4934_v46 = vld [vmem:[%s19836_s6 + $0x588] sm:$0xf]  ;;  %v4936_v47 = vld [vmem:[%s19836_s6 + $0x5a4] sm:$0xf]  ;;  %4933 = vst [vmem:[#allocation3 + $0x594] sm:$0xf] %v4932_v45 }
 0x20f   :  { %4935 = vst [vmem:[#allocation3 + $0x598] sm:$0xf] %v4934_v46  ;;  %4937 = vst [vmem:[#allocation3 + $0x59c] sm:$0xf] %v4936_v47  ;;  %v4938_v48 = vld [vmem:[%s19836_s6 + $0x58c] sm:$0xf] }
 0x210   :  { %v4940_v49 = vld [vmem:[%s19836_s6 + $0x5a8] sm:$0xf]  ;;  %v4942_v50 = vld [vmem:[%s19836_s6 + $0x590] sm:$0xf]  ;;  %4939 = vst [vmem:[#allocation3 + $0x5a0] sm:$0xf] %v4938_v48 }
 0x211   :  { %4941 = vst [vmem:[#allocation3 + $0x5a4] sm:$0xf] %v4940_v49  ;;  %4943 = vst [vmem:[#allocation3 + $0x5a8] sm:$0xf] %v4942_v50  ;;  %v4948_v52 = vld [vmem:[%s19836_s6 + $0x5cc] sm:$0xf] }
 0x212   :  { %v4950_v53 = vld [vmem:[%s19836_s6 + $0x5b4] sm:$0xf]  ;;  %4945 = vst [vmem:[#allocation3 + $0x5ac] sm:$0xff] %v4944_v51   ;;  %4949 = vst [vmem:[#allocation3 + $0x5b4] sm:$0xf] %v4948_v52  ;;  %v5000_v13 = vld [vmem:[%s19836_s6 + $0x61c] sm:$0xff]  }
 0x213   :  { %4951 = vst [vmem:[#allocation3 + $0x5b8] sm:$0xf] %v4950_v53  ;;  %v4952_v54 = vld [vmem:[%s19836_s6 + $0x5d0] sm:$0xf]  ;;  %v4954_v55 = vld [vmem:[%s19836_s6 + $0x5b8] sm:$0xf] }
 0x214   :  { %v4956_v56 = vld [vmem:[%s19836_s6 + $0x5d4] sm:$0xf]  ;;  %4953 = vst [vmem:[#allocation3 + $0x5bc] sm:$0xf] %v4952_v54  ;;  %4955 = vst [vmem:[#allocation3 + $0x5c0] sm:$0xf] %v4954_v55 }
 0x215   :  { %4957 = vst [vmem:[#allocation3 + $0x5c4] sm:$0xf] %v4956_v56  ;;  %v4958_v57 = vld [vmem:[%s19836_s6 + $0x5bc] sm:$0xf]  ;;  %v4960_v58 = vld [vmem:[%s19836_s6 + $0x5d8] sm:$0xf] }
 0x216   :  { %v4962_v59 = vld [vmem:[%s19836_s6 + $0x5c0] sm:$0xf]  ;;  %4959 = vst [vmem:[#allocation3 + $0x5c8] sm:$0xf] %v4958_v57  ;;  %4961 = vst [vmem:[#allocation3 + $0x5cc] sm:$0xf] %v4960_v58 }
 0x217   :  { %4963 = vst [vmem:[#allocation3 + $0x5d0] sm:$0xf] %v4962_v59  ;;  %v4964_v60 = vld [vmem:[%s19836_s6 + $0x5dc] sm:$0xf]  ;;  %v4966_v61 = vld [vmem:[%s19836_s6 + $0x5c4] sm:$0xf] }
 0x218   :  { %v4968_v62 = vld [vmem:[%s19836_s6 + $0x5e0] sm:$0xf]  ;;  %4965 = vst [vmem:[#allocation3 + $0x5d4] sm:$0xf] %v4964_v60  ;;  %4967 = vst [vmem:[#allocation3 + $0x5d8] sm:$0xf] %v4966_v61 }
 0x219   :  { %4969 = vst [vmem:[#allocation3 + $0x5dc] sm:$0xf] %v4968_v62  ;;  %v4970_v63 = vld [vmem:[%s19836_s6 + $0x5c8] sm:$0xf]  ;;  %v4976_v1 = vld [vmem:[%s19836_s6 + $0x604] sm:$0xf] }
 0x21a   :  { %4971 = vst [vmem:[#allocation3 + $0x5e0] sm:$0xf] %v4970_v63  ;;  %4973 = vst [vmem:[#allocation3 + $0x5e4] sm:$0xff] %v4972_v0   ;;  %v4978_v2 = vld [vmem:[%s19836_s6 + $0x5ec] sm:$0xf]  ;;  %v5028_v26 = vld [vmem:[%s19836_s6 + $0x654] sm:$0xff]  }
 0x21b   :  { %4977 = vst [vmem:[#allocation3 + $0x5ec] sm:$0xf] %v4976_v1  ;;  %v4980_v3 = vld [vmem:[%s19836_s6 + $0x608] sm:$0xf]  ;;  %v4982_v4 = vld [vmem:[%s19836_s6 + $0x5f0] sm:$0xf] }
 0x21c   :  { %4979 = vst [vmem:[#allocation3 + $0x5f0] sm:$0xf] %v4978_v2  ;;  %4981 = vst [vmem:[#allocation3 + $0x5f4] sm:$0xf] %v4980_v3  ;;  %v4984_v5 = vld [vmem:[%s19836_s6 + $0x60c] sm:$0xf] }
 0x21d   :  { %4983 = vst [vmem:[#allocation3 + $0x5f8] sm:$0xf] %v4982_v4  ;;  %v4986_v6 = vld [vmem:[%s19836_s6 + $0x5f4] sm:$0xf]  ;;  %v4988_v7 = vld [vmem:[%s19836_s6 + $0x610] sm:$0xf] }
 0x21e   :  { %4985 = vst [vmem:[#allocation3 + $0x5fc] sm:$0xf] %v4984_v5  ;;  %4987 = vst [vmem:[#allocation3 + $0x600] sm:$0xf] %v4986_v6  ;;  %v4990_v8 = vld [vmem:[%s19836_s6 + $0x5f8] sm:$0xf] }
 0x21f   :  { %4989 = vst [vmem:[#allocation3 + $0x604] sm:$0xf] %v4988_v7  ;;  %v4992_v9 = vld [vmem:[%s19836_s6 + $0x614] sm:$0xf]  ;;  %v4994_v10 = vld [vmem:[%s19836_s6 + $0x5fc] sm:$0xf] }
 0x220   :  { %4991 = vst [vmem:[#allocation3 + $0x608] sm:$0xf] %v4990_v8  ;;  %4993 = vst [vmem:[#allocation3 + $0x60c] sm:$0xf] %v4992_v9  ;;  %v4996_v11 = vld [vmem:[%s19836_s6 + $0x618] sm:$0xf] }
 0x221   :  { %4995 = vst [vmem:[#allocation3 + $0x610] sm:$0xf] %v4994_v10  ;;  %v4998_v12 = vld [vmem:[%s19836_s6 + $0x600] sm:$0xf]  ;;  %4997 = vst [vmem:[#allocation3 + $0x614] sm:$0xf] %v4996_v11 }
 0x222   :  { %4999 = vst [vmem:[#allocation3 + $0x618] sm:$0xf] %v4998_v12  ;;  %5001 = vst [vmem:[#allocation3 + $0x61c] sm:$0xff] %v5000_v13   ;;  %v5004_v14 = vld [vmem:[%s19836_s6 + $0x63c] sm:$0xf]  ;;  %v5056_v39 = vld [vmem:[%s19836_s6 + $0x68c] sm:$0xff]  }
 0x223   :  { %v5006_v15 = vld [vmem:[%s19836_s6 + $0x624] sm:$0xf]  ;;  %v5008_v16 = vld [vmem:[%s19836_s6 + $0x640] sm:$0xf]  ;;  %5005 = vst [vmem:[#allocation3 + $0x624] sm:$0xf] %v5004_v14 }
 0x224   :  { %5007 = vst [vmem:[#allocation3 + $0x628] sm:$0xf] %v5006_v15  ;;  %5009 = vst [vmem:[#allocation3 + $0x62c] sm:$0xf] %v5008_v16  ;;  %v5010_v17 = vld [vmem:[%s19836_s6 + $0x628] sm:$0xf] }
 0x225   :  { %v5012_v18 = vld [vmem:[%s19836_s6 + $0x644] sm:$0xf]  ;;  %v5014_v19 = vld [vmem:[%s19836_s6 + $0x62c] sm:$0xf]  ;;  %5011 = vst [vmem:[#allocation3 + $0x630] sm:$0xf] %v5010_v17 }
 0x226   :  { %5013 = vst [vmem:[#allocation3 + $0x634] sm:$0xf] %v5012_v18  ;;  %5015 = vst [vmem:[#allocation3 + $0x638] sm:$0xf] %v5014_v19  ;;  %v5016_v20 = vld [vmem:[%s19836_s6 + $0x648] sm:$0xf] }
 0x227   :  { %v5018_v21 = vld [vmem:[%s19836_s6 + $0x630] sm:$0xf]  ;;  %v5020_v22 = vld [vmem:[%s19836_s6 + $0x64c] sm:$0xf]  ;;  %5017 = vst [vmem:[#allocation3 + $0x63c] sm:$0xf] %v5016_v20 }
 0x228   :  { %5019 = vst [vmem:[#allocation3 + $0x640] sm:$0xf] %v5018_v21  ;;  %5021 = vst [vmem:[#allocation3 + $0x644] sm:$0xf] %v5020_v22  ;;  %v5022_v23 = vld [vmem:[%s19836_s6 + $0x634] sm:$0xf] }
 0x229   :  { %v5024_v24 = vld [vmem:[%s19836_s6 + $0x650] sm:$0xf]  ;;  %v5026_v25 = vld [vmem:[%s19836_s6 + $0x638] sm:$0xf]  ;;  %5023 = vst [vmem:[#allocation3 + $0x648] sm:$0xf] %v5022_v23 }
 0x22a   :  { %5025 = vst [vmem:[#allocation3 + $0x64c] sm:$0xf] %v5024_v24  ;;  %5027 = vst [vmem:[#allocation3 + $0x650] sm:$0xf] %v5026_v25  ;;  %v5032_v27 = vld [vmem:[%s19836_s6 + $0x674] sm:$0xf] }
 0x22b   :  { %v5034_v28 = vld [vmem:[%s19836_s6 + $0x65c] sm:$0xf]  ;;  %5029 = vst [vmem:[#allocation3 + $0x654] sm:$0xff] %v5028_v26   ;;  %5033 = vst [vmem:[#allocation3 + $0x65c] sm:$0xf] %v5032_v27  ;;  %v5084_v52 = vld [vmem:[%s19836_s6 + $0x6c4] sm:$0xff]  }
 0x22c   :  { %5035 = vst [vmem:[#allocation3 + $0x660] sm:$0xf] %v5034_v28  ;;  %v5036_v29 = vld [vmem:[%s19836_s6 + $0x678] sm:$0xf]  ;;  %v5038_v30 = vld [vmem:[%s19836_s6 + $0x660] sm:$0xf] }
 0x22d   :  { %v5040_v31 = vld [vmem:[%s19836_s6 + $0x67c] sm:$0xf]  ;;  %5037 = vst [vmem:[#allocation3 + $0x664] sm:$0xf] %v5036_v29  ;;  %5039 = vst [vmem:[#allocation3 + $0x668] sm:$0xf] %v5038_v30 }
 0x22e   :  { %5041 = vst [vmem:[#allocation3 + $0x66c] sm:$0xf] %v5040_v31  ;;  %v5042_v32 = vld [vmem:[%s19836_s6 + $0x664] sm:$0xf]  ;;  %v5044_v33 = vld [vmem:[%s19836_s6 + $0x680] sm:$0xf] }
 0x22f   :  { %v5046_v34 = vld [vmem:[%s19836_s6 + $0x668] sm:$0xf]  ;;  %5043 = vst [vmem:[#allocation3 + $0x670] sm:$0xf] %v5042_v32  ;;  %5045 = vst [vmem:[#allocation3 + $0x674] sm:$0xf] %v5044_v33 }
 0x230   :  { %5047 = vst [vmem:[#allocation3 + $0x678] sm:$0xf] %v5046_v34  ;;  %v5048_v35 = vld [vmem:[%s19836_s6 + $0x684] sm:$0xf]  ;;  %v5050_v36 = vld [vmem:[%s19836_s6 + $0x66c] sm:$0xf] }
 0x231   :  { %v5052_v37 = vld [vmem:[%s19836_s6 + $0x688] sm:$0xf]  ;;  %5049 = vst [vmem:[#allocation3 + $0x67c] sm:$0xf] %v5048_v35  ;;  %5051 = vst [vmem:[#allocation3 + $0x680] sm:$0xf] %v5050_v36 }
 0x232   :  { %5053 = vst [vmem:[#allocation3 + $0x684] sm:$0xf] %v5052_v37  ;;  %v5054_v38 = vld [vmem:[%s19836_s6 + $0x670] sm:$0xf]  ;;  %v5060_v40 = vld [vmem:[%s19836_s6 + $0x6ac] sm:$0xf] }
 0x233   :  { %5055 = vst [vmem:[#allocation3 + $0x688] sm:$0xf] %v5054_v38  ;;  %5057 = vst [vmem:[#allocation3 + $0x68c] sm:$0xff] %v5056_v39   ;;  %v5062_v41 = vld [vmem:[%s19836_s6 + $0x694] sm:$0xf]  ;;  %v5112_v1 = vld [vmem:[%s19836_s6 + $0x6fc] sm:$0xff]  }
 0x234   :  { %5061 = vst [vmem:[#allocation3 + $0x694] sm:$0xf] %v5060_v40  ;;  %v5064_v42 = vld [vmem:[%s19836_s6 + $0x6b0] sm:$0xf]  ;;  %v5066_v43 = vld [vmem:[%s19836_s6 + $0x698] sm:$0xf] }
 0x235   :  { %5063 = vst [vmem:[#allocation3 + $0x698] sm:$0xf] %v5062_v41  ;;  %5065 = vst [vmem:[#allocation3 + $0x69c] sm:$0xf] %v5064_v42  ;;  %v5068_v44 = vld [vmem:[%s19836_s6 + $0x6b4] sm:$0xf] }
 0x236   :  { %5067 = vst [vmem:[#allocation3 + $0x6a0] sm:$0xf] %v5066_v43  ;;  %v5070_v45 = vld [vmem:[%s19836_s6 + $0x69c] sm:$0xf]  ;;  %v5072_v46 = vld [vmem:[%s19836_s6 + $0x6b8] sm:$0xf] }
 0x237   :  { %5069 = vst [vmem:[#allocation3 + $0x6a4] sm:$0xf] %v5068_v44  ;;  %5071 = vst [vmem:[#allocation3 + $0x6a8] sm:$0xf] %v5070_v45  ;;  %v5074_v47 = vld [vmem:[%s19836_s6 + $0x6a0] sm:$0xf] }
 0x238   :  { %5073 = vst [vmem:[#allocation3 + $0x6ac] sm:$0xf] %v5072_v46  ;;  %v5076_v48 = vld [vmem:[%s19836_s6 + $0x6bc] sm:$0xf]  ;;  %v5078_v49 = vld [vmem:[%s19836_s6 + $0x6a4] sm:$0xf] }
 0x239   :  { %5075 = vst [vmem:[#allocation3 + $0x6b0] sm:$0xf] %v5074_v47  ;;  %5077 = vst [vmem:[#allocation3 + $0x6b4] sm:$0xf] %v5076_v48  ;;  %v5080_v50 = vld [vmem:[%s19836_s6 + $0x6c0] sm:$0xf] }
 0x23a   :  { %5079 = vst [vmem:[#allocation3 + $0x6b8] sm:$0xf] %v5078_v49  ;;  %v5082_v51 = vld [vmem:[%s19836_s6 + $0x6a8] sm:$0xf]  ;;  %5081 = vst [vmem:[#allocation3 + $0x6bc] sm:$0xf] %v5080_v50 }
 0x23b   :  { %5083 = vst [vmem:[#allocation3 + $0x6c0] sm:$0xf] %v5082_v51  ;;  %5085 = vst [vmem:[#allocation3 + $0x6c4] sm:$0xff] %v5084_v52   ;;  %v5088_v53 = vld [vmem:[%s19836_s6 + $0x6e4] sm:$0xf]  ;;  %v5140_v14 = vld [vmem:[%s19836_s6 + $0x734] sm:$0xff]  }
 0x23c   :  { %v5090_v54 = vld [vmem:[%s19836_s6 + $0x6cc] sm:$0xf]  ;;  %v5092_v55 = vld [vmem:[%s19836_s6 + $0x6e8] sm:$0xf]  ;;  %5089 = vst [vmem:[#allocation3 + $0x6cc] sm:$0xf] %v5088_v53 }
 0x23d   :  { %5091 = vst [vmem:[#allocation3 + $0x6d0] sm:$0xf] %v5090_v54  ;;  %5093 = vst [vmem:[#allocation3 + $0x6d4] sm:$0xf] %v5092_v55  ;;  %v5094_v56 = vld [vmem:[%s19836_s6 + $0x6d0] sm:$0xf] }
 0x23e   :  { %v5096_v57 = vld [vmem:[%s19836_s6 + $0x6ec] sm:$0xf]  ;;  %v5098_v58 = vld [vmem:[%s19836_s6 + $0x6d4] sm:$0xf]  ;;  %5095 = vst [vmem:[#allocation3 + $0x6d8] sm:$0xf] %v5094_v56 }
 0x23f   :  { %5097 = vst [vmem:[#allocation3 + $0x6dc] sm:$0xf] %v5096_v57  ;;  %5099 = vst [vmem:[#allocation3 + $0x6e0] sm:$0xf] %v5098_v58  ;;  %v5100_v59 = vld [vmem:[%s19836_s6 + $0x6f0] sm:$0xf] }
 0x240   :  { %v5102_v60 = vld [vmem:[%s19836_s6 + $0x6d8] sm:$0xf]  ;;  %v5104_v61 = vld [vmem:[%s19836_s6 + $0x6f4] sm:$0xf]  ;;  %5101 = vst [vmem:[#allocation3 + $0x6e4] sm:$0xf] %v5100_v59 }
 0x241   :  { %5103 = vst [vmem:[#allocation3 + $0x6e8] sm:$0xf] %v5102_v60  ;;  %5105 = vst [vmem:[#allocation3 + $0x6ec] sm:$0xf] %v5104_v61  ;;  %v5106_v62 = vld [vmem:[%s19836_s6 + $0x6dc] sm:$0xf] }
 0x242   :  { %v5108_v63 = vld [vmem:[%s19836_s6 + $0x6f8] sm:$0xf]  ;;  %v5110_v0 = vld [vmem:[%s19836_s6 + $0x6e0] sm:$0xf]  ;;  %5107 = vst [vmem:[#allocation3 + $0x6f0] sm:$0xf] %v5106_v62 }
 0x243   :  { %5109 = vst [vmem:[#allocation3 + $0x6f4] sm:$0xf] %v5108_v63  ;;  %5111 = vst [vmem:[#allocation3 + $0x6f8] sm:$0xf] %v5110_v0  ;;  %v5116_v2 = vld [vmem:[%s19836_s6 + $0x71c] sm:$0xf] }
 0x244   :  { %v5118_v3 = vld [vmem:[%s19836_s6 + $0x704] sm:$0xf]  ;;  %5113 = vst [vmem:[#allocation3 + $0x6fc] sm:$0xff] %v5112_v1   ;;  %5117 = vst [vmem:[#allocation3 + $0x704] sm:$0xf] %v5116_v2  ;;  %v5168_v27 = vld [vmem:[%s19836_s6 + $0x76c] sm:$0xff]  }
 0x245   :  { %5119 = vst [vmem:[#allocation3 + $0x708] sm:$0xf] %v5118_v3  ;;  %v5120_v4 = vld [vmem:[%s19836_s6 + $0x720] sm:$0xf]  ;;  %v5122_v5 = vld [vmem:[%s19836_s6 + $0x708] sm:$0xf] }
 0x246   :  { %v5124_v6 = vld [vmem:[%s19836_s6 + $0x724] sm:$0xf]  ;;  %5121 = vst [vmem:[#allocation3 + $0x70c] sm:$0xf] %v5120_v4  ;;  %5123 = vst [vmem:[#allocation3 + $0x710] sm:$0xf] %v5122_v5 }
 0x247   :  { %5125 = vst [vmem:[#allocation3 + $0x714] sm:$0xf] %v5124_v6  ;;  %v5126_v7 = vld [vmem:[%s19836_s6 + $0x70c] sm:$0xf]  ;;  %v5128_v8 = vld [vmem:[%s19836_s6 + $0x728] sm:$0xf] }
 0x248   :  { %v5130_v9 = vld [vmem:[%s19836_s6 + $0x710] sm:$0xf]  ;;  %5127 = vst [vmem:[#allocation3 + $0x718] sm:$0xf] %v5126_v7  ;;  %5129 = vst [vmem:[#allocation3 + $0x71c] sm:$0xf] %v5128_v8 }
 0x249   :  { %5131 = vst [vmem:[#allocation3 + $0x720] sm:$0xf] %v5130_v9  ;;  %v5132_v10 = vld [vmem:[%s19836_s6 + $0x72c] sm:$0xf]  ;;  %v5134_v11 = vld [vmem:[%s19836_s6 + $0x714] sm:$0xf] }
 0x24a   :  { %v5136_v12 = vld [vmem:[%s19836_s6 + $0x730] sm:$0xf]  ;;  %5133 = vst [vmem:[#allocation3 + $0x724] sm:$0xf] %v5132_v10  ;;  %5135 = vst [vmem:[#allocation3 + $0x728] sm:$0xf] %v5134_v11 }
 0x24b   :  { %5137 = vst [vmem:[#allocation3 + $0x72c] sm:$0xf] %v5136_v12  ;;  %v5138_v13 = vld [vmem:[%s19836_s6 + $0x718] sm:$0xf]  ;;  %v5144_v15 = vld [vmem:[%s19836_s6 + $0x754] sm:$0xf] }
 0x24c   :  { %5139 = vst [vmem:[#allocation3 + $0x730] sm:$0xf] %v5138_v13  ;;  %5141 = vst [vmem:[#allocation3 + $0x734] sm:$0xff] %v5140_v14   ;;  %v5146_v16 = vld [vmem:[%s19836_s6 + $0x73c] sm:$0xf]  ;;  %v5196_v40 = vld [vmem:[%s19836_s6 + $0x7a4] sm:$0xff]  }
 0x24d   :  { %5145 = vst [vmem:[#allocation3 + $0x73c] sm:$0xf] %v5144_v15  ;;  %v5148_v17 = vld [vmem:[%s19836_s6 + $0x758] sm:$0xf]  ;;  %v5150_v18 = vld [vmem:[%s19836_s6 + $0x740] sm:$0xf] }
 0x24e   :  { %5147 = vst [vmem:[#allocation3 + $0x740] sm:$0xf] %v5146_v16  ;;  %5149 = vst [vmem:[#allocation3 + $0x744] sm:$0xf] %v5148_v17  ;;  %v5152_v19 = vld [vmem:[%s19836_s6 + $0x75c] sm:$0xf] }
 0x24f   :  { %5151 = vst [vmem:[#allocation3 + $0x748] sm:$0xf] %v5150_v18  ;;  %v5154_v20 = vld [vmem:[%s19836_s6 + $0x744] sm:$0xf]  ;;  %v5156_v21 = vld [vmem:[%s19836_s6 + $0x760] sm:$0xf] }
 0x250   :  { %5153 = vst [vmem:[#allocation3 + $0x74c] sm:$0xf] %v5152_v19  ;;  %5155 = vst [vmem:[#allocation3 + $0x750] sm:$0xf] %v5154_v20  ;;  %v5158_v22 = vld [vmem:[%s19836_s6 + $0x748] sm:$0xf] }
 0x251   :  { %5157 = vst [vmem:[#allocation3 + $0x754] sm:$0xf] %v5156_v21  ;;  %v5160_v23 = vld [vmem:[%s19836_s6 + $0x764] sm:$0xf]  ;;  %v5162_v24 = vld [vmem:[%s19836_s6 + $0x74c] sm:$0xf] }
 0x252   :  { %5159 = vst [vmem:[#allocation3 + $0x758] sm:$0xf] %v5158_v22  ;;  %5161 = vst [vmem:[#allocation3 + $0x75c] sm:$0xf] %v5160_v23  ;;  %v5164_v25 = vld [vmem:[%s19836_s6 + $0x768] sm:$0xf] }
 0x253   :  { %5163 = vst [vmem:[#allocation3 + $0x760] sm:$0xf] %v5162_v24  ;;  %v5166_v26 = vld [vmem:[%s19836_s6 + $0x750] sm:$0xf]  ;;  %5165 = vst [vmem:[#allocation3 + $0x764] sm:$0xf] %v5164_v25 }
 0x254   :  { %5167 = vst [vmem:[#allocation3 + $0x768] sm:$0xf] %v5166_v26  ;;  %5169 = vst [vmem:[#allocation3 + $0x76c] sm:$0xff] %v5168_v27   ;;  %v5172_v28 = vld [vmem:[%s19836_s6 + $0x78c] sm:$0xf]  ;;  %v5224_v53 = vld [vmem:[%s19836_s6 + $0x7dc] sm:$0xff]  }
 0x255   :  { %v5174_v29 = vld [vmem:[%s19836_s6 + $0x774] sm:$0xf]  ;;  %v5176_v30 = vld [vmem:[%s19836_s6 + $0x790] sm:$0xf]  ;;  %5173 = vst [vmem:[#allocation3 + $0x774] sm:$0xf] %v5172_v28 }
 0x256   :  { %5175 = vst [vmem:[#allocation3 + $0x778] sm:$0xf] %v5174_v29  ;;  %5177 = vst [vmem:[#allocation3 + $0x77c] sm:$0xf] %v5176_v30  ;;  %v5178_v31 = vld [vmem:[%s19836_s6 + $0x778] sm:$0xf] }
 0x257   :  { %v5180_v32 = vld [vmem:[%s19836_s6 + $0x794] sm:$0xf]  ;;  %v5182_v33 = vld [vmem:[%s19836_s6 + $0x77c] sm:$0xf]  ;;  %5179 = vst [vmem:[#allocation3 + $0x780] sm:$0xf] %v5178_v31 }
 0x258   :  { %5181 = vst [vmem:[#allocation3 + $0x784] sm:$0xf] %v5180_v32  ;;  %5183 = vst [vmem:[#allocation3 + $0x788] sm:$0xf] %v5182_v33  ;;  %v5184_v34 = vld [vmem:[%s19836_s6 + $0x798] sm:$0xf] }
 0x259   :  { %v5186_v35 = vld [vmem:[%s19836_s6 + $0x780] sm:$0xf]  ;;  %v5188_v36 = vld [vmem:[%s19836_s6 + $0x79c] sm:$0xf]  ;;  %5185 = vst [vmem:[#allocation3 + $0x78c] sm:$0xf] %v5184_v34 }
 0x25a   :  { %5187 = vst [vmem:[#allocation3 + $0x790] sm:$0xf] %v5186_v35  ;;  %5189 = vst [vmem:[#allocation3 + $0x794] sm:$0xf] %v5188_v36  ;;  %v5190_v37 = vld [vmem:[%s19836_s6 + $0x784] sm:$0xf] }
 0x25b   :  { %v5192_v38 = vld [vmem:[%s19836_s6 + $0x7a0] sm:$0xf]  ;;  %v5194_v39 = vld [vmem:[%s19836_s6 + $0x788] sm:$0xf]  ;;  %5191 = vst [vmem:[#allocation3 + $0x798] sm:$0xf] %v5190_v37 }
 0x25c   :  { %5193 = vst [vmem:[#allocation3 + $0x79c] sm:$0xf] %v5192_v38  ;;  %5195 = vst [vmem:[#allocation3 + $0x7a0] sm:$0xf] %v5194_v39  ;;  %v5200_v41 = vld [vmem:[%s19836_s6 + $0x7c4] sm:$0xf] }
 0x25d   :  { %v5202_v42 = vld [vmem:[%s19836_s6 + $0x7ac] sm:$0xf]  ;;  %5197 = vst [vmem:[#allocation3 + $0x7a4] sm:$0xff] %v5196_v40   ;;  %5201 = vst [vmem:[#allocation3 + $0x7ac] sm:$0xf] %v5200_v41  ;;  %v5252_v2 = vld [vmem:[%s19836_s6 + $0x814] sm:$0xff]  }
 0x25e   :  { %5203 = vst [vmem:[#allocation3 + $0x7b0] sm:$0xf] %v5202_v42  ;;  %v5204_v43 = vld [vmem:[%s19836_s6 + $0x7c8] sm:$0xf]  ;;  %v5206_v44 = vld [vmem:[%s19836_s6 + $0x7b0] sm:$0xf] }
 0x25f   :  { %v5208_v45 = vld [vmem:[%s19836_s6 + $0x7cc] sm:$0xf]  ;;  %5205 = vst [vmem:[#allocation3 + $0x7b4] sm:$0xf] %v5204_v43  ;;  %5207 = vst [vmem:[#allocation3 + $0x7b8] sm:$0xf] %v5206_v44 }
 0x260   :  { %5209 = vst [vmem:[#allocation3 + $0x7bc] sm:$0xf] %v5208_v45  ;;  %v5210_v46 = vld [vmem:[%s19836_s6 + $0x7b4] sm:$0xf]  ;;  %v5212_v47 = vld [vmem:[%s19836_s6 + $0x7d0] sm:$0xf] }
 0x261   :  { %v5214_v48 = vld [vmem:[%s19836_s6 + $0x7b8] sm:$0xf]  ;;  %5211 = vst [vmem:[#allocation3 + $0x7c0] sm:$0xf] %v5210_v46  ;;  %5213 = vst [vmem:[#allocation3 + $0x7c4] sm:$0xf] %v5212_v47 }
 0x262   :  { %5215 = vst [vmem:[#allocation3 + $0x7c8] sm:$0xf] %v5214_v48  ;;  %v5216_v49 = vld [vmem:[%s19836_s6 + $0x7d4] sm:$0xf]  ;;  %v5218_v50 = vld [vmem:[%s19836_s6 + $0x7bc] sm:$0xf] }
 0x263   :  { %v5220_v51 = vld [vmem:[%s19836_s6 + $0x7d8] sm:$0xf]  ;;  %5217 = vst [vmem:[#allocation3 + $0x7cc] sm:$0xf] %v5216_v49  ;;  %5219 = vst [vmem:[#allocation3 + $0x7d0] sm:$0xf] %v5218_v50 }
 0x264   :  { %5221 = vst [vmem:[#allocation3 + $0x7d4] sm:$0xf] %v5220_v51  ;;  %v5222_v52 = vld [vmem:[%s19836_s6 + $0x7c0] sm:$0xf]  ;;  %v5228_v54 = vld [vmem:[%s19836_s6 + $0x7fc] sm:$0xf] }
 0x265   :  { %5223 = vst [vmem:[#allocation3 + $0x7d8] sm:$0xf] %v5222_v52  ;;  %5225 = vst [vmem:[#allocation3 + $0x7dc] sm:$0xff] %v5224_v53   ;;  %v5230_v55 = vld [vmem:[%s19836_s6 + $0x7e4] sm:$0xf]  ;;  %v5280_v15 = vld [vmem:[%s19836_s6 + $0x84c] sm:$0xff]  }
 0x266   :  { %5229 = vst [vmem:[#allocation3 + $0x7e4] sm:$0xf] %v5228_v54  ;;  %v5232_v56 = vld [vmem:[%s19836_s6 + $0x800] sm:$0xf]  ;;  %v5234_v57 = vld [vmem:[%s19836_s6 + $0x7e8] sm:$0xf] }
 0x267   :  { %5231 = vst [vmem:[#allocation3 + $0x7e8] sm:$0xf] %v5230_v55  ;;  %5233 = vst [vmem:[#allocation3 + $0x7ec] sm:$0xf] %v5232_v56  ;;  %v5236_v58 = vld [vmem:[%s19836_s6 + $0x804] sm:$0xf] }
 0x268   :  { %5235 = vst [vmem:[#allocation3 + $0x7f0] sm:$0xf] %v5234_v57  ;;  %v5238_v59 = vld [vmem:[%s19836_s6 + $0x7ec] sm:$0xf]  ;;  %v5240_v60 = vld [vmem:[%s19836_s6 + $0x808] sm:$0xf] }
 0x269   :  { %5237 = vst [vmem:[#allocation3 + $0x7f4] sm:$0xf] %v5236_v58  ;;  %5239 = vst [vmem:[#allocation3 + $0x7f8] sm:$0xf] %v5238_v59  ;;  %v5242_v61 = vld [vmem:[%s19836_s6 + $0x7f0] sm:$0xf] }
 0x26a   :  { %5241 = vst [vmem:[#allocation3 + $0x7fc] sm:$0xf] %v5240_v60  ;;  %v5244_v62 = vld [vmem:[%s19836_s6 + $0x80c] sm:$0xf]  ;;  %v5246_v63 = vld [vmem:[%s19836_s6 + $0x7f4] sm:$0xf] }
 0x26b   :  { %5243 = vst [vmem:[#allocation3 + $0x800] sm:$0xf] %v5242_v61  ;;  %5245 = vst [vmem:[#allocation3 + $0x804] sm:$0xf] %v5244_v62  ;;  %v5248_v0 = vld [vmem:[%s19836_s6 + $0x810] sm:$0xf] }
 0x26c   :  { %5247 = vst [vmem:[#allocation3 + $0x808] sm:$0xf] %v5246_v63  ;;  %v5250_v1 = vld [vmem:[%s19836_s6 + $0x7f8] sm:$0xf]  ;;  %5249 = vst [vmem:[#allocation3 + $0x80c] sm:$0xf] %v5248_v0 }
 0x26d   :  { %5251 = vst [vmem:[#allocation3 + $0x810] sm:$0xf] %v5250_v1  ;;  %5253 = vst [vmem:[#allocation3 + $0x814] sm:$0xff] %v5252_v2   ;;  %v5256_v3 = vld [vmem:[%s19836_s6 + $0x834] sm:$0xf]  ;;  %v5308_v28 = vld [vmem:[%s19836_s6 + $0x884] sm:$0xff]  }
 0x26e   :  { %v5258_v4 = vld [vmem:[%s19836_s6 + $0x81c] sm:$0xf]  ;;  %v5260_v5 = vld [vmem:[%s19836_s6 + $0x838] sm:$0xf]  ;;  %5257 = vst [vmem:[#allocation3 + $0x81c] sm:$0xf] %v5256_v3 }
 0x26f   :  { %5259 = vst [vmem:[#allocation3 + $0x820] sm:$0xf] %v5258_v4  ;;  %5261 = vst [vmem:[#allocation3 + $0x824] sm:$0xf] %v5260_v5  ;;  %v5262_v6 = vld [vmem:[%s19836_s6 + $0x820] sm:$0xf] }
 0x270   :  { %v5264_v7 = vld [vmem:[%s19836_s6 + $0x83c] sm:$0xf]  ;;  %v5266_v8 = vld [vmem:[%s19836_s6 + $0x824] sm:$0xf]  ;;  %5263 = vst [vmem:[#allocation3 + $0x828] sm:$0xf] %v5262_v6 }
 0x271   :  { %5265 = vst [vmem:[#allocation3 + $0x82c] sm:$0xf] %v5264_v7  ;;  %5267 = vst [vmem:[#allocation3 + $0x830] sm:$0xf] %v5266_v8  ;;  %v5268_v9 = vld [vmem:[%s19836_s6 + $0x840] sm:$0xf] }
 0x272   :  { %v5270_v10 = vld [vmem:[%s19836_s6 + $0x828] sm:$0xf]  ;;  %v5272_v11 = vld [vmem:[%s19836_s6 + $0x844] sm:$0xf]  ;;  %5269 = vst [vmem:[#allocation3 + $0x834] sm:$0xf] %v5268_v9 }
 0x273   :  { %5271 = vst [vmem:[#allocation3 + $0x838] sm:$0xf] %v5270_v10  ;;  %5273 = vst [vmem:[#allocation3 + $0x83c] sm:$0xf] %v5272_v11  ;;  %v5274_v12 = vld [vmem:[%s19836_s6 + $0x82c] sm:$0xf] }
 0x274   :  { %v5276_v13 = vld [vmem:[%s19836_s6 + $0x848] sm:$0xf]  ;;  %v5278_v14 = vld [vmem:[%s19836_s6 + $0x830] sm:$0xf]  ;;  %5275 = vst [vmem:[#allocation3 + $0x840] sm:$0xf] %v5274_v12 }
 0x275   :  { %5277 = vst [vmem:[#allocation3 + $0x844] sm:$0xf] %v5276_v13  ;;  %5279 = vst [vmem:[#allocation3 + $0x848] sm:$0xf] %v5278_v14  ;;  %v5284_v16 = vld [vmem:[%s19836_s6 + $0x86c] sm:$0xf] }
 0x276   :  { %v5286_v17 = vld [vmem:[%s19836_s6 + $0x854] sm:$0xf]  ;;  %5281 = vst [vmem:[#allocation3 + $0x84c] sm:$0xff] %v5280_v15   ;;  %5285 = vst [vmem:[#allocation3 + $0x854] sm:$0xf] %v5284_v16  ;;  %v5336_v41 = vld [vmem:[%s19836_s6 + $0x8bc] sm:$0xff]  }
 0x277   :  { %5287 = vst [vmem:[#allocation3 + $0x858] sm:$0xf] %v5286_v17  ;;  %v5288_v18 = vld [vmem:[%s19836_s6 + $0x870] sm:$0xf]  ;;  %v5290_v19 = vld [vmem:[%s19836_s6 + $0x858] sm:$0xf] }
 0x278   :  { %v5292_v20 = vld [vmem:[%s19836_s6 + $0x874] sm:$0xf]  ;;  %5289 = vst [vmem:[#allocation3 + $0x85c] sm:$0xf] %v5288_v18  ;;  %5291 = vst [vmem:[#allocation3 + $0x860] sm:$0xf] %v5290_v19 }
 0x279   :  { %5293 = vst [vmem:[#allocation3 + $0x864] sm:$0xf] %v5292_v20  ;;  %v5294_v21 = vld [vmem:[%s19836_s6 + $0x85c] sm:$0xf]  ;;  %v5296_v22 = vld [vmem:[%s19836_s6 + $0x878] sm:$0xf] }
 0x27a   :  { %v5298_v23 = vld [vmem:[%s19836_s6 + $0x860] sm:$0xf]  ;;  %5295 = vst [vmem:[#allocation3 + $0x868] sm:$0xf] %v5294_v21  ;;  %5297 = vst [vmem:[#allocation3 + $0x86c] sm:$0xf] %v5296_v22 }
 0x27b   :  { %5299 = vst [vmem:[#allocation3 + $0x870] sm:$0xf] %v5298_v23  ;;  %v5300_v24 = vld [vmem:[%s19836_s6 + $0x87c] sm:$0xf]  ;;  %v5302_v25 = vld [vmem:[%s19836_s6 + $0x864] sm:$0xf] }
 0x27c   :  { %v5304_v26 = vld [vmem:[%s19836_s6 + $0x880] sm:$0xf]  ;;  %5301 = vst [vmem:[#allocation3 + $0x874] sm:$0xf] %v5300_v24  ;;  %5303 = vst [vmem:[#allocation3 + $0x878] sm:$0xf] %v5302_v25 }
 0x27d   :  { %5305 = vst [vmem:[#allocation3 + $0x87c] sm:$0xf] %v5304_v26  ;;  %v5306_v27 = vld [vmem:[%s19836_s6 + $0x868] sm:$0xf]  ;;  %v5312_v29 = vld [vmem:[%s19836_s6 + $0x8a4] sm:$0xf] }
 0x27e   :  { %5307 = vst [vmem:[#allocation3 + $0x880] sm:$0xf] %v5306_v27  ;;  %5309 = vst [vmem:[#allocation3 + $0x884] sm:$0xff] %v5308_v28   ;;  %v5314_v30 = vld [vmem:[%s19836_s6 + $0x88c] sm:$0xf]  ;;  %v5364_v54 = vld [vmem:[%s19836_s6 + $0x8f4] sm:$0xff]  }
 0x27f   :  { %5313 = vst [vmem:[#allocation3 + $0x88c] sm:$0xf] %v5312_v29  ;;  %v5316_v31 = vld [vmem:[%s19836_s6 + $0x8a8] sm:$0xf]  ;;  %v5318_v32 = vld [vmem:[%s19836_s6 + $0x890] sm:$0xf] }
 0x280   :  { %5315 = vst [vmem:[#allocation3 + $0x890] sm:$0xf] %v5314_v30  ;;  %5317 = vst [vmem:[#allocation3 + $0x894] sm:$0xf] %v5316_v31  ;;  %v5320_v33 = vld [vmem:[%s19836_s6 + $0x8ac] sm:$0xf] }
 0x281   :  { %5319 = vst [vmem:[#allocation3 + $0x898] sm:$0xf] %v5318_v32  ;;  %v5322_v34 = vld [vmem:[%s19836_s6 + $0x894] sm:$0xf]  ;;  %v5324_v35 = vld [vmem:[%s19836_s6 + $0x8b0] sm:$0xf] }
 0x282   :  { %5321 = vst [vmem:[#allocation3 + $0x89c] sm:$0xf] %v5320_v33  ;;  %5323 = vst [vmem:[#allocation3 + $0x8a0] sm:$0xf] %v5322_v34  ;;  %v5326_v36 = vld [vmem:[%s19836_s6 + $0x898] sm:$0xf] }
 0x283   :  { %5325 = vst [vmem:[#allocation3 + $0x8a4] sm:$0xf] %v5324_v35  ;;  %v5328_v37 = vld [vmem:[%s19836_s6 + $0x8b4] sm:$0xf]  ;;  %v5330_v38 = vld [vmem:[%s19836_s6 + $0x89c] sm:$0xf] }
 0x284   :  { %5327 = vst [vmem:[#allocation3 + $0x8a8] sm:$0xf] %v5326_v36  ;;  %5329 = vst [vmem:[#allocation3 + $0x8ac] sm:$0xf] %v5328_v37  ;;  %v5332_v39 = vld [vmem:[%s19836_s6 + $0x8b8] sm:$0xf] }
 0x285   :  { %5331 = vst [vmem:[#allocation3 + $0x8b0] sm:$0xf] %v5330_v38  ;;  %v5334_v40 = vld [vmem:[%s19836_s6 + $0x8a0] sm:$0xf]  ;;  %5333 = vst [vmem:[#allocation3 + $0x8b4] sm:$0xf] %v5332_v39 }
 0x286   :  { %5335 = vst [vmem:[#allocation3 + $0x8b8] sm:$0xf] %v5334_v40  ;;  %5337 = vst [vmem:[#allocation3 + $0x8bc] sm:$0xff] %v5336_v41   ;;  %v5340_v42 = vld [vmem:[%s19836_s6 + $0x8dc] sm:$0xf]  ;;  %v5392_v3 = vld [vmem:[%s19836_s6 + $0x92c] sm:$0xff]  }
 0x287   :  { %v5342_v43 = vld [vmem:[%s19836_s6 + $0x8c4] sm:$0xf]  ;;  %v5344_v44 = vld [vmem:[%s19836_s6 + $0x8e0] sm:$0xf]  ;;  %5341 = vst [vmem:[#allocation3 + $0x8c4] sm:$0xf] %v5340_v42 }
 0x288   :  { %5343 = vst [vmem:[#allocation3 + $0x8c8] sm:$0xf] %v5342_v43  ;;  %5345 = vst [vmem:[#allocation3 + $0x8cc] sm:$0xf] %v5344_v44  ;;  %v5346_v45 = vld [vmem:[%s19836_s6 + $0x8c8] sm:$0xf] }
 0x289   :  { %v5348_v46 = vld [vmem:[%s19836_s6 + $0x8e4] sm:$0xf]  ;;  %v5350_v47 = vld [vmem:[%s19836_s6 + $0x8cc] sm:$0xf]  ;;  %5347 = vst [vmem:[#allocation3 + $0x8d0] sm:$0xf] %v5346_v45 }
 0x28a   :  { %5349 = vst [vmem:[#allocation3 + $0x8d4] sm:$0xf] %v5348_v46  ;;  %5351 = vst [vmem:[#allocation3 + $0x8d8] sm:$0xf] %v5350_v47  ;;  %v5352_v48 = vld [vmem:[%s19836_s6 + $0x8e8] sm:$0xf] }
 0x28b   :  { %v5354_v49 = vld [vmem:[%s19836_s6 + $0x8d0] sm:$0xf]  ;;  %v5356_v50 = vld [vmem:[%s19836_s6 + $0x8ec] sm:$0xf]  ;;  %5353 = vst [vmem:[#allocation3 + $0x8dc] sm:$0xf] %v5352_v48 }
 0x28c   :  { %5355 = vst [vmem:[#allocation3 + $0x8e0] sm:$0xf] %v5354_v49  ;;  %5357 = vst [vmem:[#allocation3 + $0x8e4] sm:$0xf] %v5356_v50  ;;  %v5358_v51 = vld [vmem:[%s19836_s6 + $0x8d4] sm:$0xf] }
 0x28d   :  { %v5360_v52 = vld [vmem:[%s19836_s6 + $0x8f0] sm:$0xf]  ;;  %v5362_v53 = vld [vmem:[%s19836_s6 + $0x8d8] sm:$0xf]  ;;  %5359 = vst [vmem:[#allocation3 + $0x8e8] sm:$0xf] %v5358_v51 }
 0x28e   :  { %5361 = vst [vmem:[#allocation3 + $0x8ec] sm:$0xf] %v5360_v52  ;;  %5363 = vst [vmem:[#allocation3 + $0x8f0] sm:$0xf] %v5362_v53  ;;  %v5368_v55 = vld [vmem:[%s19836_s6 + $0x914] sm:$0xf] }
 0x28f   :  { %v5370_v56 = vld [vmem:[%s19836_s6 + $0x8fc] sm:$0xf]  ;;  %5365 = vst [vmem:[#allocation3 + $0x8f4] sm:$0xff] %v5364_v54   ;;  %5369 = vst [vmem:[#allocation3 + $0x8fc] sm:$0xf] %v5368_v55  ;;  %v5420_v16 = vld [vmem:[%s19836_s6 + $0x964] sm:$0xff]  }
 0x290   :  { %5371 = vst [vmem:[#allocation3 + $0x900] sm:$0xf] %v5370_v56  ;;  %v5372_v57 = vld [vmem:[%s19836_s6 + $0x918] sm:$0xf]  ;;  %v5374_v58 = vld [vmem:[%s19836_s6 + $0x900] sm:$0xf] }
 0x291   :  { %v5376_v59 = vld [vmem:[%s19836_s6 + $0x91c] sm:$0xf]  ;;  %5373 = vst [vmem:[#allocation3 + $0x904] sm:$0xf] %v5372_v57  ;;  %5375 = vst [vmem:[#allocation3 + $0x908] sm:$0xf] %v5374_v58 }
 0x292   :  { %5377 = vst [vmem:[#allocation3 + $0x90c] sm:$0xf] %v5376_v59  ;;  %v5378_v60 = vld [vmem:[%s19836_s6 + $0x904] sm:$0xf]  ;;  %v5380_v61 = vld [vmem:[%s19836_s6 + $0x920] sm:$0xf] }
 0x293   :  { %v5382_v62 = vld [vmem:[%s19836_s6 + $0x908] sm:$0xf]  ;;  %5379 = vst [vmem:[#allocation3 + $0x910] sm:$0xf] %v5378_v60  ;;  %5381 = vst [vmem:[#allocation3 + $0x914] sm:$0xf] %v5380_v61 }
 0x294   :  { %5383 = vst [vmem:[#allocation3 + $0x918] sm:$0xf] %v5382_v62  ;;  %v5384_v63 = vld [vmem:[%s19836_s6 + $0x924] sm:$0xf]  ;;  %v5386_v0 = vld [vmem:[%s19836_s6 + $0x90c] sm:$0xf] }
 0x295   :  { %v5388_v1 = vld [vmem:[%s19836_s6 + $0x928] sm:$0xf]  ;;  %5385 = vst [vmem:[#allocation3 + $0x91c] sm:$0xf] %v5384_v63  ;;  %5387 = vst [vmem:[#allocation3 + $0x920] sm:$0xf] %v5386_v0 }
 0x296   :  { %5389 = vst [vmem:[#allocation3 + $0x924] sm:$0xf] %v5388_v1  ;;  %v5390_v2 = vld [vmem:[%s19836_s6 + $0x910] sm:$0xf]  ;;  %v5396_v4 = vld [vmem:[%s19836_s6 + $0x94c] sm:$0xf] }
 0x297   :  { %5391 = vst [vmem:[#allocation3 + $0x928] sm:$0xf] %v5390_v2  ;;  %5393 = vst [vmem:[#allocation3 + $0x92c] sm:$0xff] %v5392_v3   ;;  %v5398_v5 = vld [vmem:[%s19836_s6 + $0x934] sm:$0xf]  ;;  %v5448_v29 = vld [vmem:[%s19836_s6 + $0x99c] sm:$0xff]  }
 0x298   :  { %5397 = vst [vmem:[#allocation3 + $0x934] sm:$0xf] %v5396_v4  ;;  %v5400_v6 = vld [vmem:[%s19836_s6 + $0x950] sm:$0xf]  ;;  %v5402_v7 = vld [vmem:[%s19836_s6 + $0x938] sm:$0xf] }
 0x299   :  { %5399 = vst [vmem:[#allocation3 + $0x938] sm:$0xf] %v5398_v5  ;;  %5401 = vst [vmem:[#allocation3 + $0x93c] sm:$0xf] %v5400_v6  ;;  %v5404_v8 = vld [vmem:[%s19836_s6 + $0x954] sm:$0xf] }
 0x29a   :  { %5403 = vst [vmem:[#allocation3 + $0x940] sm:$0xf] %v5402_v7  ;;  %v5406_v9 = vld [vmem:[%s19836_s6 + $0x93c] sm:$0xf]  ;;  %v5408_v10 = vld [vmem:[%s19836_s6 + $0x958] sm:$0xf] }
 0x29b   :  { %5405 = vst [vmem:[#allocation3 + $0x944] sm:$0xf] %v5404_v8  ;;  %5407 = vst [vmem:[#allocation3 + $0x948] sm:$0xf] %v5406_v9  ;;  %v5410_v11 = vld [vmem:[%s19836_s6 + $0x940] sm:$0xf] }
 0x29c   :  { %5409 = vst [vmem:[#allocation3 + $0x94c] sm:$0xf] %v5408_v10  ;;  %v5412_v12 = vld [vmem:[%s19836_s6 + $0x95c] sm:$0xf]  ;;  %v5414_v13 = vld [vmem:[%s19836_s6 + $0x944] sm:$0xf] }
 0x29d   :  { %5411 = vst [vmem:[#allocation3 + $0x950] sm:$0xf] %v5410_v11  ;;  %5413 = vst [vmem:[#allocation3 + $0x954] sm:$0xf] %v5412_v12  ;;  %v5416_v14 = vld [vmem:[%s19836_s6 + $0x960] sm:$0xf] }
 0x29e   :  { %5415 = vst [vmem:[#allocation3 + $0x958] sm:$0xf] %v5414_v13  ;;  %v5418_v15 = vld [vmem:[%s19836_s6 + $0x948] sm:$0xf]  ;;  %5417 = vst [vmem:[#allocation3 + $0x95c] sm:$0xf] %v5416_v14 }
 0x29f   :  { %5419 = vst [vmem:[#allocation3 + $0x960] sm:$0xf] %v5418_v15  ;;  %5421 = vst [vmem:[#allocation3 + $0x964] sm:$0xff] %v5420_v16   ;;  %v5424_v17 = vld [vmem:[%s19836_s6 + $0x984] sm:$0xf]  ;;  %v5476_v42 = vld [vmem:[%s19836_s6 + $0x9d4] sm:$0xff]  }
 0x2a0   :  { %v5426_v18 = vld [vmem:[%s19836_s6 + $0x96c] sm:$0xf]  ;;  %v5428_v19 = vld [vmem:[%s19836_s6 + $0x988] sm:$0xf]  ;;  %5425 = vst [vmem:[#allocation3 + $0x96c] sm:$0xf] %v5424_v17 }
 0x2a1   :  { %5427 = vst [vmem:[#allocation3 + $0x970] sm:$0xf] %v5426_v18  ;;  %5429 = vst [vmem:[#allocation3 + $0x974] sm:$0xf] %v5428_v19  ;;  %v5430_v20 = vld [vmem:[%s19836_s6 + $0x970] sm:$0xf] }
 0x2a2   :  { %v5432_v21 = vld [vmem:[%s19836_s6 + $0x98c] sm:$0xf]  ;;  %v5434_v22 = vld [vmem:[%s19836_s6 + $0x974] sm:$0xf]  ;;  %5431 = vst [vmem:[#allocation3 + $0x978] sm:$0xf] %v5430_v20 }
 0x2a3   :  { %5433 = vst [vmem:[#allocation3 + $0x97c] sm:$0xf] %v5432_v21  ;;  %5435 = vst [vmem:[#allocation3 + $0x980] sm:$0xf] %v5434_v22  ;;  %v5436_v23 = vld [vmem:[%s19836_s6 + $0x990] sm:$0xf] }
 0x2a4   :  { %v5438_v24 = vld [vmem:[%s19836_s6 + $0x978] sm:$0xf]  ;;  %v5440_v25 = vld [vmem:[%s19836_s6 + $0x994] sm:$0xf]  ;;  %5437 = vst [vmem:[#allocation3 + $0x984] sm:$0xf] %v5436_v23 }
 0x2a5   :  { %5439 = vst [vmem:[#allocation3 + $0x988] sm:$0xf] %v5438_v24  ;;  %5441 = vst [vmem:[#allocation3 + $0x98c] sm:$0xf] %v5440_v25  ;;  %v5442_v26 = vld [vmem:[%s19836_s6 + $0x97c] sm:$0xf] }
 0x2a6   :  { %v5444_v27 = vld [vmem:[%s19836_s6 + $0x998] sm:$0xf]  ;;  %v5446_v28 = vld [vmem:[%s19836_s6 + $0x980] sm:$0xf]  ;;  %5443 = vst [vmem:[#allocation3 + $0x990] sm:$0xf] %v5442_v26 }
 0x2a7   :  { %5445 = vst [vmem:[#allocation3 + $0x994] sm:$0xf] %v5444_v27  ;;  %5447 = vst [vmem:[#allocation3 + $0x998] sm:$0xf] %v5446_v28  ;;  %v5452_v30 = vld [vmem:[%s19836_s6 + $0x9bc] sm:$0xf] }
 0x2a8   :  { %v5454_v31 = vld [vmem:[%s19836_s6 + $0x9a4] sm:$0xf]  ;;  %5449 = vst [vmem:[#allocation3 + $0x99c] sm:$0xff] %v5448_v29   ;;  %5453 = vst [vmem:[#allocation3 + $0x9a4] sm:$0xf] %v5452_v30  ;;  %v5504_v55 = vld [vmem:[%s19836_s6 + $0xa0c] sm:$0xff]  }
 0x2a9   :  { %5455 = vst [vmem:[#allocation3 + $0x9a8] sm:$0xf] %v5454_v31  ;;  %v5456_v32 = vld [vmem:[%s19836_s6 + $0x9c0] sm:$0xf]  ;;  %v5458_v33 = vld [vmem:[%s19836_s6 + $0x9a8] sm:$0xf] }
 0x2aa   :  { %v5460_v34 = vld [vmem:[%s19836_s6 + $0x9c4] sm:$0xf]  ;;  %5457 = vst [vmem:[#allocation3 + $0x9ac] sm:$0xf] %v5456_v32  ;;  %5459 = vst [vmem:[#allocation3 + $0x9b0] sm:$0xf] %v5458_v33 }
 0x2ab   :  { %5461 = vst [vmem:[#allocation3 + $0x9b4] sm:$0xf] %v5460_v34  ;;  %v5462_v35 = vld [vmem:[%s19836_s6 + $0x9ac] sm:$0xf]  ;;  %v5464_v36 = vld [vmem:[%s19836_s6 + $0x9c8] sm:$0xf] }
 0x2ac   :  { %v5466_v37 = vld [vmem:[%s19836_s6 + $0x9b0] sm:$0xf]  ;;  %5463 = vst [vmem:[#allocation3 + $0x9b8] sm:$0xf] %v5462_v35  ;;  %5465 = vst [vmem:[#allocation3 + $0x9bc] sm:$0xf] %v5464_v36 }
 0x2ad   :  { %5467 = vst [vmem:[#allocation3 + $0x9c0] sm:$0xf] %v5466_v37  ;;  %v5468_v38 = vld [vmem:[%s19836_s6 + $0x9cc] sm:$0xf]  ;;  %v5470_v39 = vld [vmem:[%s19836_s6 + $0x9b4] sm:$0xf] }
 0x2ae   :  { %v5472_v40 = vld [vmem:[%s19836_s6 + $0x9d0] sm:$0xf]  ;;  %5469 = vst [vmem:[#allocation3 + $0x9c4] sm:$0xf] %v5468_v38  ;;  %5471 = vst [vmem:[#allocation3 + $0x9c8] sm:$0xf] %v5470_v39 }
 0x2af   :  { %5473 = vst [vmem:[#allocation3 + $0x9cc] sm:$0xf] %v5472_v40  ;;  %v5474_v41 = vld [vmem:[%s19836_s6 + $0x9b8] sm:$0xf]  ;;  %v5480_v43 = vld [vmem:[%s19836_s6 + $0x9f4] sm:$0xf] }
 0x2b0   :  { %5475 = vst [vmem:[#allocation3 + $0x9d0] sm:$0xf] %v5474_v41  ;;  %5477 = vst [vmem:[#allocation3 + $0x9d4] sm:$0xff] %v5476_v42   ;;  %v5482_v44 = vld [vmem:[%s19836_s6 + $0x9dc] sm:$0xf]  ;;  %v5532_v4 = vld [vmem:[%s19836_s6 + $0xa44] sm:$0xff]  }
 0x2b1   :  { %5481 = vst [vmem:[#allocation3 + $0x9dc] sm:$0xf] %v5480_v43  ;;  %v5484_v45 = vld [vmem:[%s19836_s6 + $0x9f8] sm:$0xf]  ;;  %v5486_v46 = vld [vmem:[%s19836_s6 + $0x9e0] sm:$0xf] }
 0x2b2   :  { %5483 = vst [vmem:[#allocation3 + $0x9e0] sm:$0xf] %v5482_v44  ;;  %5485 = vst [vmem:[#allocation3 + $0x9e4] sm:$0xf] %v5484_v45  ;;  %v5488_v47 = vld [vmem:[%s19836_s6 + $0x9fc] sm:$0xf] }
 0x2b3   :  { %5487 = vst [vmem:[#allocation3 + $0x9e8] sm:$0xf] %v5486_v46  ;;  %v5490_v48 = vld [vmem:[%s19836_s6 + $0x9e4] sm:$0xf]  ;;  %v5492_v49 = vld [vmem:[%s19836_s6 + $0xa00] sm:$0xf] }
 0x2b4   :  { %5489 = vst [vmem:[#allocation3 + $0x9ec] sm:$0xf] %v5488_v47  ;;  %5491 = vst [vmem:[#allocation3 + $0x9f0] sm:$0xf] %v5490_v48  ;;  %v5494_v50 = vld [vmem:[%s19836_s6 + $0x9e8] sm:$0xf] }
 0x2b5   :  { %5493 = vst [vmem:[#allocation3 + $0x9f4] sm:$0xf] %v5492_v49  ;;  %v5496_v51 = vld [vmem:[%s19836_s6 + $0xa04] sm:$0xf]  ;;  %v5498_v52 = vld [vmem:[%s19836_s6 + $0x9ec] sm:$0xf] }
 0x2b6   :  { %5495 = vst [vmem:[#allocation3 + $0x9f8] sm:$0xf] %v5494_v50  ;;  %5497 = vst [vmem:[#allocation3 + $0x9fc] sm:$0xf] %v5496_v51  ;;  %v5500_v53 = vld [vmem:[%s19836_s6 + $0xa08] sm:$0xf] }
 0x2b7   :  { %5499 = vst [vmem:[#allocation3 + $0xa00] sm:$0xf] %v5498_v52  ;;  %v5502_v54 = vld [vmem:[%s19836_s6 + $0x9f0] sm:$0xf]  ;;  %5501 = vst [vmem:[#allocation3 + $0xa04] sm:$0xf] %v5500_v53 }
 0x2b8   :  { %5503 = vst [vmem:[#allocation3 + $0xa08] sm:$0xf] %v5502_v54  ;;  %5505 = vst [vmem:[#allocation3 + $0xa0c] sm:$0xff] %v5504_v55   ;;  %v5508_v56 = vld [vmem:[%s19836_s6 + $0xa2c] sm:$0xf]  ;;  %v5560_v17 = vld [vmem:[%s19836_s6 + $0xa7c] sm:$0xff]  }
 0x2b9   :  { %v5510_v57 = vld [vmem:[%s19836_s6 + $0xa14] sm:$0xf]  ;;  %v5512_v58 = vld [vmem:[%s19836_s6 + $0xa30] sm:$0xf]  ;;  %5509 = vst [vmem:[#allocation3 + $0xa14] sm:$0xf] %v5508_v56 }
 0x2ba   :  { %5511 = vst [vmem:[#allocation3 + $0xa18] sm:$0xf] %v5510_v57  ;;  %5513 = vst [vmem:[#allocation3 + $0xa1c] sm:$0xf] %v5512_v58  ;;  %v5514_v59 = vld [vmem:[%s19836_s6 + $0xa18] sm:$0xf] }
 0x2bb   :  { %v5516_v60 = vld [vmem:[%s19836_s6 + $0xa34] sm:$0xf]  ;;  %v5518_v61 = vld [vmem:[%s19836_s6 + $0xa1c] sm:$0xf]  ;;  %5515 = vst [vmem:[#allocation3 + $0xa20] sm:$0xf] %v5514_v59 }
 0x2bc   :  { %5517 = vst [vmem:[#allocation3 + $0xa24] sm:$0xf] %v5516_v60  ;;  %5519 = vst [vmem:[#allocation3 + $0xa28] sm:$0xf] %v5518_v61  ;;  %v5520_v62 = vld [vmem:[%s19836_s6 + $0xa38] sm:$0xf] }
 0x2bd   :  { %v5522_v63 = vld [vmem:[%s19836_s6 + $0xa20] sm:$0xf]  ;;  %v5524_v0 = vld [vmem:[%s19836_s6 + $0xa3c] sm:$0xf]  ;;  %5521 = vst [vmem:[#allocation3 + $0xa2c] sm:$0xf] %v5520_v62 }
 0x2be   :  { %5523 = vst [vmem:[#allocation3 + $0xa30] sm:$0xf] %v5522_v63  ;;  %5525 = vst [vmem:[#allocation3 + $0xa34] sm:$0xf] %v5524_v0  ;;  %v5526_v1 = vld [vmem:[%s19836_s6 + $0xa24] sm:$0xf] }
 0x2bf   :  { %v5528_v2 = vld [vmem:[%s19836_s6 + $0xa40] sm:$0xf]  ;;  %v5530_v3 = vld [vmem:[%s19836_s6 + $0xa28] sm:$0xf]  ;;  %5527 = vst [vmem:[#allocation3 + $0xa38] sm:$0xf] %v5526_v1 }
 0x2c0   :  { %5529 = vst [vmem:[#allocation3 + $0xa3c] sm:$0xf] %v5528_v2  ;;  %5531 = vst [vmem:[#allocation3 + $0xa40] sm:$0xf] %v5530_v3  ;;  %v5536_v5 = vld [vmem:[%s19836_s6 + $0xa64] sm:$0xf] }
 0x2c1   :  { %v5538_v6 = vld [vmem:[%s19836_s6 + $0xa4c] sm:$0xf]  ;;  %5533 = vst [vmem:[#allocation3 + $0xa44] sm:$0xff] %v5532_v4   ;;  %5537 = vst [vmem:[#allocation3 + $0xa4c] sm:$0xf] %v5536_v5  ;;  %v5588_v30 = vld [vmem:[%s19836_s6 + $0xab4] sm:$0xff]  }
 0x2c2   :  { %5539 = vst [vmem:[#allocation3 + $0xa50] sm:$0xf] %v5538_v6  ;;  %v5540_v7 = vld [vmem:[%s19836_s6 + $0xa68] sm:$0xf]  ;;  %v5542_v8 = vld [vmem:[%s19836_s6 + $0xa50] sm:$0xf] }
 0x2c3   :  { %v5544_v9 = vld [vmem:[%s19836_s6 + $0xa6c] sm:$0xf]  ;;  %5541 = vst [vmem:[#allocation3 + $0xa54] sm:$0xf] %v5540_v7  ;;  %5543 = vst [vmem:[#allocation3 + $0xa58] sm:$0xf] %v5542_v8 }
 0x2c4   :  { %5545 = vst [vmem:[#allocation3 + $0xa5c] sm:$0xf] %v5544_v9  ;;  %v5546_v10 = vld [vmem:[%s19836_s6 + $0xa54] sm:$0xf]  ;;  %v5548_v11 = vld [vmem:[%s19836_s6 + $0xa70] sm:$0xf] }
 0x2c5   :  { %v5550_v12 = vld [vmem:[%s19836_s6 + $0xa58] sm:$0xf]  ;;  %5547 = vst [vmem:[#allocation3 + $0xa60] sm:$0xf] %v5546_v10  ;;  %5549 = vst [vmem:[#allocation3 + $0xa64] sm:$0xf] %v5548_v11 }
 0x2c6   :  { %5551 = vst [vmem:[#allocation3 + $0xa68] sm:$0xf] %v5550_v12  ;;  %v5552_v13 = vld [vmem:[%s19836_s6 + $0xa74] sm:$0xf]  ;;  %v5554_v14 = vld [vmem:[%s19836_s6 + $0xa5c] sm:$0xf] }
 0x2c7   :  { %v5556_v15 = vld [vmem:[%s19836_s6 + $0xa78] sm:$0xf]  ;;  %5553 = vst [vmem:[#allocation3 + $0xa6c] sm:$0xf] %v5552_v13  ;;  %5555 = vst [vmem:[#allocation3 + $0xa70] sm:$0xf] %v5554_v14 }
 0x2c8   :  { %5557 = vst [vmem:[#allocation3 + $0xa74] sm:$0xf] %v5556_v15  ;;  %v5558_v16 = vld [vmem:[%s19836_s6 + $0xa60] sm:$0xf]  ;;  %v5564_v18 = vld [vmem:[%s19836_s6 + $0xa9c] sm:$0xf] }
 0x2c9   :  { %5559 = vst [vmem:[#allocation3 + $0xa78] sm:$0xf] %v5558_v16  ;;  %5561 = vst [vmem:[#allocation3 + $0xa7c] sm:$0xff] %v5560_v17   ;;  %v5566_v19 = vld [vmem:[%s19836_s6 + $0xa84] sm:$0xf]  ;;  %v5616_v43 = vld [vmem:[%s19836_s6 + $0xaec] sm:$0xff]  }
 0x2ca   :  { %5565 = vst [vmem:[#allocation3 + $0xa84] sm:$0xf] %v5564_v18  ;;  %v5568_v20 = vld [vmem:[%s19836_s6 + $0xaa0] sm:$0xf]  ;;  %v5570_v21 = vld [vmem:[%s19836_s6 + $0xa88] sm:$0xf] }
 0x2cb   :  { %5567 = vst [vmem:[#allocation3 + $0xa88] sm:$0xf] %v5566_v19  ;;  %5569 = vst [vmem:[#allocation3 + $0xa8c] sm:$0xf] %v5568_v20  ;;  %v5572_v22 = vld [vmem:[%s19836_s6 + $0xaa4] sm:$0xf] }
 0x2cc   :  { %5571 = vst [vmem:[#allocation3 + $0xa90] sm:$0xf] %v5570_v21  ;;  %v5574_v23 = vld [vmem:[%s19836_s6 + $0xa8c] sm:$0xf]  ;;  %v5576_v24 = vld [vmem:[%s19836_s6 + $0xaa8] sm:$0xf] }
 0x2cd   :  { %5573 = vst [vmem:[#allocation3 + $0xa94] sm:$0xf] %v5572_v22  ;;  %5575 = vst [vmem:[#allocation3 + $0xa98] sm:$0xf] %v5574_v23  ;;  %v5578_v25 = vld [vmem:[%s19836_s6 + $0xa90] sm:$0xf] }
 0x2ce   :  { %5577 = vst [vmem:[#allocation3 + $0xa9c] sm:$0xf] %v5576_v24  ;;  %v5580_v26 = vld [vmem:[%s19836_s6 + $0xaac] sm:$0xf]  ;;  %v5582_v27 = vld [vmem:[%s19836_s6 + $0xa94] sm:$0xf] }
 0x2cf   :  { %5579 = vst [vmem:[#allocation3 + $0xaa0] sm:$0xf] %v5578_v25  ;;  %5581 = vst [vmem:[#allocation3 + $0xaa4] sm:$0xf] %v5580_v26  ;;  %v5584_v28 = vld [vmem:[%s19836_s6 + $0xab0] sm:$0xf] }
 0x2d0   :  { %5583 = vst [vmem:[#allocation3 + $0xaa8] sm:$0xf] %v5582_v27  ;;  %v5586_v29 = vld [vmem:[%s19836_s6 + $0xa98] sm:$0xf]  ;;  %5585 = vst [vmem:[#allocation3 + $0xaac] sm:$0xf] %v5584_v28 }
 0x2d1   :  { %5587 = vst [vmem:[#allocation3 + $0xab0] sm:$0xf] %v5586_v29  ;;  %5589 = vst [vmem:[#allocation3 + $0xab4] sm:$0xff] %v5588_v30   ;;  %v5592_v31 = vld [vmem:[%s19836_s6 + $0xad4] sm:$0xf]  ;;  %v5644_v56 = vld [vmem:[%s19836_s6 + $0xb24] sm:$0xff]  }
 0x2d2   :  { %v5594_v32 = vld [vmem:[%s19836_s6 + $0xabc] sm:$0xf]  ;;  %v5596_v33 = vld [vmem:[%s19836_s6 + $0xad8] sm:$0xf]  ;;  %5593 = vst [vmem:[#allocation3 + $0xabc] sm:$0xf] %v5592_v31 }
 0x2d3   :  { %5595 = vst [vmem:[#allocation3 + $0xac0] sm:$0xf] %v5594_v32  ;;  %5597 = vst [vmem:[#allocation3 + $0xac4] sm:$0xf] %v5596_v33  ;;  %v5598_v34 = vld [vmem:[%s19836_s6 + $0xac0] sm:$0xf] }
 0x2d4   :  { %v5600_v35 = vld [vmem:[%s19836_s6 + $0xadc] sm:$0xf]  ;;  %v5602_v36 = vld [vmem:[%s19836_s6 + $0xac4] sm:$0xf]  ;;  %5599 = vst [vmem:[#allocation3 + $0xac8] sm:$0xf] %v5598_v34 }
 0x2d5   :  { %5601 = vst [vmem:[#allocation3 + $0xacc] sm:$0xf] %v5600_v35  ;;  %5603 = vst [vmem:[#allocation3 + $0xad0] sm:$0xf] %v5602_v36  ;;  %v5604_v37 = vld [vmem:[%s19836_s6 + $0xae0] sm:$0xf] }
 0x2d6   :  { %v5606_v38 = vld [vmem:[%s19836_s6 + $0xac8] sm:$0xf]  ;;  %v5608_v39 = vld [vmem:[%s19836_s6 + $0xae4] sm:$0xf]  ;;  %5605 = vst [vmem:[#allocation3 + $0xad4] sm:$0xf] %v5604_v37 }
 0x2d7   :  { %5607 = vst [vmem:[#allocation3 + $0xad8] sm:$0xf] %v5606_v38  ;;  %5609 = vst [vmem:[#allocation3 + $0xadc] sm:$0xf] %v5608_v39  ;;  %v5610_v40 = vld [vmem:[%s19836_s6 + $0xacc] sm:$0xf] }
 0x2d8   :  { %v5612_v41 = vld [vmem:[%s19836_s6 + $0xae8] sm:$0xf]  ;;  %v5614_v42 = vld [vmem:[%s19836_s6 + $0xad0] sm:$0xf]  ;;  %5611 = vst [vmem:[#allocation3 + $0xae0] sm:$0xf] %v5610_v40 }
 0x2d9   :  { %5613 = vst [vmem:[#allocation3 + $0xae4] sm:$0xf] %v5612_v41  ;;  %5615 = vst [vmem:[#allocation3 + $0xae8] sm:$0xf] %v5614_v42  ;;  %v5620_v44 = vld [vmem:[%s19836_s6 + $0xb0c] sm:$0xf] }
 0x2da   :  { %v5622_v45 = vld [vmem:[%s19836_s6 + $0xaf4] sm:$0xf]  ;;  %5617 = vst [vmem:[#allocation3 + $0xaec] sm:$0xff] %v5616_v43   ;;  %5621 = vst [vmem:[#allocation3 + $0xaf4] sm:$0xf] %v5620_v44  ;;  %v5672_v5 = vld [vmem:[%s19836_s6 + $0xb5c] sm:$0xff]  }
 0x2db   :  { %5623 = vst [vmem:[#allocation3 + $0xaf8] sm:$0xf] %v5622_v45  ;;  %v5624_v46 = vld [vmem:[%s19836_s6 + $0xb10] sm:$0xf]  ;;  %v5626_v47 = vld [vmem:[%s19836_s6 + $0xaf8] sm:$0xf] }
 0x2dc   :  { %v5628_v48 = vld [vmem:[%s19836_s6 + $0xb14] sm:$0xf]  ;;  %5625 = vst [vmem:[#allocation3 + $0xafc] sm:$0xf] %v5624_v46  ;;  %5627 = vst [vmem:[#allocation3 + $0xb00] sm:$0xf] %v5626_v47 }
 0x2dd   :  { %5629 = vst [vmem:[#allocation3 + $0xb04] sm:$0xf] %v5628_v48  ;;  %v5630_v49 = vld [vmem:[%s19836_s6 + $0xafc] sm:$0xf]  ;;  %v5632_v50 = vld [vmem:[%s19836_s6 + $0xb18] sm:$0xf] }
 0x2de   :  { %v5634_v51 = vld [vmem:[%s19836_s6 + $0xb00] sm:$0xf]  ;;  %5631 = vst [vmem:[#allocation3 + $0xb08] sm:$0xf] %v5630_v49  ;;  %5633 = vst [vmem:[#allocation3 + $0xb0c] sm:$0xf] %v5632_v50 }
 0x2df   :  { %5635 = vst [vmem:[#allocation3 + $0xb10] sm:$0xf] %v5634_v51  ;;  %v5636_v52 = vld [vmem:[%s19836_s6 + $0xb1c] sm:$0xf]  ;;  %v5638_v53 = vld [vmem:[%s19836_s6 + $0xb04] sm:$0xf] }
 0x2e0   :  { %v5640_v54 = vld [vmem:[%s19836_s6 + $0xb20] sm:$0xf]  ;;  %5637 = vst [vmem:[#allocation3 + $0xb14] sm:$0xf] %v5636_v52  ;;  %5639 = vst [vmem:[#allocation3 + $0xb18] sm:$0xf] %v5638_v53 }
 0x2e1   :  { %5641 = vst [vmem:[#allocation3 + $0xb1c] sm:$0xf] %v5640_v54  ;;  %v5642_v55 = vld [vmem:[%s19836_s6 + $0xb08] sm:$0xf]  ;;  %v5648_v57 = vld [vmem:[%s19836_s6 + $0xb44] sm:$0xf] }
 0x2e2   :  { %5643 = vst [vmem:[#allocation3 + $0xb20] sm:$0xf] %v5642_v55  ;;  %5645 = vst [vmem:[#allocation3 + $0xb24] sm:$0xff] %v5644_v56   ;;  %v5650_v58 = vld [vmem:[%s19836_s6 + $0xb2c] sm:$0xf]  ;;  %v5700_v18 = vld [vmem:[%s19836_s6 + $0xb94] sm:$0xff]  }
 0x2e3   :  { %5649 = vst [vmem:[#allocation3 + $0xb2c] sm:$0xf] %v5648_v57  ;;  %v5652_v59 = vld [vmem:[%s19836_s6 + $0xb48] sm:$0xf]  ;;  %v5654_v60 = vld [vmem:[%s19836_s6 + $0xb30] sm:$0xf] }
 0x2e4   :  { %5651 = vst [vmem:[#allocation3 + $0xb30] sm:$0xf] %v5650_v58  ;;  %5653 = vst [vmem:[#allocation3 + $0xb34] sm:$0xf] %v5652_v59  ;;  %v5656_v61 = vld [vmem:[%s19836_s6 + $0xb4c] sm:$0xf] }
 0x2e5   :  { %5655 = vst [vmem:[#allocation3 + $0xb38] sm:$0xf] %v5654_v60  ;;  %v5658_v62 = vld [vmem:[%s19836_s6 + $0xb34] sm:$0xf]  ;;  %v5660_v63 = vld [vmem:[%s19836_s6 + $0xb50] sm:$0xf] }
 0x2e6   :  { %5657 = vst [vmem:[#allocation3 + $0xb3c] sm:$0xf] %v5656_v61  ;;  %5659 = vst [vmem:[#allocation3 + $0xb40] sm:$0xf] %v5658_v62  ;;  %v5662_v0 = vld [vmem:[%s19836_s6 + $0xb38] sm:$0xf] }
 0x2e7   :  { %5661 = vst [vmem:[#allocation3 + $0xb44] sm:$0xf] %v5660_v63  ;;  %v5664_v1 = vld [vmem:[%s19836_s6 + $0xb54] sm:$0xf]  ;;  %v5666_v2 = vld [vmem:[%s19836_s6 + $0xb3c] sm:$0xf] }
 0x2e8   :  { %5663 = vst [vmem:[#allocation3 + $0xb48] sm:$0xf] %v5662_v0  ;;  %5665 = vst [vmem:[#allocation3 + $0xb4c] sm:$0xf] %v5664_v1  ;;  %v5668_v3 = vld [vmem:[%s19836_s6 + $0xb58] sm:$0xf] }
 0x2e9   :  { %5667 = vst [vmem:[#allocation3 + $0xb50] sm:$0xf] %v5666_v2  ;;  %v5670_v4 = vld [vmem:[%s19836_s6 + $0xb40] sm:$0xf]  ;;  %5669 = vst [vmem:[#allocation3 + $0xb54] sm:$0xf] %v5668_v3 }
 0x2ea   :  { %5671 = vst [vmem:[#allocation3 + $0xb58] sm:$0xf] %v5670_v4  ;;  %5673 = vst [vmem:[#allocation3 + $0xb5c] sm:$0xff] %v5672_v5   ;;  %v5676_v6 = vld [vmem:[%s19836_s6 + $0xb7c] sm:$0xf]  ;;  %v5728_v31 = vld [vmem:[%s19836_s6 + $0xbcc] sm:$0xff]  }
 0x2eb   :  { %v5678_v7 = vld [vmem:[%s19836_s6 + $0xb64] sm:$0xf]  ;;  %v5680_v8 = vld [vmem:[%s19836_s6 + $0xb80] sm:$0xf]  ;;  %5677 = vst [vmem:[#allocation3 + $0xb64] sm:$0xf] %v5676_v6 }
 0x2ec   :  { %5679 = vst [vmem:[#allocation3 + $0xb68] sm:$0xf] %v5678_v7  ;;  %5681 = vst [vmem:[#allocation3 + $0xb6c] sm:$0xf] %v5680_v8  ;;  %v5682_v9 = vld [vmem:[%s19836_s6 + $0xb68] sm:$0xf] }
 0x2ed   :  { %v5684_v10 = vld [vmem:[%s19836_s6 + $0xb84] sm:$0xf]  ;;  %v5686_v11 = vld [vmem:[%s19836_s6 + $0xb6c] sm:$0xf]  ;;  %5683 = vst [vmem:[#allocation3 + $0xb70] sm:$0xf] %v5682_v9 }
 0x2ee   :  { %5685 = vst [vmem:[#allocation3 + $0xb74] sm:$0xf] %v5684_v10  ;;  %5687 = vst [vmem:[#allocation3 + $0xb78] sm:$0xf] %v5686_v11  ;;  %v5688_v12 = vld [vmem:[%s19836_s6 + $0xb88] sm:$0xf] }
 0x2ef   :  { %v5690_v13 = vld [vmem:[%s19836_s6 + $0xb70] sm:$0xf]  ;;  %v5692_v14 = vld [vmem:[%s19836_s6 + $0xb8c] sm:$0xf]  ;;  %5689 = vst [vmem:[#allocation3 + $0xb7c] sm:$0xf] %v5688_v12 }
 0x2f0   :  { %5691 = vst [vmem:[#allocation3 + $0xb80] sm:$0xf] %v5690_v13  ;;  %5693 = vst [vmem:[#allocation3 + $0xb84] sm:$0xf] %v5692_v14  ;;  %v5694_v15 = vld [vmem:[%s19836_s6 + $0xb74] sm:$0xf] }
 0x2f1   :  { %v5696_v16 = vld [vmem:[%s19836_s6 + $0xb90] sm:$0xf]  ;;  %v5698_v17 = vld [vmem:[%s19836_s6 + $0xb78] sm:$0xf]  ;;  %5695 = vst [vmem:[#allocation3 + $0xb88] sm:$0xf] %v5694_v15 }
 0x2f2   :  { %5697 = vst [vmem:[#allocation3 + $0xb8c] sm:$0xf] %v5696_v16  ;;  %5699 = vst [vmem:[#allocation3 + $0xb90] sm:$0xf] %v5698_v17  ;;  %v5704_v19 = vld [vmem:[%s19836_s6 + $0xbb4] sm:$0xf] }
 0x2f3   :  { %v5706_v20 = vld [vmem:[%s19836_s6 + $0xb9c] sm:$0xf]  ;;  %5701 = vst [vmem:[#allocation3 + $0xb94] sm:$0xff] %v5700_v18   ;;  %5705 = vst [vmem:[#allocation3 + $0xb9c] sm:$0xf] %v5704_v19  ;;  %v5756_v44 = vld [vmem:[%s19836_s6 + $0xc04] sm:$0xff]  }
 0x2f4   :  { %5707 = vst [vmem:[#allocation3 + $0xba0] sm:$0xf] %v5706_v20  ;;  %v5708_v21 = vld [vmem:[%s19836_s6 + $0xbb8] sm:$0xf]  ;;  %v5710_v22 = vld [vmem:[%s19836_s6 + $0xba0] sm:$0xf] }
 0x2f5   :  { %v5712_v23 = vld [vmem:[%s19836_s6 + $0xbbc] sm:$0xf]  ;;  %5709 = vst [vmem:[#allocation3 + $0xba4] sm:$0xf] %v5708_v21  ;;  %5711 = vst [vmem:[#allocation3 + $0xba8] sm:$0xf] %v5710_v22 }
 0x2f6   :  { %5713 = vst [vmem:[#allocation3 + $0xbac] sm:$0xf] %v5712_v23  ;;  %v5714_v24 = vld [vmem:[%s19836_s6 + $0xba4] sm:$0xf]  ;;  %v5716_v25 = vld [vmem:[%s19836_s6 + $0xbc0] sm:$0xf] }
 0x2f7   :  { %v5718_v26 = vld [vmem:[%s19836_s6 + $0xba8] sm:$0xf]  ;;  %5715 = vst [vmem:[#allocation3 + $0xbb0] sm:$0xf] %v5714_v24  ;;  %5717 = vst [vmem:[#allocation3 + $0xbb4] sm:$0xf] %v5716_v25 }
 0x2f8   :  { %5719 = vst [vmem:[#allocation3 + $0xbb8] sm:$0xf] %v5718_v26  ;;  %v5720_v27 = vld [vmem:[%s19836_s6 + $0xbc4] sm:$0xf]  ;;  %v5722_v28 = vld [vmem:[%s19836_s6 + $0xbac] sm:$0xf] }
 0x2f9   :  { %v5724_v29 = vld [vmem:[%s19836_s6 + $0xbc8] sm:$0xf]  ;;  %5721 = vst [vmem:[#allocation3 + $0xbbc] sm:$0xf] %v5720_v27  ;;  %5723 = vst [vmem:[#allocation3 + $0xbc0] sm:$0xf] %v5722_v28 }
 0x2fa   :  { %5725 = vst [vmem:[#allocation3 + $0xbc4] sm:$0xf] %v5724_v29  ;;  %v5726_v30 = vld [vmem:[%s19836_s6 + $0xbb0] sm:$0xf]  ;;  %v5732_v32 = vld [vmem:[%s19836_s6 + $0xbec] sm:$0xf] }
 0x2fb   :  { %5727 = vst [vmem:[#allocation3 + $0xbc8] sm:$0xf] %v5726_v30  ;;  %5729 = vst [vmem:[#allocation3 + $0xbcc] sm:$0xff] %v5728_v31   ;;  %v5734_v33 = vld [vmem:[%s19836_s6 + $0xbd4] sm:$0xf]  ;;  %v5784_v57 = vld [vmem:[%s19836_s6 + $0xc3c] sm:$0xff]  }
 0x2fc   :  { %5733 = vst [vmem:[#allocation3 + $0xbd4] sm:$0xf] %v5732_v32  ;;  %v5736_v34 = vld [vmem:[%s19836_s6 + $0xbf0] sm:$0xf]  ;;  %v5738_v35 = vld [vmem:[%s19836_s6 + $0xbd8] sm:$0xf] }
 0x2fd   :  { %5735 = vst [vmem:[#allocation3 + $0xbd8] sm:$0xf] %v5734_v33  ;;  %5737 = vst [vmem:[#allocation3 + $0xbdc] sm:$0xf] %v5736_v34  ;;  %v5740_v36 = vld [vmem:[%s19836_s6 + $0xbf4] sm:$0xf] }
 0x2fe   :  { %5739 = vst [vmem:[#allocation3 + $0xbe0] sm:$0xf] %v5738_v35  ;;  %v5742_v37 = vld [vmem:[%s19836_s6 + $0xbdc] sm:$0xf]  ;;  %v5744_v38 = vld [vmem:[%s19836_s6 + $0xbf8] sm:$0xf] }
 0x2ff   :  { %5741 = vst [vmem:[#allocation3 + $0xbe4] sm:$0xf] %v5740_v36  ;;  %5743 = vst [vmem:[#allocation3 + $0xbe8] sm:$0xf] %v5742_v37  ;;  %v5746_v39 = vld [vmem:[%s19836_s6 + $0xbe0] sm:$0xf] }
 0x300   :  { %5745 = vst [vmem:[#allocation3 + $0xbec] sm:$0xf] %v5744_v38  ;;  %v5748_v40 = vld [vmem:[%s19836_s6 + $0xbfc] sm:$0xf]  ;;  %v5750_v41 = vld [vmem:[%s19836_s6 + $0xbe4] sm:$0xf] }
 0x301   :  { %5747 = vst [vmem:[#allocation3 + $0xbf0] sm:$0xf] %v5746_v39  ;;  %5749 = vst [vmem:[#allocation3 + $0xbf4] sm:$0xf] %v5748_v40  ;;  %v5752_v42 = vld [vmem:[%s19836_s6 + $0xc00] sm:$0xf] }
 0x302   :  { %5751 = vst [vmem:[#allocation3 + $0xbf8] sm:$0xf] %v5750_v41  ;;  %v5754_v43 = vld [vmem:[%s19836_s6 + $0xbe8] sm:$0xf]  ;;  %5753 = vst [vmem:[#allocation3 + $0xbfc] sm:$0xf] %v5752_v42 }
 0x303   :  { %5755 = vst [vmem:[#allocation3 + $0xc00] sm:$0xf] %v5754_v43  ;;  %5757 = vst [vmem:[#allocation3 + $0xc04] sm:$0xff] %v5756_v44   ;;  %v5760_v45 = vld [vmem:[%s19836_s6 + $0xc24] sm:$0xf]  ;;  %v5812_v6 = vld [vmem:[%s19836_s6 + $0xc74] sm:$0xff]  }
 0x304   :  { %v5762_v46 = vld [vmem:[%s19836_s6 + $0xc0c] sm:$0xf]  ;;  %v5764_v47 = vld [vmem:[%s19836_s6 + $0xc28] sm:$0xf]  ;;  %5761 = vst [vmem:[#allocation3 + $0xc0c] sm:$0xf] %v5760_v45 }
 0x305   :  { %5763 = vst [vmem:[#allocation3 + $0xc10] sm:$0xf] %v5762_v46  ;;  %5765 = vst [vmem:[#allocation3 + $0xc14] sm:$0xf] %v5764_v47  ;;  %v5766_v48 = vld [vmem:[%s19836_s6 + $0xc10] sm:$0xf] }
 0x306   :  { %v5768_v49 = vld [vmem:[%s19836_s6 + $0xc2c] sm:$0xf]  ;;  %v5770_v50 = vld [vmem:[%s19836_s6 + $0xc14] sm:$0xf]  ;;  %5767 = vst [vmem:[#allocation3 + $0xc18] sm:$0xf] %v5766_v48 }
 0x307   :  { %5769 = vst [vmem:[#allocation3 + $0xc1c] sm:$0xf] %v5768_v49  ;;  %5771 = vst [vmem:[#allocation3 + $0xc20] sm:$0xf] %v5770_v50  ;;  %v5772_v51 = vld [vmem:[%s19836_s6 + $0xc30] sm:$0xf] }
 0x308   :  { %v5774_v52 = vld [vmem:[%s19836_s6 + $0xc18] sm:$0xf]  ;;  %v5776_v53 = vld [vmem:[%s19836_s6 + $0xc34] sm:$0xf]  ;;  %5773 = vst [vmem:[#allocation3 + $0xc24] sm:$0xf] %v5772_v51 }
 0x309   :  { %5775 = vst [vmem:[#allocation3 + $0xc28] sm:$0xf] %v5774_v52  ;;  %5777 = vst [vmem:[#allocation3 + $0xc2c] sm:$0xf] %v5776_v53  ;;  %v5778_v54 = vld [vmem:[%s19836_s6 + $0xc1c] sm:$0xf] }
 0x30a   :  { %v5780_v55 = vld [vmem:[%s19836_s6 + $0xc38] sm:$0xf]  ;;  %v5782_v56 = vld [vmem:[%s19836_s6 + $0xc20] sm:$0xf]  ;;  %5779 = vst [vmem:[#allocation3 + $0xc30] sm:$0xf] %v5778_v54 }
 0x30b   :  { %5781 = vst [vmem:[#allocation3 + $0xc34] sm:$0xf] %v5780_v55  ;;  %5783 = vst [vmem:[#allocation3 + $0xc38] sm:$0xf] %v5782_v56  ;;  %v5788_v58 = vld [vmem:[%s19836_s6 + $0xc5c] sm:$0xf] }
 0x30c   :  { %v5790_v59 = vld [vmem:[%s19836_s6 + $0xc44] sm:$0xf]  ;;  %5785 = vst [vmem:[#allocation3 + $0xc3c] sm:$0xff] %v5784_v57   ;;  %5789 = vst [vmem:[#allocation3 + $0xc44] sm:$0xf] %v5788_v58  ;;  %v5840_v19 = vld [vmem:[%s19836_s6 + $0xcac] sm:$0xff]  }
 0x30d   :  { %5791 = vst [vmem:[#allocation3 + $0xc48] sm:$0xf] %v5790_v59  ;;  %v5792_v60 = vld [vmem:[%s19836_s6 + $0xc60] sm:$0xf]  ;;  %v5794_v61 = vld [vmem:[%s19836_s6 + $0xc48] sm:$0xf] }
 0x30e   :  { %v5796_v62 = vld [vmem:[%s19836_s6 + $0xc64] sm:$0xf]  ;;  %5793 = vst [vmem:[#allocation3 + $0xc4c] sm:$0xf] %v5792_v60  ;;  %5795 = vst [vmem:[#allocation3 + $0xc50] sm:$0xf] %v5794_v61 }
 0x30f   :  { %5797 = vst [vmem:[#allocation3 + $0xc54] sm:$0xf] %v5796_v62  ;;  %v5798_v63 = vld [vmem:[%s19836_s6 + $0xc4c] sm:$0xf]  ;;  %v5800_v0 = vld [vmem:[%s19836_s6 + $0xc68] sm:$0xf] }
 0x310   :  { %v5802_v1 = vld [vmem:[%s19836_s6 + $0xc50] sm:$0xf]  ;;  %5799 = vst [vmem:[#allocation3 + $0xc58] sm:$0xf] %v5798_v63  ;;  %5801 = vst [vmem:[#allocation3 + $0xc5c] sm:$0xf] %v5800_v0 }
 0x311   :  { %5803 = vst [vmem:[#allocation3 + $0xc60] sm:$0xf] %v5802_v1  ;;  %v5804_v2 = vld [vmem:[%s19836_s6 + $0xc6c] sm:$0xf]  ;;  %v5806_v3 = vld [vmem:[%s19836_s6 + $0xc54] sm:$0xf] }
 0x312   :  { %v5808_v4 = vld [vmem:[%s19836_s6 + $0xc70] sm:$0xf]  ;;  %5805 = vst [vmem:[#allocation3 + $0xc64] sm:$0xf] %v5804_v2  ;;  %5807 = vst [vmem:[#allocation3 + $0xc68] sm:$0xf] %v5806_v3 }
 0x313   :  { %5809 = vst [vmem:[#allocation3 + $0xc6c] sm:$0xf] %v5808_v4  ;;  %v5810_v5 = vld [vmem:[%s19836_s6 + $0xc58] sm:$0xf]  ;;  %v5816_v7 = vld [vmem:[%s19836_s6 + $0xc94] sm:$0xf] }
 0x314   :  { %5811 = vst [vmem:[#allocation3 + $0xc70] sm:$0xf] %v5810_v5  ;;  %5813 = vst [vmem:[#allocation3 + $0xc74] sm:$0xff] %v5812_v6   ;;  %v5818_v8 = vld [vmem:[%s19836_s6 + $0xc7c] sm:$0xf]  ;;  %v5868_v32 = vld [vmem:[%s19836_s6 + $0xce4] sm:$0xff]  }
 0x315   :  { %5817 = vst [vmem:[#allocation3 + $0xc7c] sm:$0xf] %v5816_v7  ;;  %v5820_v9 = vld [vmem:[%s19836_s6 + $0xc98] sm:$0xf]  ;;  %v5822_v10 = vld [vmem:[%s19836_s6 + $0xc80] sm:$0xf] }
 0x316   :  { %5819 = vst [vmem:[#allocation3 + $0xc80] sm:$0xf] %v5818_v8  ;;  %5821 = vst [vmem:[#allocation3 + $0xc84] sm:$0xf] %v5820_v9  ;;  %v5824_v11 = vld [vmem:[%s19836_s6 + $0xc9c] sm:$0xf] }
 0x317   :  { %5823 = vst [vmem:[#allocation3 + $0xc88] sm:$0xf] %v5822_v10  ;;  %v5826_v12 = vld [vmem:[%s19836_s6 + $0xc84] sm:$0xf]  ;;  %v5828_v13 = vld [vmem:[%s19836_s6 + $0xca0] sm:$0xf] }
 0x318   :  { %5825 = vst [vmem:[#allocation3 + $0xc8c] sm:$0xf] %v5824_v11  ;;  %5827 = vst [vmem:[#allocation3 + $0xc90] sm:$0xf] %v5826_v12  ;;  %v5830_v14 = vld [vmem:[%s19836_s6 + $0xc88] sm:$0xf] }
 0x319   :  { %5829 = vst [vmem:[#allocation3 + $0xc94] sm:$0xf] %v5828_v13  ;;  %v5832_v15 = vld [vmem:[%s19836_s6 + $0xca4] sm:$0xf]  ;;  %v5834_v16 = vld [vmem:[%s19836_s6 + $0xc8c] sm:$0xf] }
 0x31a   :  { %5831 = vst [vmem:[#allocation3 + $0xc98] sm:$0xf] %v5830_v14  ;;  %5833 = vst [vmem:[#allocation3 + $0xc9c] sm:$0xf] %v5832_v15  ;;  %v5836_v17 = vld [vmem:[%s19836_s6 + $0xca8] sm:$0xf] }
 0x31b   :  { %5835 = vst [vmem:[#allocation3 + $0xca0] sm:$0xf] %v5834_v16  ;;  %v5838_v18 = vld [vmem:[%s19836_s6 + $0xc90] sm:$0xf]  ;;  %5837 = vst [vmem:[#allocation3 + $0xca4] sm:$0xf] %v5836_v17 }
 0x31c   :  { %5839 = vst [vmem:[#allocation3 + $0xca8] sm:$0xf] %v5838_v18  ;;  %5841 = vst [vmem:[#allocation3 + $0xcac] sm:$0xff] %v5840_v19   ;;  %v5844_v20 = vld [vmem:[%s19836_s6 + $0xccc] sm:$0xf]  ;;  %v5896_v45 = vld [vmem:[%s19836_s6 + $0xd1c] sm:$0xff]  }
 0x31d   :  { %v5846_v21 = vld [vmem:[%s19836_s6 + $0xcb4] sm:$0xf]  ;;  %v5848_v22 = vld [vmem:[%s19836_s6 + $0xcd0] sm:$0xf]  ;;  %5845 = vst [vmem:[#allocation3 + $0xcb4] sm:$0xf] %v5844_v20 }
 0x31e   :  { %5847 = vst [vmem:[#allocation3 + $0xcb8] sm:$0xf] %v5846_v21  ;;  %5849 = vst [vmem:[#allocation3 + $0xcbc] sm:$0xf] %v5848_v22  ;;  %v5850_v23 = vld [vmem:[%s19836_s6 + $0xcb8] sm:$0xf] }
 0x31f   :  { %v5852_v24 = vld [vmem:[%s19836_s6 + $0xcd4] sm:$0xf]  ;;  %v5854_v25 = vld [vmem:[%s19836_s6 + $0xcbc] sm:$0xf]  ;;  %5851 = vst [vmem:[#allocation3 + $0xcc0] sm:$0xf] %v5850_v23 }
 0x320   :  { %5853 = vst [vmem:[#allocation3 + $0xcc4] sm:$0xf] %v5852_v24  ;;  %5855 = vst [vmem:[#allocation3 + $0xcc8] sm:$0xf] %v5854_v25  ;;  %v5856_v26 = vld [vmem:[%s19836_s6 + $0xcd8] sm:$0xf] }
 0x321   :  { %v5858_v27 = vld [vmem:[%s19836_s6 + $0xcc0] sm:$0xf]  ;;  %v5860_v28 = vld [vmem:[%s19836_s6 + $0xcdc] sm:$0xf]  ;;  %5857 = vst [vmem:[#allocation3 + $0xccc] sm:$0xf] %v5856_v26 }
 0x322   :  { %5859 = vst [vmem:[#allocation3 + $0xcd0] sm:$0xf] %v5858_v27  ;;  %5861 = vst [vmem:[#allocation3 + $0xcd4] sm:$0xf] %v5860_v28  ;;  %v5862_v29 = vld [vmem:[%s19836_s6 + $0xcc4] sm:$0xf] }
 0x323   :  { %v5864_v30 = vld [vmem:[%s19836_s6 + $0xce0] sm:$0xf]  ;;  %v5866_v31 = vld [vmem:[%s19836_s6 + $0xcc8] sm:$0xf]  ;;  %5863 = vst [vmem:[#allocation3 + $0xcd8] sm:$0xf] %v5862_v29 }
 0x324   :  { %5865 = vst [vmem:[#allocation3 + $0xcdc] sm:$0xf] %v5864_v30  ;;  %5867 = vst [vmem:[#allocation3 + $0xce0] sm:$0xf] %v5866_v31  ;;  %v5872_v33 = vld [vmem:[%s19836_s6 + $0xd04] sm:$0xf] }
 0x325   :  { %v5874_v34 = vld [vmem:[%s19836_s6 + $0xcec] sm:$0xf]  ;;  %5869 = vst [vmem:[#allocation3 + $0xce4] sm:$0xff] %v5868_v32   ;;  %5873 = vst [vmem:[#allocation3 + $0xcec] sm:$0xf] %v5872_v33  ;;  %v5924_v58 = vld [vmem:[%s19836_s6 + $0xd54] sm:$0xff]  }
 0x326   :  { %5875 = vst [vmem:[#allocation3 + $0xcf0] sm:$0xf] %v5874_v34  ;;  %v5876_v35 = vld [vmem:[%s19836_s6 + $0xd08] sm:$0xf]  ;;  %v5878_v36 = vld [vmem:[%s19836_s6 + $0xcf0] sm:$0xf] }
 0x327   :  { %v5880_v37 = vld [vmem:[%s19836_s6 + $0xd0c] sm:$0xf]  ;;  %5877 = vst [vmem:[#allocation3 + $0xcf4] sm:$0xf] %v5876_v35  ;;  %5879 = vst [vmem:[#allocation3 + $0xcf8] sm:$0xf] %v5878_v36 }
 0x328   :  { %5881 = vst [vmem:[#allocation3 + $0xcfc] sm:$0xf] %v5880_v37  ;;  %v5882_v38 = vld [vmem:[%s19836_s6 + $0xcf4] sm:$0xf]  ;;  %v5884_v39 = vld [vmem:[%s19836_s6 + $0xd10] sm:$0xf] }
 0x329   :  { %v5886_v40 = vld [vmem:[%s19836_s6 + $0xcf8] sm:$0xf]  ;;  %5883 = vst [vmem:[#allocation3 + $0xd00] sm:$0xf] %v5882_v38  ;;  %5885 = vst [vmem:[#allocation3 + $0xd04] sm:$0xf] %v5884_v39 }
 0x32a   :  { %5887 = vst [vmem:[#allocation3 + $0xd08] sm:$0xf] %v5886_v40  ;;  %v5888_v41 = vld [vmem:[%s19836_s6 + $0xd14] sm:$0xf]  ;;  %v5890_v42 = vld [vmem:[%s19836_s6 + $0xcfc] sm:$0xf] }
 0x32b   :  { %v5892_v43 = vld [vmem:[%s19836_s6 + $0xd18] sm:$0xf]  ;;  %5889 = vst [vmem:[#allocation3 + $0xd0c] sm:$0xf] %v5888_v41  ;;  %5891 = vst [vmem:[#allocation3 + $0xd10] sm:$0xf] %v5890_v42 }
 0x32c   :  { %5893 = vst [vmem:[#allocation3 + $0xd14] sm:$0xf] %v5892_v43  ;;  %v5894_v44 = vld [vmem:[%s19836_s6 + $0xd00] sm:$0xf]  ;;  %v5900_v46 = vld [vmem:[%s19836_s6 + $0xd3c] sm:$0xf] }
 0x32d   :  { %5895 = vst [vmem:[#allocation3 + $0xd18] sm:$0xf] %v5894_v44  ;;  %5897 = vst [vmem:[#allocation3 + $0xd1c] sm:$0xff] %v5896_v45   ;;  %v5902_v47 = vld [vmem:[%s19836_s6 + $0xd24] sm:$0xf]  ;;  %v5952_v7 = vld [vmem:[%s19836_s6 + $0xd8c] sm:$0xff]  }
 0x32e   :  { %5901 = vst [vmem:[#allocation3 + $0xd24] sm:$0xf] %v5900_v46  ;;  %v5904_v48 = vld [vmem:[%s19836_s6 + $0xd40] sm:$0xf]  ;;  %v5906_v49 = vld [vmem:[%s19836_s6 + $0xd28] sm:$0xf] }
 0x32f   :  { %5903 = vst [vmem:[#allocation3 + $0xd28] sm:$0xf] %v5902_v47  ;;  %5905 = vst [vmem:[#allocation3 + $0xd2c] sm:$0xf] %v5904_v48  ;;  %v5908_v50 = vld [vmem:[%s19836_s6 + $0xd44] sm:$0xf] }
 0x330   :  { %5907 = vst [vmem:[#allocation3 + $0xd30] sm:$0xf] %v5906_v49  ;;  %v5910_v51 = vld [vmem:[%s19836_s6 + $0xd2c] sm:$0xf]  ;;  %v5912_v52 = vld [vmem:[%s19836_s6 + $0xd48] sm:$0xf] }
 0x331   :  { %5909 = vst [vmem:[#allocation3 + $0xd34] sm:$0xf] %v5908_v50  ;;  %5911 = vst [vmem:[#allocation3 + $0xd38] sm:$0xf] %v5910_v51  ;;  %v5914_v53 = vld [vmem:[%s19836_s6 + $0xd30] sm:$0xf] }
 0x332   :  { %5913 = vst [vmem:[#allocation3 + $0xd3c] sm:$0xf] %v5912_v52  ;;  %v5916_v54 = vld [vmem:[%s19836_s6 + $0xd4c] sm:$0xf]  ;;  %v5918_v55 = vld [vmem:[%s19836_s6 + $0xd34] sm:$0xf] }
 0x333   :  { %5915 = vst [vmem:[#allocation3 + $0xd40] sm:$0xf] %v5914_v53  ;;  %5917 = vst [vmem:[#allocation3 + $0xd44] sm:$0xf] %v5916_v54  ;;  %v5920_v56 = vld [vmem:[%s19836_s6 + $0xd50] sm:$0xf] }
 0x334   :  { %5919 = vst [vmem:[#allocation3 + $0xd48] sm:$0xf] %v5918_v55  ;;  %v5922_v57 = vld [vmem:[%s19836_s6 + $0xd38] sm:$0xf]  ;;  %5921 = vst [vmem:[#allocation3 + $0xd4c] sm:$0xf] %v5920_v56 }
 0x335   :  { %5923 = vst [vmem:[#allocation3 + $0xd50] sm:$0xf] %v5922_v57  ;;  %5925 = vst [vmem:[#allocation3 + $0xd54] sm:$0xff] %v5924_v58   ;;  %v5928_v59 = vld [vmem:[%s19836_s6 + $0xd74] sm:$0xf]  ;;  %v5980_v20 = vld [vmem:[%s19836_s6 + $0xdc4] sm:$0xff]  }
 0x336   :  { %v5930_v60 = vld [vmem:[%s19836_s6 + $0xd5c] sm:$0xf]  ;;  %v5932_v61 = vld [vmem:[%s19836_s6 + $0xd78] sm:$0xf]  ;;  %5929 = vst [vmem:[#allocation3 + $0xd5c] sm:$0xf] %v5928_v59 }
 0x337   :  { %5931 = vst [vmem:[#allocation3 + $0xd60] sm:$0xf] %v5930_v60  ;;  %5933 = vst [vmem:[#allocation3 + $0xd64] sm:$0xf] %v5932_v61  ;;  %v5934_v62 = vld [vmem:[%s19836_s6 + $0xd60] sm:$0xf] }
 0x338   :  { %v5936_v63 = vld [vmem:[%s19836_s6 + $0xd7c] sm:$0xf]  ;;  %v5938_v0 = vld [vmem:[%s19836_s6 + $0xd64] sm:$0xf]  ;;  %5935 = vst [vmem:[#allocation3 + $0xd68] sm:$0xf] %v5934_v62 }
 0x339   :  { %5937 = vst [vmem:[#allocation3 + $0xd6c] sm:$0xf] %v5936_v63  ;;  %5939 = vst [vmem:[#allocation3 + $0xd70] sm:$0xf] %v5938_v0  ;;  %v5940_v1 = vld [vmem:[%s19836_s6 + $0xd80] sm:$0xf] }
 0x33a   :  { %v5942_v2 = vld [vmem:[%s19836_s6 + $0xd68] sm:$0xf]  ;;  %v5944_v3 = vld [vmem:[%s19836_s6 + $0xd84] sm:$0xf]  ;;  %5941 = vst [vmem:[#allocation3 + $0xd74] sm:$0xf] %v5940_v1 }
 0x33b   :  { %5943 = vst [vmem:[#allocation3 + $0xd78] sm:$0xf] %v5942_v2  ;;  %5945 = vst [vmem:[#allocation3 + $0xd7c] sm:$0xf] %v5944_v3  ;;  %v5946_v4 = vld [vmem:[%s19836_s6 + $0xd6c] sm:$0xf] }
 0x33c   :  { %v5948_v5 = vld [vmem:[%s19836_s6 + $0xd88] sm:$0xf]  ;;  %v5950_v6 = vld [vmem:[%s19836_s6 + $0xd70] sm:$0xf]  ;;  %5947 = vst [vmem:[#allocation3 + $0xd80] sm:$0xf] %v5946_v4 }
 0x33d   :  { %5949 = vst [vmem:[#allocation3 + $0xd84] sm:$0xf] %v5948_v5  ;;  %5951 = vst [vmem:[#allocation3 + $0xd88] sm:$0xf] %v5950_v6  ;;  %v5956_v8 = vld [vmem:[%s19836_s6 + $0xdac] sm:$0xf] }
 0x33e   :  { %v5958_v9 = vld [vmem:[%s19836_s6 + $0xd94] sm:$0xf]  ;;  %5953 = vst [vmem:[#allocation3 + $0xd8c] sm:$0xff] %v5952_v7   ;;  %5957 = vst [vmem:[#allocation3 + $0xd94] sm:$0xf] %v5956_v8 }
 0x33f   :  { %5959 = vst [vmem:[#allocation3 + $0xd98] sm:$0xf] %v5958_v9  ;;  %v5960_v10 = vld [vmem:[%s19836_s6 + $0xdb0] sm:$0xf]  ;;  %v5962_v11 = vld [vmem:[%s19836_s6 + $0xd98] sm:$0xf] }
 0x340   :  { %v5964_v12 = vld [vmem:[%s19836_s6 + $0xdb4] sm:$0xf]  ;;  %5961 = vst [vmem:[#allocation3 + $0xd9c] sm:$0xf] %v5960_v10  ;;  %5963 = vst [vmem:[#allocation3 + $0xda0] sm:$0xf] %v5962_v11 }
 0x341   :  { %5965 = vst [vmem:[#allocation3 + $0xda4] sm:$0xf] %v5964_v12  ;;  %v5966_v13 = vld [vmem:[%s19836_s6 + $0xd9c] sm:$0xf]  ;;  %v5968_v14 = vld [vmem:[%s19836_s6 + $0xdb8] sm:$0xf] }
 0x342   :  { %v5970_v15 = vld [vmem:[%s19836_s6 + $0xda0] sm:$0xf]  ;;  %5967 = vst [vmem:[#allocation3 + $0xda8] sm:$0xf] %v5966_v13  ;;  %5969 = vst [vmem:[#allocation3 + $0xdac] sm:$0xf] %v5968_v14 }
 0x343   :  { %5971 = vst [vmem:[#allocation3 + $0xdb0] sm:$0xf] %v5970_v15  ;;  %v5972_v16 = vld [vmem:[%s19836_s6 + $0xdbc] sm:$0xf]  ;;  %v5974_v17 = vld [vmem:[%s19836_s6 + $0xda4] sm:$0xf] }
 0x344   :  { %v5976_v18 = vld [vmem:[%s19836_s6 + $0xdc0] sm:$0xf]  ;;  %5973 = vst [vmem:[#allocation3 + $0xdb4] sm:$0xf] %v5972_v16  ;;  %5975 = vst [vmem:[#allocation3 + $0xdb8] sm:$0xf] %v5974_v17 }
 0x345   :  { %5977 = vst [vmem:[#allocation3 + $0xdbc] sm:$0xf] %v5976_v18  ;;  %v5978_v19 = vld [vmem:[%s19836_s6 + $0xda8] sm:$0xf]  ;;  %v5984_v21 = vld [vmem:[%s19836_s6 + $0xde4] sm:$0xf] }
 0x346   :  { %5979 = vst [vmem:[#allocation3 + $0xdc0] sm:$0xf] %v5978_v19  ;;  %5981 = vst [vmem:[#allocation3 + $0xdc4] sm:$0xff] %v5980_v20   ;;  %v5986_v22 = vld [vmem:[%s19836_s6 + $0xdcc] sm:$0xf] }
 0x347   :  { %5985 = vst [vmem:[#allocation3 + $0xdcc] sm:$0xf] %v5984_v21  ;;  %v5988_v23 = vld [vmem:[%s19836_s6 + $0xde8] sm:$0xf]  ;;  %v5990_v24 = vld [vmem:[%s19836_s6 + $0xdd0] sm:$0xf] }
 0x348   :  { %5987 = vst [vmem:[#allocation3 + $0xdd0] sm:$0xf] %v5986_v22  ;;  %5989 = vst [vmem:[#allocation3 + $0xdd4] sm:$0xf] %v5988_v23  ;;  %v5992_v25 = vld [vmem:[%s19836_s6 + $0xdec] sm:$0xf] }
 0x349   :  { %5991 = vst [vmem:[#allocation3 + $0xdd8] sm:$0xf] %v5990_v24  ;;  %v5994_v26 = vld [vmem:[%s19836_s6 + $0xdd4] sm:$0xf]  ;;  %v5996_v27 = vld [vmem:[%s19836_s6 + $0xdf0] sm:$0xf] }
 0x34a   :  { %5993 = vst [vmem:[#allocation3 + $0xddc] sm:$0xf] %v5992_v25  ;;  %5995 = vst [vmem:[#allocation3 + $0xde0] sm:$0xf] %v5994_v26  ;;  %v5998_v28 = vld [vmem:[%s19836_s6 + $0xdd8] sm:$0xf] }
 0x34b   :  { %5997 = vst [vmem:[#allocation3 + $0xde4] sm:$0xf] %v5996_v27  ;;  %v6000_v29 = vld [vmem:[%s19836_s6 + $0xdf4] sm:$0xf]  ;;  %v6002_v30 = vld [vmem:[%s19836_s6 + $0xddc] sm:$0xf] }
 0x34c   :  { %5999 = vst [vmem:[#allocation3 + $0xde8] sm:$0xf] %v5998_v28  ;;  %6001 = vst [vmem:[#allocation3 + $0xdec] sm:$0xf] %v6000_v29  ;;  %v6004_v31 = vld [vmem:[%s19836_s6 + $0xdf8] sm:$0xf] }
 0x34d   :  { %6003 = vst [vmem:[#allocation3 + $0xdf0] sm:$0xf] %v6002_v30  ;;  %v6006_v32 = vld [vmem:[%s19836_s6 + $0xde0] sm:$0xf]  ;;  %v6008_v33 = vld [vmem:[%s19836_s6 + $0xdfc] sm:$0xf] }
 0x34e   :  { %6005 = vst [vmem:[#allocation3 + $0xdf4] sm:$0xf] %v6004_v31  ;;  %6007 = vst [vmem:[#allocation3 + $0xdf8] sm:$0xf] %v6006_v32 }
 0x34f   :  { %6009 = vst [vmem:[#allocation3 + $0xdfc] sm:$0xf] %v6008_v33 }
 0x350   :  { %11449 = vsyncadd [#allocation4 + $0x1], 57344  ;;  %v19179_v34 = vld [vmem:[%s19831_s1 + $0xd] sm:$0xff]  ;;  %v19184_v35 = vld [vmem:[%s19831_s1 + $0x15] sm:$0xff]  ;;  %v15190_v37 = vmov 0.0   ;;  %vm15191_vm0 = vmmov 0  }
 0x351   :  { %v19189_v36 = vld [vmem:[%s19831_s1 + $0x1d] sm:$0x7f]  ;;  %14943 = vmatprep.subr.bf16.mxu0 %v15190_v37  ;;  %14953 = vmatprep.mubr.msk.bf16.mxu0 %vm15191_vm0, %v15190_v37  ;;  %v15020_v39 = vld [vmem:[%s19832_s2 + $0x8] sm:$0xff]   ;;  %v15021_v40 = vld [vmem:[%s19832_s2 + $0x10] sm:$0xff]   ;;  %vm11509_vm1 = vcmask 1044480   ;;  %vm11505_vm2 = vcmask 605184  }
 0x352   :  { %v15019_v38 = vld [vmem:[%s19832_s2] sm:$0xff]   ;;  %v15027_v43 = vld [vmem:[%s19833_s3 + $0x14] ss:$8 sps:$4 sm:$0xff]   ;;  %v15029_v44 = vld [vmem:[%s19833_s3 + $0x10] ss:$8 sps:$4 sm:$0xff]   ;;  %v15192_v62 = vmov 0  }
 0x353   :  { %14944 = vmatpush3.bf16.msra.mxu0 %v15019_v38  ;;  %v15024_v41 = vld [vmem:[%s19833_s3 + $0x4] ss:$8 sps:$4 sm:$0xff]   ;;  %v15026_v42 = vld [vmem:[%s19833_s3] ss:$8 sps:$4 sm:$0xff]   ;;  %v15022_v46 = vld [vmem:[%s19832_s2 + $0x18] sm:$0xff]   ;;  %11685 = vmatprep.mubr.bf16.mxu1 %v15192_v62 }
 0x354   :  { %14945 = vmatprep.subr.bf16.mxu0 %v15190_v37  ;;  %11653 = vmatprep.subr.bf16.mxu1 %v15024_v41  ;;  %v15030_v45 = vld [vmem:[%s19833_s3 + $0x24] ss:$8 sps:$4 sm:$0xff]   ;;  %v15032_v49 = vld [vmem:[%s19833_s3 + $0x20] ss:$8 sps:$4 sm:$0xff]   ;;  %v15033_v50 = vld [vmem:[%s19833_s3 + $0x34] ss:$8 sps:$4 sm:$0xff]  }
 0x355   :  { %11654 = vmatpush1.bf16.msra.mxu1 %v15026_v42  ;;  %v15023_v47 = vld [vmem:[%s19832_s2 + $0x20] sm:$0x1f]   ;;  %v15035_v51 = vld [vmem:[%s19833_s3 + $0x30] ss:$8 sps:$4 sm:$0xff]   ;;  %v15039_v56 = vld [vmem:[%s19833_s3 + $0x54] ss:$8 sps:$4 sm:$0xff]  }
 0x356   :  { %11655 = vmatprep.subr.bf16.mxu1 %v15027_v43  ;;  %v11458_v48 = vld [vmem:[%s19830_s0] sm:$0xff]  ;;  %v11511_v52 = vsel %vm11509_vm1, %v15023_v47, 0  ;;  %v15041_v57 = vld [vmem:[%s19833_s3 + $0x50] ss:$8 sps:$4 sm:$0xff]   ;;  %v15045_v60 = vld [vmem:[%s19833_s3 + $0x74] ss:$8 sps:$4 sm:$0xff]  }
 0x357   :  { %14946 = vmatpush3.bf16.msra.mxu0 %v15020_v39  ;;  %v15036_v53 = vld [vmem:[%s19833_s3 + $0x44] ss:$8 sps:$4 sm:$0xff]   ;;  %v11459_v54 = vpack.c.bf16 %v11458_v48, %v11458_v48  ;;  %v15038_v55 = vld [vmem:[%s19833_s3 + $0x40] ss:$8 sps:$4 sm:$0xff]   ;;  %v15047_v61 = vld [vmem:[%s19833_s3 + $0x70] ss:$8 sps:$4 sm:$0xff]  }
 0x358   :  { %14947 = vmatprep.subr.bf16.mxu0 %v15190_v37  ;;  %v15042_v58 = vld [vmem:[%s19833_s3 + $0x64] ss:$8 sps:$4 sm:$0xff]   ;;  %v15044_v59 = vld [vmem:[%s19833_s3 + $0x60] ss:$8 sps:$4 sm:$0xff]  }
 0x359   :  { %11656 = vmatpush1.bf16.msra.mxu1 %v15029_v44  ;;  %v14760_v63 = vld [vmem:[%s19831_s1] ss:$0 sm:$0xff]  ;;  %v15050_v8 = vld [vmem:[%s19834_s4 + $0x4] ss:$16 sps:$4 sm:$0xff]   ;;  %v15098_v43 = vld [vmem:[%s19834_s4 + $0xc] ss:$16 sps:$4 sm:$0xff]  }
 0x35a   :  { %11657 = vmatprep.subr.bf16.mxu1 %v15030_v45  ;;  %v15048_v9 = vld [vmem:[%s19834_s4] ss:$16 sps:$4 sm:$0xff]   ;;  %v15053_v10 = vld [vmem:[%s19834_s4 + $0x24] ss:$16 sps:$4 sm:$0xff]  }
 0x35b   :  { %14948 = vmatpush3.bf16.msra.mxu0 %v15021_v40  ;;  %v15051_v11 = vld [vmem:[%s19834_s4 + $0x20] ss:$16 sps:$4 sm:$0xff]   ;;  %v15056_v12 = vld [vmem:[%s19834_s4 + $0x44] ss:$16 sps:$4 sm:$0xff]  }
 0x35c   :  { %14949 = vmatprep.subr.bf16.mxu0 %v15190_v37  ;;  %v15054_v13 = vld [vmem:[%s19834_s4 + $0x40] ss:$16 sps:$4 sm:$0xff]   ;;  %v15059_v14 = vld [vmem:[%s19834_s4 + $0x64] ss:$16 sps:$4 sm:$0xff]  }
 0x35d   :  { %11658 = vmatpush1.bf16.msra.mxu1 %v15032_v49  ;;  %v15057_v15 = vld [vmem:[%s19834_s4 + $0x60] ss:$16 sps:$4 sm:$0xff]   ;;  %v15062_v16 = vld [vmem:[%s19834_s4 + $0x84] ss:$16 sps:$4 sm:$0xff]  }
 0x35e   :  { %11659 = vmatprep.subr.bf16.mxu1 %v15033_v50  ;;  %v15060_v17 = vld [vmem:[%s19834_s4 + $0x80] ss:$16 sps:$4 sm:$0xff]   ;;  %v15065_v18 = vld [vmem:[%s19834_s4 + $0xa4] ss:$16 sps:$4 sm:$0xff]  }
 0x35f   :  { %14950 = vmatpush3.bf16.msra.mxu0 %v15022_v46  ;;  %v15063_v19 = vld [vmem:[%s19834_s4 + $0xa0] ss:$16 sps:$4 sm:$0xff]   ;;  %v15068_v20 = vld [vmem:[%s19834_s4 + $0xc4] ss:$16 sps:$4 sm:$0xff]  }
 0x360   :  { %14951 = vmatprep.subr.bf16.mxu0 %v15190_v37  ;;  %v15066_v21 = vld [vmem:[%s19834_s4 + $0xc0] ss:$16 sps:$4 sm:$0xff]   ;;  %v15071_v22 = vld [vmem:[%s19834_s4 + $0xe4] ss:$16 sps:$4 sm:$0xff]  }
 0x361   :  { %11660 = vmatpush1.bf16.msra.mxu1 %v15035_v51  ;;  %v15069_v23 = vld [vmem:[%s19834_s4 + $0xe0] ss:$16 sps:$4 sm:$0xff]   ;;  %v15074_v24 = vld [vmem:[%s19834_s4 + $0x104] ss:$16 sps:$4 sm:$0xff]  }
 0x362   :  { %11661 = vmatprep.subr.bf16.mxu1 %v15036_v53  ;;  %v15072_v25 = vld [vmem:[%s19834_s4 + $0x100] ss:$16 sps:$4 sm:$0xff]   ;;  %v15077_v26 = vld [vmem:[%s19834_s4 + $0x124] ss:$16 sps:$4 sm:$0xff]  }
 0x363   :  { %14952 = vmatpush3.bf16.msra.mxu0 %v11511_v52  ;;  %v15075_v27 = vld [vmem:[%s19834_s4 + $0x120] ss:$16 sps:$4 sm:$0xff]   ;;  %v15080_v28 = vld [vmem:[%s19834_s4 + $0x144] ss:$16 sps:$4 sm:$0xff]  }
 0x364   :  { %v15078_v29 = vld [vmem:[%s19834_s4 + $0x140] ss:$16 sps:$4 sm:$0xff]   ;;  %v15083_v30 = vld [vmem:[%s19834_s4 + $0x164] ss:$16 sps:$4 sm:$0xff]  }
 0x365   :  { %11662 = vmatpush1.bf16.msra.mxu1 %v15038_v55  ;;  %v15081_v31 = vld [vmem:[%s19834_s4 + $0x160] ss:$16 sps:$4 sm:$0xff]   ;;  %v15086_v32 = vld [vmem:[%s19834_s4 + $0x184] ss:$16 sps:$4 sm:$0xff]  }
 0x366   :  { %14954 = vmatmul.mubr.msk.bf16.vlgmr.msra.gmra.mrb[0].mxu0 %vm11505_vm2, %v11459_v54  ;;  %11663 = vmatprep.subr.bf16.mxu1 %v15039_v56  ;;  %v15084_v33 = vld [vmem:[%s19834_s4 + $0x180] ss:$16 sps:$4 sm:$0xff]   ;;  %v15089_v37 = vld [vmem:[%s19834_s4 + $0x1a4] ss:$16 sps:$4 sm:$0xff]  }
 0x367   :  { %v15087_v38 = vld [vmem:[%s19834_s4 + $0x1a0] ss:$16 sps:$4 sm:$0xff]   ;;  %v15092_v39 = vld [vmem:[%s19834_s4 + $0x1c4] ss:$16 sps:$4 sm:$0xff]  }
 0x368   :  { %v15090_v40 = vld [vmem:[%s19834_s4 + $0x1c0] ss:$16 sps:$4 sm:$0xff]   ;;  %v15095_v42 = vld [vmem:[%s19834_s4 + $0x1e4] ss:$16 sps:$4 sm:$0xff]  }
 0x369   :  { %11664 = vmatpush1.bf16.msra.mxu1 %v15041_v57  ;;  %v15093_v41 = vld [vmem:[%s19834_s4 + $0x1e0] ss:$16 sps:$4 sm:$0xff]  }
 0x36a   :  { %11665 = vmatprep.subr.bf16.mxu1 %v15042_v58 }
 0x36d   :  { %11666 = vmatpush1.bf16.msra.mxu1 %v15044_v59 }
 0x36e   :  { %11667 = vmatprep.subr.bf16.mxu1 %v15045_v60 }
 0x371   :  { %11668 = vmatpush1.bf16.msra.mxu1 %v15047_v61 }
 0x372   :  { %12192 = vmatprep.subr.bf16.mxu1 %v15050_v8 }
 0x439   :  { %v11547_v0 = vpop.f32.mrb[0].mxu0 }
 0x43a   :  { %v11548_v1 = vadd.f32 %v14760_v63, %v11547_v0  ;;  %v14955_v2 = vpop.f32.mrb[1].mxu0 }
 0x43b   :  { %v11550_v3 = vpop.f32.mrb[2].mxu0 }
 0x43c   :  { %vm11553_vm3 = vcmp.gt.f32.partialorder %v11548_v1, 0.0  ;;  %v11554_v4 = vmul.f32 0.2, %v11548_v1  ;;  %v14956_v5 = vpop.f32.mrb[3].mxu0 }
 0x43e   :  { %v11555_v6 = vsel %vm11553_vm3, %v11548_v1, %v11554_v4 }
 0x43f   :  { %v11556_v7 = vpack.c.bf16 %v11555_v6, %v11555_v6 }
 0x441   :  { %11686 = vmatmul.mubr.bf16.vlgmr.msra.gmra.mrb[0].mxu1 %v11556_v7 }
 0x442   :  { %12193 = vmatpush1.bf16.msra.mxu1 %v15048_v9 }
 0x443   :  { %12194 = vmatprep.subr.bf16.mxu1 %v15053_v10 }
 0x446   :  { %12195 = vmatpush1.bf16.msra.mxu1 %v15051_v11 }
 0x447   :  { %12196 = vmatprep.subr.bf16.mxu1 %v15056_v12 }
 0x44a   :  { %12197 = vmatpush1.bf16.msra.mxu1 %v15054_v13 }
 0x44b   :  { %12198 = vmatprep.subr.bf16.mxu1 %v15059_v14 }
 0x44e   :  { %12199 = vmatpush1.bf16.msra.mxu1 %v15057_v15 }
 0x44f   :  { %12200 = vmatprep.subr.bf16.mxu1 %v15062_v16 }
 0x452   :  { %12201 = vmatpush1.bf16.msra.mxu1 %v15060_v17 }
 0x453   :  { %12202 = vmatprep.subr.bf16.mxu1 %v15065_v18 }
 0x456   :  { %12203 = vmatpush1.bf16.msra.mxu1 %v15063_v19 }
 0x457   :  { %12204 = vmatprep.subr.bf16.mxu1 %v15068_v20 }
 0x45a   :  { %12205 = vmatpush1.bf16.msra.mxu1 %v15066_v21 }
 0x45b   :  { %12206 = vmatprep.subr.bf16.mxu1 %v15071_v22  ;;  %v15193_v22 = vmov 1966171168  }
 0x45e   :  { %12207 = vmatpush1.bf16.msra.mxu1 %v15069_v23  ;;  %v11738_v23 = vunpack.c.l.s4 %v15193_v22  ;;  %v15137_v22 = vld [vmem:[%s19834_s4 + $0x1ac] ss:$16 sps:$4 sm:$0xff]  }
 0x45f   :  { %12208 = vmatprep.subr.bf16.mxu1 %v15074_v24  ;;  %v11740_v24 = vlaneseq }
 0x462   :  { %12209 = vmatpush1.bf16.msra.mxu1 %v15072_v25  ;;  %v11739_v25 = vunpack.c.0.s8 %v11738_v23  ;;  %v15135_v23 = vld [vmem:[%s19834_s4 + $0x1a8] ss:$16 sps:$4 sm:$0xff]  }
 0x463   :  { %12210 = vmatprep.subr.bf16.mxu1 %v15077_v26  ;;  %v19365_v26 = vshrl.u32 %v11740_v24, 7  ;;  %v15140_v24 = vld [vmem:[%s19834_s4 + $0x1cc] ss:$16 sps:$4 sm:$0xff]  }
 0x466   :  { %12211 = vmatpush1.bf16.msra.mxu1 %v15075_v27 }
 0x467   :  { %12212 = vmatprep.subr.bf16.mxu1 %v15080_v28  ;;  %v19368_v28 = vsub.s32 %v11739_v25, %v19365_v26  ;;  %v15138_v25 = vld [vmem:[%s19834_s4 + $0x1c8] ss:$16 sps:$4 sm:$0xff]  }
 0x46a   :  { %12213 = vmatpush1.bf16.msra.mxu1 %v15078_v29 }
 0x46b   :  { %12214 = vmatprep.subr.bf16.mxu1 %v15083_v30 }
 0x46e   :  { %12215 = vmatpush1.bf16.msra.mxu1 %v15081_v31 }
 0x46f   :  { %12216 = vmatprep.subr.bf16.mxu1 %v15086_v32  ;;  %v11451_v32 = vld [vmem:[%s19831_s1 + $0x1] sm:$0x3] }
 0x472   :  { %12217 = vmatpush1.bf16.msra.mxu1 %v15084_v33 }
 0x473   :  { %12218 = vmatprep.subr.bf16.mxu1 %v15089_v37  ;;  %v19376_v37 = vsub.s32 0, %v19365_v26 }
 0x476   :  { %12219 = vmatpush1.bf16.msra.mxu1 %v15087_v38  ;;  %v19379_v38 = vsub.s32 1, %v19365_v26 }
 0x477   :  { %12220 = vmatprep.subr.bf16.mxu1 %v15092_v39 }
 0x47a   :  { %12221 = vmatpush1.bf16.msra.mxu1 %v15090_v40 }
 0x47b   :  { %12222 = vmatprep.subr.bf16.mxu1 %v15095_v42 }
 0x47e   :  { %12223 = vmatpush1.bf16.msra.mxu1 %v15093_v41 }
 0x47f   :  { %12233 = vmatprep.subr.bf16.mxu1 %v15098_v43 }
 0x514   :  { %v19359_v44 = vpop.f32.mrb[0].mxu1 }
 0x515   :  { %v11694_v45 = vrot.slane %v19359_v44, 4  ;;  %v11708_v46 = vmul.f32 %v19359_v44, %v19359_v44  ;;  %v11689_v47 = vpop.f32.mrb[1].mxu1 }
 0x516   :  { %v11700_v48 = vrot.slane %v11689_v47, 4  ;;  %v11709_v49 = vmul.f32 %v11689_v47, %v11689_v47  ;;  %v11691_v50 = vpop.f32.mrb[2].mxu1 }
 0x517   :  { %v11695_v51 = vadd.f32 %v11694_v45, %v19359_v44  ;;  %v11710_v52 = vrot.slane %v11708_v46, 4  ;;  %v11692_v53 = vpop.f32.mrb[3].mxu1  ;;  %v11452_v50 = vld [vmem:[%s19831_s1 + $0x3] sm:$0x3] }
 0x518   :  { %v11701_v54 = vadd.f32 %v11700_v48, %v11689_v47  ;;  %v11716_v55 = vrot.slane %v11709_v49, 4 }
 0x519   :  { %v11696_v56 = vrot.slane %v11695_v51, 2  ;;  %v11711_v57 = vadd.f32 %v11710_v52, %v11708_v46 }
 0x51a   :  { %v11702_v58 = vrot.slane %v11701_v54, 2  ;;  %v11717_v59 = vadd.f32 %v11716_v55, %v11709_v49 }
 0x51b   :  { %v11697_v60 = vadd.f32 %v11696_v56, %v11695_v51  ;;  %v11712_v61 = vrot.slane %v11711_v57, 2 }
 0x51c   :  { %v11703_v62 = vadd.f32 %v11702_v58, %v11701_v54  ;;  %v11718_v63 = vrot.slane %v11717_v59, 2 }
 0x51d   :  { %v11698_v0 = vrot.slane %v11697_v60, 1  ;;  %v11713_v1 = vadd.f32 %v11712_v61, %v11711_v57 }
 0x51e   :  { %v11704_v2 = vrot.slane %v11703_v62, 1  ;;  %v11719_v3 = vadd.f32 %v11718_v63, %v11717_v59  ;;  %v15099_v63 = vld [vmem:[%s19834_s4 + $0x28] ss:$16 sps:$4 sm:$0xff]  }
 0x51f   :  { %v11699_v4 = vadd.f32 %v11698_v0, %v11697_v60  ;;  %v11714_v5 = vrot.slane %v11713_v1, 1  ;;  %v15096_v60 = vld [vmem:[%s19834_s4 + $0x8] ss:$16 sps:$4 sm:$0xff]   ;;  %v15104_v0 = vld [vmem:[%s19834_s4 + $0x4c] ss:$16 sps:$4 sm:$0xff]  }
 0x520   :  { %v11705_v6 = vadd.f32 %v11704_v2, %v11703_v62  ;;  %v11720_v7 = vrot.slane %v11719_v3, 1  ;;  %v15101_v62 = vld [vmem:[%s19834_s4 + $0x2c] ss:$16 sps:$4 sm:$0xff]  }
 0x521   :  { %v11706_v8 = vmul.f32 0.125, %v11699_v4  ;;  %v11715_v9 = vadd.f32 %v11714_v5, %v11713_v1  ;;  %v15102_v1 = vld [vmem:[%s19834_s4 + $0x48] ss:$16 sps:$4 sm:$0xff]   ;;  %v15107_v2 = vld [vmem:[%s19834_s4 + $0x6c] ss:$16 sps:$4 sm:$0xff]  }
 0x522   :  { %v11707_v10 = vmul.f32 0.125, %v11705_v6  ;;  %v11721_v11 = vadd.f32 %v11720_v7, %v11719_v3  ;;  %v15105_v3 = vld [vmem:[%s19834_s4 + $0x68] ss:$16 sps:$4 sm:$0xff]   ;;  %v15110_v4 = vld [vmem:[%s19834_s4 + $0x8c] ss:$16 sps:$4 sm:$0xff]  }
 0x523   :  { %v11722_v12 = vmul.f32 0.125, %v11715_v9  ;;  %v11724_v13 = vmul.f32 %v11706_v8, %v11706_v8  ;;  %v15108_v5 = vld [vmem:[%s19834_s4 + $0x88] ss:$16 sps:$4 sm:$0xff]   ;;  %v15113_v6 = vld [vmem:[%s19834_s4 + $0xac] ss:$16 sps:$4 sm:$0xff]  }
 0x524   :  { %v11723_v14 = vmul.f32 0.125, %v11721_v11  ;;  %v11725_v15 = vmul.f32 %v11707_v10, %v11707_v10  ;;  %v15111_v7 = vld [vmem:[%s19834_s4 + $0xa8] ss:$16 sps:$4 sm:$0xff]  }
 0x525   :  { %v11726_v16 = vsub.f32 %v11722_v12, %v11724_v13  ;;  %v15114_v9 = vld [vmem:[%s19834_s4 + $0xc8] ss:$16 sps:$4 sm:$0xff]   ;;  %v15122_v12 = vld [vmem:[%s19834_s4 + $0x10c] ss:$16 sps:$4 sm:$0xff]  }
 0x526   :  { %v11727_v17 = vsub.f32 %v11723_v14, %v11725_v15  ;;  %v15117_v11 = vld [vmem:[%s19834_s4 + $0xe8] ss:$16 sps:$4 sm:$0xff]   ;;  %v15125_v14 = vld [vmem:[%s19834_s4 + $0x12c] ss:$16 sps:$4 sm:$0xff]  }
 0x527   :  { %v11728_v18 = vmax.f32 %v11726_v16, 0.0  ;;  %v15120_v13 = vld [vmem:[%s19834_s4 + $0x108] ss:$16 sps:$4 sm:$0xff]   ;;  %v15128_v16 = vld [vmem:[%s19834_s4 + $0x14c] ss:$16 sps:$4 sm:$0xff]  }
 0x528   :  { %v11729_v19 = vmax.f32 %v11727_v17, 0.0  ;;  %v15123_v15 = vld [vmem:[%s19834_s4 + $0x128] ss:$16 sps:$4 sm:$0xff]  }
 0x529   :  { %v11730_v20 = vadd.f32 1e-05, %v11728_v18  ;;  %v15126_v17 = vld [vmem:[%s19834_s4 + $0x148] ss:$16 sps:$4 sm:$0xff]   ;;  %v15131_v18 = vld [vmem:[%s19834_s4 + $0x16c] ss:$16 sps:$4 sm:$0xff]  }
 0x52a   :  { %v11731_v21 = vadd.f32 1e-05, %v11729_v19  ;;  %v15129_v19 = vld [vmem:[%s19834_s4 + $0x168] ss:$16 sps:$4 sm:$0xff]  }
 0x52b   :  { %15144 = vrsqrt.f32 %v11730_v20  ;;  %v15134_v20 = vld [vmem:[%s19834_s4 + $0x18c] ss:$16 sps:$4 sm:$0xff]  }
 0x52c   :  { %15146 = vrsqrt.f32 %v11731_v21  ;;  %v15132_v21 = vld [vmem:[%s19834_s4 + $0x188] ss:$16 sps:$4 sm:$0xff]  }
 0x535   :  { %v15145_v27 = vpop.eup %15144 }
 0x536   :  { %v15147_v29 = vpop.eup %15146 }
 0x537   :  { %v11736_v30 = vcombine.low %v15145_v27, %v15147_v29  ;;  %v15143_v27 = vld [vmem:[%s19834_s4 + $0x1ec] ss:$16 sps:$4 sm:$0xff]   ;;  %v15141_v29 = vld [vmem:[%s19834_s4 + $0x1e8] ss:$16 sps:$4 sm:$0xff]  }
 0x539   :  { %v11743_v31 = vrot.slane %v11736_v30, %v19368_v28 }
 0x53b   :  { %v11750_v33 = vrot.slane %v11743_v31, %v19368_v28 }
 0x53d   :  { %v11752_v39 = vmul.f32 %v11750_v33, %v11451_v32 }
 0x53f   :  { %v11757_v40 = vrot.slane %v11752_v39, %v19376_v37  ;;  %v11761_v41 = vrot.slane %v11752_v39, %v19379_v38 }
 0x541   :  { %v11764_v42 = vmul.f32 %v11757_v40, %v11706_v8  ;;  %v11765_v43 = vmul.f32 %v11761_v41, %v11707_v10  ;;  %v11785_v45 = vmul.f32 %v11757_v40, %v19359_v44  ;;  %v11786_v46 = vmul.f32 %v11761_v41, %v11689_v47  ;;  %v15116_v8 = vld [vmem:[%s19834_s4 + $0xcc] ss:$16 sps:$4 sm:$0xff]  }
 0x542   :  { %v15119_v10 = vld [vmem:[%s19834_s4 + $0xec] ss:$16 sps:$4 sm:$0xff]  }
 0x543   :  { %v11768_v48 = vcombine.low %v11764_v42, %v11765_v43 }
 0x545   :  { %v11775_v49 = vrot.slane %v11768_v48, %v19368_v28 }
 0x547   :  { %v11782_v51 = vrot.slane %v11775_v49, %v19368_v28 }
 0x549   :  { %v11784_v52 = vsub.f32 %v11452_v50, %v11782_v51 }
 0x54b   :  { %v11791_v53 = vrot.slane %v11784_v52, %v19376_v37  ;;  %v11795_v54 = vrot.slane %v11784_v52, %v19379_v38 }
 0x54d   :  { %v11799_v55 = vadd.f32 %v11795_v54, %v11786_v46  ;;  %v11798_v56 = vadd.f32 %v11791_v53, %v11785_v45 }
 0x54f   :  { %vm11801_vm4 = vcmp.gt.f32.partialorder %v11799_v55, 0.0  ;;  %v11803_v57 = vmul.f32 0.2, %v11799_v55  ;;  %vm11800_vm5 = vcmp.gt.f32.partialorder %v11798_v56, 0.0  ;;  %v11802_v44 = vmul.f32 0.2, %v11798_v56 }
 0x551   :  { %v11805_v47 = vsel %vm11801_vm4, %v11799_v55, %v11803_v57  ;;  %v11804_v58 = vsel %vm11800_vm5, %v11798_v56, %v11802_v44 }
 0x552   :  { %v11807_v59 = vpack.c.bf16 %v11805_v47, %v11805_v47  ;;  %v19394_v61 = vpack.c.bf16 %v11804_v58, %v11804_v58 }
 0x554   :  { %12224 = vmatprep.mubr.bf16.mxu1 %v11807_v59 }
 0x555   :  { %12225 = vmatmul.mubr.bf16.vlgmr.msra.gmra.mrb[4].mxu1 %v19394_v61 }
 0x556   :  { %12234 = vmatpush1.bf16.msra.mxu1 %v15096_v60  ;;  %12265 = vmatprep.mubr.bf16.mxu1 %v11807_v59 }
 0x557   :  { %12235 = vmatprep.subr.bf16.mxu1 %v15101_v62 }
 0x55a   :  { %12236 = vmatpush1.bf16.msra.mxu1 %v15099_v63 }
 0x55b   :  { %12237 = vmatprep.subr.bf16.mxu1 %v15104_v0 }
 0x55e   :  { %12238 = vmatpush1.bf16.msra.mxu1 %v15102_v1 }
 0x55f   :  { %12239 = vmatprep.subr.bf16.mxu1 %v15107_v2 }
 0x562   :  { %12240 = vmatpush1.bf16.msra.mxu1 %v15105_v3 }
 0x563   :  { %12241 = vmatprep.subr.bf16.mxu1 %v15110_v4 }
 0x566   :  { %12242 = vmatpush1.bf16.msra.mxu1 %v15108_v5 }
 0x567   :  { %12243 = vmatprep.subr.bf16.mxu1 %v15113_v6 }
 0x56a   :  { %12244 = vmatpush1.bf16.msra.mxu1 %v15111_v7 }
 0x56b   :  { %12245 = vmatprep.subr.bf16.mxu1 %v15116_v8 }
 0x56e   :  { %12246 = vmatpush1.bf16.msra.mxu1 %v15114_v9 }
 0x56f   :  { %12247 = vmatprep.subr.bf16.mxu1 %v15119_v10 }
 0x572   :  { %12248 = vmatpush1.bf16.msra.mxu1 %v15117_v11 }
 0x573   :  { %12249 = vmatprep.subr.bf16.mxu1 %v15122_v12 }
 0x576   :  { %12250 = vmatpush1.bf16.msra.mxu1 %v15120_v13 }
 0x577   :  { %12251 = vmatprep.subr.bf16.mxu1 %v15125_v14 }
 0x57a   :  { %12252 = vmatpush1.bf16.msra.mxu1 %v15123_v15 }
 0x57b   :  { %12253 = vmatprep.subr.bf16.mxu1 %v15128_v16 }
 0x57e   :  { %12254 = vmatpush1.bf16.msra.mxu1 %v15126_v17 }
 0x57f   :  { %12255 = vmatprep.subr.bf16.mxu1 %v15131_v18 }
 0x582   :  { %12256 = vmatpush1.bf16.msra.mxu1 %v15129_v19 }
 0x583   :  { %12257 = vmatprep.subr.bf16.mxu1 %v15134_v20 }
 0x586   :  { %12258 = vmatpush1.bf16.msra.mxu1 %v15132_v21 }
 0x587   :  { %12259 = vmatprep.subr.bf16.mxu1 %v15137_v22 }
 0x58a   :  { %12260 = vmatpush1.bf16.msra.mxu1 %v15135_v23 }
 0x58b   :  { %12261 = vmatprep.subr.bf16.mxu1 %v15140_v24 }
 0x58e   :  { %12262 = vmatpush1.bf16.msra.mxu1 %v15138_v25 }
 0x58f   :  { %12263 = vmatprep.subr.bf16.mxu1 %v15143_v27 }
 0x592   :  { %12264 = vmatpush1.bf16.msra.mxu1 %v15141_v29 }
 0x595   :  { %12266 = vmatmul.mubr.bf16.vlgmr.msra.gmra.mrb[8].mxu1 %v19394_v61 }
 0x628   :  { %v19488_v30 = vpop.f32.mrb[4].mxu1 }
 0x629   :  { %v12274_v31 = vrot.slane %v19488_v30, 4  ;;  %v12302_v32 = vmul.f32 %v19488_v30, %v19488_v30  ;;  %v19493_v33 = vpop.f32.mrb[5].mxu1 }
 0x62a   :  { %v12280_v39 = vrot.slane %v19493_v33, 4  ;;  %v12303_v40 = vmul.f32 %v19493_v33, %v19493_v33  ;;  %v12230_v41 = vpop.f32.mrb[6].mxu1 }
 0x62b   :  { %v12275_v42 = vadd.f32 %v12274_v31, %v19488_v30  ;;  %v12306_v43 = vrot.slane %v12302_v32, 4  ;;  %v12231_v45 = vpop.f32.mrb[7].mxu1 }
 0x62c   :  { %v12281_v46 = vadd.f32 %v12280_v39, %v19493_v33  ;;  %v12312_v48 = vrot.slane %v12303_v40, 4 }
 0x62d   :  { %v12276_v49 = vrot.slane %v12275_v42, 2  ;;  %v12307_v50 = vadd.f32 %v12306_v43, %v12302_v32 }
 0x62e   :  { %v12282_v51 = vrot.slane %v12281_v46, 2  ;;  %v12313_v52 = vadd.f32 %v12312_v48, %v12303_v40 }
 0x62f   :  { %v12277_v53 = vadd.f32 %v12276_v49, %v12275_v42  ;;  %v12308_v54 = vrot.slane %v12307_v50, 2 }
 0x630   :  { %v12283_v55 = vadd.f32 %v12282_v51, %v12281_v46  ;;  %v12314_v56 = vrot.slane %v12313_v52, 2 }
 0x631   :  { %v12278_v57 = vrot.slane %v12277_v53, 1  ;;  %v12309_v44 = vadd.f32 %v12308_v54, %v12307_v50 }
 0x632   :  { %v12284_v47 = vrot.slane %v12283_v55, 1  ;;  %v12315_v58 = vadd.f32 %v12314_v56, %v12313_v52 }
 0x633   :  { %v12279_v59 = vadd.f32 %v12278_v57, %v12277_v53  ;;  %v12310_v60 = vrot.slane %v12309_v44, 1 }
 0x634   :  { %v12285_v61 = vadd.f32 %v12284_v47, %v12283_v55  ;;  %v12316_v62 = vrot.slane %v12315_v58, 1 }
 0x635   :  { %v19500_v63 = vmul.f32 0.125, %v12279_v59  ;;  %v12311_v0 = vadd.f32 %v12310_v60, %v12309_v44 }
 0x636   :  { %v19502_v1 = vmul.f32 0.125, %v12285_v61  ;;  %v12317_v2 = vadd.f32 %v12316_v62, %v12315_v58 }
 0x637   :  { %v12330_v3 = vmul.f32 0.125, %v12311_v0  ;;  %v12334_v4 = vmul.f32 %v19500_v63, %v19500_v63 }
 0x638   :  { %v12331_v5 = vmul.f32 0.125, %v12317_v2  ;;  %v12335_v6 = vmul.f32 %v19502_v1, %v19502_v1 }
 0x639   :  { %v12338_v7 = vsub.f32 %v12330_v3, %v12334_v4 }
 0x63a   :  { %v12339_v8 = vsub.f32 %v12331_v5, %v12335_v6 }
 0x63b   :  { %v12342_v9 = vmax.f32 %v12338_v7, 0.0 }
 0x63c   :  { %v12343_v10 = vmax.f32 %v12339_v8, 0.0 }
 0x63d   :  { %v12346_v11 = vadd.f32 1e-05, %v12342_v9 }
 0x63e   :  { %v12347_v12 = vadd.f32 1e-05, %v12343_v10 }
 0x63f   :  { %15148 = vrsqrt.f32 %v12346_v11  ;;  %v11453_v11 = vld [vmem:[%s19831_s1 + $0x5] sm:$0xf] }
 0x640   :  { %15150 = vrsqrt.f32 %v12347_v12 }
 0x649   :  { %v15149_v13 = vpop.eup %15148 }
 0x64a   :  { %v15151_v14 = vpop.eup %15150 }
 0x64b   :  { %v12358_v15 = vcombine.low %v15149_v13, %v15151_v14  ;;  %v19527_v13 = vsub.s32 2, %v19365_v26  ;;  %v19530_v14 = vsub.s32 3, %v19365_v26 }
 0x64d   :  { %v12366_v8 = vrot.slane %v12358_v15, %v19368_v28 }
 0x668   :  { %v19508_v16 = vpop.f32.mrb[8].mxu1 }
 0x669   :  { %v12286_v17 = vrot.slane %v19508_v16, 4  ;;  %v12304_v18 = vmul.f32 %v19508_v16, %v19508_v16  ;;  %v19513_v19 = vpop.f32.mrb[9].mxu1 }
 0x66a   :  { %v12292_v20 = vrot.slane %v19513_v19, 4  ;;  %v12305_v21 = vmul.f32 %v19513_v19, %v19513_v19  ;;  %v12271_v22 = vpop.f32.mrb[10].mxu1 }
 0x66b   :  { %v12287_v23 = vadd.f32 %v12286_v17, %v19508_v16  ;;  %v12318_v24 = vrot.slane %v12304_v18, 4  ;;  %v12272_v25 = vpop.f32.mrb[11].mxu1 }
 0x66c   :  { %v12293_v27 = vadd.f32 %v12292_v20, %v19513_v19  ;;  %v12324_v29 = vrot.slane %v12305_v21, 4 }
 0x66d   :  { %v12288_v31 = vrot.slane %v12287_v23, 2  ;;  %v12319_v32 = vadd.f32 %v12318_v24, %v12304_v18 }
 0x66e   :  { %v12294_v39 = vrot.slane %v12293_v27, 2  ;;  %v12325_v40 = vadd.f32 %v12324_v29, %v12305_v21 }
 0x66f   :  { %v12289_v41 = vadd.f32 %v12288_v31, %v12287_v23  ;;  %v12320_v42 = vrot.slane %v12319_v32, 2 }
 0x670   :  { %v12295_v43 = vadd.f32 %v12294_v39, %v12293_v27  ;;  %v12326_v45 = vrot.slane %v12325_v40, 2 }
 0x671   :  { %v12290_v46 = vrot.slane %v12289_v41, 1  ;;  %v12321_v48 = vadd.f32 %v12320_v42, %v12319_v32 }
 0x672   :  { %v12296_v49 = vrot.slane %v12295_v43, 1  ;;  %v12327_v50 = vadd.f32 %v12326_v45, %v12325_v40 }
 0x673   :  { %v12291_v51 = vadd.f32 %v12290_v46, %v12289_v41  ;;  %v12322_v52 = vrot.slane %v12321_v48, 1 }
 0x674   :  { %v12297_v53 = vadd.f32 %v12296_v49, %v12295_v43  ;;  %v12328_v54 = vrot.slane %v12327_v50, 1 }
 0x675   :  { %v12300_v55 = vmul.f32 0.125, %v12291_v51  ;;  %v12323_v56 = vadd.f32 %v12322_v52, %v12321_v48 }
 0x676   :  { %v12301_v57 = vmul.f32 0.125, %v12297_v53  ;;  %v12329_v44 = vadd.f32 %v12328_v54, %v12327_v50 }
 0x677   :  { %v12332_v47 = vmul.f32 0.125, %v12323_v56  ;;  %v12336_v58 = vmul.f32 %v12300_v55, %v12300_v55 }
 0x678   :  { %v12333_v59 = vmul.f32 0.125, %v12329_v44  ;;  %v12337_v60 = vmul.f32 %v12301_v57, %v12301_v57 }
 0x679   :  { %v12340_v61 = vsub.f32 %v12332_v47, %v12336_v58 }
 0x67a   :  { %v12341_v62 = vsub.f32 %v12333_v59, %v12337_v60 }
 0x67b   :  { %v12344_v0 = vmax.f32 %v12340_v61, 0.0 }
 0x67c   :  { %v12345_v2 = vmax.f32 %v12341_v62, 0.0 }
 0x67d   :  { %v12348_v3 = vadd.f32 1e-05, %v12344_v0 }
 0x67e   :  { %v12349_v4 = vadd.f32 1e-05, %v12345_v2 }
 0x67f   :  { %15152 = vrsqrt.f32 %v12348_v3 }
 0x680   :  { %15154 = vrsqrt.f32 %v12349_v4 }
 0x689   :  { %v15153_v5 = vpop.eup %15152 }
 0x68a   :  { %v15155_v6 = vpop.eup %15154 }
 0x68b   :  { %v12359_v7 = vcombine.low %v15153_v5, %v15155_v6 }
 0x68d   :  { %v12373_v9 = vrot.slane %v12359_v7, %v19368_v28 }
 0x68f   :  { %v12374_v10 = vcombine.low %v12366_v8, %v12373_v9 }
 0x691   :  { %v12381_v12 = vrot.slane %v12374_v10, %v19368_v28 }
 0x693   :  { %v12383_v17 = vmul.f32 %v12381_v12, %v11453_v11 }
 0x695   :  { %v12388_v18 = vrot.slane %v12383_v17, %v19376_v37  ;;  %v12392_v15 = vrot.slane %v12383_v17, %v19379_v38  ;;  %v12396_v20 = vrot.slane %v12383_v17, %v19527_v13  ;;  %v12400_v21 = vrot.slane %v12383_v17, %v19530_v14 }
 0x697   :  { %v12405_v22 = vmul.f32 %v12388_v18, %v19500_v63  ;;  %v12406_v23 = vmul.f32 %v12392_v15, %v19502_v1  ;;  %v12407_v24 = vmul.f32 %v12396_v20, %v12300_v55  ;;  %v12408_v25 = vmul.f32 %v12400_v21, %v12301_v57  ;;  %v11454_v63 = vld [vmem:[%s19831_s1 + $0x9] sm:$0xf] }
 0x698   :  { %v12439_v27 = vmul.f32 %v12388_v18, %v19488_v30  ;;  %v12440_v29 = vmul.f32 %v12392_v15, %v19493_v33  ;;  %v12441_v31 = vmul.f32 %v12396_v20, %v19508_v16  ;;  %v12442_v32 = vmul.f32 %v12400_v21, %v19513_v19 }
 0x699   :  { %v12413_v39 = vcombine.low %v12405_v22, %v12406_v23  ;;  %v12414_v40 = vcombine.low %v12407_v24, %v12408_v25 }
 0x69b   :  { %v12421_v41 = vrot.slane %v12413_v39, %v19368_v28  ;;  %v12428_v42 = vrot.slane %v12414_v40, %v19368_v28 }
 0x69d   :  { %v12429_v43 = vcombine.low %v12421_v41, %v12428_v42 }
 0x69f   :  { %v12436_v1 = vrot.slane %v12429_v43, %v19368_v28 }
 0x6a1   :  { %v12438_v30 = vsub.f32 %v11454_v63, %v12436_v1 }
 0x6a3   :  { %v12447_v33 = vrot.slane %v12438_v30, %v19376_v37  ;;  %v12451_v16 = vrot.slane %v12438_v30, %v19379_v38  ;;  %v12455_v19 = vrot.slane %v12438_v30, %v19527_v13  ;;  %v12459_v45 = vrot.slane %v12438_v30, %v19530_v14 }
 0x6a5   :  { %v12464_v46 = vadd.f32 %v12447_v33, %v12439_v27  ;;  %v12465_v48 = vadd.f32 %v12451_v16, %v12440_v29  ;;  %v12466_v49 = vadd.f32 %v12455_v19, %v12441_v31  ;;  %v12467_v50 = vadd.f32 %v12459_v45, %v12442_v32 }
 0x6a7   :  { %vm12468_vm6 = vcmp.gt.f32.partialorder %v12464_v46, 0.0  ;;  %vm12469_vm7 = vcmp.gt.f32.partialorder %v12465_v48, 0.0  ;;  %vm12470_vm8 = vcmp.gt.f32.partialorder %v12466_v49, 0.0  ;;  %vm12471_vm9 = vcmp.gt.f32.partialorder %v12467_v50, 0.0 }
 0x6a8   :  { %v12472_v51 = vmul.f32 0.2, %v12464_v46  ;;  %v12473_v52 = vmul.f32 0.2, %v12465_v48  ;;  %v12474_v53 = vmul.f32 0.2, %v12466_v49 }
 0x6a9   :  { %v12475_v54 = vmul.f32 0.2, %v12467_v50 }
 0x6aa   :  { %v19552_v55 = vsel %vm12468_vm6, %v12464_v46, %v12472_v51  ;;  %v12477_v56 = vsel %vm12469_vm7, %v12465_v48, %v12473_v52  ;;  %v19554_v57 = vsel %vm12470_vm8, %v12466_v49, %v12474_v53 }
 0x6ab   :  { %v19556_v44 = vsel %vm12471_vm9, %v12467_v50, %v12475_v54 }
 0x6ac   :  { %15186 = dma.done.wait [#allocation4], 32768 }
 0x6ad   :  { %15187 = vsyncadd [#allocation4], 4294934528  ;;  %v19558_v47 = vpack.c.bf16 %v12477_v56, %v12477_v56  ;;  %v12489_v58 = vld [vmem:[#allocation2 + $0x8] sm:$0xff]  ;;  %v12491_v59 = vld [vmem:[#allocation2 + $0x18] sm:$0xff] }
 0x6ae   :  { %v12488_v60 = vld [vmem:[#allocation2] sm:$0xff]  ;;  %12744 = vmatprep.subr.bf16.mxu0 %v12489_v58  ;;  %12826 = vmatprep.subr.bf16.mxu1 %v12491_v59  ;;  %v12490_v61 = vld [vmem:[#allocation2 + $0x10] sm:$0xff]  ;;  %v12497_v62 = vld [vmem:[#allocation2 + $0x48] sm:$0xff] }
 0x6af   :  { %12776 = vmatprep.mubr.bf16.mxu0 %v19558_v47  ;;  %12858 = vmatprep.mubr.bf16.mxu1 %v19558_v47  ;;  %v12499_v0 = vld [vmem:[#allocation2 + $0x58] sm:$0xff]  ;;  %v12496_v2 = vld [vmem:[#allocation2 + $0x40] sm:$0xff]  ;;  %v12498_v3 = vld [vmem:[#allocation2 + $0x50] sm:$0xff] }
 0x6b0   :  { %12745 = vmatpush1.bf16.msra.mxu0 %v12488_v60  ;;  %12827 = vmatpush1.bf16.msra.mxu1 %v12490_v61  ;;  %v12505_v4 = vld [vmem:[#allocation2 + $0x88] sm:$0xff]  ;;  %v12507_v5 = vld [vmem:[#allocation2 + $0x98] sm:$0xff]  ;;  %v12504_v6 = vld [vmem:[#allocation2 + $0x80] sm:$0xff] }
 0x6b1   :  { %12746 = vmatprep.subr.bf16.mxu0 %v12497_v62  ;;  %12828 = vmatprep.subr.bf16.mxu1 %v12499_v0  ;;  %v12506_v7 = vld [vmem:[#allocation2 + $0x90] sm:$0xff]  ;;  %v12513_v8 = vld [vmem:[#allocation2 + $0xc8] sm:$0xff]  ;;  %v12515_v9 = vld [vmem:[#allocation2 + $0xd8] sm:$0xff] }
 0x6b2   :  { %v12512_v10 = vld [vmem:[#allocation2 + $0xc0] sm:$0xff]  ;;  %v12514_v11 = vld [vmem:[#allocation2 + $0xd0] sm:$0xff]  ;;  %v12521_v12 = vld [vmem:[#allocation2 + $0x108] sm:$0xff] }
 0x6b3   :  { %v12523_v17 = vld [vmem:[#allocation2 + $0x118] sm:$0xff]  ;;  %v12520_v18 = vld [vmem:[#allocation2 + $0x100] sm:$0xff]  ;;  %v12522_v15 = vld [vmem:[#allocation2 + $0x110] sm:$0xff] }
 0x6b4   :  { %12747 = vmatpush1.bf16.msra.mxu0 %v12496_v2  ;;  %12829 = vmatpush1.bf16.msra.mxu1 %v12498_v3  ;;  %v12529_v20 = vld [vmem:[#allocation2 + $0x148] sm:$0xff]  ;;  %v12531_v21 = vld [vmem:[#allocation2 + $0x158] sm:$0xff]  ;;  %v12528_v22 = vld [vmem:[#allocation2 + $0x140] sm:$0xff] }
 0x6b5   :  { %12748 = vmatprep.subr.bf16.mxu0 %v12505_v4  ;;  %12830 = vmatprep.subr.bf16.mxu1 %v12507_v5  ;;  %v12530_v23 = vld [vmem:[#allocation2 + $0x150] sm:$0xff]  ;;  %v12537_v24 = vld [vmem:[#allocation2 + $0x188] sm:$0xff]  ;;  %v12539_v25 = vld [vmem:[#allocation2 + $0x198] sm:$0xff] }
 0x6b6   :  { %v12536_v27 = vld [vmem:[#allocation2 + $0x180] sm:$0xff]  ;;  %v12538_v29 = vld [vmem:[#allocation2 + $0x190] sm:$0xff]  ;;  %v12545_v31 = vld [vmem:[#allocation2 + $0x1c8] sm:$0xff] }
 0x6b7   :  { %v12547_v32 = vld [vmem:[#allocation2 + $0x1d8] sm:$0xff]  ;;  %v12544_v39 = vld [vmem:[#allocation2 + $0x1c0] sm:$0xff]  ;;  %v12546_v40 = vld [vmem:[#allocation2 + $0x1d0] sm:$0xff] }
 0x6b8   :  { %12749 = vmatpush1.bf16.msra.mxu0 %v12504_v6  ;;  %12831 = vmatpush1.bf16.msra.mxu1 %v12506_v7  ;;  %v12553_v41 = vld [vmem:[#allocation2 + $0x208] sm:$0xff]  ;;  %v12555_v42 = vld [vmem:[#allocation2 + $0x218] sm:$0xff]  ;;  %v12552_v43 = vld [vmem:[#allocation2 + $0x200] sm:$0xff] }
 0x6b9   :  { %12750 = vmatprep.subr.bf16.mxu0 %v12513_v8  ;;  %12832 = vmatprep.subr.bf16.mxu1 %v12515_v9  ;;  %v12554_v63 = vld [vmem:[#allocation2 + $0x210] sm:$0xff]  ;;  %v12561_v1 = vld [vmem:[#allocation2 + $0x248] sm:$0xff]  ;;  %v12563_v30 = vld [vmem:[#allocation2 + $0x258] sm:$0xff] }
 0x6ba   :  { %v12560_v33 = vld [vmem:[#allocation2 + $0x240] sm:$0xff]  ;;  %v12562_v16 = vld [vmem:[#allocation2 + $0x250] sm:$0xff]  ;;  %v12569_v19 = vld [vmem:[#allocation2 + $0x288] sm:$0xff] }
 0x6bb   :  { %v12571_v45 = vld [vmem:[#allocation2 + $0x298] sm:$0xff]  ;;  %v12568_v46 = vld [vmem:[#allocation2 + $0x280] sm:$0xff]  ;;  %v12570_v48 = vld [vmem:[#allocation2 + $0x290] sm:$0xff] }
 0x6bc   :  { %12751 = vmatpush1.bf16.msra.mxu0 %v12512_v10  ;;  %12833 = vmatpush1.bf16.msra.mxu1 %v12514_v11  ;;  %v12577_v49 = vld [vmem:[#allocation2 + $0x2c8] sm:$0xff]  ;;  %v12579_v50 = vld [vmem:[#allocation2 + $0x2d8] sm:$0xff]  ;;  %v12576_v51 = vld [vmem:[#allocation2 + $0x2c0] sm:$0xff]  ;;  %v19564_v11 = vpack.c.bf16 %v19552_v55, %v19552_v55 }
 0x6bd   :  { %12752 = vmatprep.subr.bf16.mxu0 %v12521_v12  ;;  %12834 = vmatprep.subr.bf16.mxu1 %v12523_v17  ;;  %v12578_v52 = vld [vmem:[#allocation2 + $0x2d0] sm:$0xff]  ;;  %v12585_v53 = vld [vmem:[#allocation2 + $0x308] sm:$0xff]  ;;  %v12587_v54 = vld [vmem:[#allocation2 + $0x318] sm:$0xff] }
 0x6be   :  { %v12584_v56 = vld [vmem:[#allocation2 + $0x300] sm:$0xff]  ;;  %v12586_v58 = vld [vmem:[#allocation2 + $0x310] sm:$0xff]  ;;  %v12593_v59 = vld [vmem:[#allocation2 + $0x348] sm:$0xff] }
 0x6bf   :  { %v12595_v60 = vld [vmem:[#allocation2 + $0x358] sm:$0xff]  ;;  %v12592_v61 = vld [vmem:[#allocation2 + $0x340] sm:$0xff]  ;;  %v12594_v62 = vld [vmem:[#allocation2 + $0x350] sm:$0xff] }
 0x6c0   :  { %12753 = vmatpush1.bf16.msra.mxu0 %v12520_v18  ;;  %12835 = vmatpush1.bf16.msra.mxu1 %v12522_v15  ;;  %v12601_v0 = vld [vmem:[#allocation2 + $0x388] sm:$0xff]  ;;  %v12603_v2 = vld [vmem:[#allocation2 + $0x398] sm:$0xff]  ;;  %v12600_v3 = vld [vmem:[#allocation2 + $0x380] sm:$0xff] }
 0x6c1   :  { %12754 = vmatprep.subr.bf16.mxu0 %v12529_v20  ;;  %12836 = vmatprep.subr.bf16.mxu1 %v12531_v21  ;;  %v12602_v4 = vld [vmem:[#allocation2 + $0x390] sm:$0xff]  ;;  %v12609_v5 = vld [vmem:[#allocation2 + $0x3c8] sm:$0xff]  ;;  %v12611_v6 = vld [vmem:[#allocation2 + $0x3d8] sm:$0xff]  ;;  %v19568_v20 = vpack.c.bf16 %v19556_v44, %v19556_v44 }
 0x6c2   :  { %v12608_v7 = vld [vmem:[#allocation2 + $0x3c0] sm:$0xff]  ;;  %v12610_v8 = vld [vmem:[#allocation2 + $0x3d0] sm:$0xff]  ;;  %v12617_v9 = vld [vmem:[#allocation2 + $0x408] sm:$0xff] }
 0x6c3   :  { %v12619_v10 = vld [vmem:[#allocation2 + $0x418] sm:$0xff]  ;;  %v12616_v12 = vld [vmem:[#allocation2 + $0x400] sm:$0xff]  ;;  %v12618_v17 = vld [vmem:[#allocation2 + $0x410] sm:$0xff] }
 0x6c4   :  { %12755 = vmatpush1.bf16.msra.mxu0 %v12528_v22  ;;  %12837 = vmatpush1.bf16.msra.mxu1 %v12530_v23  ;;  %v12625_v18 = vld [vmem:[#allocation2 + $0x448] sm:$0xff]  ;;  %v12627_v15 = vld [vmem:[#allocation2 + $0x458] sm:$0xff]  ;;  %v12624_v55 = vld [vmem:[#allocation2 + $0x440] sm:$0xff] }
 0x6c5   :  { %12756 = vmatprep.subr.bf16.mxu0 %v12537_v24  ;;  %12838 = vmatprep.subr.bf16.mxu1 %v12539_v25  ;;  %v12626_v21 = vld [vmem:[#allocation2 + $0x450] sm:$0xff]  ;;  %v12633_v22 = vld [vmem:[#allocation2 + $0x488] sm:$0xff]  ;;  %v12635_v23 = vld [vmem:[#allocation2 + $0x498] sm:$0xff] }
 0x6c6   :  { %v12632_v44 = vld [vmem:[#allocation2 + $0x480] sm:$0xff]  ;;  %v12634_v24 = vld [vmem:[#allocation2 + $0x490] sm:$0xff]  ;;  %v12641_v25 = vld [vmem:[#allocation2 + $0x4c8] sm:$0xff] }
 0x6c8   :  { %12757 = vmatpush1.bf16.msra.mxu0 %v12536_v27  ;;  %12839 = vmatpush1.bf16.msra.mxu1 %v12538_v29  ;;  %v12643_v27 = vld [vmem:[#allocation2 + $0x4d8] sm:$0xff]  ;;  %v12640_v29 = vld [vmem:[#allocation2 + $0x4c0] sm:$0xff] }
 0x6c9   :  { %12758 = vmatprep.subr.bf16.mxu0 %v12545_v31  ;;  %12840 = vmatprep.subr.bf16.mxu1 %v12547_v32  ;;  %v12642_v31 = vld [vmem:[#allocation2 + $0x4d0] sm:$0xff]  ;;  %v12649_v32 = vld [vmem:[#allocation2 + $0x508] sm:$0xff] }
 0x6cc   :  { %12759 = vmatpush1.bf16.msra.mxu0 %v12544_v39  ;;  %12841 = vmatpush1.bf16.msra.mxu1 %v12546_v40  ;;  %v12651_v39 = vld [vmem:[#allocation2 + $0x518] sm:$0xff]  ;;  %v12648_v40 = vld [vmem:[#allocation2 + $0x500] sm:$0xff] }
 0x6cd   :  { %12760 = vmatprep.subr.bf16.mxu0 %v12553_v41  ;;  %12842 = vmatprep.subr.bf16.mxu1 %v12555_v42  ;;  %v12650_v41 = vld [vmem:[#allocation2 + $0x510] sm:$0xff]  ;;  %v12657_v42 = vld [vmem:[#allocation2 + $0x548] sm:$0xff] }
 0x6d0   :  { %12761 = vmatpush1.bf16.msra.mxu0 %v12552_v43  ;;  %12843 = vmatpush1.bf16.msra.mxu1 %v12554_v63  ;;  %v12659_v43 = vld [vmem:[#allocation2 + $0x558] sm:$0xff]  ;;  %v12656_v63 = vld [vmem:[#allocation2 + $0x540] sm:$0xff] }
 0x6d1   :  { %12762 = vmatprep.subr.bf16.mxu0 %v12561_v1  ;;  %12844 = vmatprep.subr.bf16.mxu1 %v12563_v30  ;;  %v12658_v1 = vld [vmem:[#allocation2 + $0x550] sm:$0xff]  ;;  %v12665_v30 = vld [vmem:[#allocation2 + $0x588] sm:$0xff] }
 0x6d4   :  { %12763 = vmatpush1.bf16.msra.mxu0 %v12560_v33  ;;  %12845 = vmatpush1.bf16.msra.mxu1 %v12562_v16  ;;  %v12667_v33 = vld [vmem:[#allocation2 + $0x598] sm:$0xff]  ;;  %v12664_v16 = vld [vmem:[#allocation2 + $0x580] sm:$0xff] }
 0x6d5   :  { %12764 = vmatprep.subr.bf16.mxu0 %v12569_v19  ;;  %12846 = vmatprep.subr.bf16.mxu1 %v12571_v45  ;;  %v12666_v19 = vld [vmem:[#allocation2 + $0x590] sm:$0xff]  ;;  %v12673_v45 = vld [vmem:[#allocation2 + $0x5c8] sm:$0xff] }
 0x6d8   :  { %12765 = vmatpush1.bf16.msra.mxu0 %v12568_v46  ;;  %12847 = vmatpush1.bf16.msra.mxu1 %v12570_v48  ;;  %v12675_v46 = vld [vmem:[#allocation2 + $0x5d8] sm:$0xff]  ;;  %v12672_v48 = vld [vmem:[#allocation2 + $0x5c0] sm:$0xff] }
 0x6d9   :  { %12766 = vmatprep.subr.bf16.mxu0 %v12577_v49  ;;  %12848 = vmatprep.subr.bf16.mxu1 %v12579_v50  ;;  %v12674_v49 = vld [vmem:[#allocation2 + $0x5d0] sm:$0xff]  ;;  %v12681_v50 = vld [vmem:[#allocation2 + $0x608] sm:$0xff] }
 0x6dc   :  { %12767 = vmatpush1.bf16.msra.mxu0 %v12576_v51  ;;  %12849 = vmatpush1.bf16.msra.mxu1 %v12578_v52  ;;  %v12683_v51 = vld [vmem:[#allocation2 + $0x618] sm:$0xff]  ;;  %v12680_v52 = vld [vmem:[#allocation2 + $0x600] sm:$0xff] }
 0x6dd   :  { %12768 = vmatprep.subr.bf16.mxu0 %v12585_v53  ;;  %12850 = vmatprep.subr.bf16.mxu1 %v12587_v54  ;;  %v12682_v53 = vld [vmem:[#allocation2 + $0x610] sm:$0xff]  ;;  %v12689_v54 = vld [vmem:[#allocation2 + $0x648] sm:$0xff] }
 0x6e0   :  { %12769 = vmatpush1.bf16.msra.mxu0 %v12584_v56  ;;  %12851 = vmatpush1.bf16.msra.mxu1 %v12586_v58  ;;  %v12691_v56 = vld [vmem:[#allocation2 + $0x658] sm:$0xff]  ;;  %v12688_v58 = vld [vmem:[#allocation2 + $0x640] sm:$0xff] }
 0x6e1   :  { %12770 = vmatprep.subr.bf16.mxu0 %v12593_v59  ;;  %12852 = vmatprep.subr.bf16.mxu1 %v12595_v60  ;;  %v12690_v59 = vld [vmem:[#allocation2 + $0x650] sm:$0xff]  ;;  %v12697_v60 = vld [vmem:[#allocation2 + $0x688] sm:$0xff] }
 0x6e4   :  { %12771 = vmatpush1.bf16.msra.mxu0 %v12592_v61  ;;  %12853 = vmatpush1.bf16.msra.mxu1 %v12594_v62  ;;  %v12699_v61 = vld [vmem:[#allocation2 + $0x698] sm:$0xff]  ;;  %v12696_v62 = vld [vmem:[#allocation2 + $0x680] sm:$0xff] }
 0x6e5   :  { %12772 = vmatprep.subr.bf16.mxu0 %v12601_v0  ;;  %12854 = vmatprep.subr.bf16.mxu1 %v12603_v2  ;;  %v12698_v0 = vld [vmem:[#allocation2 + $0x690] sm:$0xff]  ;;  %v12705_v2 = vld [vmem:[#allocation2 + $0x6c8] sm:$0xff] }
 0x6e8   :  { %12773 = vmatpush1.bf16.msra.mxu0 %v12600_v3  ;;  %12855 = vmatpush1.bf16.msra.mxu1 %v12602_v4  ;;  %v12707_v3 = vld [vmem:[#allocation2 + $0x6d8] sm:$0xff]  ;;  %v12704_v4 = vld [vmem:[#allocation2 + $0x6c0] sm:$0xff] }
 0x6e9   :  { %12774 = vmatprep.subr.bf16.mxu0 %v12609_v5  ;;  %12856 = vmatprep.subr.bf16.mxu1 %v12611_v6  ;;  %v12706_v5 = vld [vmem:[#allocation2 + $0x6d0] sm:$0xff]  ;;  %v12713_v6 = vld [vmem:[#allocation2 + $0x708] sm:$0xff] }
 0x6ec   :  { %12775 = vmatpush1.bf16.msra.mxu0 %v12608_v7  ;;  %12857 = vmatpush1.bf16.msra.mxu1 %v12610_v8  ;;  %v12715_v7 = vld [vmem:[#allocation2 + $0x718] sm:$0xff]  ;;  %v12712_v8 = vld [vmem:[#allocation2 + $0x700] sm:$0xff] }
 0x6ed   :  { %12785 = vmatprep.subr.bf16.mxu0 %v12617_v9  ;;  %12867 = vmatprep.subr.bf16.mxu1 %v12619_v10  ;;  %v12714_v9 = vld [vmem:[#allocation2 + $0x710] sm:$0xff]  ;;  %v12721_v10 = vld [vmem:[#allocation2 + $0x748] sm:$0xff] }
 0x6ef   :  { %12777 = vmatmul.mubr.bf16.vlgmr.msra.gmra.mrb[4].mxu0 %v19564_v11  ;;  %12859 = vmatmul.mubr.bf16.vlgmr.msra.gmra.mrb[12].mxu1 %v19564_v11 }
 0x6f0   :  { %12786 = vmatpush1.bf16.msra.mxu0 %v12616_v12  ;;  %12868 = vmatpush1.bf16.msra.mxu1 %v12618_v17  ;;  %v12723_v12 = vld [vmem:[#allocation2 + $0x758] sm:$0xff]  ;;  %v12720_v17 = vld [vmem:[#allocation2 + $0x740] sm:$0xff] }
 0x6f1   :  { %12787 = vmatprep.subr.bf16.mxu0 %v12625_v18  ;;  %12869 = vmatprep.subr.bf16.mxu1 %v12627_v15  ;;  %v12722_v18 = vld [vmem:[#allocation2 + $0x750] sm:$0xff]  ;;  %v12729_v15 = vld [vmem:[#allocation2 + $0x788] sm:$0xff] }
 0x6f2   :  { %12817 = vmatprep.mubr.bf16.mxu0 %v19568_v20  ;;  %12899 = vmatprep.mubr.bf16.mxu1 %v19568_v20 }
 0x6f4   :  { %12788 = vmatpush1.bf16.msra.mxu0 %v12624_v55  ;;  %12870 = vmatpush1.bf16.msra.mxu1 %v12626_v21  ;;  %v12731_v55 = vld [vmem:[#allocation2 + $0x798] sm:$0xff]  ;;  %v12728_v21 = vld [vmem:[#allocation2 + $0x780] sm:$0xff] }
 0x6f5   :  { %12789 = vmatprep.subr.bf16.mxu0 %v12633_v22  ;;  %12871 = vmatprep.subr.bf16.mxu1 %v12635_v23  ;;  %v12730_v22 = vld [vmem:[#allocation2 + $0x790] sm:$0xff]  ;;  %v12737_v23 = vld [vmem:[#allocation2 + $0x7c8] sm:$0xff] }
 0x6f8   :  { %12790 = vmatpush1.bf16.msra.mxu0 %v12632_v44  ;;  %12872 = vmatpush1.bf16.msra.mxu1 %v12634_v24  ;;  %v12739_v44 = vld [vmem:[#allocation2 + $0x7d8] sm:$0xff]  ;;  %v12736_v24 = vld [vmem:[#allocation2 + $0x7c0] sm:$0xff] }
 0x6f9   :  { %12791 = vmatprep.subr.bf16.mxu0 %v12641_v25  ;;  %12873 = vmatprep.subr.bf16.mxu1 %v12643_v27  ;;  %v12738_v25 = vld [vmem:[#allocation2 + $0x7d0] sm:$0xff]  ;;  %v12493_v27 = vld [vmem:[#allocation2 + $0x28] sm:$0xff] }
 0x6fc   :  { %12792 = vmatpush1.bf16.msra.mxu0 %v12640_v29  ;;  %12874 = vmatpush1.bf16.msra.mxu1 %v12642_v31  ;;  %v12495_v29 = vld [vmem:[#allocation2 + $0x38] sm:$0xff]  ;;  %v19576_v31 = vpack.c.bf16 %v19554_v57, %v19554_v57  ;;  %v12509_v57 = vld [vmem:[#allocation2 + $0xa8] sm:$0xff] }
 0x6fd   :  { %12793 = vmatprep.subr.bf16.mxu0 %v12649_v32  ;;  %12875 = vmatprep.subr.bf16.mxu1 %v12651_v39  ;;  %v12492_v32 = vld [vmem:[#allocation2 + $0x20] sm:$0xff]  ;;  %v12494_v39 = vld [vmem:[#allocation2 + $0x30] sm:$0xff] }
 0x700   :  { %12794 = vmatpush1.bf16.msra.mxu0 %v12648_v40  ;;  %12876 = vmatpush1.bf16.msra.mxu1 %v12650_v41  ;;  %v12501_v40 = vld [vmem:[#allocation2 + $0x68] sm:$0xff]  ;;  %v12503_v41 = vld [vmem:[#allocation2 + $0x78] sm:$0xff] }
 0x701   :  { %12795 = vmatprep.subr.bf16.mxu0 %v12657_v42  ;;  %12877 = vmatprep.subr.bf16.mxu1 %v12659_v43  ;;  %v12500_v42 = vld [vmem:[#allocation2 + $0x60] sm:$0xff]  ;;  %v12502_v43 = vld [vmem:[#allocation2 + $0x70] sm:$0xff] }
 0x704   :  { %12796 = vmatpush1.bf16.msra.mxu0 %v12656_v63  ;;  %12878 = vmatpush1.bf16.msra.mxu1 %v12658_v1  ;;  %v12511_v63 = vld [vmem:[#allocation2 + $0xb8] sm:$0xff]  ;;  %v12508_v1 = vld [vmem:[#allocation2 + $0xa0] sm:$0xff] }
 0x705   :  { %12797 = vmatprep.subr.bf16.mxu0 %v12665_v30  ;;  %12879 = vmatprep.subr.bf16.mxu1 %v12667_v33  ;;  %v12510_v30 = vld [vmem:[#allocation2 + $0xb0] sm:$0xff]  ;;  %v12517_v33 = vld [vmem:[#allocation2 + $0xe8] sm:$0xff] }
 0x708   :  { %12798 = vmatpush1.bf16.msra.mxu0 %v12664_v16  ;;  %12880 = vmatpush1.bf16.msra.mxu1 %v12666_v19  ;;  %v12519_v16 = vld [vmem:[#allocation2 + $0xf8] sm:$0xff]  ;;  %v12516_v19 = vld [vmem:[#allocation2 + $0xe0] sm:$0xff] }
 0x709   :  { %12799 = vmatprep.subr.bf16.mxu0 %v12673_v45  ;;  %12881 = vmatprep.subr.bf16.mxu1 %v12675_v46  ;;  %v12518_v45 = vld [vmem:[#allocation2 + $0xf0] sm:$0xff]  ;;  %v12525_v46 = vld [vmem:[#allocation2 + $0x128] sm:$0xff] }
 0x70c   :  { %12800 = vmatpush1.bf16.msra.mxu0 %v12672_v48  ;;  %12882 = vmatpush1.bf16.msra.mxu1 %v12674_v49  ;;  %v12527_v48 = vld [vmem:[#allocation2 + $0x138] sm:$0xff]  ;;  %v12526_v49 = vld [vmem:[#allocation2 + $0x130] sm:$0xff] }
 0x70d   :  { %12801 = vmatprep.subr.bf16.mxu0 %v12681_v50  ;;  %12883 = vmatprep.subr.bf16.mxu1 %v12683_v51  ;;  %v12533_v50 = vld [vmem:[#allocation2 + $0x168] sm:$0xff]  ;;  %v12535_v51 = vld [vmem:[#allocation2 + $0x178] sm:$0xff] }
 0x710   :  { %12802 = vmatpush1.bf16.msra.mxu0 %v12680_v52  ;;  %12884 = vmatpush1.bf16.msra.mxu1 %v12682_v53  ;;  %v12532_v52 = vld [vmem:[#allocation2 + $0x160] sm:$0xff]  ;;  %v12534_v53 = vld [vmem:[#allocation2 + $0x170] sm:$0xff] }
 0x711   :  { %12803 = vmatprep.subr.bf16.mxu0 %v12689_v54  ;;  %12885 = vmatprep.subr.bf16.mxu1 %v12691_v56  ;;  %v12541_v54 = vld [vmem:[#allocation2 + $0x1a8] sm:$0xff]  ;;  %v12543_v56 = vld [vmem:[#allocation2 + $0x1b8] sm:$0xff] }
 0x714   :  { %12804 = vmatpush1.bf16.msra.mxu0 %v12688_v58  ;;  %12886 = vmatpush1.bf16.msra.mxu1 %v12690_v59  ;;  %v12540_v58 = vld [vmem:[#allocation2 + $0x1a0] sm:$0xff]  ;;  %v12542_v59 = vld [vmem:[#allocation2 + $0x1b0] sm:$0xff] }
 0x715   :  { %12805 = vmatprep.subr.bf16.mxu0 %v12697_v60  ;;  %12887 = vmatprep.subr.bf16.mxu1 %v12699_v61  ;;  %v12549_v60 = vld [vmem:[#allocation2 + $0x1e8] sm:$0xff]  ;;  %v12551_v61 = vld [vmem:[#allocation2 + $0x1f8] sm:$0xff] }
 0x718   :  { %12806 = vmatpush1.bf16.msra.mxu0 %v12696_v62  ;;  %12888 = vmatpush1.bf16.msra.mxu1 %v12698_v0  ;;  %v12548_v62 = vld [vmem:[#allocation2 + $0x1e0] sm:$0xff]  ;;  %v12550_v0 = vld [vmem:[#allocation2 + $0x1f0] sm:$0xff] }
 0x719   :  { %12807 = vmatprep.subr.bf16.mxu0 %v12705_v2  ;;  %12889 = vmatprep.subr.bf16.mxu1 %v12707_v3  ;;  %v12557_v2 = vld [vmem:[#allocation2 + $0x228] sm:$0xff]  ;;  %v12559_v3 = vld [vmem:[#allocation2 + $0x238] sm:$0xff] }
 0x71c   :  { %12808 = vmatpush1.bf16.msra.mxu0 %v12704_v4  ;;  %12890 = vmatpush1.bf16.msra.mxu1 %v12706_v5  ;;  %v12556_v4 = vld [vmem:[#allocation2 + $0x220] sm:$0xff]  ;;  %v12558_v5 = vld [vmem:[#allocation2 + $0x230] sm:$0xff] }
 0x71d   :  { %12809 = vmatprep.subr.bf16.mxu0 %v12713_v6  ;;  %12891 = vmatprep.subr.bf16.mxu1 %v12715_v7  ;;  %v12565_v6 = vld [vmem:[#allocation2 + $0x268] sm:$0xff]  ;;  %v12567_v7 = vld [vmem:[#allocation2 + $0x278] sm:$0xff] }
 0x720   :  { %12810 = vmatpush1.bf16.msra.mxu0 %v12712_v8  ;;  %12892 = vmatpush1.bf16.msra.mxu1 %v12714_v9  ;;  %v12564_v8 = vld [vmem:[#allocation2 + $0x260] sm:$0xff]  ;;  %v12566_v9 = vld [vmem:[#allocation2 + $0x270] sm:$0xff] }
 0x721   :  { %12811 = vmatprep.subr.bf16.mxu0 %v12721_v10  ;;  %12893 = vmatprep.subr.bf16.mxu1 %v12723_v12  ;;  %v12573_v10 = vld [vmem:[#allocation2 + $0x2a8] sm:$0xff]  ;;  %v12575_v12 = vld [vmem:[#allocation2 + $0x2b8] sm:$0xff] }
 0x724   :  { %12812 = vmatpush1.bf16.msra.mxu0 %v12720_v17  ;;  %12894 = vmatpush1.bf16.msra.mxu1 %v12722_v18  ;;  %v12572_v17 = vld [vmem:[#allocation2 + $0x2a0] sm:$0xff]  ;;  %v12574_v18 = vld [vmem:[#allocation2 + $0x2b0] sm:$0xff] }
 0x725   :  { %12813 = vmatprep.subr.bf16.mxu0 %v12729_v15  ;;  %12895 = vmatprep.subr.bf16.mxu1 %v12731_v55  ;;  %v12581_v15 = vld [vmem:[#allocation2 + $0x2e8] sm:$0xff]  ;;  %v12583_v55 = vld [vmem:[#allocation2 + $0x2f8] sm:$0xff] }
 0x728   :  { %12814 = vmatpush1.bf16.msra.mxu0 %v12728_v21  ;;  %12896 = vmatpush1.bf16.msra.mxu1 %v12730_v22  ;;  %v12580_v21 = vld [vmem:[#allocation2 + $0x2e0] sm:$0xff]  ;;  %v12582_v22 = vld [vmem:[#allocation2 + $0x2f0] sm:$0xff] }
 0x729   :  { %12815 = vmatprep.subr.bf16.mxu0 %v12737_v23  ;;  %12897 = vmatprep.subr.bf16.mxu1 %v12739_v44  ;;  %v12589_v23 = vld [vmem:[#allocation2 + $0x328] sm:$0xff]  ;;  %v12591_v44 = vld [vmem:[#allocation2 + $0x338] sm:$0xff] }
 0x72c   :  { %12816 = vmatpush1.bf16.msra.mxu0 %v12736_v24  ;;  %12898 = vmatpush1.bf16.msra.mxu1 %v12738_v25  ;;  %v12588_v24 = vld [vmem:[#allocation2 + $0x320] sm:$0xff]  ;;  %v12590_v25 = vld [vmem:[#allocation2 + $0x330] sm:$0xff] }
 0x72d   :  { %12908 = vmatprep.subr.bf16.mxu0 %v12493_v27  ;;  %12990 = vmatprep.subr.bf16.mxu1 %v12495_v29  ;;  %v12597_v27 = vld [vmem:[#allocation2 + $0x368] sm:$0xff]  ;;  %v12599_v29 = vld [vmem:[#allocation2 + $0x378] sm:$0xff] }
 0x72f   :  { %12818 = vmatmul.mubr.bf16.vlgmr.msra.gmra.mrb[4].mxu0 %v19576_v31  ;;  %12900 = vmatmul.mubr.bf16.vlgmr.msra.gmra.mrb[12].mxu1 %v19576_v31 }
 0x730   :  { %12909 = vmatpush1.bf16.msra.mxu0 %v12492_v32  ;;  %12991 = vmatpush1.bf16.msra.mxu1 %v12494_v39  ;;  %v12596_v32 = vld [vmem:[#allocation2 + $0x360] sm:$0xff]  ;;  %v12598_v39 = vld [vmem:[#allocation2 + $0x370] sm:$0xff] }
 0x731   :  { %12910 = vmatprep.subr.bf16.mxu0 %v12501_v40  ;;  %12992 = vmatprep.subr.bf16.mxu1 %v12503_v41  ;;  %v12605_v40 = vld [vmem:[#allocation2 + $0x3a8] sm:$0xff]  ;;  %v12607_v41 = vld [vmem:[#allocation2 + $0x3b8] sm:$0xff] }
 0x732   :  { %12940 = vmatprep.mubr.bf16.mxu0 %v19558_v47  ;;  %13022 = vmatprep.mubr.bf16.mxu1 %v19558_v47  ;;  %v12524_v47 = vld [vmem:[#allocation2 + $0x120] sm:$0xff] }
 0x734   :  { %12911 = vmatpush1.bf16.msra.mxu0 %v12500_v42  ;;  %12993 = vmatpush1.bf16.msra.mxu1 %v12502_v43  ;;  %v12604_v42 = vld [vmem:[#allocation2 + $0x3a0] sm:$0xff]  ;;  %v12606_v43 = vld [vmem:[#allocation2 + $0x3b0] sm:$0xff] }
 0x735   :  { %12912 = vmatprep.subr.bf16.mxu0 %v12509_v57  ;;  %12994 = vmatprep.subr.bf16.mxu1 %v12511_v63  ;;  %v12613_v57 = vld [vmem:[#allocation2 + $0x3e8] sm:$0xff]  ;;  %v12615_v63 = vld [vmem:[#allocation2 + $0x3f8] sm:$0xff] }
 0x738   :  { %12913 = vmatpush1.bf16.msra.mxu0 %v12508_v1  ;;  %12995 = vmatpush1.bf16.msra.mxu1 %v12510_v30  ;;  %v12612_v1 = vld [vmem:[#allocation2 + $0x3e0] sm:$0xff]  ;;  %v12614_v30 = vld [vmem:[#allocation2 + $0x3f0] sm:$0xff] }
 0x739   :  { %12914 = vmatprep.subr.bf16.mxu0 %v12517_v33  ;;  %12996 = vmatprep.subr.bf16.mxu1 %v12519_v16  ;;  %v12621_v33 = vld [vmem:[#allocation2 + $0x428] sm:$0xff]  ;;  %v12623_v16 = vld [vmem:[#allocation2 + $0x438] sm:$0xff] }
 0x73c   :  { %12915 = vmatpush1.bf16.msra.mxu0 %v12516_v19  ;;  %12997 = vmatpush1.bf16.msra.mxu1 %v12518_v45  ;;  %v12620_v19 = vld [vmem:[#allocation2 + $0x420] sm:$0xff]  ;;  %v12622_v45 = vld [vmem:[#allocation2 + $0x430] sm:$0xff] }
 0x73d   :  { %12916 = vmatprep.subr.bf16.mxu0 %v12525_v46  ;;  %12998 = vmatprep.subr.bf16.mxu1 %v12527_v48  ;;  %v12629_v46 = vld [vmem:[#allocation2 + $0x468] sm:$0xff]  ;;  %v12631_v48 = vld [vmem:[#allocation2 + $0x478] sm:$0xff] }
 0x740   :  { %12917 = vmatpush1.bf16.msra.mxu0 %v12524_v47  ;;  %12999 = vmatpush1.bf16.msra.mxu1 %v12526_v49  ;;  %v12628_v47 = vld [vmem:[#allocation2 + $0x460] sm:$0xff]  ;;  %v12630_v49 = vld [vmem:[#allocation2 + $0x470] sm:$0xff] }
 0x741   :  { %12918 = vmatprep.subr.bf16.mxu0 %v12533_v50  ;;  %13000 = vmatprep.subr.bf16.mxu1 %v12535_v51  ;;  %v12637_v50 = vld [vmem:[#allocation2 + $0x4a8] sm:$0xff]  ;;  %v12639_v51 = vld [vmem:[#allocation2 + $0x4b8] sm:$0xff] }
 0x744   :  { %12919 = vmatpush1.bf16.msra.mxu0 %v12532_v52  ;;  %13001 = vmatpush1.bf16.msra.mxu1 %v12534_v53  ;;  %v12636_v52 = vld [vmem:[#allocation2 + $0x4a0] sm:$0xff]  ;;  %v12638_v53 = vld [vmem:[#allocation2 + $0x4b0] sm:$0xff] }
 0x745   :  { %12920 = vmatprep.subr.bf16.mxu0 %v12541_v54  ;;  %13002 = vmatprep.subr.bf16.mxu1 %v12543_v56  ;;  %v12645_v54 = vld [vmem:[#allocation2 + $0x4e8] sm:$0xff]  ;;  %v12644_v56 = vld [vmem:[#allocation2 + $0x4e0] sm:$0xff] }
 0x748   :  { %12921 = vmatpush1.bf16.msra.mxu0 %v12540_v58  ;;  %13003 = vmatpush1.bf16.msra.mxu1 %v12542_v59  ;;  %v12646_v58 = vld [vmem:[#allocation2 + $0x4f0] sm:$0xff]  ;;  %v12653_v59 = vld [vmem:[#allocation2 + $0x528] sm:$0xff] }
 0x749   :  { %12922 = vmatprep.subr.bf16.mxu0 %v12549_v60  ;;  %13004 = vmatprep.subr.bf16.mxu1 %v12551_v61  ;;  %v12655_v60 = vld [vmem:[#allocation2 + $0x538] sm:$0xff]  ;;  %v12654_v61 = vld [vmem:[#allocation2 + $0x530] sm:$0xff] }
 0x74c   :  { %12923 = vmatpush1.bf16.msra.mxu0 %v12548_v62  ;;  %13005 = vmatpush1.bf16.msra.mxu1 %v12550_v0  ;;  %v12661_v62 = vld [vmem:[#allocation2 + $0x568] sm:$0xff]  ;;  %v12663_v0 = vld [vmem:[#allocation2 + $0x578] sm:$0xff] }
 0x74d   :  { %12924 = vmatprep.subr.bf16.mxu0 %v12557_v2  ;;  %13006 = vmatprep.subr.bf16.mxu1 %v12559_v3  ;;  %v12660_v2 = vld [vmem:[#allocation2 + $0x560] sm:$0xff]  ;;  %v12662_v3 = vld [vmem:[#allocation2 + $0x570] sm:$0xff] }
 0x750   :  { %12925 = vmatpush1.bf16.msra.mxu0 %v12556_v4  ;;  %13007 = vmatpush1.bf16.msra.mxu1 %v12558_v5  ;;  %v12669_v4 = vld [vmem:[#allocation2 + $0x5a8] sm:$0xff]  ;;  %v12671_v5 = vld [vmem:[#allocation2 + $0x5b8] sm:$0xff] }
 0x751   :  { %12926 = vmatprep.subr.bf16.mxu0 %v12565_v6  ;;  %13008 = vmatprep.subr.bf16.mxu1 %v12567_v7  ;;  %v12668_v6 = vld [vmem:[#allocation2 + $0x5a0] sm:$0xff]  ;;  %v12670_v7 = vld [vmem:[#allocation2 + $0x5b0] sm:$0xff] }
 0x754   :  { %12927 = vmatpush1.bf16.msra.mxu0 %v12564_v8  ;;  %13009 = vmatpush1.bf16.msra.mxu1 %v12566_v9  ;;  %v12677_v8 = vld [vmem:[#allocation2 + $0x5e8] sm:$0xff]  ;;  %v12679_v9 = vld [vmem:[#allocation2 + $0x5f8] sm:$0xff] }
 0x755   :  { %12928 = vmatprep.subr.bf16.mxu0 %v12573_v10  ;;  %13010 = vmatprep.subr.bf16.mxu1 %v12575_v12  ;;  %v12676_v10 = vld [vmem:[#allocation2 + $0x5e0] sm:$0xff]  ;;  %v12678_v12 = vld [vmem:[#allocation2 + $0x5f0] sm:$0xff] }
 0x758   :  { %12929 = vmatpush1.bf16.msra.mxu0 %v12572_v17  ;;  %13011 = vmatpush1.bf16.msra.mxu1 %v12574_v18  ;;  %v12685_v17 = vld [vmem:[#allocation2 + $0x628] sm:$0xff]  ;;  %v12687_v18 = vld [vmem:[#allocation2 + $0x638] sm:$0xff] }
 0x759   :  { %12930 = vmatprep.subr.bf16.mxu0 %v12581_v15  ;;  %13012 = vmatprep.subr.bf16.mxu1 %v12583_v55  ;;  %v12684_v15 = vld [vmem:[#allocation2 + $0x620] sm:$0xff]  ;;  %v12686_v55 = vld [vmem:[#allocation2 + $0x630] sm:$0xff] }
 0x75c   :  { %12931 = vmatpush1.bf16.msra.mxu0 %v12580_v21  ;;  %13013 = vmatpush1.bf16.msra.mxu1 %v12582_v22  ;;  %v12693_v21 = vld [vmem:[#allocation2 + $0x668] sm:$0xff]  ;;  %v12695_v22 = vld [vmem:[#allocation2 + $0x678] sm:$0xff] }
 0x75d   :  { %12932 = vmatprep.subr.bf16.mxu0 %v12589_v23  ;;  %13014 = vmatprep.subr.bf16.mxu1 %v12591_v44  ;;  %v12692_v23 = vld [vmem:[#allocation2 + $0x660] sm:$0xff]  ;;  %v12694_v44 = vld [vmem:[#allocation2 + $0x670] sm:$0xff] }
 0x760   :  { %12933 = vmatpush1.bf16.msra.mxu0 %v12588_v24  ;;  %13015 = vmatpush1.bf16.msra.mxu1 %v12590_v25  ;;  %v12701_v24 = vld [vmem:[#allocation2 + $0x6a8] sm:$0xff]  ;;  %v12703_v25 = vld [vmem:[#allocation2 + $0x6b8] sm:$0xff] }
 0x761   :  { %12934 = vmatprep.subr.bf16.mxu0 %v12597_v27  ;;  %13016 = vmatprep.subr.bf16.mxu1 %v12599_v29  ;;  %v12700_v27 = vld [vmem:[#allocation2 + $0x6a0] sm:$0xff]  ;;  %v12702_v29 = vld [vmem:[#allocation2 + $0x6b0] sm:$0xff] }
 0x764   :  { %12935 = vmatpush1.bf16.msra.mxu0 %v12596_v32  ;;  %13017 = vmatpush1.bf16.msra.mxu1 %v12598_v39  ;;  %v12709_v32 = vld [vmem:[#allocation2 + $0x6e8] sm:$0xff]  ;;  %v12711_v39 = vld [vmem:[#allocation2 + $0x6f8] sm:$0xff] }
 0x765   :  { %12936 = vmatprep.subr.bf16.mxu0 %v12605_v40  ;;  %13018 = vmatprep.subr.bf16.mxu1 %v12607_v41  ;;  %v12708_v40 = vld [vmem:[#allocation2 + $0x6e0] sm:$0xff]  ;;  %v12710_v41 = vld [vmem:[#allocation2 + $0x6f0] sm:$0xff] }
 0x768   :  { %12937 = vmatpush1.bf16.msra.mxu0 %v12604_v42  ;;  %13019 = vmatpush1.bf16.msra.mxu1 %v12606_v43  ;;  %v12717_v42 = vld [vmem:[#allocation2 + $0x728] sm:$0xff]  ;;  %v12719_v43 = vld [vmem:[#allocation2 + $0x738] sm:$0xff] }
 0x769   :  { %12938 = vmatprep.subr.bf16.mxu0 %v12613_v57  ;;  %13020 = vmatprep.subr.bf16.mxu1 %v12615_v63  ;;  %v12716_v57 = vld [vmem:[#allocation2 + $0x720] sm:$0xff]  ;;  %v12718_v63 = vld [vmem:[#allocation2 + $0x730] sm:$0xff] }
 0x76c   :  { %12939 = vmatpush1.bf16.msra.mxu0 %v12612_v1  ;;  %13021 = vmatpush1.bf16.msra.mxu1 %v12614_v30  ;;  %v12725_v1 = vld [vmem:[#allocation2 + $0x768] sm:$0xff]  ;;  %v12727_v30 = vld [vmem:[#allocation2 + $0x778] sm:$0xff] }
 0x76d   :  { %12949 = vmatprep.subr.bf16.mxu0 %v12621_v33  ;;  %13031 = vmatprep.subr.bf16.mxu1 %v12623_v16  ;;  %v12724_v33 = vld [vmem:[#allocation2 + $0x760] sm:$0xff]  ;;  %v12726_v16 = vld [vmem:[#allocation2 + $0x770] sm:$0xff] }
 0x76f   :  { %12941 = vmatmul.mubr.bf16.vlgmr.msra.gmra.mrb[8].mxu0 %v19564_v11  ;;  %13023 = vmatmul.mubr.bf16.vlgmr.msra.gmra.mrb[16].mxu1 %v19564_v11  ;;  %v12647_v11 = vld [vmem:[#allocation2 + $0x4f8] sm:$0xff] }
 0x770   :  { %12950 = vmatpush1.bf16.msra.mxu0 %v12620_v19  ;;  %13032 = vmatpush1.bf16.msra.mxu1 %v12622_v45  ;;  %v12733_v19 = vld [vmem:[#allocation2 + $0x7a8] sm:$0xff]  ;;  %v12735_v45 = vld [vmem:[#allocation2 + $0x7b8] sm:$0xff] }
 0x771   :  { %12951 = vmatprep.subr.bf16.mxu0 %v12629_v46  ;;  %13033 = vmatprep.subr.bf16.mxu1 %v12631_v48  ;;  %v12732_v46 = vld [vmem:[#allocation2 + $0x7a0] sm:$0xff]  ;;  %v12734_v48 = vld [vmem:[#allocation2 + $0x7b0] sm:$0xff] }
 0x772   :  { %12981 = vmatprep.mubr.bf16.mxu0 %v19568_v20  ;;  %13063 = vmatprep.mubr.bf16.mxu1 %v19568_v20  ;;  %v12652_v20 = vld [vmem:[#allocation2 + $0x520] sm:$0xff] }
 0x774   :  { %12952 = vmatpush1.bf16.msra.mxu0 %v12628_v47  ;;  %13034 = vmatpush1.bf16.msra.mxu1 %v12630_v49  ;;  %v12741_v47 = vld [vmem:[#allocation2 + $0x7e8] sm:$0xff]  ;;  %v12743_v49 = vld [vmem:[#allocation2 + $0x7f8] sm:$0xff] }
 0x775   :  { %12953 = vmatprep.subr.bf16.mxu0 %v12637_v50  ;;  %13035 = vmatprep.subr.bf16.mxu1 %v12639_v51  ;;  %v12740_v50 = vld [vmem:[#allocation2 + $0x7e0] sm:$0xff]  ;;  %v12742_v51 = vld [vmem:[#allocation2 + $0x7f0] sm:$0xff] }
 0x778   :  { %12954 = vmatpush1.bf16.msra.mxu0 %v12636_v52  ;;  %13036 = vmatpush1.bf16.msra.mxu1 %v12638_v53 }
 0x779   :  { %12955 = vmatprep.subr.bf16.mxu0 %v12645_v54  ;;  %13037 = vmatprep.subr.bf16.mxu1 %v12647_v11 }
 0x77c   :  { %12956 = vmatpush1.bf16.msra.mxu0 %v12644_v56  ;;  %13038 = vmatpush1.bf16.msra.mxu1 %v12646_v58 }
 0x77d   :  { %12957 = vmatprep.subr.bf16.mxu0 %v12653_v59  ;;  %13039 = vmatprep.subr.bf16.mxu1 %v12655_v60 }
 0x780   :  { %12958 = vmatpush1.bf16.msra.mxu0 %v12652_v20  ;;  %13040 = vmatpush1.bf16.msra.mxu1 %v12654_v61 }
 0x781   :  { %12959 = vmatprep.subr.bf16.mxu0 %v12661_v62  ;;  %13041 = vmatprep.subr.bf16.mxu1 %v12663_v0 }
 0x784   :  { %12960 = vmatpush1.bf16.msra.mxu0 %v12660_v2  ;;  %13042 = vmatpush1.bf16.msra.mxu1 %v12662_v3 }
 0x785   :  { %12961 = vmatprep.subr.bf16.mxu0 %v12669_v4  ;;  %13043 = vmatprep.subr.bf16.mxu1 %v12671_v5 }
 0x788   :  { %12962 = vmatpush1.bf16.msra.mxu0 %v12668_v6  ;;  %13044 = vmatpush1.bf16.msra.mxu1 %v12670_v7 }
 0x789   :  { %12963 = vmatprep.subr.bf16.mxu0 %v12677_v8  ;;  %13045 = vmatprep.subr.bf16.mxu1 %v12679_v9 }
 0x78c   :  { %12964 = vmatpush1.bf16.msra.mxu0 %v12676_v10  ;;  %13046 = vmatpush1.bf16.msra.mxu1 %v12678_v12 }
 0x78d   :  { %12965 = vmatprep.subr.bf16.mxu0 %v12685_v17  ;;  %13047 = vmatprep.subr.bf16.mxu1 %v12687_v18 }
 0x790   :  { %12966 = vmatpush1.bf16.msra.mxu0 %v12684_v15  ;;  %13048 = vmatpush1.bf16.msra.mxu1 %v12686_v55 }
 0x791   :  { %12967 = vmatprep.subr.bf16.mxu0 %v12693_v21  ;;  %13049 = vmatprep.subr.bf16.mxu1 %v12695_v22 }
 0x794   :  { %12968 = vmatpush1.bf16.msra.mxu0 %v12692_v23  ;;  %13050 = vmatpush1.bf16.msra.mxu1 %v12694_v44 }
 0x795   :  { %12969 = vmatprep.subr.bf16.mxu0 %v12701_v24  ;;  %13051 = vmatprep.subr.bf16.mxu1 %v12703_v25 }
 0x798   :  { %12970 = vmatpush1.bf16.msra.mxu0 %v12700_v27  ;;  %13052 = vmatpush1.bf16.msra.mxu1 %v12702_v29 }
 0x799   :  { %12971 = vmatprep.subr.bf16.mxu0 %v12709_v32  ;;  %13053 = vmatprep.subr.bf16.mxu1 %v12711_v39 }
 0x79c   :  { %12972 = vmatpush1.bf16.msra.mxu0 %v12708_v40  ;;  %13054 = vmatpush1.bf16.msra.mxu1 %v12710_v41 }
 0x79d   :  { %12973 = vmatprep.subr.bf16.mxu0 %v12717_v42  ;;  %13055 = vmatprep.subr.bf16.mxu1 %v12719_v43 }
 0x7a0   :  { %12974 = vmatpush1.bf16.msra.mxu0 %v12716_v57  ;;  %13056 = vmatpush1.bf16.msra.mxu1 %v12718_v63 }
 0x7a1   :  { %12975 = vmatprep.subr.bf16.mxu0 %v12725_v1  ;;  %13057 = vmatprep.subr.bf16.mxu1 %v12727_v30 }
 0x7a4   :  { %12976 = vmatpush1.bf16.msra.mxu0 %v12724_v33  ;;  %13058 = vmatpush1.bf16.msra.mxu1 %v12726_v16 }
 0x7a5   :  { %12977 = vmatprep.subr.bf16.mxu0 %v12733_v19  ;;  %13059 = vmatprep.subr.bf16.mxu1 %v12735_v45 }
 0x7a8   :  { %12978 = vmatpush1.bf16.msra.mxu0 %v12732_v46  ;;  %13060 = vmatpush1.bf16.msra.mxu1 %v12734_v48 }
 0x7a9   :  { %12979 = vmatprep.subr.bf16.mxu0 %v12741_v47  ;;  %13061 = vmatprep.subr.bf16.mxu1 %v12743_v49 }
 0x7ac   :  { %12980 = vmatpush1.bf16.msra.mxu0 %v12740_v50  ;;  %13062 = vmatpush1.bf16.msra.mxu1 %v12742_v51 }
 0x7af   :  { %12982 = vmatmul.mubr.bf16.vlgmr.msra.gmra.mrb[8].mxu0 %v19576_v31  ;;  %13064 = vmatmul.mubr.bf16.vlgmr.msra.gmra.mrb[16].mxu1 %v19576_v31 }
 0x802   :  { %v19588_v52 = vpop.f32.mrb[4].mxu0  ;;  %v19590_v53 = vpop.f32.mrb[12].mxu1 }
 0x803   :  { %v13072_v54 = vrot.slane %v19588_v52, 4  ;;  %v13128_v11 = vmul.f32 %v19588_v52, %v19588_v52  ;;  %v13084_v56 = vrot.slane %v19590_v53, 4  ;;  %v13130_v58 = vmul.f32 %v19590_v53, %v19590_v53  ;;  %v19598_v59 = vpop.f32.mrb[5].mxu0  ;;  %v19600_v60 = vpop.f32.mrb[13].mxu1 }
 0x804   :  { %v13078_v31 = vrot.slane %v19598_v59, 4  ;;  %v13129_v20 = vmul.f32 %v19598_v59, %v19598_v59  ;;  %v13090_v61 = vrot.slane %v19600_v60, 4  ;;  %v13131_v62 = vmul.f32 %v19600_v60, %v19600_v60  ;;  %v12823_v0 = vpop.f32.mrb[6].mxu0  ;;  %v12905_v2 = vpop.f32.mrb[14].mxu1 }
 0x805   :  { %v13073_v3 = vadd.f32 %v13072_v54, %v19588_v52  ;;  %v13136_v4 = vrot.slane %v13128_v11, 4  ;;  %v13085_v5 = vadd.f32 %v13084_v56, %v19590_v53  ;;  %v13148_v6 = vrot.slane %v13130_v58, 4  ;;  %v12824_v7 = vpop.f32.mrb[7].mxu0  ;;  %v12906_v8 = vpop.f32.mrb[15].mxu1 }
 0x806   :  { %v13079_v9 = vadd.f32 %v13078_v31, %v19598_v59  ;;  %v13142_v10 = vrot.slane %v13129_v20, 4  ;;  %v13091_v12 = vadd.f32 %v13090_v61, %v19600_v60  ;;  %v13154_v17 = vrot.slane %v13131_v62, 4 }
 0x807   :  { %v13074_v18 = vrot.slane %v13073_v3, 2  ;;  %v13137_v15 = vadd.f32 %v13136_v4, %v13128_v11  ;;  %v13086_v55 = vrot.slane %v13085_v5, 2  ;;  %v13149_v21 = vadd.f32 %v13148_v6, %v13130_v58 }
 0x808   :  { %v13080_v22 = vrot.slane %v13079_v9, 2  ;;  %v13143_v23 = vadd.f32 %v13142_v10, %v13129_v20  ;;  %v13092_v44 = vrot.slane %v13091_v12, 2  ;;  %v13155_v24 = vadd.f32 %v13154_v17, %v13131_v62 }
 0x809   :  { %v13075_v25 = vadd.f32 %v13074_v18, %v13073_v3  ;;  %v13138_v27 = vrot.slane %v13137_v15, 2  ;;  %v13087_v29 = vadd.f32 %v13086_v55, %v13085_v5  ;;  %v13150_v32 = vrot.slane %v13149_v21, 2 }
 0x80a   :  { %v13081_v39 = vadd.f32 %v13080_v22, %v13079_v9  ;;  %v13144_v40 = vrot.slane %v13143_v23, 2  ;;  %v13093_v41 = vadd.f32 %v13092_v44, %v13091_v12  ;;  %v13156_v42 = vrot.slane %v13155_v24, 2 }
 0x80b   :  { %v13076_v43 = vrot.slane %v13075_v25, 1  ;;  %v13139_v57 = vadd.f32 %v13138_v27, %v13137_v15  ;;  %v13088_v63 = vrot.slane %v13087_v29, 1  ;;  %v13151_v1 = vadd.f32 %v13150_v32, %v13149_v21 }
 0x80c   :  { %v13082_v30 = vrot.slane %v13081_v39, 1  ;;  %v13145_v33 = vadd.f32 %v13144_v40, %v13143_v23  ;;  %v13094_v16 = vrot.slane %v13093_v41, 1  ;;  %v13157_v19 = vadd.f32 %v13156_v42, %v13155_v24 }
 0x80d   :  { %v13077_v45 = vadd.f32 %v13076_v43, %v13075_v25  ;;  %v13140_v46 = vrot.slane %v13139_v57, 1  ;;  %v13089_v48 = vadd.f32 %v13088_v63, %v13087_v29  ;;  %v13152_v47 = vrot.slane %v13151_v1, 1 }
 0x80e   :  { %v13083_v49 = vadd.f32 %v13082_v30, %v13081_v39  ;;  %v13146_v50 = vrot.slane %v13145_v33, 1  ;;  %v13095_v51 = vadd.f32 %v13094_v16, %v13093_v41  ;;  %v13158_v54 = vrot.slane %v13157_v19, 1 }
 0x80f   :  { %v19612_v11 = vmul.f32 0.125, %v13077_v45  ;;  %v13141_v56 = vadd.f32 %v13140_v46, %v13139_v57  ;;  %v19614_v58 = vmul.f32 0.125, %v13089_v48  ;;  %v13153_v31 = vadd.f32 %v13152_v47, %v13151_v1 }
 0x810   :  { %v19616_v20 = vmul.f32 0.125, %v13083_v49  ;;  %v13147_v61 = vadd.f32 %v13146_v50, %v13145_v33  ;;  %v19618_v62 = vmul.f32 0.125, %v13095_v51  ;;  %v13159_v0 = vadd.f32 %v13158_v54, %v13157_v19 }
 0x811   :  { %v13184_v2 = vmul.f32 0.125, %v13141_v56  ;;  %v13192_v3 = vmul.f32 %v19612_v11, %v19612_v11  ;;  %v13186_v4 = vmul.f32 0.125, %v13153_v31  ;;  %v13194_v5 = vmul.f32 %v19614_v58, %v19614_v58 }
 0x812   :  { %v13185_v6 = vmul.f32 0.125, %v13147_v61  ;;  %v13193_v7 = vmul.f32 %v19616_v20, %v19616_v20  ;;  %v13187_v8 = vmul.f32 0.125, %v13159_v0  ;;  %v13195_v9 = vmul.f32 %v19618_v62, %v19618_v62 }
 0x813   :  { %v13200_v10 = vsub.f32 %v13184_v2, %v13192_v3  ;;  %v13202_v12 = vsub.f32 %v13186_v4, %v13194_v5 }
 0x814   :  { %v13201_v17 = vsub.f32 %v13185_v6, %v13193_v7  ;;  %v13203_v18 = vsub.f32 %v13187_v8, %v13195_v9 }
 0x815   :  { %v13208_v15 = vmax.f32 %v13200_v10, 0.0  ;;  %v13210_v55 = vmax.f32 %v13202_v12, 0.0 }
 0x816   :  { %v13209_v21 = vmax.f32 %v13201_v17, 0.0  ;;  %v13211_v22 = vmax.f32 %v13203_v18, 0.0 }
 0x817   :  { %v13216_v23 = vadd.f32 1e-05, %v13208_v15  ;;  %v13218_v44 = vadd.f32 1e-05, %v13210_v55 }
 0x818   :  { %v13217_v24 = vadd.f32 1e-05, %v13209_v21  ;;  %v13219_v25 = vadd.f32 1e-05, %v13211_v22 }
 0x819   :  { %15156 = vrsqrt.f32 %v13216_v23 }
 0x81a   :  { %15158 = vrsqrt.f32 %v13218_v44 }
 0x81b   :  { %15160 = vrsqrt.f32 %v13217_v24 }
 0x81c   :  { %15162 = vrsqrt.f32 %v13219_v25 }
 0x823   :  { %v15157_v27 = vpop.eup %15156 }
 0x824   :  { %v15159_v29 = vpop.eup %15158 }
 0x825   :  { %v15161_v32 = vpop.eup %15160 }
 0x826   :  { %v15163_v39 = vpop.eup %15162  ;;  %v13240_v40 = vcombine.low %v15157_v27, %v15161_v32 }
 0x827   :  { %v13241_v41 = vcombine.low %v15159_v29, %v15163_v39 }
 0x828   :  { %v19629_v42 = vrot.slane %v13240_v40, %v19368_v28 }
 0x829   :  { %v19632_v43 = vrot.slane %v13241_v41, %v19368_v28 }
 0x82b   :  { %v13272_v57 = vcombine.low %v19629_v42, %v19632_v43 }
 0x882   :  { %v19636_v63 = vpop.f32.mrb[8].mxu0  ;;  %v19638_v1 = vpop.f32.mrb[16].mxu1 }
 0x883   :  { %v13096_v30 = vrot.slane %v19636_v63, 4  ;;  %v13132_v33 = vmul.f32 %v19636_v63, %v19636_v63  ;;  %v13108_v16 = vrot.slane %v19638_v1, 4  ;;  %v13134_v19 = vmul.f32 %v19638_v1, %v19638_v1  ;;  %v19646_v45 = vpop.f32.mrb[9].mxu0  ;;  %v19648_v46 = vpop.f32.mrb[17].mxu1 }
 0x884   :  { %v13102_v48 = vrot.slane %v19646_v45, 4  ;;  %v13133_v47 = vmul.f32 %v19646_v45, %v19646_v45  ;;  %v13114_v49 = vrot.slane %v19648_v46, 4  ;;  %v13135_v50 = vmul.f32 %v19648_v46, %v19648_v46  ;;  %v12987_v51 = vpop.f32.mrb[10].mxu0  ;;  %v13069_v54 = vpop.f32.mrb[18].mxu1 }
 0x885   :  { %v13097_v56 = vadd.f32 %v13096_v30, %v19636_v63  ;;  %v13160_v31 = vrot.slane %v13132_v33, 4  ;;  %v13109_v61 = vadd.f32 %v13108_v16, %v19638_v1  ;;  %v13172_v0 = vrot.slane %v13134_v19, 4  ;;  %v12988_v2 = vpop.f32.mrb[11].mxu0  ;;  %v13070_v3 = vpop.f32.mrb[19].mxu1 }
 0x886   :  { %v13103_v4 = vadd.f32 %v13102_v48, %v19646_v45  ;;  %v13166_v5 = vrot.slane %v13133_v47, 4  ;;  %v13115_v6 = vadd.f32 %v13114_v49, %v19648_v46  ;;  %v13178_v7 = vrot.slane %v13135_v50, 4 }
 0x887   :  { %v13098_v8 = vrot.slane %v13097_v56, 2  ;;  %v13161_v9 = vadd.f32 %v13160_v31, %v13132_v33  ;;  %v13110_v10 = vrot.slane %v13109_v61, 2  ;;  %v13173_v12 = vadd.f32 %v13172_v0, %v13134_v19 }
 0x888   :  { %v13104_v17 = vrot.slane %v13103_v4, 2  ;;  %v13167_v18 = vadd.f32 %v13166_v5, %v13133_v47  ;;  %v13116_v15 = vrot.slane %v13115_v6, 2  ;;  %v13179_v55 = vadd.f32 %v13178_v7, %v13135_v50 }
 0x889   :  { %v13099_v21 = vadd.f32 %v13098_v8, %v13097_v56  ;;  %v13162_v22 = vrot.slane %v13161_v9, 2  ;;  %v13111_v23 = vadd.f32 %v13110_v10, %v13109_v61  ;;  %v13174_v44 = vrot.slane %v13173_v12, 2 }
 0x88a   :  { %v13105_v24 = vadd.f32 %v13104_v17, %v13103_v4  ;;  %v13168_v25 = vrot.slane %v13167_v18, 2  ;;  %v13117_v27 = vadd.f32 %v13116_v15, %v13115_v6  ;;  %v13180_v29 = vrot.slane %v13179_v55, 2 }
 0x88b   :  { %v13100_v32 = vrot.slane %v13099_v21, 1  ;;  %v13163_v39 = vadd.f32 %v13162_v22, %v13161_v9  ;;  %v13112_v40 = vrot.slane %v13111_v23, 1  ;;  %v13175_v41 = vadd.f32 %v13174_v44, %v13173_v12 }
 0x88c   :  { %v13106_v30 = vrot.slane %v13105_v24, 1  ;;  %v13169_v33 = vadd.f32 %v13168_v25, %v13167_v18  ;;  %v13118_v16 = vrot.slane %v13117_v27, 1  ;;  %v13181_v19 = vadd.f32 %v13180_v29, %v13179_v55 }
 0x88d   :  { %v13101_v48 = vadd.f32 %v13100_v32, %v13099_v21  ;;  %v13164_v47 = vrot.slane %v13163_v39, 1  ;;  %v13113_v49 = vadd.f32 %v13112_v40, %v13111_v23  ;;  %v13176_v50 = vrot.slane %v13175_v41, 1 }
 0x88e   :  { %v13107_v51 = vadd.f32 %v13106_v30, %v13105_v24  ;;  %v13170_v54 = vrot.slane %v13169_v33, 1  ;;  %v13119_v56 = vadd.f32 %v13118_v16, %v13117_v27  ;;  %v13182_v31 = vrot.slane %v13181_v19, 1 }
 0x88f   :  { %v13124_v61 = vmul.f32 0.125, %v13101_v48  ;;  %v13165_v0 = vadd.f32 %v13164_v47, %v13163_v39  ;;  %v13126_v2 = vmul.f32 0.125, %v13113_v49  ;;  %v13177_v3 = vadd.f32 %v13176_v50, %v13175_v41 }
 0x890   :  { %v13125_v4 = vmul.f32 0.125, %v13107_v51  ;;  %v13171_v5 = vadd.f32 %v13170_v54, %v13169_v33  ;;  %v13127_v6 = vmul.f32 0.125, %v13119_v56  ;;  %v13183_v7 = vadd.f32 %v13182_v31, %v13181_v19 }
 0x891   :  { %v13188_v8 = vmul.f32 0.125, %v13165_v0  ;;  %v13196_v9 = vmul.f32 %v13124_v61, %v13124_v61  ;;  %v13190_v10 = vmul.f32 0.125, %v13177_v3  ;;  %v13198_v12 = vmul.f32 %v13126_v2, %v13126_v2 }
 0x892   :  { %v13189_v17 = vmul.f32 0.125, %v13171_v5  ;;  %v13197_v18 = vmul.f32 %v13125_v4, %v13125_v4  ;;  %v13191_v15 = vmul.f32 0.125, %v13183_v7  ;;  %v13199_v55 = vmul.f32 %v13127_v6, %v13127_v6 }
 0x893   :  { %v13204_v21 = vsub.f32 %v13188_v8, %v13196_v9  ;;  %v13206_v22 = vsub.f32 %v13190_v10, %v13198_v12  ;;  %v13280_v54 = vrot.slane %v13272_v57, %v19368_v28  ;;  %v19668_v0 = vsub.s32 4, %v19365_v26 }
 0x894   :  { %v13205_v23 = vsub.f32 %v13189_v17, %v13197_v18  ;;  %v13207_v44 = vsub.f32 %v13191_v15, %v13199_v55  ;;  %v19671_v3 = vsub.s32 5, %v19365_v26  ;;  %v19674_v5 = vsub.s32 6, %v19365_v26 }
 0x895   :  { %v13212_v24 = vmax.f32 %v13204_v21, 0.0  ;;  %v13214_v25 = vmax.f32 %v13206_v22, 0.0  ;;  %v13322_v7 = vsub.s32 7, %v19365_v26 }
 0x896   :  { %v13213_v27 = vmax.f32 %v13205_v23, 0.0  ;;  %v13215_v29 = vmax.f32 %v13207_v44, 0.0 }
 0x897   :  { %v13220_v32 = vadd.f32 1e-05, %v13212_v24  ;;  %v13222_v39 = vadd.f32 1e-05, %v13214_v25 }
 0x898   :  { %v13221_v40 = vadd.f32 1e-05, %v13213_v27  ;;  %v13223_v41 = vadd.f32 1e-05, %v13215_v29 }
 0x899   :  { %15164 = vrsqrt.f32 %v13220_v32 }
 0x89a   :  { %15166 = vrsqrt.f32 %v13222_v39 }
 0x89b   :  { %15168 = vrsqrt.f32 %v13221_v40 }
 0x89c   :  { %15170 = vrsqrt.f32 %v13223_v41 }
 0x8a3   :  { %v15165_v30 = vpop.eup %15164 }
 0x8a4   :  { %v15167_v33 = vpop.eup %15166 }
 0x8a5   :  { %v15169_v16 = vpop.eup %15168 }
 0x8a6   :  { %v15171_v19 = vpop.eup %15170  ;;  %v13242_v48 = vcombine.low %v15165_v30, %v15169_v16 }
 0x8a7   :  { %v13243_v47 = vcombine.low %v15167_v33, %v15171_v19 }
 0x8a8   :  { %v13264_v49 = vrot.slane %v13242_v48, %v19368_v28 }
 0x8a9   :  { %v13271_v50 = vrot.slane %v13243_v47, %v19368_v28 }
 0x8ab   :  { %v13273_v51 = vcombine.low %v13264_v49, %v13271_v50 }
 0x8ad   :  { %v13287_v56 = vrot.slane %v13273_v51, %v19368_v28 }
 0x8af   :  { %v13288_v31 = vcombine.low %v13280_v54, %v13287_v56 }
 0x8b1   :  { %v13290_v8 = vmul.f32 %v13288_v31, %v19179_v34 }
 0x8b3   :  { %v13295_v9 = vrot.slane %v13290_v8, %v19376_v37  ;;  %v13299_v42 = vrot.slane %v13290_v8, %v19379_v38  ;;  %v13303_v43 = vrot.slane %v13290_v8, %v19527_v13  ;;  %v13307_v57 = vrot.slane %v13290_v8, %v19530_v14 }
 0x8b4   :  { %v13311_v10 = vrot.slane %v13290_v8, %v19668_v0  ;;  %v13315_v12 = vrot.slane %v13290_v8, %v19671_v3  ;;  %v13319_v17 = vrot.slane %v13290_v8, %v19674_v5  ;;  %v13323_v18 = vrot.slane %v13290_v8, %v13322_v7 }
 0x8b5   :  { %v13332_v15 = vmul.f32 %v13295_v9, %v19612_v11  ;;  %v13333_v26 = vmul.f32 %v13299_v42, %v19616_v20  ;;  %v13334_v34 = vmul.f32 %v13303_v43, %v19614_v58  ;;  %v13335_v55 = vmul.f32 %v13307_v57, %v19618_v62 }
 0x8b6   :  { %v13336_v21 = vmul.f32 %v13311_v10, %v13124_v61  ;;  %v13337_v22 = vmul.f32 %v13315_v12, %v13125_v4  ;;  %v13338_v23 = vmul.f32 %v13319_v17, %v13126_v2  ;;  %v13339_v44 = vmul.f32 %v13323_v18, %v13127_v6 }
 0x8b7   :  { %v13348_v24 = vcombine.low %v13332_v15, %v13333_v26  ;;  %v13349_v25 = vcombine.low %v13334_v34, %v13335_v55  ;;  %v13399_v27 = vmul.f32 %v13295_v9, %v19588_v52  ;;  %v13400_v29 = vmul.f32 %v13299_v42, %v19598_v59 }
 0x8b8   :  { %v13350_v32 = vcombine.low %v13336_v21, %v13337_v22  ;;  %v13351_v39 = vcombine.low %v13338_v23, %v13339_v44  ;;  %v13401_v11 = vmul.f32 %v13303_v43, %v19590_v53  ;;  %v13402_v20 = vmul.f32 %v13307_v57, %v19600_v60 }
 0x8b9   :  { %v13358_v58 = vrot.slane %v13348_v24, %v19368_v28  ;;  %v13365_v62 = vrot.slane %v13349_v25, %v19368_v28  ;;  %v13403_v61 = vmul.f32 %v13311_v10, %v19636_v63  ;;  %v13404_v2 = vmul.f32 %v13315_v12, %v19646_v45 }
 0x8ba   :  { %v13372_v4 = vrot.slane %v13350_v32, %v19368_v28  ;;  %v13379_v52 = vrot.slane %v13351_v39, %v19368_v28  ;;  %v13405_v59 = vmul.f32 %v13319_v17, %v19638_v1  ;;  %v13406_v6 = vmul.f32 %v13323_v18, %v19648_v46 }
 0x8bb   :  { %v13380_v40 = vcombine.low %v13358_v58, %v13365_v62 }
 0x8bc   :  { %v13381_v53 = vcombine.low %v13372_v4, %v13379_v52 }
 0x8bd   :  { %v13388_v60 = vrot.slane %v13380_v40, %v19368_v28 }
 0x8be   :  { %v13395_v41 = vrot.slane %v13381_v53, %v19368_v28 }
 0x8c0   :  { %v13396_v30 = vcombine.low %v13388_v60, %v13395_v41 }
 0x8c2   :  { %v13398_v33 = vsub.f32 %v19184_v35, %v13396_v30 }
 0x8c4   :  { %v13411_v63 = vrot.slane %v13398_v33, %v19376_v37  ;;  %v13415_v45 = vrot.slane %v13398_v33, %v19379_v38  ;;  %v13419_v16 = vrot.slane %v13398_v33, %v19527_v13  ;;  %v13423_v19 = vrot.slane %v13398_v33, %v19530_v14 }
 0x8c5   :  { %v13427_v1 = vrot.slane %v13398_v33, %v19668_v0  ;;  %v13431_v46 = vrot.slane %v13398_v33, %v19671_v3  ;;  %v13435_v48 = vrot.slane %v13398_v33, %v19674_v5  ;;  %v13439_v47 = vrot.slane %v13398_v33, %v13322_v7 }
 0x8c6   :  { %v13448_v49 = vadd.f32 %v13411_v63, %v13399_v27  ;;  %v13449_v28 = vadd.f32 %v13415_v45, %v13400_v29  ;;  %v13450_v50 = vadd.f32 %v13419_v16, %v13401_v11  ;;  %v13451_v51 = vadd.f32 %v13423_v19, %v13402_v20 }
 0x8c7   :  { %v13452_v35 = vadd.f32 %v13427_v1, %v13403_v61  ;;  %v13453_v54 = vadd.f32 %v13431_v46, %v13404_v2  ;;  %v13454_v56 = vadd.f32 %v13435_v48, %v13405_v59  ;;  %v13455_v31 = vadd.f32 %v13439_v47, %v13406_v6 }
 0x8c8   :  { %vm13456_vm10 = vcmp.gt.f32.partialorder %v13448_v49, 0.0  ;;  %vm13457_vm11 = vcmp.gt.f32.partialorder %v13449_v28, 0.0  ;;  %vm13458_vm12 = vcmp.gt.f32.partialorder %v13450_v50, 0.0  ;;  %vm13459_vm13 = vcmp.gt.f32.partialorder %v13451_v51, 0.0 }
 0x8c9   :  { %vm13460_vm14 = vcmp.gt.f32.partialorder %v13452_v35, 0.0  ;;  %vm13461_vm15 = vcmp.gt.f32.partialorder %v13453_v54, 0.0  ;;  %vm13462_vm0 = vcmp.gt.f32.partialorder %v13454_v56, 0.0  ;;  %vm13463_vm1 = vcmp.gt.f32.partialorder %v13455_v31, 0.0 }
 0x8ca   :  { %v13464_v8 = vmul.f32 0.2, %v13448_v49  ;;  %v13465_v9 = vmul.f32 0.2, %v13449_v28  ;;  %v13466_v42 = vmul.f32 0.2, %v13450_v50 }
 0x8cb   :  { %v13467_v7 = vmul.f32 0.2, %v13451_v51  ;;  %v13468_v43 = vmul.f32 0.2, %v13452_v35  ;;  %v13469_v57 = vmul.f32 0.2, %v13453_v54 }
 0x8cc   :  { %v13470_v10 = vmul.f32 0.2, %v13454_v56  ;;  %v13471_v12 = vmul.f32 0.2, %v13455_v31  ;;  %v19712_v17 = vsel %vm13456_vm10, %v13448_v49, %v13464_v8  ;;  %v13473_v18 = vsel %vm13457_vm11, %v13449_v28, %v13465_v9 }
 0x8cd   :  { %v19716_v15 = vsel %vm13458_vm12, %v13450_v50, %v13466_v42  ;;  %v19719_v26 = vsel %vm13459_vm13, %v13451_v51, %v13467_v7  ;;  %v19722_v34 = vsel %vm13460_vm14, %v13452_v35, %v13468_v43  ;;  %v19725_v55 = vsel %vm13461_vm15, %v13453_v54, %v13469_v57 }
 0x8ce   :  { %v19728_v21 = vsel %vm13462_vm0, %v13454_v56, %v13470_v10  ;;  %v19731_v22 = vsel %vm13463_vm1, %v13455_v31, %v13471_v12 }
 0x8cf   :  { %15188 = dma.done.wait [#allocation4 + $0x1], 57344 }
 0x8d0   :  { %15189 = vsyncadd [#allocation4 + $0x1], 4294909952  ;;  %v19733_v23 = vpack.c.bf16 %v13473_v18, %v13473_v18  ;;  %v13493_v44 = vld [vmem:[#allocation3 + $0x8] sm:$0xff]  ;;  %v13495_v24 = vld [vmem:[#allocation3 + $0x18] sm:$0xff]  ;;  %vm14641_vm2 = vcmask 130048  }
 0x8d1   :  { %v13492_v25 = vld [vmem:[#allocation3] sm:$0xff]  ;;  %13976 = vmatprep.subr.bf16.mxu0 %v13493_v44  ;;  %14140 = vmatprep.subr.bf16.mxu1 %v13495_v24  ;;  %v13494_v27 = vld [vmem:[#allocation3 + $0x10] sm:$0xff]  ;;  %v13499_v39 = vld [vmem:[#allocation3 + $0x38] sm:$0xff] }
 0x8d2   :  { %14008 = vmatprep.mubr.bf16.mxu0 %v19733_v23  ;;  %14172 = vmatprep.mubr.bf16.mxu1 %v19733_v23  ;;  %v13500_v29 = vld [vmem:[#allocation3 + $0x40] sm:$0xff]  ;;  %v13502_v32 = vld [vmem:[#allocation3 + $0x50] sm:$0xff]  ;;  %v13501_v11 = vld [vmem:[#allocation3 + $0x48] sm:$0xff] }
 0x8d3   :  { %13977 = vmatpush1.bf16.msra.mxu0 %v13492_v25  ;;  %14141 = vmatpush1.bf16.msra.mxu1 %v13494_v27  ;;  %v13507_v20 = vld [vmem:[#allocation3 + $0x78] sm:$0xff]  ;;  %v13509_v58 = vld [vmem:[#allocation3 + $0x88] sm:$0xff]  ;;  %v13506_v62 = vld [vmem:[#allocation3 + $0x70] sm:$0xff] }
 0x8d4   :  { %13978 = vmatprep.subr.bf16.mxu0 %v13500_v29  ;;  %14142 = vmatprep.subr.bf16.mxu1 %v13502_v32  ;;  %v13508_v61 = vld [vmem:[#allocation3 + $0x80] sm:$0xff]  ;;  %v13514_v2 = vld [vmem:[#allocation3 + $0xb0] sm:$0xff]  ;;  %v13513_v52 = vld [vmem:[#allocation3 + $0xa8] sm:$0xff] }
 0x8d5   :  { %v13516_v4 = vld [vmem:[#allocation3 + $0xc0] sm:$0xff]  ;;  %v13515_v59 = vld [vmem:[#allocation3 + $0xb8] sm:$0xff]  ;;  %v13521_v6 = vld [vmem:[#allocation3 + $0xe8] sm:$0xff] }
 0x8d6   :  { %v13523_v40 = vld [vmem:[#allocation3 + $0xf8] sm:$0xff]  ;;  %v13520_v53 = vld [vmem:[#allocation3 + $0xe0] sm:$0xff]  ;;  %v13522_v60 = vld [vmem:[#allocation3 + $0xf0] sm:$0xff] }
 0x8d7   :  { %13979 = vmatpush1.bf16.msra.mxu0 %v13499_v39  ;;  %14143 = vmatpush1.bf16.msra.mxu1 %v13501_v11  ;;  %v13528_v41 = vld [vmem:[#allocation3 + $0x120] sm:$0xff]  ;;  %v13530_v30 = vld [vmem:[#allocation3 + $0x130] sm:$0xff]  ;;  %v13527_v33 = vld [vmem:[#allocation3 + $0x118] sm:$0xff] }
 0x8d8   :  { %13980 = vmatprep.subr.bf16.mxu0 %v13507_v20  ;;  %14144 = vmatprep.subr.bf16.mxu1 %v13509_v58  ;;  %v13529_v63 = vld [vmem:[#allocation3 + $0x128] sm:$0xff]  ;;  %v13535_v45 = vld [vmem:[#allocation3 + $0x158] sm:$0xff]  ;;  %v13534_v19 = vld [vmem:[#allocation3 + $0x150] sm:$0xff] }
 0x8d9   :  { %v13537_v16 = vld [vmem:[#allocation3 + $0x168] sm:$0xff]  ;;  %v13536_v1 = vld [vmem:[#allocation3 + $0x160] sm:$0xff]  ;;  %v13542_v46 = vld [vmem:[#allocation3 + $0x190] sm:$0xff] }
 0x8da   :  { %v13544_v48 = vld [vmem:[#allocation3 + $0x1a0] sm:$0xff]  ;;  %v13541_v47 = vld [vmem:[#allocation3 + $0x188] sm:$0xff]  ;;  %v13543_v49 = vld [vmem:[#allocation3 + $0x198] sm:$0xff] }
 0x8db   :  { %13981 = vmatpush1.bf16.msra.mxu0 %v13506_v62  ;;  %14145 = vmatpush1.bf16.msra.mxu1 %v13508_v61  ;;  %v13549_v28 = vld [vmem:[#allocation3 + $0x1c8] sm:$0xff]  ;;  %v13551_v50 = vld [vmem:[#allocation3 + $0x1d8] sm:$0xff]  ;;  %v13548_v51 = vld [vmem:[#allocation3 + $0x1c0] sm:$0xff] }
 0x8dc   :  { %13982 = vmatprep.subr.bf16.mxu0 %v13514_v2  ;;  %14146 = vmatprep.subr.bf16.mxu1 %v13516_v4  ;;  %v13550_v35 = vld [vmem:[#allocation3 + $0x1d0] sm:$0xff]  ;;  %v13556_v54 = vld [vmem:[#allocation3 + $0x200] sm:$0xff]  ;;  %v13555_v31 = vld [vmem:[#allocation3 + $0x1f8] sm:$0xff] }
 0x8dd   :  { %v13558_v56 = vld [vmem:[#allocation3 + $0x210] sm:$0xff]  ;;  %v13557_v8 = vld [vmem:[#allocation3 + $0x208] sm:$0xff]  ;;  %v13563_v9 = vld [vmem:[#allocation3 + $0x238] sm:$0xff] }
 0x8de   :  { %v13565_v42 = vld [vmem:[#allocation3 + $0x248] sm:$0xff]  ;;  %v13562_v7 = vld [vmem:[#allocation3 + $0x230] sm:$0xff]  ;;  %v13564_v43 = vld [vmem:[#allocation3 + $0x240] sm:$0xff] }
 0x8df   :  { %13983 = vmatpush1.bf16.msra.mxu0 %v13513_v52  ;;  %14147 = vmatpush1.bf16.msra.mxu1 %v13515_v59  ;;  %v13570_v57 = vld [vmem:[#allocation3 + $0x270] sm:$0xff]  ;;  %v13572_v10 = vld [vmem:[#allocation3 + $0x280] sm:$0xff]  ;;  %v13569_v12 = vld [vmem:[#allocation3 + $0x268] sm:$0xff] }
 0x8e0   :  { %13984 = vmatprep.subr.bf16.mxu0 %v13521_v6  ;;  %14148 = vmatprep.subr.bf16.mxu1 %v13523_v40  ;;  %v13571_v18 = vld [vmem:[#allocation3 + $0x278] sm:$0xff]  ;;  %v13577_v44 = vld [vmem:[#allocation3 + $0x2a8] sm:$0xff]  ;;  %v13576_v25 = vld [vmem:[#allocation3 + $0x2a0] sm:$0xff] }
 0x8e1   :  { %v13579_v24 = vld [vmem:[#allocation3 + $0x2b8] sm:$0xff]  ;;  %v13578_v27 = vld [vmem:[#allocation3 + $0x2b0] sm:$0xff]  ;;  %v13584_v29 = vld [vmem:[#allocation3 + $0x2e0] sm:$0xff] }
 0x8e2   :  { %v13586_v32 = vld [vmem:[#allocation3 + $0x2f0] sm:$0xff]  ;;  %v13583_v39 = vld [vmem:[#allocation3 + $0x2d8] sm:$0xff]  ;;  %v13585_v11 = vld [vmem:[#allocation3 + $0x2e8] sm:$0xff] }
 0x8e3   :  { %13985 = vmatpush1.bf16.msra.mxu0 %v13520_v53  ;;  %14149 = vmatpush1.bf16.msra.mxu1 %v13522_v60  ;;  %v13591_v20 = vld [vmem:[#allocation3 + $0x318] sm:$0xff]  ;;  %v13593_v58 = vld [vmem:[#allocation3 + $0x328] sm:$0xff]  ;;  %v13590_v62 = vld [vmem:[#allocation3 + $0x310] sm:$0xff]  ;;  %v19739_v53 = vpack.c.bf16 %v19712_v17, %v19712_v17 }
 0x8e4   :  { %13986 = vmatprep.subr.bf16.mxu0 %v13528_v41  ;;  %14150 = vmatprep.subr.bf16.mxu1 %v13530_v30  ;;  %v13592_v61 = vld [vmem:[#allocation3 + $0x320] sm:$0xff]  ;;  %v13598_v2 = vld [vmem:[#allocation3 + $0x350] sm:$0xff]  ;;  %v13597_v52 = vld [vmem:[#allocation3 + $0x348] sm:$0xff] }
 0x8e5   :  { %v13600_v4 = vld [vmem:[#allocation3 + $0x360] sm:$0xff]  ;;  %v13599_v59 = vld [vmem:[#allocation3 + $0x358] sm:$0xff]  ;;  %v13605_v6 = vld [vmem:[#allocation3 + $0x388] sm:$0xff] }
 0x8e6   :  { %v13607_v40 = vld [vmem:[#allocation3 + $0x398] sm:$0xff]  ;;  %v13604_v60 = vld [vmem:[#allocation3 + $0x380] sm:$0xff]  ;;  %v13606_v41 = vld [vmem:[#allocation3 + $0x390] sm:$0xff] }
 0x8e7   :  { %13987 = vmatpush1.bf16.msra.mxu0 %v13527_v33  ;;  %14151 = vmatpush1.bf16.msra.mxu1 %v13529_v63  ;;  %v13612_v30 = vld [vmem:[#allocation3 + $0x3c0] sm:$0xff]  ;;  %v13614_v33 = vld [vmem:[#allocation3 + $0x3d0] sm:$0xff]  ;;  %v19743_v63 = vpack.c.bf16 %v19719_v26, %v19719_v26  ;;  %v13611_v17 = vld [vmem:[#allocation3 + $0x3b8] sm:$0xff] }
 0x8e8   :  { %13988 = vmatprep.subr.bf16.mxu0 %v13535_v45  ;;  %14152 = vmatprep.subr.bf16.mxu1 %v13537_v16  ;;  %v13613_v45 = vld [vmem:[#allocation3 + $0x3c8] sm:$0xff]  ;;  %v13619_v16 = vld [vmem:[#allocation3 + $0x3f8] sm:$0xff]  ;;  %v13618_v26 = vld [vmem:[#allocation3 + $0x3f0] sm:$0xff] }
 0x8eb   :  { %13989 = vmatpush1.bf16.msra.mxu0 %v13534_v19  ;;  %14153 = vmatpush1.bf16.msra.mxu1 %v13536_v1  ;;  %v13621_v19 = vld [vmem:[#allocation3 + $0x408] sm:$0xff]  ;;  %v13620_v1 = vld [vmem:[#allocation3 + $0x400] sm:$0xff] }
 0x8ec   :  { %13990 = vmatprep.subr.bf16.mxu0 %v13542_v46  ;;  %14154 = vmatprep.subr.bf16.mxu1 %v13544_v48  ;;  %v13626_v46 = vld [vmem:[#allocation3 + $0x430] sm:$0xff]  ;;  %v13628_v48 = vld [vmem:[#allocation3 + $0x440] sm:$0xff] }
 0x8ef   :  { %13991 = vmatpush1.bf16.msra.mxu0 %v13541_v47  ;;  %14155 = vmatpush1.bf16.msra.mxu1 %v13543_v49  ;;  %v13625_v47 = vld [vmem:[#allocation3 + $0x428] sm:$0xff]  ;;  %v13627_v49 = vld [vmem:[#allocation3 + $0x438] sm:$0xff] }
 0x8f0   :  { %13992 = vmatprep.subr.bf16.mxu0 %v13549_v28  ;;  %14156 = vmatprep.subr.bf16.mxu1 %v13551_v50  ;;  %v13633_v28 = vld [vmem:[#allocation3 + $0x468] sm:$0xff]  ;;  %v13635_v50 = vld [vmem:[#allocation3 + $0x478] sm:$0xff] }
 0x8f3   :  { %13993 = vmatpush1.bf16.msra.mxu0 %v13548_v51  ;;  %14157 = vmatpush1.bf16.msra.mxu1 %v13550_v35  ;;  %v13632_v51 = vld [vmem:[#allocation3 + $0x460] sm:$0xff]  ;;  %v13634_v35 = vld [vmem:[#allocation3 + $0x470] sm:$0xff] }
 0x8f4   :  { %13994 = vmatprep.subr.bf16.mxu0 %v13556_v54  ;;  %14158 = vmatprep.subr.bf16.mxu1 %v13558_v56  ;;  %v13640_v54 = vld [vmem:[#allocation3 + $0x4a0] sm:$0xff]  ;;  %v13642_v56 = vld [vmem:[#allocation3 + $0x4b0] sm:$0xff] }
 0x8f7   :  { %13995 = vmatpush1.bf16.msra.mxu0 %v13555_v31  ;;  %14159 = vmatpush1.bf16.msra.mxu1 %v13557_v8  ;;  %v13639_v31 = vld [vmem:[#allocation3 + $0x498] sm:$0xff]  ;;  %v13641_v8 = vld [vmem:[#allocation3 + $0x4a8] sm:$0xff] }
 0x8f8   :  { %13996 = vmatprep.subr.bf16.mxu0 %v13563_v9  ;;  %14160 = vmatprep.subr.bf16.mxu1 %v13565_v42  ;;  %v13647_v9 = vld [vmem:[#allocation3 + $0x4d8] sm:$0xff]  ;;  %v13649_v42 = vld [vmem:[#allocation3 + $0x4e8] sm:$0xff] }
 0x8fb   :  { %13997 = vmatpush1.bf16.msra.mxu0 %v13562_v7  ;;  %14161 = vmatpush1.bf16.msra.mxu1 %v13564_v43  ;;  %v13646_v7 = vld [vmem:[#allocation3 + $0x4d0] sm:$0xff]  ;;  %v13648_v43 = vld [vmem:[#allocation3 + $0x4e0] sm:$0xff] }
 0x8fc   :  { %13998 = vmatprep.subr.bf16.mxu0 %v13570_v57  ;;  %14162 = vmatprep.subr.bf16.mxu1 %v13572_v10  ;;  %v13654_v57 = vld [vmem:[#allocation3 + $0x510] sm:$0xff]  ;;  %v13656_v10 = vld [vmem:[#allocation3 + $0x520] sm:$0xff] }
 0x8ff   :  { %13999 = vmatpush1.bf16.msra.mxu0 %v13569_v12  ;;  %14163 = vmatpush1.bf16.msra.mxu1 %v13571_v18  ;;  %v13653_v12 = vld [vmem:[#allocation3 + $0x508] sm:$0xff]  ;;  %v13655_v18 = vld [vmem:[#allocation3 + $0x518] sm:$0xff] }
 0x900   :  { %14000 = vmatprep.subr.bf16.mxu0 %v13577_v44  ;;  %14164 = vmatprep.subr.bf16.mxu1 %v13579_v24  ;;  %v13661_v44 = vld [vmem:[#allocation3 + $0x548] sm:$0xff]  ;;  %v13663_v24 = vld [vmem:[#allocation3 + $0x558] sm:$0xff] }
 0x903   :  { %14001 = vmatpush1.bf16.msra.mxu0 %v13576_v25  ;;  %14165 = vmatpush1.bf16.msra.mxu1 %v13578_v27  ;;  %v13660_v25 = vld [vmem:[#allocation3 + $0x540] sm:$0xff]  ;;  %v13662_v27 = vld [vmem:[#allocation3 + $0x550] sm:$0xff] }
 0x904   :  { %14002 = vmatprep.subr.bf16.mxu0 %v13584_v29  ;;  %14166 = vmatprep.subr.bf16.mxu1 %v13586_v32  ;;  %v13668_v29 = vld [vmem:[#allocation3 + $0x580] sm:$0xff]  ;;  %v13670_v32 = vld [vmem:[#allocation3 + $0x590] sm:$0xff] }
 0x907   :  { %14003 = vmatpush1.bf16.msra.mxu0 %v13583_v39  ;;  %14167 = vmatpush1.bf16.msra.mxu1 %v13585_v11  ;;  %v13667_v39 = vld [vmem:[#allocation3 + $0x578] sm:$0xff]  ;;  %v13669_v11 = vld [vmem:[#allocation3 + $0x588] sm:$0xff] }
 0x908   :  { %14004 = vmatprep.subr.bf16.mxu0 %v13591_v20  ;;  %14168 = vmatprep.subr.bf16.mxu1 %v13593_v58  ;;  %v13675_v20 = vld [vmem:[#allocation3 + $0x5b8] sm:$0xff]  ;;  %v13677_v58 = vld [vmem:[#allocation3 + $0x5c8] sm:$0xff] }
 0x90b   :  { %14005 = vmatpush1.bf16.msra.mxu0 %v13590_v62  ;;  %14169 = vmatpush1.bf16.msra.mxu1 %v13592_v61  ;;  %v13674_v62 = vld [vmem:[#allocation3 + $0x5b0] sm:$0xff]  ;;  %v13676_v61 = vld [vmem:[#allocation3 + $0x5c0] sm:$0xff] }
 0x90c   :  { %14006 = vmatprep.subr.bf16.mxu0 %v13598_v2  ;;  %14170 = vmatprep.subr.bf16.mxu1 %v13600_v4  ;;  %v13682_v2 = vld [vmem:[#allocation3 + $0x5f0] sm:$0xff]  ;;  %v13684_v4 = vld [vmem:[#allocation3 + $0x600] sm:$0xff] }
 0x90f   :  { %14007 = vmatpush1.bf16.msra.mxu0 %v13597_v52  ;;  %14171 = vmatpush1.bf16.msra.mxu1 %v13599_v59  ;;  %v13681_v52 = vld [vmem:[#allocation3 + $0x5e8] sm:$0xff]  ;;  %v13683_v59 = vld [vmem:[#allocation3 + $0x5f8] sm:$0xff] }
 0x910   :  { %14017 = vmatprep.subr.bf16.mxu0 %v13605_v6  ;;  %14181 = vmatprep.subr.bf16.mxu1 %v13607_v40  ;;  %v13689_v6 = vld [vmem:[#allocation3 + $0x628] sm:$0xff]  ;;  %v13691_v40 = vld [vmem:[#allocation3 + $0x638] sm:$0xff] }
 0x912   :  { %14009 = vmatmul.mubr.bf16.vlgmr.msra.gmra.mrb[12].mxu0 %v19739_v53  ;;  %14173 = vmatmul.mubr.bf16.vlgmr.msra.gmra.mrb[20].mxu1 %v19739_v53 }
 0x913   :  { %14018 = vmatpush1.bf16.msra.mxu0 %v13604_v60  ;;  %14182 = vmatpush1.bf16.msra.mxu1 %v13606_v41  ;;  %v13688_v60 = vld [vmem:[#allocation3 + $0x620] sm:$0xff]  ;;  %v13690_v41 = vld [vmem:[#allocation3 + $0x630] sm:$0xff] }
 0x914   :  { %14019 = vmatprep.subr.bf16.mxu0 %v13612_v30  ;;  %14183 = vmatprep.subr.bf16.mxu1 %v13614_v33  ;;  %v13696_v30 = vld [vmem:[#allocation3 + $0x660] sm:$0xff]  ;;  %v13698_v33 = vld [vmem:[#allocation3 + $0x670] sm:$0xff] }
 0x915   :  { %14049 = vmatprep.mubr.bf16.mxu0 %v19743_v63  ;;  %14213 = vmatprep.mubr.bf16.mxu1 %v19743_v63 }
 0x917   :  { %14020 = vmatpush1.bf16.msra.mxu0 %v13611_v17  ;;  %14184 = vmatpush1.bf16.msra.mxu1 %v13613_v45  ;;  %v13695_v17 = vld [vmem:[#allocation3 + $0x658] sm:$0xff]  ;;  %v13697_v45 = vld [vmem:[#allocation3 + $0x668] sm:$0xff] }
 0x918   :  { %14021 = vmatprep.subr.bf16.mxu0 %v13619_v16  ;;  %14185 = vmatprep.subr.bf16.mxu1 %v13621_v19  ;;  %v13703_v16 = vld [vmem:[#allocation3 + $0x698] sm:$0xff]  ;;  %v13705_v19 = vld [vmem:[#allocation3 + $0x6a8] sm:$0xff] }
 0x91b   :  { %14022 = vmatpush1.bf16.msra.mxu0 %v13618_v26  ;;  %14186 = vmatpush1.bf16.msra.mxu1 %v13620_v1  ;;  %v13702_v26 = vld [vmem:[#allocation3 + $0x690] sm:$0xff]  ;;  %v13704_v1 = vld [vmem:[#allocation3 + $0x6a0] sm:$0xff] }
 0x91c   :  { %14023 = vmatprep.subr.bf16.mxu0 %v13626_v46  ;;  %14187 = vmatprep.subr.bf16.mxu1 %v13628_v48  ;;  %v13710_v46 = vld [vmem:[#allocation3 + $0x6d0] sm:$0xff]  ;;  %v13712_v48 = vld [vmem:[#allocation3 + $0x6e0] sm:$0xff] }
 0x91f   :  { %14024 = vmatpush1.bf16.msra.mxu0 %v13625_v47  ;;  %14188 = vmatpush1.bf16.msra.mxu1 %v13627_v49  ;;  %v13709_v47 = vld [vmem:[#allocation3 + $0x6c8] sm:$0xff]  ;;  %v13711_v49 = vld [vmem:[#allocation3 + $0x6d8] sm:$0xff] }
 0x920   :  { %14025 = vmatprep.subr.bf16.mxu0 %v13633_v28  ;;  %14189 = vmatprep.subr.bf16.mxu1 %v13635_v50  ;;  %v13717_v28 = vld [vmem:[#allocation3 + $0x708] sm:$0xff]  ;;  %v13719_v50 = vld [vmem:[#allocation3 + $0x718] sm:$0xff] }
 0x923   :  { %14026 = vmatpush1.bf16.msra.mxu0 %v13632_v51  ;;  %14190 = vmatpush1.bf16.msra.mxu1 %v13634_v35  ;;  %v19751_v51 = vpack.c.bf16 %v19716_v15, %v19716_v15  ;;  %v13716_v35 = vld [vmem:[#allocation3 + $0x700] sm:$0xff]  ;;  %v13723_v15 = vld [vmem:[#allocation3 + $0x738] sm:$0xff] }
 0x924   :  { %14027 = vmatprep.subr.bf16.mxu0 %v13640_v54  ;;  %14191 = vmatprep.subr.bf16.mxu1 %v13642_v56  ;;  %v13718_v54 = vld [vmem:[#allocation3 + $0x710] sm:$0xff]  ;;  %v13724_v56 = vld [vmem:[#allocation3 + $0x740] sm:$0xff] }
 0x927   :  { %14028 = vmatpush1.bf16.msra.mxu0 %v13639_v31  ;;  %14192 = vmatpush1.bf16.msra.mxu1 %v13641_v8  ;;  %v13726_v31 = vld [vmem:[#allocation3 + $0x750] sm:$0xff]  ;;  %v19755_v8 = vpack.c.bf16 %v19725_v55, %v19725_v55 }
 0x928   :  { %14029 = vmatprep.subr.bf16.mxu0 %v13647_v9  ;;  %14193 = vmatprep.subr.bf16.mxu1 %v13649_v42  ;;  %v13725_v9 = vld [vmem:[#allocation3 + $0x748] sm:$0xff]  ;;  %v13731_v42 = vld [vmem:[#allocation3 + $0x778] sm:$0xff]  ;;  %v13730_v55 = vld [vmem:[#allocation3 + $0x770] sm:$0xff] }
 0x92b   :  { %14030 = vmatpush1.bf16.msra.mxu0 %v13646_v7  ;;  %14194 = vmatpush1.bf16.msra.mxu1 %v13648_v43  ;;  %v13733_v7 = vld [vmem:[#allocation3 + $0x788] sm:$0xff]  ;;  %v13732_v43 = vld [vmem:[#allocation3 + $0x780] sm:$0xff] }
 0x92c   :  { %14031 = vmatprep.subr.bf16.mxu0 %v13654_v57  ;;  %14195 = vmatprep.subr.bf16.mxu1 %v13656_v10  ;;  %v13738_v57 = vld [vmem:[#allocation3 + $0x7b0] sm:$0xff]  ;;  %v13740_v10 = vld [vmem:[#allocation3 + $0x7c0] sm:$0xff] }
 0x92f   :  { %14032 = vmatpush1.bf16.msra.mxu0 %v13653_v12  ;;  %14196 = vmatpush1.bf16.msra.mxu1 %v13655_v18  ;;  %v13737_v12 = vld [vmem:[#allocation3 + $0x7a8] sm:$0xff]  ;;  %v13739_v18 = vld [vmem:[#allocation3 + $0x7b8] sm:$0xff] }
 0x930   :  { %14033 = vmatprep.subr.bf16.mxu0 %v13661_v44  ;;  %14197 = vmatprep.subr.bf16.mxu1 %v13663_v24  ;;  %v13745_v44 = vld [vmem:[#allocation3 + $0x7e8] sm:$0xff]  ;;  %v13747_v24 = vld [vmem:[#allocation3 + $0x7f8] sm:$0xff] }
 0x933   :  { %14034 = vmatpush1.bf16.msra.mxu0 %v13660_v25  ;;  %14198 = vmatpush1.bf16.msra.mxu1 %v13662_v27  ;;  %v13744_v25 = vld [vmem:[#allocation3 + $0x7e0] sm:$0xff]  ;;  %v13746_v27 = vld [vmem:[#allocation3 + $0x7f0] sm:$0xff] }
 0x934   :  { %14035 = vmatprep.subr.bf16.mxu0 %v13668_v29  ;;  %14199 = vmatprep.subr.bf16.mxu1 %v13670_v32  ;;  %v13752_v29 = vld [vmem:[#allocation3 + $0x820] sm:$0xff]  ;;  %v13754_v32 = vld [vmem:[#allocation3 + $0x830] sm:$0xff] }
 0x937   :  { %14036 = vmatpush1.bf16.msra.mxu0 %v13667_v39  ;;  %14200 = vmatpush1.bf16.msra.mxu1 %v13669_v11  ;;  %v13751_v39 = vld [vmem:[#allocation3 + $0x818] sm:$0xff]  ;;  %v13753_v11 = vld [vmem:[#allocation3 + $0x828] sm:$0xff] }
 0x938   :  { %14037 = vmatprep.subr.bf16.mxu0 %v13675_v20  ;;  %14201 = vmatprep.subr.bf16.mxu1 %v13677_v58  ;;  %v13759_v20 = vld [vmem:[#allocation3 + $0x858] sm:$0xff]  ;;  %v13761_v58 = vld [vmem:[#allocation3 + $0x868] sm:$0xff] }
 0x93b   :  { %14038 = vmatpush1.bf16.msra.mxu0 %v13674_v62  ;;  %14202 = vmatpush1.bf16.msra.mxu1 %v13676_v61  ;;  %v13758_v62 = vld [vmem:[#allocation3 + $0x850] sm:$0xff]  ;;  %v13760_v61 = vld [vmem:[#allocation3 + $0x860] sm:$0xff] }
 0x93c   :  { %14039 = vmatprep.subr.bf16.mxu0 %v13682_v2  ;;  %14203 = vmatprep.subr.bf16.mxu1 %v13684_v4  ;;  %v13766_v2 = vld [vmem:[#allocation3 + $0x890] sm:$0xff]  ;;  %v13768_v4 = vld [vmem:[#allocation3 + $0x8a0] sm:$0xff] }
 0x93f   :  { %14040 = vmatpush1.bf16.msra.mxu0 %v13681_v52  ;;  %14204 = vmatpush1.bf16.msra.mxu1 %v13683_v59  ;;  %v13765_v52 = vld [vmem:[#allocation3 + $0x888] sm:$0xff]  ;;  %v13767_v59 = vld [vmem:[#allocation3 + $0x898] sm:$0xff] }
 0x940   :  { %14041 = vmatprep.subr.bf16.mxu0 %v13689_v6  ;;  %14205 = vmatprep.subr.bf16.mxu1 %v13691_v40  ;;  %v13773_v6 = vld [vmem:[#allocation3 + $0x8c8] sm:$0xff]  ;;  %v13775_v40 = vld [vmem:[#allocation3 + $0x8d8] sm:$0xff] }
 0x943   :  { %14042 = vmatpush1.bf16.msra.mxu0 %v13688_v60  ;;  %14206 = vmatpush1.bf16.msra.mxu1 %v13690_v41  ;;  %v13772_v60 = vld [vmem:[#allocation3 + $0x8c0] sm:$0xff]  ;;  %v13774_v41 = vld [vmem:[#allocation3 + $0x8d0] sm:$0xff] }
 0x944   :  { %14043 = vmatprep.subr.bf16.mxu0 %v13696_v30  ;;  %14207 = vmatprep.subr.bf16.mxu1 %v13698_v33  ;;  %v13780_v30 = vld [vmem:[#allocation3 + $0x900] sm:$0xff]  ;;  %v13782_v33 = vld [vmem:[#allocation3 + $0x910] sm:$0xff] }
 0x947   :  { %14044 = vmatpush1.bf16.msra.mxu0 %v13695_v17  ;;  %14208 = vmatpush1.bf16.msra.mxu1 %v13697_v45  ;;  %v13779_v17 = vld [vmem:[#allocation3 + $0x8f8] sm:$0xff]  ;;  %v13781_v45 = vld [vmem:[#allocation3 + $0x908] sm:$0xff] }
 0x948   :  { %14045 = vmatprep.subr.bf16.mxu0 %v13703_v16  ;;  %14209 = vmatprep.subr.bf16.mxu1 %v13705_v19  ;;  %v13787_v16 = vld [vmem:[#allocation3 + $0x938] sm:$0xff]  ;;  %v13789_v19 = vld [vmem:[#allocation3 + $0x948] sm:$0xff] }
 0x94b   :  { %14046 = vmatpush1.bf16.msra.mxu0 %v13702_v26  ;;  %14210 = vmatpush1.bf16.msra.mxu1 %v13704_v1  ;;  %v13786_v26 = vld [vmem:[#allocation3 + $0x930] sm:$0xff]  ;;  %v13788_v1 = vld [vmem:[#allocation3 + $0x940] sm:$0xff] }
 0x94c   :  { %14047 = vmatprep.subr.bf16.mxu0 %v13710_v46  ;;  %14211 = vmatprep.subr.bf16.mxu1 %v13712_v48  ;;  %v13794_v46 = vld [vmem:[#allocation3 + $0x970] sm:$0xff]  ;;  %v13796_v48 = vld [vmem:[#allocation3 + $0x980] sm:$0xff] }
 0x94f   :  { %14048 = vmatpush1.bf16.msra.mxu0 %v13709_v47  ;;  %14212 = vmatpush1.bf16.msra.mxu1 %v13711_v49  ;;  %v13793_v47 = vld [vmem:[#allocation3 + $0x968] sm:$0xff]  ;;  %v13795_v49 = vld [vmem:[#allocation3 + $0x978] sm:$0xff] }
 0x950   :  { %14058 = vmatprep.subr.bf16.mxu0 %v13717_v28  ;;  %14222 = vmatprep.subr.bf16.mxu1 %v13719_v50  ;;  %v13801_v28 = vld [vmem:[#allocation3 + $0x9a8] sm:$0xff]  ;;  %v13803_v50 = vld [vmem:[#allocation3 + $0x9b8] sm:$0xff] }
 0x952   :  { %14050 = vmatmul.mubr.bf16.vlgmr.msra.gmra.mrb[12].mxu0 %v19751_v51  ;;  %14214 = vmatmul.mubr.bf16.vlgmr.msra.gmra.mrb[20].mxu1 %v19751_v51 }
 0x953   :  { %14059 = vmatpush1.bf16.msra.mxu0 %v13716_v35  ;;  %14223 = vmatpush1.bf16.msra.mxu1 %v13718_v54  ;;  %v13800_v35 = vld [vmem:[#allocation3 + $0x9a0] sm:$0xff]  ;;  %v13802_v54 = vld [vmem:[#allocation3 + $0x9b0] sm:$0xff] }
 0x954   :  { %14060 = vmatprep.subr.bf16.mxu0 %v13724_v56  ;;  %14224 = vmatprep.subr.bf16.mxu1 %v13726_v31  ;;  %v13808_v56 = vld [vmem:[#allocation3 + $0x9e0] sm:$0xff]  ;;  %v13810_v31 = vld [vmem:[#allocation3 + $0x9f0] sm:$0xff] }
 0x955   :  { %14090 = vmatprep.mubr.bf16.mxu0 %v19755_v8  ;;  %14254 = vmatprep.mubr.bf16.mxu1 %v19755_v8 }
 0x957   :  { %14061 = vmatpush1.bf16.msra.mxu0 %v13723_v15  ;;  %14225 = vmatpush1.bf16.msra.mxu1 %v13725_v9  ;;  %v13807_v15 = vld [vmem:[#allocation3 + $0x9d8] sm:$0xff]  ;;  %v13809_v9 = vld [vmem:[#allocation3 + $0x9e8] sm:$0xff] }
 0x958   :  { %14062 = vmatprep.subr.bf16.mxu0 %v13731_v42  ;;  %14226 = vmatprep.subr.bf16.mxu1 %v13733_v7  ;;  %v13815_v42 = vld [vmem:[#allocation3 + $0xa18] sm:$0xff]  ;;  %v13817_v7 = vld [vmem:[#allocation3 + $0xa28] sm:$0xff] }
 0x95b   :  { %14063 = vmatpush1.bf16.msra.mxu0 %v13730_v55  ;;  %14227 = vmatpush1.bf16.msra.mxu1 %v13732_v43  ;;  %v13814_v55 = vld [vmem:[#allocation3 + $0xa10] sm:$0xff]  ;;  %v13816_v43 = vld [vmem:[#allocation3 + $0xa20] sm:$0xff] }
 0x95c   :  { %14064 = vmatprep.subr.bf16.mxu0 %v13738_v57  ;;  %14228 = vmatprep.subr.bf16.mxu1 %v13740_v10  ;;  %v13822_v57 = vld [vmem:[#allocation3 + $0xa50] sm:$0xff]  ;;  %v13824_v10 = vld [vmem:[#allocation3 + $0xa60] sm:$0xff] }
 0x95f   :  { %14065 = vmatpush1.bf16.msra.mxu0 %v13737_v12  ;;  %14229 = vmatpush1.bf16.msra.mxu1 %v13739_v18  ;;  %v13821_v12 = vld [vmem:[#allocation3 + $0xa48] sm:$0xff]  ;;  %v13823_v18 = vld [vmem:[#allocation3 + $0xa58] sm:$0xff] }
 0x960   :  { %14066 = vmatprep.subr.bf16.mxu0 %v13745_v44  ;;  %14230 = vmatprep.subr.bf16.mxu1 %v13747_v24  ;;  %v13829_v44 = vld [vmem:[#allocation3 + $0xa88] sm:$0xff]  ;;  %v13831_v24 = vld [vmem:[#allocation3 + $0xa98] sm:$0xff] }
 0x963   :  { %14067 = vmatpush1.bf16.msra.mxu0 %v13744_v25  ;;  %14231 = vmatpush1.bf16.msra.mxu1 %v13746_v27  ;;  %v19763_v25 = vpack.c.bf16 %v19722_v34, %v19722_v34  ;;  %v13828_v27 = vld [vmem:[#allocation3 + $0xa80] sm:$0xff]  ;;  %v13835_v34 = vld [vmem:[#allocation3 + $0xab8] sm:$0xff] }
 0x964   :  { %14068 = vmatprep.subr.bf16.mxu0 %v13752_v29  ;;  %14232 = vmatprep.subr.bf16.mxu1 %v13754_v32  ;;  %v13830_v29 = vld [vmem:[#allocation3 + $0xa90] sm:$0xff]  ;;  %v13836_v32 = vld [vmem:[#allocation3 + $0xac0] sm:$0xff] }
 0x967   :  { %14069 = vmatpush1.bf16.msra.mxu0 %v13751_v39  ;;  %14233 = vmatpush1.bf16.msra.mxu1 %v13753_v11  ;;  %v13838_v39 = vld [vmem:[#allocation3 + $0xad0] sm:$0xff]  ;;  %v19767_v11 = vpack.c.bf16 %v19731_v22, %v19731_v22 }
 0x968   :  { %14070 = vmatprep.subr.bf16.mxu0 %v13759_v20  ;;  %14234 = vmatprep.subr.bf16.mxu1 %v13761_v58  ;;  %v13837_v20 = vld [vmem:[#allocation3 + $0xac8] sm:$0xff]  ;;  %v13843_v58 = vld [vmem:[#allocation3 + $0xaf8] sm:$0xff]  ;;  %v13842_v22 = vld [vmem:[#allocation3 + $0xaf0] sm:$0xff] }
 0x96b   :  { %14071 = vmatpush1.bf16.msra.mxu0 %v13758_v62  ;;  %14235 = vmatpush1.bf16.msra.mxu1 %v13760_v61  ;;  %v13845_v62 = vld [vmem:[#allocation3 + $0xb08] sm:$0xff]  ;;  %v13844_v61 = vld [vmem:[#allocation3 + $0xb00] sm:$0xff] }
 0x96c   :  { %14072 = vmatprep.subr.bf16.mxu0 %v13766_v2  ;;  %14236 = vmatprep.subr.bf16.mxu1 %v13768_v4  ;;  %v13850_v2 = vld [vmem:[#allocation3 + $0xb30] sm:$0xff]  ;;  %v13852_v4 = vld [vmem:[#allocation3 + $0xb40] sm:$0xff] }
 0x96f   :  { %14073 = vmatpush1.bf16.msra.mxu0 %v13765_v52  ;;  %14237 = vmatpush1.bf16.msra.mxu1 %v13767_v59  ;;  %v13849_v52 = vld [vmem:[#allocation3 + $0xb28] sm:$0xff]  ;;  %v13851_v59 = vld [vmem:[#allocation3 + $0xb38] sm:$0xff] }
 0x970   :  { %14074 = vmatprep.subr.bf16.mxu0 %v13773_v6  ;;  %14238 = vmatprep.subr.bf16.mxu1 %v13775_v40  ;;  %v13857_v6 = vld [vmem:[#allocation3 + $0xb68] sm:$0xff]  ;;  %v13859_v40 = vld [vmem:[#allocation3 + $0xb78] sm:$0xff] }
 0x973   :  { %14075 = vmatpush1.bf16.msra.mxu0 %v13772_v60  ;;  %14239 = vmatpush1.bf16.msra.mxu1 %v13774_v41  ;;  %v13856_v60 = vld [vmem:[#allocation3 + $0xb60] sm:$0xff]  ;;  %v13858_v41 = vld [vmem:[#allocation3 + $0xb70] sm:$0xff] }
 0x974   :  { %14076 = vmatprep.subr.bf16.mxu0 %v13780_v30  ;;  %14240 = vmatprep.subr.bf16.mxu1 %v13782_v33  ;;  %v13864_v30 = vld [vmem:[#allocation3 + $0xba0] sm:$0xff]  ;;  %v13866_v33 = vld [vmem:[#allocation3 + $0xbb0] sm:$0xff] }
 0x977   :  { %14077 = vmatpush1.bf16.msra.mxu0 %v13779_v17  ;;  %14241 = vmatpush1.bf16.msra.mxu1 %v13781_v45  ;;  %v13863_v17 = vld [vmem:[#allocation3 + $0xb98] sm:$0xff]  ;;  %v13865_v45 = vld [vmem:[#allocation3 + $0xba8] sm:$0xff] }
 0x978   :  { %14078 = vmatprep.subr.bf16.mxu0 %v13787_v16  ;;  %14242 = vmatprep.subr.bf16.mxu1 %v13789_v19  ;;  %v13871_v16 = vld [vmem:[#allocation3 + $0xbd8] sm:$0xff]  ;;  %v13873_v19 = vld [vmem:[#allocation3 + $0xbe8] sm:$0xff] }
 0x97b   :  { %14079 = vmatpush1.bf16.msra.mxu0 %v13786_v26  ;;  %14243 = vmatpush1.bf16.msra.mxu1 %v13788_v1  ;;  %v13870_v26 = vld [vmem:[#allocation3 + $0xbd0] sm:$0xff]  ;;  %v13872_v1 = vld [vmem:[#allocation3 + $0xbe0] sm:$0xff] }
 0x97c   :  { %14080 = vmatprep.subr.bf16.mxu0 %v13794_v46  ;;  %14244 = vmatprep.subr.bf16.mxu1 %v13796_v48  ;;  %v13878_v46 = vld [vmem:[#allocation3 + $0xc10] sm:$0xff]  ;;  %v13880_v48 = vld [vmem:[#allocation3 + $0xc20] sm:$0xff] }
 0x97f   :  { %14081 = vmatpush1.bf16.msra.mxu0 %v13793_v47  ;;  %14245 = vmatpush1.bf16.msra.mxu1 %v13795_v49  ;;  %v13877_v47 = vld [vmem:[#allocation3 + $0xc08] sm:$0xff]  ;;  %v13879_v49 = vld [vmem:[#allocation3 + $0xc18] sm:$0xff] }
 0x980   :  { %14082 = vmatprep.subr.bf16.mxu0 %v13801_v28  ;;  %14246 = vmatprep.subr.bf16.mxu1 %v13803_v50  ;;  %v13885_v28 = vld [vmem:[#allocation3 + $0xc48] sm:$0xff]  ;;  %v13887_v50 = vld [vmem:[#allocation3 + $0xc58] sm:$0xff] }
 0x983   :  { %14083 = vmatpush1.bf16.msra.mxu0 %v13800_v35  ;;  %14247 = vmatpush1.bf16.msra.mxu1 %v13802_v54  ;;  %v13884_v35 = vld [vmem:[#allocation3 + $0xc40] sm:$0xff]  ;;  %v13886_v54 = vld [vmem:[#allocation3 + $0xc50] sm:$0xff] }
 0x984   :  { %14084 = vmatprep.subr.bf16.mxu0 %v13808_v56  ;;  %14248 = vmatprep.subr.bf16.mxu1 %v13810_v31  ;;  %v13892_v56 = vld [vmem:[#allocation3 + $0xc80] sm:$0xff]  ;;  %v13894_v31 = vld [vmem:[#allocation3 + $0xc90] sm:$0xff] }
 0x987   :  { %14085 = vmatpush1.bf16.msra.mxu0 %v13807_v15  ;;  %14249 = vmatpush1.bf16.msra.mxu1 %v13809_v9  ;;  %v13891_v15 = vld [vmem:[#allocation3 + $0xc78] sm:$0xff]  ;;  %v13893_v9 = vld [vmem:[#allocation3 + $0xc88] sm:$0xff] }
 0x988   :  { %14086 = vmatprep.subr.bf16.mxu0 %v13815_v42  ;;  %14250 = vmatprep.subr.bf16.mxu1 %v13817_v7  ;;  %v13899_v42 = vld [vmem:[#allocation3 + $0xcb8] sm:$0xff]  ;;  %v13901_v7 = vld [vmem:[#allocation3 + $0xcc8] sm:$0xff] }
 0x98b   :  { %14087 = vmatpush1.bf16.msra.mxu0 %v13814_v55  ;;  %14251 = vmatpush1.bf16.msra.mxu1 %v13816_v43  ;;  %v13898_v55 = vld [vmem:[#allocation3 + $0xcb0] sm:$0xff]  ;;  %v13900_v43 = vld [vmem:[#allocation3 + $0xcc0] sm:$0xff] }
 0x98c   :  { %14088 = vmatprep.subr.bf16.mxu0 %v13822_v57  ;;  %14252 = vmatprep.subr.bf16.mxu1 %v13824_v10  ;;  %v13906_v57 = vld [vmem:[#allocation3 + $0xcf0] sm:$0xff]  ;;  %v13908_v10 = vld [vmem:[#allocation3 + $0xd00] sm:$0xff] }
 0x98f   :  { %14089 = vmatpush1.bf16.msra.mxu0 %v13821_v12  ;;  %14253 = vmatpush1.bf16.msra.mxu1 %v13823_v18  ;;  %v13905_v12 = vld [vmem:[#allocation3 + $0xce8] sm:$0xff]  ;;  %v13907_v18 = vld [vmem:[#allocation3 + $0xcf8] sm:$0xff] }
 0x990   :  { %14099 = vmatprep.subr.bf16.mxu0 %v13829_v44  ;;  %14263 = vmatprep.subr.bf16.mxu1 %v13831_v24  ;;  %v13913_v44 = vld [vmem:[#allocation3 + $0xd28] sm:$0xff]  ;;  %v13915_v24 = vld [vmem:[#allocation3 + $0xd38] sm:$0xff] }
 0x992   :  { %14091 = vmatmul.mubr.bf16.vlgmr.msra.gmra.mrb[12].mxu0 %v19763_v25  ;;  %14255 = vmatmul.mubr.bf16.vlgmr.msra.gmra.mrb[20].mxu1 %v19763_v25 }
 0x993   :  { %14100 = vmatpush1.bf16.msra.mxu0 %v13828_v27  ;;  %14264 = vmatpush1.bf16.msra.mxu1 %v13830_v29  ;;  %v13912_v27 = vld [vmem:[#allocation3 + $0xd20] sm:$0xff]  ;;  %v13914_v29 = vld [vmem:[#allocation3 + $0xd30] sm:$0xff] }
 0x994   :  { %14101 = vmatprep.subr.bf16.mxu0 %v13836_v32  ;;  %14265 = vmatprep.subr.bf16.mxu1 %v13838_v39  ;;  %v13920_v32 = vld [vmem:[#allocation3 + $0xd60] sm:$0xff]  ;;  %v13922_v39 = vld [vmem:[#allocation3 + $0xd70] sm:$0xff] }
 0x995   :  { %14131 = vmatprep.mubr.bf16.mxu0 %v19767_v11  ;;  %14295 = vmatprep.mubr.bf16.mxu1 %v19767_v11 }
 0x997   :  { %14102 = vmatpush1.bf16.msra.mxu0 %v13835_v34  ;;  %14266 = vmatpush1.bf16.msra.mxu1 %v13837_v20  ;;  %v13919_v34 = vld [vmem:[#allocation3 + $0xd58] sm:$0xff]  ;;  %v13921_v20 = vld [vmem:[#allocation3 + $0xd68] sm:$0xff] }
 0x998   :  { %14103 = vmatprep.subr.bf16.mxu0 %v13843_v58  ;;  %14267 = vmatprep.subr.bf16.mxu1 %v13845_v62  ;;  %v13927_v58 = vld [vmem:[#allocation3 + $0xd98] sm:$0xff]  ;;  %v13929_v62 = vld [vmem:[#allocation3 + $0xda8] sm:$0xff] }
 0x99b   :  { %14104 = vmatpush1.bf16.msra.mxu0 %v13842_v22  ;;  %14268 = vmatpush1.bf16.msra.mxu1 %v13844_v61  ;;  %v13926_v22 = vld [vmem:[#allocation3 + $0xd90] sm:$0xff]  ;;  %v13928_v61 = vld [vmem:[#allocation3 + $0xda0] sm:$0xff] }
 0x99c   :  { %14105 = vmatprep.subr.bf16.mxu0 %v13850_v2  ;;  %14269 = vmatprep.subr.bf16.mxu1 %v13852_v4  ;;  %v13934_v2 = vld [vmem:[#allocation3 + $0xdd0] sm:$0xff]  ;;  %v13936_v4 = vld [vmem:[#allocation3 + $0xde0] sm:$0xff] }
 0x99f   :  { %14106 = vmatpush1.bf16.msra.mxu0 %v13849_v52  ;;  %14270 = vmatpush1.bf16.msra.mxu1 %v13851_v59  ;;  %v13933_v52 = vld [vmem:[#allocation3 + $0xdc8] sm:$0xff]  ;;  %v13935_v59 = vld [vmem:[#allocation3 + $0xdd8] sm:$0xff] }
 0x9a0   :  { %14107 = vmatprep.subr.bf16.mxu0 %v13857_v6  ;;  %14271 = vmatprep.subr.bf16.mxu1 %v13859_v40  ;;  %v13497_v6 = vld [vmem:[#allocation3 + $0x28] sm:$0xff]  ;;  %v13554_v40 = vld [vmem:[#allocation3 + $0x1f0] sm:$0xff] }
 0x9a3   :  { %14108 = vmatpush1.bf16.msra.mxu0 %v13856_v60  ;;  %14272 = vmatpush1.bf16.msra.mxu1 %v13858_v41  ;;  %v19775_v60 = vpack.c.bf16 %v19728_v21, %v19728_v21  ;;  %v13496_v41 = vld [vmem:[#allocation3 + $0x20] sm:$0xff]  ;;  %v13511_v21 = vld [vmem:[#allocation3 + $0x98] sm:$0xff] }
 0x9a4   :  { %14109 = vmatprep.subr.bf16.mxu0 %v13864_v30  ;;  %14273 = vmatprep.subr.bf16.mxu1 %v13866_v33  ;;  %v13498_v30 = vld [vmem:[#allocation3 + $0x30] sm:$0xff]  ;;  %v13504_v33 = vld [vmem:[#allocation3 + $0x60] sm:$0xff] }
 0x9a7   :  { %14110 = vmatpush1.bf16.msra.mxu0 %v13863_v17  ;;  %14274 = vmatpush1.bf16.msra.mxu1 %v13865_v45  ;;  %v13561_v17 = vld [vmem:[#allocation3 + $0x228] sm:$0xff]  ;;  %v13503_v45 = vld [vmem:[#allocation3 + $0x58] sm:$0xff] }
 0x9a8   :  { %14111 = vmatprep.subr.bf16.mxu0 %v13871_v16  ;;  %14275 = vmatprep.subr.bf16.mxu1 %v13873_v19  ;;  %v13505_v16 = vld [vmem:[#allocation3 + $0x68] sm:$0xff]  ;;  %v13568_v19 = vld [vmem:[#allocation3 + $0x260] sm:$0xff] }
 0x9ab   :  { %14112 = vmatpush1.bf16.msra.mxu0 %v13870_v26  ;;  %14276 = vmatpush1.bf16.msra.mxu1 %v13872_v1  ;;  %v13510_v26 = vld [vmem:[#allocation3 + $0x90] sm:$0xff]  ;;  %v13512_v1 = vld [vmem:[#allocation3 + $0xa0] sm:$0xff] }
 0x9ac   :  { %14113 = vmatprep.subr.bf16.mxu0 %v13878_v46  ;;  %14277 = vmatprep.subr.bf16.mxu1 %v13880_v48  ;;  %v13518_v46 = vld [vmem:[#allocation3 + $0xd0] sm:$0xff]  ;;  %v13575_v48 = vld [vmem:[#allocation3 + $0x298] sm:$0xff] }
 0x9af   :  { %14114 = vmatpush1.bf16.msra.mxu0 %v13877_v47  ;;  %14278 = vmatpush1.bf16.msra.mxu1 %v13879_v49  ;;  %v13517_v47 = vld [vmem:[#allocation3 + $0xc8] sm:$0xff]  ;;  %v13519_v49 = vld [vmem:[#allocation3 + $0xd8] sm:$0xff] }
 0x9b0   :  { %14115 = vmatprep.subr.bf16.mxu0 %v13885_v28  ;;  %14279 = vmatprep.subr.bf16.mxu1 %v13887_v50  ;;  %v13525_v28 = vld [vmem:[#allocation3 + $0x108] sm:$0xff]  ;;  %v13582_v50 = vld [vmem:[#allocation3 + $0x2d0] sm:$0xff] }
 0x9b3   :  { %14116 = vmatpush1.bf16.msra.mxu0 %v13884_v35  ;;  %14280 = vmatpush1.bf16.msra.mxu1 %v13886_v54  ;;  %v13526_v35 = vld [vmem:[#allocation3 + $0x110] sm:$0xff]  ;;  %v13532_v54 = vld [vmem:[#allocation3 + $0x140] sm:$0xff] }
 0x9b4   :  { %14117 = vmatprep.subr.bf16.mxu0 %v13892_v56  ;;  %14281 = vmatprep.subr.bf16.mxu1 %v13894_v31  ;;  %v13589_v56 = vld [vmem:[#allocation3 + $0x308] sm:$0xff]  ;;  %v13531_v31 = vld [vmem:[#allocation3 + $0x138] sm:$0xff] }
 0x9b7   :  { %14118 = vmatpush1.bf16.msra.mxu0 %v13891_v15  ;;  %14282 = vmatpush1.bf16.msra.mxu1 %v13893_v9  ;;  %v13533_v15 = vld [vmem:[#allocation3 + $0x148] sm:$0xff]  ;;  %v13539_v9 = vld [vmem:[#allocation3 + $0x178] sm:$0xff] }
 0x9b8   :  { %14119 = vmatprep.subr.bf16.mxu0 %v13899_v42  ;;  %14283 = vmatprep.subr.bf16.mxu1 %v13901_v7  ;;  %v13596_v42 = vld [vmem:[#allocation3 + $0x340] sm:$0xff]  ;;  %v13538_v7 = vld [vmem:[#allocation3 + $0x170] sm:$0xff] }
 0x9bb   :  { %14120 = vmatpush1.bf16.msra.mxu0 %v13898_v55  ;;  %14284 = vmatpush1.bf16.msra.mxu1 %v13900_v43  ;;  %v13540_v55 = vld [vmem:[#allocation3 + $0x180] sm:$0xff]  ;;  %v13546_v43 = vld [vmem:[#allocation3 + $0x1b0] sm:$0xff] }
 0x9bc   :  { %14121 = vmatprep.subr.bf16.mxu0 %v13906_v57  ;;  %14285 = vmatprep.subr.bf16.mxu1 %v13908_v10  ;;  %v13603_v57 = vld [vmem:[#allocation3 + $0x378] sm:$0xff]  ;;  %v13545_v10 = vld [vmem:[#allocation3 + $0x1a8] sm:$0xff] }
 0x9bf   :  { %14122 = vmatpush1.bf16.msra.mxu0 %v13905_v12  ;;  %14286 = vmatpush1.bf16.msra.mxu1 %v13907_v18  ;;  %v13547_v12 = vld [vmem:[#allocation3 + $0x1b8] sm:$0xff]  ;;  %v13553_v18 = vld [vmem:[#allocation3 + $0x1e8] sm:$0xff] }
 0x9c0   :  { %14123 = vmatprep.subr.bf16.mxu0 %v13913_v44  ;;  %14287 = vmatprep.subr.bf16.mxu1 %v13915_v24  ;;  %v13666_v44 = vld [vmem:[#allocation3 + $0x570] sm:$0xff]  ;;  %v13552_v24 = vld [vmem:[#allocation3 + $0x1e0] sm:$0xff] }
 0x9c3   :  { %14124 = vmatpush1.bf16.msra.mxu0 %v13912_v27  ;;  %14288 = vmatpush1.bf16.msra.mxu1 %v13914_v29  ;;  %v13610_v27 = vld [vmem:[#allocation3 + $0x3b0] sm:$0xff]  ;;  %v13560_v29 = vld [vmem:[#allocation3 + $0x220] sm:$0xff] }
 0x9c4   :  { %14125 = vmatprep.subr.bf16.mxu0 %v13920_v32  ;;  %14289 = vmatprep.subr.bf16.mxu1 %v13922_v39  ;;  %v13673_v32 = vld [vmem:[#allocation3 + $0x5a8] sm:$0xff]  ;;  %v13559_v39 = vld [vmem:[#allocation3 + $0x218] sm:$0xff] }
 0x9c7   :  { %14126 = vmatpush1.bf16.msra.mxu0 %v13919_v34  ;;  %14290 = vmatpush1.bf16.msra.mxu1 %v13921_v20  ;;  %v13617_v34 = vld [vmem:[#allocation3 + $0x3e8] sm:$0xff]  ;;  %v13567_v20 = vld [vmem:[#allocation3 + $0x258] sm:$0xff] }
 0x9c8   :  { %14127 = vmatprep.subr.bf16.mxu0 %v13927_v58  ;;  %14291 = vmatprep.subr.bf16.mxu1 %v13929_v62  ;;  %v13680_v58 = vld [vmem:[#allocation3 + $0x5e0] sm:$0xff]  ;;  %v13566_v62 = vld [vmem:[#allocation3 + $0x250] sm:$0xff] }
 0x9cb   :  { %14128 = vmatpush1.bf16.msra.mxu0 %v13926_v22  ;;  %14292 = vmatpush1.bf16.msra.mxu1 %v13928_v61  ;;  %v13624_v22 = vld [vmem:[#allocation3 + $0x420] sm:$0xff]  ;;  %v13574_v61 = vld [vmem:[#allocation3 + $0x290] sm:$0xff] }
 0x9cc   :  { %14129 = vmatprep.subr.bf16.mxu0 %v13934_v2  ;;  %14293 = vmatprep.subr.bf16.mxu1 %v13936_v4  ;;  %v13687_v2 = vld [vmem:[#allocation3 + $0x618] sm:$0xff]  ;;  %v13573_v4 = vld [vmem:[#allocation3 + $0x288] sm:$0xff] }
 0x9cf   :  { %14130 = vmatpush1.bf16.msra.mxu0 %v13933_v52  ;;  %14294 = vmatpush1.bf16.msra.mxu1 %v13935_v59  ;;  %v13631_v52 = vld [vmem:[#allocation3 + $0x458] sm:$0xff]  ;;  %v13581_v59 = vld [vmem:[#allocation3 + $0x2c8] sm:$0xff] }
 0x9d0   :  { %14304 = vmatprep.subr.bf16.mxu0 %v13497_v6  ;;  %14855 = vmatprep.subr.bf16.mxu1 %v13554_v40  ;;  %v13694_v6 = vld [vmem:[#allocation3 + $0x650] sm:$0xff]  ;;  %v13580_v40 = vld [vmem:[#allocation3 + $0x2c0] sm:$0xff] }
 0x9d2   :  { %14132 = vmatmul.mubr.bf16.vlgmr.msra.gmra.mrb[12].mxu0 %v19775_v60  ;;  %14296 = vmatmul.mubr.bf16.vlgmr.msra.gmra.mrb[20].mxu1 %v19775_v60 }
 0x9d3   :  { %14305 = vmatpush1.bf16.msra.mxu0 %v13496_v41  ;;  %14856 = vmatpush3.bf16.msra.mxu1 %v13498_v30  ;;  %v13638_v41 = vld [vmem:[#allocation3 + $0x490] sm:$0xff]  ;;  %v13588_v30 = vld [vmem:[#allocation3 + $0x300] sm:$0xff] }
 0x9d4   :  { %14306 = vmatprep.subr.bf16.mxu0 %v13504_v33  ;;  %14857 = vmatprep.subr.bf16.mxu1 %v13561_v17  ;;  %v13701_v33 = vld [vmem:[#allocation3 + $0x688] sm:$0xff]  ;;  %v13587_v17 = vld [vmem:[#allocation3 + $0x2f8] sm:$0xff] }
 0x9d5   :  { %14336 = vmatprep.mubr.bf16.mxu0 %v19733_v23  ;;  %14500 = vmatprep.mubr.bf16.mxu1 %v19733_v23  ;;  %v13524_v23 = vld [vmem:[#allocation3 + $0x100] sm:$0xff] }
 0x9d7   :  { %14307 = vmatpush1.bf16.msra.mxu0 %v13503_v45  ;;  %14858 = vmatpush3.bf16.msra.mxu1 %v13505_v16  ;;  %v13645_v45 = vld [vmem:[#allocation3 + $0x4c8] sm:$0xff]  ;;  %v13595_v16 = vld [vmem:[#allocation3 + $0x338] sm:$0xff] }
 0x9d8   :  { %14308 = vmatprep.subr.bf16.mxu0 %v13511_v21  ;;  %14859 = vmatprep.subr.bf16.mxu1 %v13568_v19  ;;  %v13708_v21 = vld [vmem:[#allocation3 + $0x6c0] sm:$0xff]  ;;  %v13594_v19 = vld [vmem:[#allocation3 + $0x330] sm:$0xff] }
 0x9db   :  { %14309 = vmatpush1.bf16.msra.mxu0 %v13510_v26  ;;  %14860 = vmatpush3.bf16.msra.mxu1 %v13512_v1  ;;  %v13652_v26 = vld [vmem:[#allocation3 + $0x500] sm:$0xff]  ;;  %v13602_v1 = vld [vmem:[#allocation3 + $0x370] sm:$0xff] }
 0x9dc   :  { %14310 = vmatprep.subr.bf16.mxu0 %v13518_v46  ;;  %14861 = vmatprep.subr.bf16.mxu1 %v13575_v48  ;;  %v13715_v46 = vld [vmem:[#allocation3 + $0x6f8] sm:$0xff]  ;;  %v13601_v48 = vld [vmem:[#allocation3 + $0x368] sm:$0xff] }
 0x9df   :  { %14311 = vmatpush1.bf16.msra.mxu0 %v13517_v47  ;;  %14862 = vmatpush3.bf16.msra.mxu1 %v13519_v49  ;;  %v13659_v47 = vld [vmem:[#allocation3 + $0x538] sm:$0xff]  ;;  %v13609_v49 = vld [vmem:[#allocation3 + $0x3a8] sm:$0xff] }
 0x9e0   :  { %14312 = vmatprep.subr.bf16.mxu0 %v13525_v28  ;;  %14863 = vmatprep.subr.bf16.mxu1 %v13582_v50  ;;  %v13778_v28 = vld [vmem:[#allocation3 + $0x8f0] sm:$0xff]  ;;  %v13608_v50 = vld [vmem:[#allocation3 + $0x3a0] sm:$0xff] }
 0x9e3   :  { %14313 = vmatpush1.bf16.msra.mxu0 %v13524_v23  ;;  %14864 = vmatpush3.bf16.msra.mxu1 %v13526_v35  ;;  %v13722_v23 = vld [vmem:[#allocation3 + $0x730] sm:$0xff]  ;;  %v13616_v35 = vld [vmem:[#allocation3 + $0x3e0] sm:$0xff] }
 0x9e4   :  { %14314 = vmatprep.subr.bf16.mxu0 %v13532_v54  ;;  %14865 = vmatprep.subr.bf16.mxu1 %v13589_v56  ;;  %v13785_v54 = vld [vmem:[#allocation3 + $0x928] sm:$0xff]  ;;  %v13615_v56 = vld [vmem:[#allocation3 + $0x3d8] sm:$0xff] }
 0x9e7   :  { %14315 = vmatpush1.bf16.msra.mxu0 %v13531_v31  ;;  %14866 = vmatpush3.bf16.msra.mxu1 %v13533_v15  ;;  %v13729_v31 = vld [vmem:[#allocation3 + $0x768] sm:$0xff]  ;;  %v13623_v15 = vld [vmem:[#allocation3 + $0x418] sm:$0xff] }
 0x9e8   :  { %14316 = vmatprep.subr.bf16.mxu0 %v13539_v9  ;;  %14867 = vmatprep.subr.bf16.mxu1 %v13596_v42  ;;  %v13792_v9 = vld [vmem:[#allocation3 + $0x960] sm:$0xff]  ;;  %v13622_v42 = vld [vmem:[#allocation3 + $0x410] sm:$0xff] }
 0x9eb   :  { %14317 = vmatpush1.bf16.msra.mxu0 %v13538_v7  ;;  %14868 = vmatpush3.bf16.msra.mxu1 %v13540_v55  ;;  %v13630_v7 = vld [vmem:[#allocation3 + $0x450] sm:$0xff]  ;;  %v13799_v55 = vld [vmem:[#allocation3 + $0x998] sm:$0xff] }
 0x9ec   :  { %14318 = vmatprep.subr.bf16.mxu0 %v13546_v43  ;;  %14869 = vmatprep.subr.bf16.mxu1 %v13603_v57  ;;  %v13629_v43 = vld [vmem:[#allocation3 + $0x448] sm:$0xff]  ;;  %v13743_v57 = vld [vmem:[#allocation3 + $0x7d8] sm:$0xff] }
 0x9ef   :  { %14319 = vmatpush1.bf16.msra.mxu0 %v13545_v10  ;;  %14870 = vmatpush3.bf16.msra.mxu1 %v13547_v12  ;;  %v13637_v10 = vld [vmem:[#allocation3 + $0x488] sm:$0xff]  ;;  %v13806_v12 = vld [vmem:[#allocation3 + $0x9d0] sm:$0xff] }
 0x9f0   :  { %14320 = vmatprep.subr.bf16.mxu0 %v13553_v18  ;;  %14877 = vmatprep.subr.bf16.mxu1 %v13666_v44  ;;  %v13750_v18 = vld [vmem:[#allocation3 + $0x810] sm:$0xff]  ;;  %v13644_v44 = vld [vmem:[#allocation3 + $0x4c0] sm:$0xff] }
 0x9f2   :  { %14501 = vmatmul.mubr.bf16.vlgmr.msra.gmra.mrb[24].mxu1 %v19739_v53 }
 0x9f3   :  { %14321 = vmatpush1.bf16.msra.mxu0 %v13552_v24  ;;  %14878 = vmatpush3.bf16.msra.mxu1 %v13610_v27  ;;  %v13813_v24 = vld [vmem:[#allocation3 + $0xa08] sm:$0xff]  ;;  %v13643_v27 = vld [vmem:[#allocation3 + $0x4b8] sm:$0xff] }
 0x9f4   :  { %14322 = vmatprep.subr.bf16.mxu0 %v13560_v29  ;;  %14879 = vmatprep.subr.bf16.mxu1 %v13673_v32  ;;  %v13757_v29 = vld [vmem:[#allocation3 + $0x848] sm:$0xff]  ;;  %v13651_v32 = vld [vmem:[#allocation3 + $0x4f8] sm:$0xff] }
 0x9f5   :  { %14540 = vmatprep.mubr.bf16.mxu1 %v19743_v63 }
 0x9f7   :  { %14323 = vmatpush1.bf16.msra.mxu0 %v13559_v39  ;;  %14880 = vmatpush3.bf16.msra.mxu1 %v13617_v34  ;;  %v13820_v39 = vld [vmem:[#allocation3 + $0xa40] sm:$0xff]  ;;  %v13650_v34 = vld [vmem:[#allocation3 + $0x4f0] sm:$0xff] }
 0x9f8   :  { %14324 = vmatprep.subr.bf16.mxu0 %v13567_v20  ;;  %14881 = vmatprep.subr.bf16.mxu1 %v13680_v58  ;;  %v13764_v20 = vld [vmem:[#allocation3 + $0x880] sm:$0xff]  ;;  %v13658_v58 = vld [vmem:[#allocation3 + $0x530] sm:$0xff] }
 0x9fb   :  { %14325 = vmatpush1.bf16.msra.mxu0 %v13566_v62  ;;  %14882 = vmatpush3.bf16.msra.mxu1 %v13624_v22  ;;  %v13827_v62 = vld [vmem:[#allocation3 + $0xa78] sm:$0xff]  ;;  %v13657_v22 = vld [vmem:[#allocation3 + $0x528] sm:$0xff] }
 0x9fc   :  { %14326 = vmatprep.subr.bf16.mxu0 %v13574_v61  ;;  %14883 = vmatprep.subr.bf16.mxu1 %v13687_v2  ;;  %v13771_v61 = vld [vmem:[#allocation3 + $0x8b8] sm:$0xff]  ;;  %v13665_v2 = vld [vmem:[#allocation3 + $0x568] sm:$0xff] }
 0x9ff   :  { %14327 = vmatpush1.bf16.msra.mxu0 %v13573_v4  ;;  %14884 = vmatpush3.bf16.msra.mxu1 %v13631_v52  ;;  %v13890_v4 = vld [vmem:[#allocation3 + $0xc70] sm:$0xff]  ;;  %v13664_v52 = vld [vmem:[#allocation3 + $0x560] sm:$0xff] }
 0xa00   :  { %14328 = vmatprep.subr.bf16.mxu0 %v13581_v59  ;;  %14885 = vmatprep.subr.bf16.mxu1 %v13694_v6  ;;  %v13834_v59 = vld [vmem:[#allocation3 + $0xab0] sm:$0xff]  ;;  %v13672_v6 = vld [vmem:[#allocation3 + $0x5a0] sm:$0xff] }
 0xa03   :  { %14329 = vmatpush1.bf16.msra.mxu0 %v13580_v40  ;;  %14886 = vmatpush3.bf16.msra.mxu1 %v13638_v41  ;;  %v13897_v40 = vld [vmem:[#allocation3 + $0xca8] sm:$0xff]  ;;  %v13671_v41 = vld [vmem:[#allocation3 + $0x598] sm:$0xff] }
 0xa04   :  { %14330 = vmatprep.subr.bf16.mxu0 %v13588_v30  ;;  %14887 = vmatprep.subr.bf16.mxu1 %v13701_v33  ;;  %v13841_v30 = vld [vmem:[#allocation3 + $0xae8] sm:$0xff]  ;;  %v13679_v33 = vld [vmem:[#allocation3 + $0x5d8] sm:$0xff] }
 0xa07   :  { %14331 = vmatpush1.bf16.msra.mxu0 %v13587_v17  ;;  %14888 = vmatpush3.bf16.msra.mxu1 %v13645_v45  ;;  %v13904_v17 = vld [vmem:[#allocation3 + $0xce0] sm:$0xff]  ;;  %v13678_v45 = vld [vmem:[#allocation3 + $0x5d0] sm:$0xff] }
 0xa08   :  { %14332 = vmatprep.subr.bf16.mxu0 %v13595_v16  ;;  %14889 = vmatprep.subr.bf16.mxu1 %v13708_v21  ;;  %v13848_v16 = vld [vmem:[#allocation3 + $0xb20] sm:$0xff]  ;;  %v13686_v21 = vld [vmem:[#allocation3 + $0x610] sm:$0xff] }
 0xa0b   :  { %14333 = vmatpush1.bf16.msra.mxu0 %v13594_v19  ;;  %14890 = vmatpush3.bf16.msra.mxu1 %v13652_v26  ;;  %v13911_v19 = vld [vmem:[#allocation3 + $0xd18] sm:$0xff]  ;;  %v13685_v26 = vld [vmem:[#allocation3 + $0x608] sm:$0xff] }
 0xa0c   :  { %14334 = vmatprep.subr.bf16.mxu0 %v13602_v1  ;;  %14891 = vmatprep.subr.bf16.mxu1 %v13715_v46  ;;  %v13855_v1 = vld [vmem:[#allocation3 + $0xb58] sm:$0xff]  ;;  %v13693_v46 = vld [vmem:[#allocation3 + $0x648] sm:$0xff] }
 0xa0f   :  { %14335 = vmatpush1.bf16.msra.mxu0 %v13601_v48  ;;  %14892 = vmatpush3.bf16.msra.mxu1 %v13659_v47  ;;  %v13918_v48 = vld [vmem:[#allocation3 + $0xd50] sm:$0xff]  ;;  %v13692_v47 = vld [vmem:[#allocation3 + $0x640] sm:$0xff] }
 0xa10   :  { %14345 = vmatprep.subr.bf16.mxu0 %v13609_v49  ;;  %14899 = vmatprep.subr.bf16.mxu1 %v13778_v28  ;;  %v13862_v49 = vld [vmem:[#allocation3 + $0xb90] sm:$0xff]  ;;  %v13700_v28 = vld [vmem:[#allocation3 + $0x680] sm:$0xff] }
 0xa12   :  { %14337 = vmatmul.mubr.bf16.vlgmr.msra.gmra.mrb[16].mxu0 %v19739_v53  ;;  %14541 = vmatmul.mubr.bf16.vlgmr.msra.gmra.mrb[28].mxu1 %v19751_v51  ;;  %v13736_v53 = vld [vmem:[#allocation3 + $0x7a0] sm:$0xff] }
 0xa13   :  { %14346 = vmatpush1.bf16.msra.mxu0 %v13608_v50  ;;  %14900 = vmatpush3.bf16.msra.mxu1 %v13722_v23  ;;  %v13925_v50 = vld [vmem:[#allocation3 + $0xd88] sm:$0xff]  ;;  %v13699_v23 = vld [vmem:[#allocation3 + $0x678] sm:$0xff] }
 0xa14   :  { %14347 = vmatprep.subr.bf16.mxu0 %v13616_v35  ;;  %14901 = vmatprep.subr.bf16.mxu1 %v13785_v54  ;;  %v13869_v35 = vld [vmem:[#allocation3 + $0xbc8] sm:$0xff]  ;;  %v13707_v54 = vld [vmem:[#allocation3 + $0x6b8] sm:$0xff] }
 0xa15   :  { %14377 = vmatprep.mubr.bf16.mxu0 %v19743_v63  ;;  %14580 = vmatprep.mubr.bf16.mxu1 %v19755_v8  ;;  %v13636_v63 = vld [vmem:[#allocation3 + $0x480] sm:$0xff] }
 0xa17   :  { %14348 = vmatpush1.bf16.msra.mxu0 %v13615_v56  ;;  %14902 = vmatpush3.bf16.msra.mxu1 %v13729_v31  ;;  %v13932_v56 = vld [vmem:[#allocation3 + $0xdc0] sm:$0xff]  ;;  %v13706_v31 = vld [vmem:[#allocation3 + $0x6b0] sm:$0xff] }
 0xa18   :  { %14349 = vmatprep.subr.bf16.mxu0 %v13623_v15  ;;  %14903 = vmatprep.subr.bf16.mxu1 %v13792_v9  ;;  %v13876_v15 = vld [vmem:[#allocation3 + $0xc00] sm:$0xff]  ;;  %v13714_v9 = vld [vmem:[#allocation3 + $0x6f0] sm:$0xff] }
 0xa1b   :  { %14350 = vmatpush1.bf16.msra.mxu0 %v13622_v42  ;;  %14904 = vmatpush3.bf16.msra.mxu1 %v13736_v53  ;;  %v13939_v42 = vld [vmem:[#allocation3 + $0xdf8] sm:$0xff]  ;;  %v13713_v53 = vld [vmem:[#allocation3 + $0x6e8] sm:$0xff] }
 0xa1c   :  { %14351 = vmatprep.subr.bf16.mxu0 %v13630_v7  ;;  %14905 = vmatprep.subr.bf16.mxu1 %v13799_v55  ;;  %v13883_v7 = vld [vmem:[#allocation3 + $0xc38] sm:$0xff]  ;;  %v13721_v55 = vld [vmem:[#allocation3 + $0x728] sm:$0xff] }
 0xa1f   :  { %14352 = vmatpush1.bf16.msra.mxu0 %v13629_v43  ;;  %14906 = vmatpush3.bf16.msra.mxu1 %v13743_v57  ;;  %v13720_v43 = vld [vmem:[#allocation3 + $0x720] sm:$0xff] }
 0xa20   :  { %14353 = vmatprep.subr.bf16.mxu0 %v13637_v10  ;;  %14907 = vmatprep.subr.bf16.mxu1 %v13806_v12  ;;  %v13728_v57 = vld [vmem:[#allocation3 + $0x760] sm:$0xff]  ;;  %v13727_v10 = vld [vmem:[#allocation3 + $0x758] sm:$0xff] }
 0xa21   :  { %v13735_v12 = vld [vmem:[#allocation3 + $0x798] sm:$0xff] }
 0xa23   :  { %14354 = vmatpush1.bf16.msra.mxu0 %v13636_v63  ;;  %14908 = vmatpush3.bf16.msra.mxu1 %v13750_v18  ;;  %v13734_v63 = vld [vmem:[#allocation3 + $0x790] sm:$0xff] }
 0xa24   :  { %14355 = vmatprep.subr.bf16.mxu0 %v13644_v44  ;;  %14909 = vmatprep.subr.bf16.mxu1 %v13813_v24  ;;  %v13742_v18 = vld [vmem:[#allocation3 + $0x7d0] sm:$0xff]  ;;  %v13741_v44 = vld [vmem:[#allocation3 + $0x7c8] sm:$0xff] }
 0xa25   :  { %v13749_v24 = vld [vmem:[#allocation3 + $0x808] sm:$0xff] }
 0xa27   :  { %14356 = vmatpush1.bf16.msra.mxu0 %v13643_v27  ;;  %14910 = vmatpush3.bf16.msra.mxu1 %v13757_v29  ;;  %v13748_v27 = vld [vmem:[#allocation3 + $0x800] sm:$0xff]  ;;  %v13755_v29 = vld [vmem:[#allocation3 + $0x838] sm:$0xff] }
 0xa28   :  { %14357 = vmatprep.subr.bf16.mxu0 %v13651_v32  ;;  %14911 = vmatprep.subr.bf16.mxu1 %v13820_v39  ;;  %v13763_v32 = vld [vmem:[#allocation3 + $0x878] sm:$0xff]  ;;  %v13770_v39 = vld [vmem:[#allocation3 + $0x8b0] sm:$0xff] }
 0xa2b   :  { %14358 = vmatpush1.bf16.msra.mxu0 %v13650_v34  ;;  %14912 = vmatpush3.bf16.msra.mxu1 %v13764_v20  ;;  %v13769_v34 = vld [vmem:[#allocation3 + $0x8a8] sm:$0xff] }
 0xa2c   :  { %14359 = vmatprep.subr.bf16.mxu0 %v13658_v58  ;;  %14913 = vmatprep.subr.bf16.mxu1 %v13827_v62  ;;  %v13777_v20 = vld [vmem:[#allocation3 + $0x8e8] sm:$0xff]  ;;  %v13776_v58 = vld [vmem:[#allocation3 + $0x8e0] sm:$0xff] }
 0xa2d   :  { %v13784_v62 = vld [vmem:[#allocation3 + $0x920] sm:$0xff] }
 0xa2f   :  { %14360 = vmatpush1.bf16.msra.mxu0 %v13657_v22  ;;  %14914 = vmatpush3.bf16.msra.mxu1 %v13771_v61  ;;  %v13783_v22 = vld [vmem:[#allocation3 + $0x918] sm:$0xff] }
 0xa30   :  { %14361 = vmatprep.subr.bf16.mxu0 %v13665_v2  ;;  %14921 = vmatprep.subr.bf16.mxu1 %v13890_v4  ;;  %v13791_v61 = vld [vmem:[#allocation3 + $0x958] sm:$0xff]  ;;  %v13790_v2 = vld [vmem:[#allocation3 + $0x950] sm:$0xff] }
 0xa31   :  { %v13798_v4 = vld [vmem:[#allocation3 + $0x990] sm:$0xff] }
 0xa32   :  { %14581 = vmatmul.mubr.bf16.vlgmr.msra.gmra.mrb[32].mxu1 %v19763_v25 }
 0xa33   :  { %14362 = vmatpush1.bf16.msra.mxu0 %v13664_v52  ;;  %14922 = vmatpush3.bf16.msra.mxu1 %v13834_v59  ;;  %v13797_v52 = vld [vmem:[#allocation3 + $0x988] sm:$0xff] }
 0xa34   :  { %14363 = vmatprep.subr.bf16.mxu0 %v13672_v6  ;;  %14923 = vmatprep.subr.bf16.mxu1 %v13897_v40  ;;  %v13805_v59 = vld [vmem:[#allocation3 + $0x9c8] sm:$0xff]  ;;  %v13804_v6 = vld [vmem:[#allocation3 + $0x9c0] sm:$0xff] }
 0xa35   :  { %14620 = vmatprep.mubr.bf16.mxu1 %v19767_v11  ;;  %v13812_v40 = vld [vmem:[#allocation3 + $0xa00] sm:$0xff] }
 0xa37   :  { %14364 = vmatpush1.bf16.msra.mxu0 %v13671_v41  ;;  %14924 = vmatpush3.bf16.msra.mxu1 %v13841_v30  ;;  %v13811_v41 = vld [vmem:[#allocation3 + $0x9f8] sm:$0xff] }
 0xa38   :  { %14365 = vmatprep.subr.bf16.mxu0 %v13679_v33  ;;  %14925 = vmatprep.subr.bf16.mxu1 %v13904_v17  ;;  %v13819_v30 = vld [vmem:[#allocation3 + $0xa38] sm:$0xff]  ;;  %v13818_v33 = vld [vmem:[#allocation3 + $0xa30] sm:$0xff] }
 0xa39   :  { %v13826_v17 = vld [vmem:[#allocation3 + $0xa70] sm:$0xff] }
 0xa3b   :  { %14366 = vmatpush1.bf16.msra.mxu0 %v13678_v45  ;;  %14926 = vmatpush3.bf16.msra.mxu1 %v13848_v16  ;;  %v13825_v45 = vld [vmem:[#allocation3 + $0xa68] sm:$0xff] }
 0xa3c   :  { %14367 = vmatprep.subr.bf16.mxu0 %v13686_v21  ;;  %14927 = vmatprep.subr.bf16.mxu1 %v13911_v19  ;;  %v13833_v16 = vld [vmem:[#allocation3 + $0xaa8] sm:$0xff]  ;;  %v13832_v21 = vld [vmem:[#allocation3 + $0xaa0] sm:$0xff] }
 0xa3d   :  { %v13840_v19 = vld [vmem:[#allocation3 + $0xae0] sm:$0xff] }
 0xa3f   :  { %14368 = vmatpush1.bf16.msra.mxu0 %v13685_v26  ;;  %14928 = vmatpush3.bf16.msra.mxu1 %v13855_v1  ;;  %v13839_v26 = vld [vmem:[#allocation3 + $0xad8] sm:$0xff] }
 0xa40   :  { %14369 = vmatprep.subr.bf16.mxu0 %v13693_v46  ;;  %14929 = vmatprep.subr.bf16.mxu1 %v13918_v48  ;;  %v13847_v1 = vld [vmem:[#allocation3 + $0xb18] sm:$0xff]  ;;  %v13846_v46 = vld [vmem:[#allocation3 + $0xb10] sm:$0xff] }
 0xa41   :  { %v13854_v48 = vld [vmem:[#allocation3 + $0xb50] sm:$0xff] }
 0xa43   :  { %14370 = vmatpush1.bf16.msra.mxu0 %v13692_v47  ;;  %14930 = vmatpush3.bf16.msra.mxu1 %v13862_v49  ;;  %v13853_v47 = vld [vmem:[#allocation3 + $0xb48] sm:$0xff] }
 0xa44   :  { %14371 = vmatprep.subr.bf16.mxu0 %v13700_v28  ;;  %14931 = vmatprep.subr.bf16.mxu1 %v13925_v50  ;;  %v13861_v49 = vld [vmem:[#allocation3 + $0xb88] sm:$0xff]  ;;  %v13860_v28 = vld [vmem:[#allocation3 + $0xb80] sm:$0xff] }
 0xa45   :  { %v13868_v50 = vld [vmem:[#allocation3 + $0xbc0] sm:$0xff] }
 0xa47   :  { %14372 = vmatpush1.bf16.msra.mxu0 %v13699_v23  ;;  %14932 = vmatpush3.bf16.msra.mxu1 %v13869_v35  ;;  %v13948_v23 = vrot.slane %v19189_v36, %v19379_v38  ;;  %v13956_v35 = vrot.slane %v19189_v36, %v19530_v14  ;;  %v13882_v14 = vld [vmem:[#allocation3 + $0xc30] sm:$0xff] }
 0xa48   :  { %14373 = vmatprep.subr.bf16.mxu0 %v13707_v54  ;;  %14933 = vmatprep.subr.bf16.mxu1 %v13932_v56  ;;  %v13867_v54 = vld [vmem:[#allocation3 + $0xbb8] sm:$0xff] }
 0xa4b   :  { %14374 = vmatpush1.bf16.msra.mxu0 %v13706_v31  ;;  %14934 = vmatpush3.bf16.msra.mxu1 %v13876_v15  ;;  %v13875_v15 = vld [vmem:[#allocation3 + $0xbf8] sm:$0xff] }
 0xa4c   :  { %14375 = vmatprep.subr.bf16.mxu0 %v13714_v9  ;;  %14935 = vmatprep.subr.bf16.mxu1 %v13939_v42 }
 0xa4f   :  { %14376 = vmatpush1.bf16.msra.mxu0 %v13713_v53  ;;  %14936 = vmatpush3.bf16.msra.mxu1 %v13883_v7 }
 0xa50   :  { %14386 = vmatprep.subr.bf16.mxu0 %v13721_v55 }
 0xa52   :  { %14378 = vmatmul.mubr.bf16.vlgmr.msra.gmra.mrb[16].mxu0 %v19751_v51  ;;  %14621 = vmatmul.mubr.bf16.vlgmr.msra.gmra.mrb[36].mxu1 %v19775_v60  ;;  %v13756_v51 = vld [vmem:[#allocation3 + $0x840] sm:$0xff] }
 0xa53   :  { %14387 = vmatpush1.bf16.msra.mxu0 %v13720_v43  ;;  %14418 = vmatprep.mubr.bf16.mxu0 %v19755_v8  ;;  %v13762_v8 = vld [vmem:[#allocation3 + $0x870] sm:$0xff] }
 0xa54   :  { %14388 = vmatprep.subr.bf16.mxu0 %v13728_v57 }
 0xa57   :  { %14389 = vmatpush1.bf16.msra.mxu0 %v13727_v10  ;;  %v13874_v10 = vld [vmem:[#allocation3 + $0xbf0] sm:$0xff] }
 0xa58   :  { %14390 = vmatprep.subr.bf16.mxu0 %v13735_v12  ;;  %v13881_v12 = vld [vmem:[#allocation3 + $0xc28] sm:$0xff] }
 0xa5b   :  { %14391 = vmatpush1.bf16.msra.mxu0 %v13734_v63  ;;  %v13889_v63 = vld [vmem:[#allocation3 + $0xc68] sm:$0xff] }
 0xa5c   :  { %14392 = vmatprep.subr.bf16.mxu0 %v13742_v18  ;;  %v13888_v18 = vld [vmem:[#allocation3 + $0xc60] sm:$0xff] }
 0xa5f   :  { %14393 = vmatpush1.bf16.msra.mxu0 %v13741_v44  ;;  %v13896_v44 = vld [vmem:[#allocation3 + $0xca0] sm:$0xff] }
 0xa60   :  { %14394 = vmatprep.subr.bf16.mxu0 %v13749_v24 }
 0xa63   :  { %14395 = vmatpush1.bf16.msra.mxu0 %v13748_v27 }
 0xa64   :  { %14396 = vmatprep.subr.bf16.mxu0 %v13756_v51 }
 0xa67   :  { %14397 = vmatpush1.bf16.msra.mxu0 %v13755_v29  ;;  %v13895_v29 = vld [vmem:[#allocation3 + $0xc98] sm:$0xff] }
 0xa68   :  { %14398 = vmatprep.subr.bf16.mxu0 %v13763_v32 }
 0xa6b   :  { %14399 = vmatpush1.bf16.msra.mxu0 %v13762_v8  ;;  %v13903_v8 = vld [vmem:[#allocation3 + $0xcd8] sm:$0xff] }
 0xa6c   :  { %14400 = vmatprep.subr.bf16.mxu0 %v13770_v39  ;;  %v13902_v39 = vld [vmem:[#allocation3 + $0xcd0] sm:$0xff] }
 0xa6f   :  { %14401 = vmatpush1.bf16.msra.mxu0 %v13769_v34  ;;  %v13910_v34 = vld [vmem:[#allocation3 + $0xd10] sm:$0xff] }
 0xa70   :  { %14402 = vmatprep.subr.bf16.mxu0 %v13777_v20  ;;  %v13909_v20 = vld [vmem:[#allocation3 + $0xd08] sm:$0xff] }
 0xa73   :  { %14403 = vmatpush1.bf16.msra.mxu0 %v13776_v58  ;;  %v13917_v58 = vld [vmem:[#allocation3 + $0xd48] sm:$0xff] }
 0xa74   :  { %14404 = vmatprep.subr.bf16.mxu0 %v13784_v62  ;;  %v13916_v62 = vld [vmem:[#allocation3 + $0xd40] sm:$0xff] }
 0xa77   :  { %14405 = vmatpush1.bf16.msra.mxu0 %v13783_v22  ;;  %v13924_v22 = vld [vmem:[#allocation3 + $0xd80] sm:$0xff] }
 0xa78   :  { %14406 = vmatprep.subr.bf16.mxu0 %v13791_v61  ;;  %v13923_v61 = vld [vmem:[#allocation3 + $0xd78] sm:$0xff] }
 0xa7b   :  { %14407 = vmatpush1.bf16.msra.mxu0 %v13790_v2  ;;  %v13931_v2 = vld [vmem:[#allocation3 + $0xdb8] sm:$0xff] }
 0xa7c   :  { %14408 = vmatprep.subr.bf16.mxu0 %v13798_v4 }
 0xa7f   :  { %14409 = vmatpush1.bf16.msra.mxu0 %v13797_v52 }
 0xa80   :  { %14410 = vmatprep.subr.bf16.mxu0 %v13805_v59 }
 0xa83   :  { %14411 = vmatpush1.bf16.msra.mxu0 %v13804_v6 }
 0xa84   :  { %14412 = vmatprep.subr.bf16.mxu0 %v13812_v40  ;;  %v13930_v40 = vld [vmem:[#allocation3 + $0xdb0] sm:$0xff] }
 0xa87   :  { %14413 = vmatpush1.bf16.msra.mxu0 %v13811_v41 }
 0xa88   :  { %14414 = vmatprep.subr.bf16.mxu0 %v13819_v30  ;;  %v13938_v30 = vld [vmem:[#allocation3 + $0xdf0] sm:$0xff] }
 0xa8b   :  { %14415 = vmatpush1.bf16.msra.mxu0 %v13818_v33  ;;  %v13937_v33 = vld [vmem:[#allocation3 + $0xde8] sm:$0xff] }
 0xa8c   :  { %14416 = vmatprep.subr.bf16.mxu0 %v13826_v17  ;;  %v13968_v17 = vrot.slane %v19189_v36, %v19674_v5 }
 0xa8f   :  { %14417 = vmatpush1.bf16.msra.mxu0 %v13825_v45 }
 0xa90   :  { %14427 = vmatprep.subr.bf16.mxu0 %v13833_v16 }
 0xa92   :  { %14419 = vmatmul.mubr.bf16.vlgmr.msra.gmra.mrb[16].mxu0 %v19763_v25  ;;  %v13944_v25 = vrot.slane %v19189_v36, %v19376_v37 }
 0xa93   :  { %14428 = vmatpush1.bf16.msra.mxu0 %v13832_v21  ;;  %14459 = vmatprep.mubr.bf16.mxu0 %v19767_v11  ;;  %v13952_v11 = vrot.slane %v19189_v36, %v19527_v13 }
 0xa94   :  { %14429 = vmatprep.subr.bf16.mxu0 %v13840_v19 }
 0xa97   :  { %14430 = vmatpush1.bf16.msra.mxu0 %v13839_v26 }
 0xa98   :  { %14431 = vmatprep.subr.bf16.mxu0 %v13847_v1 }
 0xa9b   :  { %14432 = vmatpush1.bf16.msra.mxu0 %v13846_v46 }
 0xa9c   :  { %14433 = vmatprep.subr.bf16.mxu0 %v13854_v48 }
 0xa9f   :  { %14434 = vmatpush1.bf16.msra.mxu0 %v13853_v47 }
 0xaa0   :  { %14435 = vmatprep.subr.bf16.mxu0 %v13861_v49 }
 0xaa3   :  { %14436 = vmatpush1.bf16.msra.mxu0 %v13860_v28 }
 0xaa4   :  { %14437 = vmatprep.subr.bf16.mxu0 %v13868_v50 }
 0xaa5   :  { %v14133_v56 = vpop.f32.mrb[12].mxu0  ;;  %v14297_v31 = vpop.f32.mrb[20].mxu1 }
 0xaa6   :  { %v14957_v9 = vadd.f32 %v14133_v56, %v13944_v25  ;;  %v14959_v42 = vadd.f32 %v14297_v31, %v13952_v11  ;;  %v14135_v53 = vpop.f32.mrb[13].mxu0  ;;  %v14299_v7 = vpop.f32.mrb[21].mxu1  ;;  %v13960_v31 = vrot.slane %v19189_v36, %v19668_v0 }
 0xaa7   :  { %v14958_v37 = vadd.f32 %v14135_v53, %v13948_v23  ;;  %v14960_v55 = vadd.f32 %v14299_v7, %v13956_v35  ;;  %v14137_v43 = vpop.f32.mrb[14].mxu0  ;;  %v14301_v13 = vpop.f32.mrb[22].mxu1  ;;  %14438 = vmatpush1.bf16.msra.mxu0 %v13867_v54 }
 0xaa8   :  { %15172 = vtanh.f32 %v14957_v9  ;;  %v14138_v57 = vpop.f32.mrb[15].mxu0  ;;  %v14302_v38 = vpop.f32.mrb[23].mxu1  ;;  %14439 = vmatprep.subr.bf16.mxu0 %v13875_v15  ;;  %v13964_v15 = vrot.slane %v19189_v36, %v19671_v3 }
 0xaa9   :  { %15174 = vtanh.f32 %v14959_v42 }
 0xaaa   :  { %15176 = vtanh.f32 %v14958_v37 }
 0xaab   :  { %15178 = vtanh.f32 %v14960_v55  ;;  %14440 = vmatpush1.bf16.msra.mxu0 %v13874_v10 }
 0xaac   :  { %14441 = vmatprep.subr.bf16.mxu0 %v13882_v14 }
 0xaaf   :  { %14442 = vmatpush1.bf16.msra.mxu0 %v13881_v12 }
 0xab0   :  { %14443 = vmatprep.subr.bf16.mxu0 %v13889_v63 }
 0xab2   :  { %v15173_v24 = vpop.eup %15172 }
 0xab3   :  { %v15175_v27 = vpop.eup %15174  ;;  %14635 = vst [vmem:[%s19837_s7] sm:$0xff] %v15173_v24  ;;  %14444 = vmatpush1.bf16.msra.mxu0 %v13888_v18 }
 0xab4   :  { %v15177_v51 = vpop.eup %15176  ;;  %14637 = vst [vmem:[%s19837_s7 + $0x10] sm:$0xff] %v15175_v27  ;;  %14445 = vmatprep.subr.bf16.mxu0 %v13896_v44 }
 0xab5   :  { %v15179_v32 = vpop.eup %15178  ;;  %14636 = vst [vmem:[%s19837_s7 + $0x8] sm:$0xff] %v15177_v51 }
 0xab6   :  { %14638 = vst [vmem:[%s19837_s7 + $0x18] sm:$0xff] %v15179_v32 }
 0xab7   :  { %14446 = vmatpush1.bf16.msra.mxu0 %v13895_v29 }
 0xab8   :  { %14447 = vmatprep.subr.bf16.mxu0 %v13903_v8 }
 0xabb   :  { %14448 = vmatpush1.bf16.msra.mxu0 %v13902_v39 }
 0xabc   :  { %14449 = vmatprep.subr.bf16.mxu0 %v13910_v34 }
 0xabf   :  { %14450 = vmatpush1.bf16.msra.mxu0 %v13909_v20 }
 0xac0   :  { %14451 = vmatprep.subr.bf16.mxu0 %v13917_v58 }
 0xac3   :  { %14452 = vmatpush1.bf16.msra.mxu0 %v13916_v62 }
 0xac4   :  { %14453 = vmatprep.subr.bf16.mxu0 %v13924_v22 }
 0xac5   :  { %v14871_v4 = vpop.f32.mrb[24].mxu1 }
 0xac6   :  { %v14872_v52 = vpop.f32.mrb[25].mxu1 }
 0xac7   :  { %14454 = vmatpush1.bf16.msra.mxu0 %v13923_v61  ;;  %v14873_v59 = vadd.f32 %v14872_v52, %v14871_v4  ;;  %v14874_v6 = vpop.f32.mrb[26].mxu1 }
 0xac8   :  { %14455 = vmatprep.subr.bf16.mxu0 %v13931_v2  ;;  %v14875_v41 = vpop.f32.mrb[27].mxu1 }
 0xac9   :  { %v14503_v45 = vadd.f32 %v14873_v59, %v13968_v17 }
 0xacb   :  { %14456 = vmatpush1.bf16.msra.mxu0 %v13930_v40 }
 0xacc   :  { %14457 = vmatprep.subr.bf16.mxu0 %v13938_v30 }
 0xacf   :  { %14458 = vmatpush1.bf16.msra.mxu0 %v13937_v33 }
 0xad2   :  { %14460 = vmatmul.mubr.bf16.vlgmr.msra.gmra.mrb[16].mxu0 %v19775_v60 }
 0xae5   :  { %v14893_v16 = vpop.f32.mrb[28].mxu1 }
 0xae6   :  { %v14894_v21 = vpop.f32.mrb[29].mxu1 }
 0xae7   :  { %v14895_v19 = vadd.f32 %v14894_v21, %v14893_v16  ;;  %v14896_v26 = vpop.f32.mrb[30].mxu1 }
 0xae8   :  { %v14897_v1 = vpop.f32.mrb[31].mxu1 }
 0xae9   :  { %v14543_v46 = vadd.f32 %v14895_v19, %v14503_v45 }
 0xb05   :  { %v14915_v48 = vpop.f32.mrb[32].mxu1 }
 0xb06   :  { %v14916_v47 = vpop.f32.mrb[33].mxu1 }
 0xb07   :  { %v14917_v49 = vadd.f32 %v14916_v47, %v14915_v48  ;;  %v14918_v28 = vpop.f32.mrb[34].mxu1 }
 0xb08   :  { %v14919_v50 = vpop.f32.mrb[35].mxu1 }
 0xb09   :  { %v14583_v25 = vadd.f32 %v14917_v49, %v14543_v46 }
 0xb25   :  { %v14937_v11 = vpop.f32.mrb[36].mxu1 }
 0xb26   :  { %v14938_v23 = vpop.f32.mrb[37].mxu1 }
 0xb27   :  { %v14939_v35 = vadd.f32 %v14938_v23, %v14937_v11  ;;  %v14940_v60 = vpop.f32.mrb[38].mxu1 }
 0xb28   :  { %v14941_v54 = vpop.f32.mrb[39].mxu1 }
 0xb29   :  { %v14623_v56 = vadd.f32 %v14939_v35, %v14583_v25 }
 0xb2b   :  { %15180 = vtanh.f32 %v14623_v56 }
 0xb35   :  { %v15181_v5 = vpop.eup %15180 }
 0xb36   :  { %14642 = vst.msk [vmem:[%s19837_s7 + $0x30] sm:$0xff] %vm14641_vm2, %v15181_v5 }
 0xba5   :  { %v14461_v9 = vpop.f32.mrb[16].mxu0 }
 0xba6   :  { %v14961_v42 = vadd.f32 %v14461_v9, %v13960_v31  ;;  %v14463_v53 = vpop.f32.mrb[17].mxu0 }
 0xba7   :  { %v14962_v7 = vadd.f32 %v14463_v53, %v13964_v15  ;;  %v14465_v37 = vpop.f32.mrb[18].mxu0 }
 0xba8   :  { %15182 = vtanh.f32 %v14961_v42  ;;  %v14466_v55 = vpop.f32.mrb[19].mxu0 }
 0xba9   :  { %15184 = vtanh.f32 %v14962_v7 }
 0xbb2   :  { %v15183_v43 = vpop.eup %15182 }
 0xbb3   :  { %v15185_v13 = vpop.eup %15184  ;;  %14639 = vst [vmem:[%s19837_s7 + $0x20] sm:$0xff] %v15183_v43 }
 0xbb4   :  { %14640 = vst [vmem:[%s19837_s7 + $0x28] sm:$0xff] %v15185_v13 }
 0xbb5   :  { %14647 = vsyncmov [#allocation4] }
 0xbb8   :  { %s14648_s12 = vpop.sfrf %14647 }
 0xbb9   :  { %p14847_p0 = scmp.ne.s32.totalorder %s14648_s12, 0 }
 0xbbb   :  { %14652 = shalt.err (%p14847_p0)  }
 0xbbc   :  { %14654 = vsyncmov [#allocation4 + $0x1] }
 0xbbf   :  { %s14655_s13 = vpop.sfrf %14654 }
 0xbc0   :  { %p14848_p1 = scmp.ne.s32.totalorder %s14655_s13, 0 }
 0xbc2   :  { %14659 = shalt.err (%p14848_p1)  }

</bundles_post_ra>
